<compile_context>
chip_gen: v7x
topology: tpu7x:2x2x1
jax: 0.10.0
libtpu: 0.0.40
codegen_flags: <defaults>
</compile_context>

<pallas_src>
import jax
import jax.numpy as jnp
from jax.experimental import pallas as pl
from jax.experimental.pallas import tpu as pltpu


# ----------------------------- Encoder kernel -------------------------------
# Global-avg-pool (stand-in for resnet avgpool output) -> Linear -> BatchNorm1d
# (training-mode batch statistics, eps=1e-5, affine).  Linear operands cast to
# bf16 for full-rate MXU; accumulation and BN stay f32.
# TODO(synk): at real ResNet scale (C=2048) tile over batch, put channels on
#   lanes (reshape to (B, H*W, C), reduce axis=1), and grid this call.
def encoder_kernel(img_ref, wemb_ref, bemb_ref, gamma_ref, beta_ref, feat_ref):
    x = img_ref[...].astype(jnp.float32)            # (B, C, H*W)
    pooled = jnp.mean(x, axis=-1)                   # (B, C)   spatial avg-pool
    feat = jnp.dot(pooled.astype(jnp.bfloat16),
                   wemb_ref[...].astype(jnp.bfloat16),
                   preferred_element_type=jnp.float32) + bemb_ref[...]  # (B, E)
    mean = jnp.mean(feat, axis=0, keepdims=True)    # batch stats (BatchNorm1d)
    var = jnp.mean((feat - mean) ** 2, axis=0, keepdims=True)
    norm = (feat - mean) * jax.lax.rsqrt(var + 1e-5)
    feat_ref[...] = (norm * gamma_ref[...] + beta_ref[...]).astype(feat_ref.dtype)


def encoder_forward(images, w_emb, b_emb, gamma, beta):
    B, C, H, W = images.shape
    E = w_emb.shape[1]
    x = images.reshape(B, C, H * W)                 # lane-dense spatial axis
    return pl.pallas_call(
        encoder_kernel,
        out_shape=jax.ShapeDtypeStruct((B, E), jnp.float32),
    )(x, w_emb, b_emb.reshape(1, E), gamma.reshape(1, E), beta.reshape(1, E))


# ---------------------- Fused LSTM + vocab-projection kernel -----------------
# Per batch-block:
#   1. one big [T*Bb, E] x [E, 4H] matmul for every step's input projection,
#      stored time-major in bf16 VMEM scratch,
#   2. fori_loop over T steps; each step only does the small h @ W_hh matmul +
#      VPU/EUP gate math (PyTorch gate order i,f,g,o); h_t is kept in bf16
#      VMEM scratch (never goes to HBM),
#   3. one big [T*Bb, H] x [H, V] matmul + bias for the vocab projection,
#      written time-major (contiguous, lane-dense stores).
# TODO(synk): for production vocab sizes add a V-tiling loop (or split the
#   projection back out with a (V//tv, T) grid, T innermost) so the W_out tile
#   stays inside v7x's 64 MiB VMEM.
def decoder_kernel(x_ref, wih_ref, whh_ref, b_ref, wout_ref, bout_ref,
                   logits_ref, gx_sc, h_sc):
    T, Bb, E = x_ref.shape
    H = whh_ref.shape[0]

    # (1) Hoisted input projection: one MXU matmul for all time steps at once.
    x_flat = x_ref[...].reshape(T * Bb, E)                        # bf16, free reshape
    gx = jnp.dot(x_flat, wih_ref[...],
                 preferred_element_type=jnp.float32)              # (T*Bb, 4H) f32
    gx_sc[...] = gx.reshape(T, Bb, 4 * H).astype(jnp.bfloat16)    # bf16 scratch

    bias = b_ref[...]                                             # (1, 4H) f32, hoisted

    def step(t, carry):
        h_prev, c_prev = carry
        # Only the recurrent matmul stays on the serial critical path.
        g = (gx_sc[t].astype(jnp.float32) + bias
             + jnp.dot(h_prev.astype(jnp.bfloat16), whh_ref[...],
                       preferred_element_type=jnp.float32))       # (Bb, 4H)
        # H is a multiple of 128 -> these static slices are free vreg selects.
        i_g = jax.nn.sigmoid(g[:, 0 * H:1 * H])
        f_g = jax.nn.sigmoid(g[:, 1 * H:2 * H])
        g_g = jnp.tanh(g[:, 2 * H:3 * H])
        o_g = jax.nn.sigmoid(g[:, 3 * H:4 * H])
        c = f_g * c_prev + i_g * g_g
        h = o_g * jnp.tanh(c)
        h_sc[t] = h.astype(jnp.bfloat16)                          # VMEM-resident h_t
        return h, c

    h0 = jnp.zeros((Bb, H), jnp.float32)   # DecoderRNN.init_hidden -> zeros
    c0 = jnp.zeros((Bb, H), jnp.float32)
    # Full unroll only for short captions; partial unroll avoids vreg spills.
    jax.lax.fori_loop(0, T, step, (h0, c0), unroll=True if T <= 16 else 4)

    # (3) Vocab projection as ONE big MXU matmul over all T*Bb rows.
    h_flat = h_sc[...].reshape(T * Bb, H)                         # bf16, free reshape
    logits = jnp.dot(h_flat, wout_ref[...],
                     preferred_element_type=jnp.float32) + bout_ref[...]
    logits_ref[...] = logits.reshape(logits_ref.shape).astype(logits_ref.dtype)


def decoder_forward(x_tbe, w_ih, w_hh, b_lstm, w_out, b_out):
    T, Bp, E = x_tbe.shape
    H = w_hh.shape[0]
    V = w_out.shape[1]

    # Batch rows are independent: split them across TensorCores (v7x has 2)
    # when the padded batch is large enough that each block still fills bf16
    # packed vregs; at toy size we keep a single block so 1-TC chips do not
    # pay a second serial pass of the recurrence.
    n_blk = 2 if Bp >= 32 else 1
    Bb = Bp // n_blk

    grid_spec = pltpu.PrefetchScalarGridSpec(
        num_scalar_prefetch=0,
        grid=(n_blk,),
        in_specs=[
            pl.BlockSpec((T, Bb, E), lambda i: (0, i, 0)),        # x (time-major)
            pl.BlockSpec((E, 4 * H), lambda i: (0, 0)),           # W_ih
            pl.BlockSpec((H, 4 * H), lambda i: (0, 0)),           # W_hh
            pl.BlockSpec((1, 4 * H), lambda i: (0, 0)),           # b_ih + b_hh
            pl.BlockSpec((H, V), lambda i: (0, 0)),               # W_out^T
            pl.BlockSpec((1, V), lambda i: (0, 0)),               # b_out
        ],
        out_specs=pl.BlockSpec((T, Bb, V), lambda i: (0, i, 0)),  # time-major logits
        scratch_shapes=[
            pltpu.VMEM((T, Bb, 4 * H), jnp.bfloat16),             # gx (bf16)
            pltpu.VMEM((T, Bb, H), jnp.bfloat16),                 # h_all (bf16)
        ],
    )
    return pl.pallas_call(
        decoder_kernel,
        out_shape=jax.ShapeDtypeStruct((T, Bp, V), jnp.float32),
        grid_spec=grid_spec,
        compiler_params=pltpu.CompilerParams(
            dimension_semantics=("parallel",),
            vmem_limit_bytes=64 * 1024 * 1024,
        ),
    )(x_tbe, w_ih, w_hh, b_lstm.reshape(1, 4 * H), w_out, b_out.reshape(1, V))


# ------------------------------ Full forward --------------------------------
@jax.jit
def img2cap_forward(params, images, captions):
    B = images.shape[0]

    # EncoderCNN (real rows only -> BN batch statistics are uncorrupted).
    features = encoder_forward(images, params["w_emb"], params["b_emb"],
                               params["gamma"], params["beta"])          # [B, E] f32

    # DecoderRNN glue — pad batch to a multiple of 16 (bf16 packs 2 rows per
    # sublane) AFTER the encoder; padded rows are sliced off at the end.
    cap = captions[:, :-1]                                               # [B, Tc-1]
    B_pad = ((B + 15) // 16) * 16
    pad = B_pad - B
    feats_p = jnp.pad(features, ((0, pad), (0, 0))).astype(jnp.bfloat16) # [Bp, E]
    cap_p = jnp.pad(cap, ((0, pad), (0, 0)))                             # [Bp, Tc-1]

    # dropout(0.5): identity (inference mode)
    # Build the LSTM input TIME-MAJOR directly: the embedding gather writes
    # [T-1, Bp, E] in place (captions.T is a tiny int transpose), so no
    # transpose pass over B*T*E.
    embed_tbe = jnp.take(params["emb_table"], cap_p.T, axis=0)           # [Tc-1, Bp, E] bf16
    x_tbe = jnp.concatenate([feats_p[None], embed_tbe], axis=0)          # [T, Bp, E] bf16

    # Fused LSTM + vocab projection; logits come back time-major [T, Bp, V]
    # (contiguous stores); transpose to batch-first after dropping pad rows.
    logits_tbv = decoder_forward(x_tbe, params["w_ih"], params["w_hh"],
                                 params["b_lstm"], params["w_out"],
                                 params["b_out"])                        # [T, Bp, V] f32
    return jnp.transpose(logits_tbv[:, :B, :], (1, 0, 2))                # [B, T, V]


def init_params(key, feat_dim, embed_size, hidden_size, vocab_size):
    ks = jax.random.split(key, 10)
    s = 0.05
    bf16 = jnp.bfloat16
    return {
        # EncoderCNN: Linear(feat_dim -> embed) stored as [in, out], BatchNorm1d affine
        "w_emb": s * jax.random.normal(ks[0], (feat_dim, embed_size), jnp.float32),
        "b_emb": s * jax.random.normal(ks[1], (embed_size,), jnp.float32),
        "gamma": jnp.ones((embed_size,), jnp.float32),
        "beta": jnp.zeros((embed_size,), jnp.float32),
        # DecoderRNN — matmul weights in bf16 (f32 accumulation), biases f32.
        "emb_table": (s * jax.random.normal(ks[2], (vocab_size, embed_size),
                                            jnp.float32)).astype(bf16),
        "w_ih": (s * jax.random.normal(ks[3], (embed_size, 4 * hidden_size),
                                       jnp.float32)).astype(bf16),
        "w_hh": (s * jax.random.normal(ks[4], (hidden_size, 4 * hidden_size),
                                       jnp.float32)).astype(bf16),
        # b_lstm models PyTorch's (b_ih + b_hh) as a single fused bias.
        "b_lstm": s * jax.random.normal(ks[5], (4 * hidden_size,), jnp.float32),
        "w_out": (s * jax.random.normal(ks[6], (hidden_size, vocab_size),
                                        jnp.float32)).astype(bf16),
        "b_out": s * jax.random.normal(ks[7], (vocab_size,), jnp.float32),
    }


if __name__ == "__main__":
    B, C, Himg, Wimg = 4, 8, 16, 16
    embed_size, hidden_size, vocab_size = 256, 256, 512
    Tcap = 8  # caption length; decoder sequence length = 1 + (Tcap - 1) = Tcap

    key = jax.random.PRNGKey(0)
    k_img, k_cap, k_par = jax.random.split(key, 3)

    images = jax.random.normal(k_img, (B, C, Himg, Wimg), jnp.float32)   # NCHW
    captions = jax.random.randint(k_cap, (B, Tcap), 0, vocab_size, jnp.int32)
    params = init_params(k_par, C, embed_size, hidden_size, vocab_size)

    out = img2cap_forward(params, images, captions)
    out = jax.block_until_ready(out)
    assert out.shape == (B, Tcap, vocab_size), out.shape
    assert jnp.isfinite(out).all()
    print("KERNEL_OK")
</pallas_src>

<mosaic_0001>
module attributes {stable_mosaic.version = 11 : i64} {
  func.func @encoder_kernel(%arg0: memref<4x8x256xf32, #tpu.memory_space<vmem>>, %arg1: memref<8x256xf32, #tpu.memory_space<vmem>>, %arg2: memref<1x256xf32, #tpu.memory_space<vmem>>, %arg3: memref<1x256xf32, #tpu.memory_space<vmem>>, %arg4: memref<1x256xf32, #tpu.memory_space<vmem>>, %arg5: memref<4x256xf32, #tpu.memory_space<vmem>>) attributes {dimension_semantics = [], scalar_prefetch = 0 : i64, scratch_operands = 0 : i64, tpu.core_type = #tpu.core_type<tc>} {
    %c0 = arith.constant 0 : index
    %c0_0 = arith.constant 0 : index
    %c0_1 = arith.constant 0 : index
    %0 = vector.load %arg0[%c0, %c0_0, %c0_1] : memref<4x8x256xf32, #tpu.memory_space<vmem>>, vector<4x8x256xf32>
    %cst = arith.constant dense<0.000000e+00> : vector<4x8xf32>
    %1 = vector.multi_reduction <add>, %0, %cst [2] : vector<4x8x256xf32> to vector<4x8xf32>
    %cst_2 = arith.constant 2.560000e+02 : f32
    %2 = vector.broadcast %cst_2 : f32 to vector<4x8xf32>
    %3 = arith.divf %1, %2 : vector<4x8xf32>
    %4 = arith.truncf %3 : vector<4x8xf32> to vector<4x8xbf16>
    %c0_3 = arith.constant 0 : index
    %c0_4 = arith.constant 0 : index
    %5 = vector.load %arg1[%c0_3, %c0_4] : memref<8x256xf32, #tpu.memory_space<vmem>>, vector<8x256xf32>
    %6 = arith.truncf %5 : vector<8x256xf32> to vector<8x256xbf16>
    %cst_5 = arith.constant dense<0.000000e+00> : vector<4x256xf32>
    %7 = tpu.matmul %4, %6, %cst_5 {dimension_numbers = #tpu.dot_dimension_numbers<[1], [0], [0], [1], [0, 0, 1, 1], [], []>} : vector<4x8xbf16>, vector<8x256xbf16>, vector<4x256xf32> -> vector<4x256xf32>
    %c0_6 = arith.constant 0 : index
    %c0_7 = arith.constant 0 : index
    %8 = vector.load %arg2[%c0_6, %c0_7] : memref<1x256xf32, #tpu.memory_space<vmem>>, vector<1x256xf32>
    %9 = vector.broadcast %8 : vector<1x256xf32> to vector<4x256xf32>
    %10 = arith.addf %7, %9 : vector<4x256xf32>
    %cst_8 = arith.constant dense<0.000000e+00> : vector<256xf32>
    %11 = vector.multi_reduction <add>, %10, %cst_8 [0] : vector<4x256xf32> to vector<256xf32>
    %12 = vector.shape_cast %11 : vector<256xf32> to vector<1x256xf32>
    %cst_9 = arith.constant 4.000000e+00 : f32
    %13 = vector.broadcast %cst_9 : f32 to vector<1x256xf32>
    %14 = arith.divf %12, %13 : vector<1x256xf32>
    %15 = vector.broadcast %14 : vector<1x256xf32> to vector<4x256xf32>
    %16 = arith.subf %10, %15 : vector<4x256xf32>
    %17 = arith.mulf %16, %16 : vector<4x256xf32>
    %cst_10 = arith.constant dense<0.000000e+00> : vector<256xf32>
    %18 = vector.multi_reduction <add>, %17, %cst_10 [0] : vector<4x256xf32> to vector<256xf32>
    %19 = vector.shape_cast %18 : vector<256xf32> to vector<1x256xf32>
    %cst_11 = arith.constant 4.000000e+00 : f32
    %20 = vector.broadcast %cst_11 : f32 to vector<1x256xf32>
    %21 = arith.divf %19, %20 : vector<1x256xf32>
    %22 = vector.broadcast %14 : vector<1x256xf32> to vector<4x256xf32>
    %23 = arith.subf %10, %22 : vector<4x256xf32>
    %cst_12 = arith.constant 9.99999974E-6 : f32
    %24 = vector.broadcast %cst_12 : f32 to vector<1x256xf32>
    %25 = arith.addf %21, %24 : vector<1x256xf32>
    %26 = math.rsqrt %25 : vector<1x256xf32>
    %27 = vector.broadcast %26 : vector<1x256xf32> to vector<4x256xf32>
    %28 = arith.mulf %23, %27 : vector<4x256xf32>
    %c0_13 = arith.constant 0 : index
    %c0_14 = arith.constant 0 : index
    %29 = vector.load %arg3[%c0_13, %c0_14] : memref<1x256xf32, #tpu.memory_space<vmem>>, vector<1x256xf32>
    %30 = vector.broadcast %29 : vector<1x256xf32> to vector<4x256xf32>
    %31 = arith.mulf %28, %30 : vector<4x256xf32>
    %c0_15 = arith.constant 0 : index
    %c0_16 = arith.constant 0 : index
    %32 = vector.load %arg4[%c0_15, %c0_16] : memref<1x256xf32, #tpu.memory_space<vmem>>, vector<1x256xf32>
    %33 = vector.broadcast %32 : vector<1x256xf32> to vector<4x256xf32>
    %34 = arith.addf %31, %33 : vector<4x256xf32>
    %c0_17 = arith.constant 0 : index
    %c0_18 = arith.constant 0 : index
    %35 = vector.load %arg5[%c0_17, %c0_18] : memref<4x256xf32, #tpu.memory_space<vmem>>, vector<4x256xf32>
    tpu.vector_store %arg5[%c0_17, %c0_18], %34 {strides = array<i32>} : memref<4x256xf32, #tpu.memory_space<vmem>>, vector<4x256xf32>,
    return
  }
}

module attributes {stable_mosaic.version = 11 : i64} {
  func.func @decoder_kernel(%arg0: i32, %arg1: memref<8x16x256xbf16, #tpu.memory_space<vmem>>, %arg2: memref<256x1024xbf16, #tpu.memory_space<vmem>>, %arg3: memref<256x1024xbf16, #tpu.memory_space<vmem>>, %arg4: memref<1x1024xf32, #tpu.memory_space<vmem>>, %arg5: memref<256x512xbf16, #tpu.memory_space<vmem>>, %arg6: memref<1x512xf32, #tpu.memory_space<vmem>>, %arg7: memref<8x16x512xf32, #tpu.memory_space<vmem>>, %arg8: memref<8x16x1024xbf16, #tpu.memory_space<vmem>>, %arg9: memref<8x16x256xbf16, #tpu.memory_space<vmem>>) attributes {dimension_semantics = [#tpu.dimension_semantics<parallel>], iteration_bounds = array<i64: 1>, scalar_prefetch = 0 : i64, scratch_operands = 2 : i64, tpu.core_type = #tpu.core_type<tc>, window_params = [{transform_indices = @transform_0, window_bounds = array<i64: 8, 16, 256>}, {pipeline_mode = #tpu.pipeline_mode<synchronous>, transform_indices = @transform_1, window_bounds = array<i64: 256, 1024>}, {pipeline_mode = #tpu.pipeline_mode<synchronous>, transform_indices = @transform_2, window_bounds = array<i64: 256, 1024>}, {pipeline_mode = #tpu.pipeline_mode<synchronous>, transform_indices = @transform_3, window_bounds = array<i64: 1, 1024>}, {pipeline_mode = #tpu.pipeline_mode<synchronous>, transform_indices = @transform_4, window_bounds = array<i64: 256, 512>}, {pipeline_mode = #tpu.pipeline_mode<synchronous>, transform_indices = @transform_5, window_bounds = array<i64: 1, 512>}, {transform_indices = @transform_6, window_bounds = array<i64: 8, 16, 512>}]} {
    %c0 = arith.constant 0 : index
    %c0_0 = arith.constant 0 : index
    %c0_1 = arith.constant 0 : index
    %0 = vector.load %arg1[%c0, %c0_0, %c0_1] : memref<8x16x256xbf16, #tpu.memory_space<vmem>>, vector<8x16x256xbf16>
    %1 = vector.shape_cast %0 : vector<8x16x256xbf16> to vector<128x256xbf16>
    %c0_2 = arith.constant 0 : index
    %c0_3 = arith.constant 0 : index
    %2 = vector.load %arg2[%c0_2, %c0_3] : memref<256x1024xbf16, #tpu.memory_space<vmem>>, vector<256x1024xbf16>
    %cst = arith.constant dense<0.000000e+00> : vector<128x1024xf32>
    %3 = tpu.matmul %1, %2, %cst {dimension_numbers = #tpu.dot_dimension_numbers<[1], [0], [0], [1], [0, 0, 1, 1], [], []>} : vector<128x256xbf16>, vector<256x1024xbf16>, vector<128x1024xf32> -> vector<128x1024xf32>
    %4 = vector.shape_cast %3 : vector<128x1024xf32> to vector<8x16x1024xf32>
    %5 = arith.truncf %4 : vector<8x16x1024xf32> to vector<8x16x1024xbf16>
    %c0_4 = arith.constant 0 : index
    %c0_5 = arith.constant 0 : index
    %c0_6 = arith.constant 0 : index
    %6 = vector.load %arg8[%c0_4, %c0_5, %c0_6] : memref<8x16x1024xbf16, #tpu.memory_space<vmem>>, vector<8x16x1024xbf16>
    tpu.vector_store %arg8[%c0_4, %c0_5, %c0_6], %5 {strides = array<i32>} : memref<8x16x1024xbf16, #tpu.memory_space<vmem>>, vector<8x16x1024xbf16>,
    %c0_7 = arith.constant 0 : index
    %c0_8 = arith.constant 0 : index
    %7 = vector.load %arg4[%c0_7, %c0_8] : memref<1x1024xf32, #tpu.memory_space<vmem>>, vector<1x1024xf32>
    %cst_9 = arith.constant 0.000000e+00 : f32
    %8 = vector.broadcast %cst_9 : f32 to vector<16x256xf32>
    %cst_10 = arith.constant 0.000000e+00 : f32
    %9 = vector.broadcast %cst_10 : f32 to vector<16x256xf32>
    %c0_i32 = arith.constant 0 : i32
    %10 = arith.index_cast %c0_i32 : i32 to index
    %c0_11 = arith.constant 0 : index
    %c0_12 = arith.constant 0 : index
    %11 = vector.load %arg8[%10, %c0_11, %c0_12] : memref<8x16x1024xbf16, #tpu.memory_space<vmem>>, vector<1x16x1024xbf16>
    %12 = vector.shape_cast %11 : vector<1x16x1024xbf16> to vector<16x1024xbf16>
    %13 = arith.extf %12 : vector<16x1024xbf16> to vector<16x1024xf32>
    %14 = vector.broadcast %7 : vector<1x1024xf32> to vector<16x1024xf32>
    %15 = arith.addf %13, %14 : vector<16x1024xf32>
    %16 = arith.truncf %8 : vector<16x256xf32> to vector<16x256xbf16>
    %c0_13 = arith.constant 0 : index
    %c0_14 = arith.constant 0 : index
    %17 = vector.load %arg3[%c0_13, %c0_14] : memref<256x1024xbf16, #tpu.memory_space<vmem>>, vector<256x1024xbf16>
    %cst_15 = arith.constant dense<0.000000e+00> : vector<16x1024xf32>
    %18 = tpu.matmul %16, %17, %cst_15 {dimension_numbers = #tpu.dot_dimension_numbers<[1], [0], [0], [1], [0, 0, 1, 1], [], []>} : vector<16x256xbf16>, vector<256x1024xbf16>, vector<16x1024xf32> -> vector<16x1024xf32>
    %19 = arith.addf %15, %18 : vector<16x1024xf32>
    %20 = vector.extract_strided_slice %19 {offsets = [0, 0], sizes = [16, 256], strides = [1, 1]} : vector<16x1024xf32> to vector<16x256xf32>
    %21 = arith.negf %20 : vector<16x256xf32>
    %22 = math.exp %21 : vector<16x256xf32>
    %cst_16 = arith.constant 1.000000e+00 : f32
    %23 = vector.broadcast %cst_16 : f32 to vector<16x256xf32>
    %24 = arith.addf %23, %22 : vector<16x256xf32>
    %25 = arith.divf %23, %24 : vector<16x256xf32>
    %26 = vector.extract_strided_slice %19 {offsets = [0, 256], sizes = [16, 256], strides = [1, 1]} : vector<16x1024xf32> to vector<16x256xf32>
    %27 = arith.negf %26 : vector<16x256xf32>
    %28 = math.exp %27 : vector<16x256xf32>
    %cst_17 = arith.constant 1.000000e+00 : f32
    %29 = vector.broadcast %cst_17 : f32 to vector<16x256xf32>
    %30 = arith.addf %29, %28 : vector<16x256xf32>
    %31 = arith.divf %29, %30 : vector<16x256xf32>
    %32 = vector.extract_strided_slice %19 {offsets = [0, 512], sizes = [16, 256], strides = [1, 1]} : vector<16x1024xf32> to vector<16x256xf32>
    %33 = math.tanh %32 : vector<16x256xf32>
    %34 = vector.extract_strided_slice %19 {offsets = [0, 768], sizes = [16, 256], strides = [1, 1]} : vector<16x1024xf32> to vector<16x256xf32>
    %35 = arith.negf %34 : vector<16x256xf32>
    %36 = math.exp %35 : vector<16x256xf32>
    %cst_18 = arith.constant 1.000000e+00 : f32
    %37 = vector.broadcast %cst_18 : f32 to vector<16x256xf32>
    %38 = arith.addf %37, %36 : vector<16x256xf32>
    %39 = arith.divf %37, %38 : vector<16x256xf32>
    %40 = arith.mulf %31, %9 : vector<16x256xf32>
    %41 = arith.mulf %25, %33 : vector<16x256xf32>
    %42 = arith.addf %40, %41 : vector<16x256xf32>
    %43 = math.tanh %42 : vector<16x256xf32>
    %44 = arith.mulf %39, %43 : vector<16x256xf32>
    %45 = arith.truncf %44 : vector<16x256xf32> to vector<16x256xbf16>
    %46 = arith.index_cast %c0_i32 : i32 to index
    %c0_19 = arith.constant 0 : index
    %c0_20 = arith.constant 0 : index
    %47 = vector.load %arg9[%46, %c0_19, %c0_20] : memref<8x16x256xbf16, #tpu.memory_space<vmem>>, vector<1x16x256xbf16>
    %48 = vector.shape_cast %47 : vector<1x16x256xbf16> to vector<16x256xbf16>
    %49 = vector.shape_cast %45 : vector<16x256xbf16> to vector<1x16x256xbf16>
    tpu.vector_store %arg9[%46, %c0_19, %c0_20], %49 {strides = array<i32>} : memref<8x16x256xbf16, #tpu.memory_space<vmem>>, vector<1x16x256xbf16>,
    %c1_i32 = arith.constant 1 : i32
    %50 = arith.index_cast %c1_i32 : i32 to index
    %c0_21 = arith.constant 0 : index
    %c0_22 = arith.constant 0 : index
    %51 = vector.load %arg8[%50, %c0_21, %c0_22] : memref<8x16x1024xbf16, #tpu.memory_space<vmem>>, vector<1x16x1024xbf16>
    %52 = vector.shape_cast %51 : vector<1x16x1024xbf16> to vector<16x1024xbf16>
    %53 = arith.extf %52 : vector<16x1024xbf16> to vector<16x1024xf32>
    %54 = vector.broadcast %7 : vector<1x1024xf32> to vector<16x1024xf32>
    %55 = arith.addf %53, %54 : vector<16x1024xf32>
    %56 = arith.truncf %44 : vector<16x256xf32> to vector<16x256xbf16>
    %c0_23 = arith.constant 0 : index
    %c0_24 = arith.constant 0 : index
    %57 = vector.load %arg3[%c0_23, %c0_24] : memref<256x1024xbf16, #tpu.memory_space<vmem>>, vector<256x1024xbf16>
    %cst_25 = arith.constant dense<0.000000e+00> : vector<16x1024xf32>
    %58 = tpu.matmul %56, %57, %cst_25 {dimension_numbers = #tpu.dot_dimension_numbers<[1], [0], [0], [1], [0, 0, 1, 1], [], []>} : vector<16x256xbf16>, vector<256x1024xbf16>, vector<16x1024xf32> -> vector<16x1024xf32>
    %59 = arith.addf %55, %58 : vector<16x1024xf32>
    %60 = vector.extract_strided_slice %59 {offsets = [0, 0], sizes = [16, 256], strides = [1, 1]} : vector<16x1024xf32> to vector<16x256xf32>
    %61 = arith.negf %60 : vector<16x256xf32>
    %62 = math.exp %61 : vector<16x256xf32>
    %cst_26 = arith.constant 1.000000e+00 : f32
    %63 = vector.broadcast %cst_26 : f32 to vector<16x256xf32>
    %64 = arith.addf %63, %62 : vector<16x256xf32>
    %65 = arith.divf %63, %64 : vector<16x256xf32>
    %66 = vector.extract_strided_slice %59 {offsets = [0, 256], sizes = [16, 256], strides = [1, 1]} : vector<16x1024xf32> to vector<16x256xf32>
    %67 = arith.negf %66 : vector<16x256xf32>
    %68 = math.exp %67 : vector<16x256xf32>
    %cst_27 = arith.constant 1.000000e+00 : f32
    %69 = vector.broadcast %cst_27 : f32 to vector<16x256xf32>
    %70 = arith.addf %69, %68 : vector<16x256xf32>
    %71 = arith.divf %69, %70 : vector<16x256xf32>
    %72 = vector.extract_strided_slice %59 {offsets = [0, 512], sizes = [16, 256], strides = [1, 1]} : vector<16x1024xf32> to vector<16x256xf32>
    %73 = math.tanh %72 : vector<16x256xf32>
    %74 = vector.extract_strided_slice %59 {offsets = [0, 768], sizes = [16, 256], strides = [1, 1]} : vector<16x1024xf32> to vector<16x256xf32>
    %75 = arith.negf %74 : vector<16x256xf32>
    %76 = math.exp %75 : vector<16x256xf32>
    %cst_28 = arith.constant 1.000000e+00 : f32
    %77 = vector.broadcast %cst_28 : f32 to vector<16x256xf32>
    %78 = arith.addf %77, %76 : vector<16x256xf32>
    %79 = arith.divf %77, %78 : vector<16x256xf32>
    %80 = arith.mulf %71, %42 : vector<16x256xf32>
    %81 = arith.mulf %65, %73 : vector<16x256xf32>
    %82 = arith.addf %80, %81 : vector<16x256xf32>
    %83 = math.tanh %82 : vector<16x256xf32>
    %84 = arith.mulf %79, %83 : vector<16x256xf32>
    %85 = arith.truncf %84 : vector<16x256xf32> to vector<16x256xbf16>
    %86 = arith.index_cast %c1_i32 : i32 to index
    %c0_29 = arith.constant 0 : index
    %c0_30 = arith.constant 0 : index
    %87 = vector.load %arg9[%86, %c0_29, %c0_30] : memref<8x16x256xbf16, #tpu.memory_space<vmem>>, vector<1x16x256xbf16>
    %88 = vector.shape_cast %87 : vector<1x16x256xbf16> to vector<16x256xbf16>
    %89 = vector.shape_cast %85 : vector<16x256xbf16> to vector<1x16x256xbf16>
    tpu.vector_store %arg9[%86, %c0_29, %c0_30], %89 {strides = array<i32>} : memref<8x16x256xbf16, #tpu.memory_space<vmem>>, vector<1x16x256xbf16>,
    %c2_i32 = arith.constant 2 : i32
    %90 = arith.index_cast %c2_i32 : i32 to index
    %c0_31 = arith.constant 0 : index
    %c0_32 = arith.constant 0 : index
    %91 = vector.load %arg8[%90, %c0_31, %c0_32] : memref<8x16x1024xbf16, #tpu.memory_space<vmem>>, vector<1x16x1024xbf16>
    %92 = vector.shape_cast %91 : vector<1x16x1024xbf16> to vector<16x1024xbf16>
    %93 = arith.extf %92 : vector<16x1024xbf16> to vector<16x1024xf32>
    %94 = vector.broadcast %7 : vector<1x1024xf32> to vector<16x1024xf32>
    %95 = arith.addf %93, %94 : vector<16x1024xf32>
    %96 = arith.truncf %84 : vector<16x256xf32> to vector<16x256xbf16>
    %c0_33 = arith.constant 0 : index
    %c0_34 = arith.constant 0 : index
    %97 = vector.load %arg3[%c0_33, %c0_34] : memref<256x1024xbf16, #tpu.memory_space<vmem>>, vector<256x1024xbf16>
    %cst_35 = arith.constant dense<0.000000e+00> : vector<16x1024xf32>
    %98 = tpu.matmul %96, %97, %cst_35 {dimension_numbers = #tpu.dot_dimension_numbers<[1], [0], [0], [1], [0, 0, 1, 1], [], []>} : vector<16x256xbf16>, vector<256x1024xbf16>, vector<16x1024xf32> -> vector<16x1024xf32>
    %99 = arith.addf %95, %98 : vector<16x1024xf32>
    %100 = vector.extract_strided_slice %99 {offsets = [0, 0], sizes = [16, 256], strides = [1, 1]} : vector<16x1024xf32> to vector<16x256xf32>
    %101 = arith.negf %100 : vector<16x256xf32>
    %102 = math.exp %101 : vector<16x256xf32>
    %cst_36 = arith.constant 1.000000e+00 : f32
    %103 = vector.broadcast %cst_36 : f32 to vector<16x256xf32>
    %104 = arith.addf %103, %102 : vector<16x256xf32>
    %105 = arith.divf %103, %104 : vector<16x256xf32>
    %106 = vector.extract_strided_slice %99 {offsets = [0, 256], sizes = [16, 256], strides = [1, 1]} : vector<16x1024xf32> to vector<16x256xf32>
    %107 = arith.negf %106 : vector<16x256xf32>
    %108 = math.exp %107 : vector<16x256xf32>
    %cst_37 = arith.constant 1.000000e+00 : f32
    %109 = vector.broadcast %cst_37 : f32 to vector<16x256xf32>
    %110 = arith.addf %109, %108 : vector<16x256xf32>
    %111 = arith.divf %109, %110 : vector<16x256xf32>
    %112 = vector.extract_strided_slice %99 {offsets = [0, 512], sizes = [16, 256], strides = [1, 1]} : vector<16x1024xf32> to vector<16x256xf32>
    %113 = math.tanh %112 : vector<16x256xf32>
    %114 = vector.extract_strided_slice %99 {offsets = [0, 768], sizes = [16, 256], strides = [1, 1]} : vector<16x1024xf32> to vector<16x256xf32>
    %115 = arith.negf %114 : vector<16x256xf32>
    %116 = math.exp %115 : vector<16x256xf32>
    %cst_38 = arith.constant 1.000000e+00 : f32
    %117 = vector.broadcast %cst_38 : f32 to vector<16x256xf32>
    %118 = arith.addf %117, %116 : vector<16x256xf32>
    %119 = arith.divf %117, %118 : vector<16x256xf32>
    %120 = arith.mulf %111, %82 : vector<16x256xf32>
    %121 = arith.mulf %105, %113 : vector<16x256xf32>
    %122 = arith.addf %120, %121 : vector<16x256xf32>
    %123 = math.tanh %122 : vector<16x256xf32>
    %124 = arith.mulf %119, %123 : vector<16x256xf32>
    %125 = arith.truncf %124 : vector<16x256xf32> to vector<16x256xbf16>
    %126 = arith.index_cast %c2_i32 : i32 to index
    %c0_39 = arith.constant 0 : index
    %c0_40 = arith.constant 0 : index
    %127 = vector.load %arg9[%126, %c0_39, %c0_40] : memref<8x16x256xbf16, #tpu.memory_space<vmem>>, vector<1x16x256xbf16>
    %128 = vector.shape_cast %127 : vector<1x16x256xbf16> to vector<16x256xbf16>
    %129 = vector.shape_cast %125 : vector<16x256xbf16> to vector<1x16x256xbf16>
    tpu.vector_store %arg9[%126, %c0_39, %c0_40], %129 {strides = array<i32>} : memref<8x16x256xbf16, #tpu.memory_space<vmem>>, vector<1x16x256xbf16>,
    %c3_i32 = arith.constant 3 : i32
    %130 = arith.index_cast %c3_i32 : i32 to index
    %c0_41 = arith.constant 0 : index
    %c0_42 = arith.constant 0 : index
    %131 = vector.load %arg8[%130, %c0_41, %c0_42] : memref<8x16x1024xbf16, #tpu.memory_space<vmem>>, vector<1x16x1024xbf16>
    %132 = vector.shape_cast %131 : vector<1x16x1024xbf16> to vector<16x1024xbf16>
    %133 = arith.extf %132 : vector<16x1024xbf16> to vector<16x1024xf32>
    %134 = vector.broadcast %7 : vector<1x1024xf32> to vector<16x1024xf32>
    %135 = arith.addf %133, %134 : vector<16x1024xf32>
    %136 = arith.truncf %124 : vector<16x256xf32> to vector<16x256xbf16>
    %c0_43 = arith.constant 0 : index
    %c0_44 = arith.constant 0 : index
    %137 = vector.load %arg3[%c0_43, %c0_44] : memref<256x1024xbf16, #tpu.memory_space<vmem>>, vector<256x1024xbf16>
    %cst_45 = arith.constant dense<0.000000e+00> : vector<16x1024xf32>
    %138 = tpu.matmul %136, %137, %cst_45 {dimension_numbers = #tpu.dot_dimension_numbers<[1], [0], [0], [1], [0, 0, 1, 1], [], []>} : vector<16x256xbf16>, vector<256x1024xbf16>, vector<16x1024xf32> -> vector<16x1024xf32>
    %139 = arith.addf %135, %138 : vector<16x1024xf32>
    %140 = vector.extract_strided_slice %139 {offsets = [0, 0], sizes = [16, 256], strides = [1, 1]} : vector<16x1024xf32> to vector<16x256xf32>
    %141 = arith.negf %140 : vector<16x256xf32>
    %142 = math.exp %141 : vector<16x256xf32>
    %cst_46 = arith.constant 1.000000e+00 : f32
    %143 = vector.broadcast %cst_46 : f32 to vector<16x256xf32>
    %144 = arith.addf %143, %142 : vector<16x256xf32>
    %145 = arith.divf %143, %144 : vector<16x256xf32>
    %146 = vector.extract_strided_slice %139 {offsets = [0, 256], sizes = [16, 256], strides = [1, 1]} : vector<16x1024xf32> to vector<16x256xf32>
    %147 = arith.negf %146 : vector<16x256xf32>
    %148 = math.exp %147 : vector<16x256xf32>
    %cst_47 = arith.constant 1.000000e+00 : f32
    %149 = vector.broadcast %cst_47 : f32 to vector<16x256xf32>
    %150 = arith.addf %149, %148 : vector<16x256xf32>
    %151 = arith.divf %149, %150 : vector<16x256xf32>
    %152 = vector.extract_strided_slice %139 {offsets = [0, 512], sizes = [16, 256], strides = [1, 1]} : vector<16x1024xf32> to vector<16x256xf32>
    %153 = math.tanh %152 : vector<16x256xf32>
    %154 = vector.extract_strided_slice %139 {offsets = [0, 768], sizes = [16, 256], strides = [1, 1]} : vector<16x1024xf32> to vector<16x256xf32>
    %155 = arith.negf %154 : vector<16x256xf32>
    %156 = math.exp %155 : vector<16x256xf32>
    %cst_48 = arith.constant 1.000000e+00 : f32
    %157 = vector.broadcast %cst_48 : f32 to vector<16x256xf32>
    %158 = arith.addf %157, %156 : vector<16x256xf32>
    %159 = arith.divf %157, %158 : vector<16x256xf32>
    %160 = arith.mulf %151, %122 : vector<16x256xf32>
    %161 = arith.mulf %145, %153 : vector<16x256xf32>
    %162 = arith.addf %160, %161 : vector<16x256xf32>
    %163 = math.tanh %162 : vector<16x256xf32>
    %164 = arith.mulf %159, %163 : vector<16x256xf32>
    %165 = arith.truncf %164 : vector<16x256xf32> to vector<16x256xbf16>
    %166 = arith.index_cast %c3_i32 : i32 to index
    %c0_49 = arith.constant 0 : index
    %c0_50 = arith.constant 0 : index
    %167 = vector.load %arg9[%166, %c0_49, %c0_50] : memref<8x16x256xbf16, #tpu.memory_space<vmem>>, vector<1x16x256xbf16>
    %168 = vector.shape_cast %167 : vector<1x16x256xbf16> to vector<16x256xbf16>
    %169 = vector.shape_cast %165 : vector<16x256xbf16> to vector<1x16x256xbf16>
    tpu.vector_store %arg9[%166, %c0_49, %c0_50], %169 {strides = array<i32>} : memref<8x16x256xbf16, #tpu.memory_space<vmem>>, vector<1x16x256xbf16>,
    %c4_i32 = arith.constant 4 : i32
    %170 = arith.index_cast %c4_i32 : i32 to index
    %c0_51 = arith.constant 0 : index
    %c0_52 = arith.constant 0 : index
    %171 = vector.load %arg8[%170, %c0_51, %c0_52] : memref<8x16x1024xbf16, #tpu.memory_space<vmem>>, vector<1x16x1024xbf16>
    %172 = vector.shape_cast %171 : vector<1x16x1024xbf16> to vector<16x1024xbf16>
    %173 = arith.extf %172 : vector<16x1024xbf16> to vector<16x1024xf32>
    %174 = vector.broadcast %7 : vector<1x1024xf32> to vector<16x1024xf32>
    %175 = arith.addf %173, %174 : vector<16x1024xf32>
    %176 = arith.truncf %164 : vector<16x256xf32> to vector<16x256xbf16>
    %c0_53 = arith.constant 0 : index
    %c0_54 = arith.constant 0 : index
    %177 = vector.load %arg3[%c0_53, %c0_54] : memref<256x1024xbf16, #tpu.memory_space<vmem>>, vector<256x1024xbf16>
    %cst_55 = arith.constant dense<0.000000e+00> : vector<16x1024xf32>
    %178 = tpu.matmul %176, %177, %cst_55 {dimension_numbers = #tpu.dot_dimension_numbers<[1], [0], [0], [1], [0, 0, 1, 1], [], []>} : vector<16x256xbf16>, vector<256x1024xbf16>, vector<16x1024xf32> -> vector<16x1024xf32>
    %179 = arith.addf %175, %178 : vector<16x1024xf32>
    %180 = vector.extract_strided_slice %179 {offsets = [0, 0], sizes = [16, 256], strides = [1, 1]} : vector<16x1024xf32> to vector<16x256xf32>
    %181 = arith.negf %180 : vector<16x256xf32>
    %182 = math.exp %181 : vector<16x256xf32>
    %cst_56 = arith.constant 1.000000e+00 : f32
    %183 = vector.broadcast %cst_56 : f32 to vector<16x256xf32>
    %184 = arith.addf %183, %182 : vector<16x256xf32>
    %185 = arith.divf %183, %184 : vector<16x256xf32>
    %186 = vector.extract_strided_slice %179 {offsets = [0, 256], sizes = [16, 256], strides = [1, 1]} : vector<16x1024xf32> to vector<16x256xf32>
    %187 = arith.negf %186 : vector<16x256xf32>
    %188 = math.exp %187 : vector<16x256xf32>
    %cst_57 = arith.constant 1.000000e+00 : f32
    %189 = vector.broadcast %cst_57 : f32 to vector<16x256xf32>
    %190 = arith.addf %189, %188 : vector<16x256xf32>
    %191 = arith.divf %189, %190 : vector<16x256xf32>
    %192 = vector.extract_strided_slice %179 {offsets = [0, 512], sizes = [16, 256], strides = [1, 1]} : vector<16x1024xf32> to vector<16x256xf32>
    %193 = math.tanh %192 : vector<16x256xf32>
    %194 = vector.extract_strided_slice %179 {offsets = [0, 768], sizes = [16, 256], strides = [1, 1]} : vector<16x1024xf32> to vector<16x256xf32>
    %195 = arith.negf %194 : vector<16x256xf32>
    %196 = math.exp %195 : vector<16x256xf32>
    %cst_58 = arith.constant 1.000000e+00 : f32
    %197 = vector.broadcast %cst_58 : f32 to vector<16x256xf32>
    %198 = arith.addf %197, %196 : vector<16x256xf32>
    %199 = arith.divf %197, %198 : vector<16x256xf32>
    %200 = arith.mulf %191, %162 : vector<16x256xf32>
    %201 = arith.mulf %185, %193 : vector<16x256xf32>
    %202 = arith.addf %200, %201 : vector<16x256xf32>
    %203 = math.tanh %202 : vector<16x256xf32>
    %204 = arith.mulf %199, %203 : vector<16x256xf32>
    %205 = arith.truncf %204 : vector<16x256xf32> to vector<16x256xbf16>
    %206 = arith.index_cast %c4_i32 : i32 to index
    %c0_59 = arith.constant 0 : index
    %c0_60 = arith.constant 0 : index
    %207 = vector.load %arg9[%206, %c0_59, %c0_60] : memref<8x16x256xbf16, #tpu.memory_space<vmem>>, vector<1x16x256xbf16>
    %208 = vector.shape_cast %207 : vector<1x16x256xbf16> to vector<16x256xbf16>
    %209 = vector.shape_cast %205 : vector<16x256xbf16> to vector<1x16x256xbf16>
    tpu.vector_store %arg9[%206, %c0_59, %c0_60], %209 {strides = array<i32>} : memref<8x16x256xbf16, #tpu.memory_space<vmem>>, vector<1x16x256xbf16>,
    %c5_i32 = arith.constant 5 : i32
    %210 = arith.index_cast %c5_i32 : i32 to index
    %c0_61 = arith.constant 0 : index
    %c0_62 = arith.constant 0 : index
    %211 = vector.load %arg8[%210, %c0_61, %c0_62] : memref<8x16x1024xbf16, #tpu.memory_space<vmem>>, vector<1x16x1024xbf16>
    %212 = vector.shape_cast %211 : vector<1x16x1024xbf16> to vector<16x1024xbf16>
    %213 = arith.extf %212 : vector<16x1024xbf16> to vector<16x1024xf32>
    %214 = vector.broadcast %7 : vector<1x1024xf32> to vector<16x1024xf32>
    %215 = arith.addf %213, %214 : vector<16x1024xf32>
    %216 = arith.truncf %204 : vector<16x256xf32> to vector<16x256xbf16>
    %c0_63 = arith.constant 0 : index
    %c0_64 = arith.constant 0 : index
    %217 = vector.load %arg3[%c0_63, %c0_64] : memref<256x1024xbf16, #tpu.memory_space<vmem>>, vector<256x1024xbf16>
    %cst_65 = arith.constant dense<0.000000e+00> : vector<16x1024xf32>
    %218 = tpu.matmul %216, %217, %cst_65 {dimension_numbers = #tpu.dot_dimension_numbers<[1], [0], [0], [1], [0, 0, 1, 1], [], []>} : vector<16x256xbf16>, vector<256x1024xbf16>, vector<16x1024xf32> -> vector<16x1024xf32>
    %219 = arith.addf %215, %218 : vector<16x1024xf32>
    %220 = vector.extract_strided_slice %219 {offsets = [0, 0], sizes = [16, 256], strides = [1, 1]} : vector<16x1024xf32> to vector<16x256xf32>
    %221 = arith.negf %220 : vector<16x256xf32>
    %222 = math.exp %221 : vector<16x256xf32>
    %cst_66 = arith.constant 1.000000e+00 : f32
    %223 = vector.broadcast %cst_66 : f32 to vector<16x256xf32>
    %224 = arith.addf %223, %222 : vector<16x256xf32>
    %225 = arith.divf %223, %224 : vector<16x256xf32>
    %226 = vector.extract_strided_slice %219 {offsets = [0, 256], sizes = [16, 256], strides = [1, 1]} : vector<16x1024xf32> to vector<16x256xf32>
    %227 = arith.negf %226 : vector<16x256xf32>
    %228 = math.exp %227 : vector<16x256xf32>
    %cst_67 = arith.constant 1.000000e+00 : f32
    %229 = vector.broadcast %cst_67 : f32 to vector<16x256xf32>
    %230 = arith.addf %229, %228 : vector<16x256xf32>
    %231 = arith.divf %229, %230 : vector<16x256xf32>
    %232 = vector.extract_strided_slice %219 {offsets = [0, 512], sizes = [16, 256], strides = [1, 1]} : vector<16x1024xf32> to vector<16x256xf32>
    %233 = math.tanh %232 : vector<16x256xf32>
    %234 = vector.extract_strided_slice %219 {offsets = [0, 768], sizes = [16, 256], strides = [1, 1]} : vector<16x1024xf32> to vector<16x256xf32>
    %235 = arith.negf %234 : vector<16x256xf32>
    %236 = math.exp %235 : vector<16x256xf32>
    %cst_68 = arith.constant 1.000000e+00 : f32
    %237 = vector.broadcast %cst_68 : f32 to vector<16x256xf32>
    %238 = arith.addf %237, %236 : vector<16x256xf32>
    %239 = arith.divf %237, %238 : vector<16x256xf32>
    %240 = arith.mulf %231, %202 : vector<16x256xf32>
    %241 = arith.mulf %225, %233 : vector<16x256xf32>
    %242 = arith.addf %240, %241 : vector<16x256xf32>
    %243 = math.tanh %242 : vector<16x256xf32>
    %244 = arith.mulf %239, %243 : vector<16x256xf32>
    %245 = arith.truncf %244 : vector<16x256xf32> to vector<16x256xbf16>
    %246 = arith.index_cast %c5_i32 : i32 to index
    %c0_69 = arith.constant 0 : index
    %c0_70 = arith.constant 0 : index
    %247 = vector.load %arg9[%246, %c0_69, %c0_70] : memref<8x16x256xbf16, #tpu.memory_space<vmem>>, vector<1x16x256xbf16>
    %248 = vector.shape_cast %247 : vector<1x16x256xbf16> to vector<16x256xbf16>
    %249 = vector.shape_cast %245 : vector<16x256xbf16> to vector<1x16x256xbf16>
    tpu.vector_store %arg9[%246, %c0_69, %c0_70], %249 {strides = array<i32>} : memref<8x16x256xbf16, #tpu.memory_space<vmem>>, vector<1x16x256xbf16>,
    %c6_i32 = arith.constant 6 : i32
    %250 = arith.index_cast %c6_i32 : i32 to index
    %c0_71 = arith.constant 0 : index
    %c0_72 = arith.constant 0 : index
    %251 = vector.load %arg8[%250, %c0_71, %c0_72] : memref<8x16x1024xbf16, #tpu.memory_space<vmem>>, vector<1x16x1024xbf16>
    %252 = vector.shape_cast %251 : vector<1x16x1024xbf16> to vector<16x1024xbf16>
    %253 = arith.extf %252 : vector<16x1024xbf16> to vector<16x1024xf32>
    %254 = vector.broadcast %7 : vector<1x1024xf32> to vector<16x1024xf32>
    %255 = arith.addf %253, %254 : vector<16x1024xf32>
    %256 = arith.truncf %244 : vector<16x256xf32> to vector<16x256xbf16>
    %c0_73 = arith.constant 0 : index
    %c0_74 = arith.constant 0 : index
    %257 = vector.load %arg3[%c0_73, %c0_74] : memref<256x1024xbf16, #tpu.memory_space<vmem>>, vector<256x1024xbf16>
    %cst_75 = arith.constant dense<0.000000e+00> : vector<16x1024xf32>
    %258 = tpu.matmul %256, %257, %cst_75 {dimension_numbers = #tpu.dot_dimension_numbers<[1], [0], [0], [1], [0, 0, 1, 1], [], []>} : vector<16x256xbf16>, vector<256x1024xbf16>, vector<16x1024xf32> -> vector<16x1024xf32>
    %259 = arith.addf %255, %258 : vector<16x1024xf32>
    %260 = vector.extract_strided_slice %259 {offsets = [0, 0], sizes = [16, 256], strides = [1, 1]} : vector<16x1024xf32> to vector<16x256xf32>
    %261 = arith.negf %260 : vector<16x256xf32>
    %262 = math.exp %261 : vector<16x256xf32>
    %cst_76 = arith.constant 1.000000e+00 : f32
    %263 = vector.broadcast %cst_76 : f32 to vector<16x256xf32>
    %264 = arith.addf %263, %262 : vector<16x256xf32>
    %265 = arith.divf %263, %264 : vector<16x256xf32>
    %266 = vector.extract_strided_slice %259 {offsets = [0, 256], sizes = [16, 256], strides = [1, 1]} : vector<16x1024xf32> to vector<16x256xf32>
    %267 = arith.negf %266 : vector<16x256xf32>
    %268 = math.exp %267 : vector<16x256xf32>
    %cst_77 = arith.constant 1.000000e+00 : f32
    %269 = vector.broadcast %cst_77 : f32 to vector<16x256xf32>
    %270 = arith.addf %269, %268 : vector<16x256xf32>
    %271 = arith.divf %269, %270 : vector<16x256xf32>
    %272 = vector.extract_strided_slice %259 {offsets = [0, 512], sizes = [16, 256], strides = [1, 1]} : vector<16x1024xf32> to vector<16x256xf32>
    %273 = math.tanh %272 : vector<16x256xf32>
    %274 = vector.extract_strided_slice %259 {offsets = [0, 768], sizes = [16, 256], strides = [1, 1]} : vector<16x1024xf32> to vector<16x256xf32>
    %275 = arith.negf %274 : vector<16x256xf32>
    %276 = math.exp %275 : vector<16x256xf32>
    %cst_78 = arith.constant 1.000000e+00 : f32
    %277 = vector.broadcast %cst_78 : f32 to vector<16x256xf32>
    %278 = arith.addf %277, %276 : vector<16x256xf32>
    %279 = arith.divf %277, %278 : vector<16x256xf32>
    %280 = arith.mulf %271, %242 : vector<16x256xf32>
    %281 = arith.mulf %265, %273 : vector<16x256xf32>
    %282 = arith.addf %280, %281 : vector<16x256xf32>
    %283 = math.tanh %282 : vector<16x256xf32>
    %284 = arith.mulf %279, %283 : vector<16x256xf32>
    %285 = arith.truncf %284 : vector<16x256xf32> to vector<16x256xbf16>
    %286 = arith.index_cast %c6_i32 : i32 to index
    %c0_79 = arith.constant 0 : index
    %c0_80 = arith.constant 0 : index
    %287 = vector.load %arg9[%286, %c0_79, %c0_80] : memref<8x16x256xbf16, #tpu.memory_space<vmem>>, vector<1x16x256xbf16>
    %288 = vector.shape_cast %287 : vector<1x16x256xbf16> to vector<16x256xbf16>
    %289 = vector.shape_cast %285 : vector<16x256xbf16> to vector<1x16x256xbf16>
    tpu.vector_store %arg9[%286, %c0_79, %c0_80], %289 {strides = array<i32>} : memref<8x16x256xbf16, #tpu.memory_space<vmem>>, vector<1x16x256xbf16>,
    %c7_i32 = arith.constant 7 : i32
    %290 = arith.index_cast %c7_i32 : i32 to index
    %c0_81 = arith.constant 0 : index
    %c0_82 = arith.constant 0 : index
    %291 = vector.load %arg8[%290, %c0_81, %c0_82] : memref<8x16x1024xbf16, #tpu.memory_space<vmem>>, vector<1x16x1024xbf16>
    %292 = vector.shape_cast %291 : vector<1x16x1024xbf16> to vector<16x1024xbf16>
    %293 = arith.extf %292 : vector<16x1024xbf16> to vector<16x1024xf32>
    %294 = vector.broadcast %7 : vector<1x1024xf32> to vector<16x1024xf32>
    %295 = arith.addf %293, %294 : vector<16x1024xf32>
    %296 = arith.truncf %284 : vector<16x256xf32> to vector<16x256xbf16>
    %c0_83 = arith.constant 0 : index
    %c0_84 = arith.constant 0 : index
    %297 = vector.load %arg3[%c0_83, %c0_84] : memref<256x1024xbf16, #tpu.memory_space<vmem>>, vector<256x1024xbf16>
    %cst_85 = arith.constant dense<0.000000e+00> : vector<16x1024xf32>
    %298 = tpu.matmul %296, %297, %cst_85 {dimension_numbers = #tpu.dot_dimension_numbers<[1], [0], [0], [1], [0, 0, 1, 1], [], []>} : vector<16x256xbf16>, vector<256x1024xbf16>, vector<16x1024xf32> -> vector<16x1024xf32>
    %299 = arith.addf %295, %298 : vector<16x1024xf32>
    %300 = vector.extract_strided_slice %299 {offsets = [0, 0], sizes = [16, 256], strides = [1, 1]} : vector<16x1024xf32> to vector<16x256xf32>
    %301 = arith.negf %300 : vector<16x256xf32>
    %302 = math.exp %301 : vector<16x256xf32>
    %cst_86 = arith.constant 1.000000e+00 : f32
    %303 = vector.broadcast %cst_86 : f32 to vector<16x256xf32>
    %304 = arith.addf %303, %302 : vector<16x256xf32>
    %305 = arith.divf %303, %304 : vector<16x256xf32>
    %306 = vector.extract_strided_slice %299 {offsets = [0, 256], sizes = [16, 256], strides = [1, 1]} : vector<16x1024xf32> to vector<16x256xf32>
    %307 = arith.negf %306 : vector<16x256xf32>
    %308 = math.exp %307 : vector<16x256xf32>
    %cst_87 = arith.constant 1.000000e+00 : f32
    %309 = vector.broadcast %cst_87 : f32 to vector<16x256xf32>
    %310 = arith.addf %309, %308 : vector<16x256xf32>
    %311 = arith.divf %309, %310 : vector<16x256xf32>
    %312 = vector.extract_strided_slice %299 {offsets = [0, 512], sizes = [16, 256], strides = [1, 1]} : vector<16x1024xf32> to vector<16x256xf32>
    %313 = math.tanh %312 : vector<16x256xf32>
    %314 = vector.extract_strided_slice %299 {offsets = [0, 768], sizes = [16, 256], strides = [1, 1]} : vector<16x1024xf32> to vector<16x256xf32>
    %315 = arith.negf %314 : vector<16x256xf32>
    %316 = math.exp %315 : vector<16x256xf32>
    %cst_88 = arith.constant 1.000000e+00 : f32
    %317 = vector.broadcast %cst_88 : f32 to vector<16x256xf32>
    %318 = arith.addf %317, %316 : vector<16x256xf32>
    %319 = arith.divf %317, %318 : vector<16x256xf32>
    %320 = arith.mulf %311, %282 : vector<16x256xf32>
    %321 = arith.mulf %305, %313 : vector<16x256xf32>
    %322 = arith.addf %320, %321 : vector<16x256xf32>
    %323 = math.tanh %322 : vector<16x256xf32>
    %324 = arith.mulf %319, %323 : vector<16x256xf32>
    %325 = arith.truncf %324 : vector<16x256xf32> to vector<16x256xbf16>
    %326 = arith.index_cast %c7_i32 : i32 to index
    %c0_89 = arith.constant 0 : index
    %c0_90 = arith.constant 0 : index
    %327 = vector.load %arg9[%326, %c0_89, %c0_90] : memref<8x16x256xbf16, #tpu.memory_space<vmem>>, vector<1x16x256xbf16>
    %328 = vector.shape_cast %327 : vector<1x16x256xbf16> to vector<16x256xbf16>
    %329 = vector.shape_cast %325 : vector<16x256xbf16> to vector<1x16x256xbf16>
    tpu.vector_store %arg9[%326, %c0_89, %c0_90], %329 {strides = array<i32>} : memref<8x16x256xbf16, #tpu.memory_space<vmem>>, vector<1x16x256xbf16>,
    %c8_i32 = arith.constant 8 : i32
    %c0_91 = arith.constant 0 : index
    %c0_92 = arith.constant 0 : index
    %c0_93 = arith.constant 0 : index
    %330 = vector.load %arg9[%c0_91, %c0_92, %c0_93] : memref<8x16x256xbf16, #tpu.memory_space<vmem>>, vector<8x16x256xbf16>
    %331 = vector.shape_cast %330 : vector<8x16x256xbf16> to vector<128x256xbf16>
    %c0_94 = arith.constant 0 : index
    %c0_95 = arith.constant 0 : index
    %332 = vector.load %arg5[%c0_94, %c0_95] : memref<256x512xbf16, #tpu.memory_space<vmem>>, vector<256x512xbf16>
    %cst_96 = arith.constant dense<0.000000e+00> : vector<128x512xf32>
    %333 = tpu.matmul %331, %332, %cst_96 {dimension_numbers = #tpu.dot_dimension_numbers<[1], [0], [0], [1], [0, 0, 1, 1], [], []>} : vector<128x256xbf16>, vector<256x512xbf16>, vector<128x512xf32> -> vector<128x512xf32>
    %c0_97 = arith.constant 0 : index
    %c0_98 = arith.constant 0 : index
    %334 = vector.load %arg6[%c0_97, %c0_98] : memref<1x512xf32, #tpu.memory_space<vmem>>, vector<1x512xf32>
    %335 = vector.broadcast %334 : vector<1x512xf32> to vector<128x512xf32>
    %336 = arith.addf %333, %335 : vector<128x512xf32>
    %337 = vector.shape_cast %336 : vector<128x512xf32> to vector<8x16x512xf32>
    %c0_99 = arith.constant 0 : index
    %c0_100 = arith.constant 0 : index
    %c0_101 = arith.constant 0 : index
    %338 = vector.load %arg7[%c0_99, %c0_100, %c0_101] : memref<8x16x512xf32, #tpu.memory_space<vmem>>, vector<8x16x512xf32>
    tpu.vector_store %arg7[%c0_99, %c0_100, %c0_101], %337 {strides = array<i32>} : memref<8x16x512xf32, #tpu.memory_space<vmem>>, vector<8x16x512xf32>,
    return
  }
  func.func @transform_0(%arg0: i32) -> (i32, i32, i32) {
    %c0_i32 = arith.constant 0 : i32
    %c0_i32_0 = arith.constant 0 : i32
    %c0_i32_1 = arith.constant 0 : i32
    return %c0_i32, %arg0, %c0_i32_0 : i32, i32, i32
  }
  func.func @transform_1(%arg0: i32) -> (i32, i32) {
    %c0_i32 = arith.constant 0 : i32
    %c0_i32_0 = arith.constant 0 : i32
    %c0_i32_1 = arith.constant 0 : i32
    return %c0_i32, %c0_i32_0 : i32, i32
  }
  func.func @transform_2(%arg0: i32) -> (i32, i32) {
    %c0_i32 = arith.constant 0 : i32
    %c0_i32_0 = arith.constant 0 : i32
    %c0_i32_1 = arith.constant 0 : i32
    return %c0_i32, %c0_i32_0 : i32, i32
  }
  func.func @transform_3(%arg0: i32) -> (i32, i32) {
    %c0_i32 = arith.constant 0 : i32
    %c0_i32_0 = arith.constant 0 : i32
    %c0_i32_1 = arith.constant 0 : i32
    return %c0_i32, %c0_i32_0 : i32, i32
  }
  func.func @transform_4(%arg0: i32) -> (i32, i32) {
    %c0_i32 = arith.constant 0 : i32
    %c0_i32_0 = arith.constant 0 : i32
    %c0_i32_1 = arith.constant 0 : i32
    return %c0_i32, %c0_i32_0 : i32, i32
  }
  func.func @transform_5(%arg0: i32) -> (i32, i32) {
    %c0_i32 = arith.constant 0 : i32
    %c0_i32_0 = arith.constant 0 : i32
    %c0_i32_1 = arith.constant 0 : i32
    return %c0_i32, %c0_i32_0 : i32, i32
  }
  func.func @transform_6(%arg0: i32) -> (i32, i32, i32) {
    %c0_i32 = arith.constant 0 : i32
    %c0_i32_0 = arith.constant 0 : i32
    %c0_i32_1 = arith.constant 0 : i32
    return %c0_i32, %arg0, %c0_i32_0 : i32, i32, i32
  }
}

</mosaic_0001>

<bundles_post_ra>
// kernel: img2cap_forward.2
= control target key start
LH: loop header
LB: loop body
LE: loop exit
PB: predicated region body
PF: predicated region fallthrough
CT: control target
= control target key end

     0   :  { %vm103_vm0 = vcmask 1043456   ;;  %v238_v17 = vmov 0   ;;  %v56_v18 = vlaneseq  ;;  %vm92_vm1 = vcmask 1041409   ;;  %s327_s0 = inlined_call_operand.vmem [shape: f32[4,8,256], index: 0, kind: input, shape index: {}]   ;;  %s328_s1 = inlined_call_operand.vmem [shape: f32[8,256], index: 1, kind: input, shape index: {}]   ;;  %s329_s2 = inlined_call_operand.vmem [shape: f32[1,256], index: 2, kind: input, shape index: {}]   ;;  %s330_s3 = inlined_call_operand.vmem [shape: f32[1,256], index: 3, kind: input, shape index: {}]   ;;  %s331_s4 = inlined_call_operand.vmem [shape: f32[1,256], index: 4, kind: input, shape index: {}]   ;;  %s332_s5 = inlined_call_operand.vmem [shape: f32[4,256], index: 5, kind: output, shape index: {}]  }
   0x1   :  { %v21_v0 = vld [vmem:[%s327_s0] sm:$0xff]  ;;  %v22_v1 = vld [vmem:[%s327_s0 + $0x8] sm:$0xff]  ;;  %v23_v5 = vld [vmem:[%s327_s0 + $0x10] sm:$0xff]  ;;  %142 = vmatprep.mubr.bf16.mxu0 %v238_v17  ;;  %vm94_vm2 = vcmask 1042434   ;;  %vm96_vm3 = vcmask 1043459   ;;  %vm99_vm4 = vcmask 64512  }
   0x2   :  { %v25_v2 = vld [vmem:[%s327_s0 + $0x20] sm:$0xff]  ;;  %v29_v3 = vadd.f32 %v22_v1, %v21_v0  ;;  %v26_v4 = vld [vmem:[%s327_s0 + $0x28] sm:$0xff]  ;;  %v24_v6 = vld [vmem:[%s327_s0 + $0x18] sm:$0xff]  ;;  %v57_v23 = vshrl.u32 %v56_v18, 7  ;;  %v75_v24 = vand.u32 127, %v56_v18 }
   0x3   :  { %v35_v7 = vadd.f32 %v26_v4, %v25_v2  ;;  %v27_v8 = vld [vmem:[%s327_s0 + $0x30] sm:$0xff]  ;;  %v28_v9 = vld [vmem:[%s327_s0 + $0x38] sm:$0xff]  ;;  %v32_v10 = vadd.f32 %v24_v6, %v23_v5  ;;  %v51_v12 = vld [vmem:[%s328_s1 + $0x8] sm:$0xff] }
   0x4   :  { %30 = vadd.xlane.f32.xlu0 %v29_v3  ;;  %v38_v11 = vadd.f32 %v28_v9, %v27_v8  ;;  %v50_v13 = vld [vmem:[%s328_s1] sm:$0xff]  ;;  %v53_v14 = vpack.c.bf16 %v51_v12, %v51_v12  ;;  %v78_v31 = vsub.s32 %v75_v24, %v57_v23  ;;  %v301_v46 = vsub.s32 0, %v57_v23 }
   0x5   :  { %36 = vadd.xlane.f32.xlu1 %v35_v7  ;;  %v52_v15 = vpack.c.bf16 %v50_v13, %v50_v13  ;;  %v54_v47 = vld [vmem:[%s329_s2] sm:$0x3]  ;;  %v306_v48 = vsub.s32 1, %v57_v23 }
   0x6   :  { %231 = vmatprep.subr.msk.bf16.mxu0 %vm103_vm0, %v53_v14  ;;  %v59_v49 = vrot.slane %v54_v47, %v301_v46 }
   0x7   :  { %v105_v16 = vsel %vm103_vm0, %v52_v15, 0  ;;  %v63_v50 = vrot.slane %v54_v47, %v306_v48 }
   0x8   :  { %33 = vadd.xlane.f32.xlu0 %v32_v10  ;;  %111 = vmatpush1.bf16.msra.mxu0 %v105_v16 }
   0x9   :  { %39 = vadd.xlane.f32.xlu1 %v38_v11 }
  0x91   :  { %v31_v19 = vpop.xlane.xlu0 %30 }
  0x92   :  { %v42_v20 = vmul.f32 0.00390625, %v31_v19  ;;  %v37_v21 = vpop.xlane.xlu1 %36 }
  0x93   :  { %v44_v22 = vmul.f32 0.00390625, %v37_v21 }
  0x94   :  { %v46_v25 = vpack.c.bf16 %v42_v20, %v42_v20 }
  0x95   :  { %v48_v26 = vpack.c.bf16 %v44_v22, %v44_v22  ;;  %v34_v27 = vpop.xlane.xlu0 %33 }
  0x96   :  { %v43_v28 = vmul.f32 0.00390625, %v34_v27  ;;  %v40_v29 = vpop.xlane.xlu1 %39  ;;  %v70_v32 = vunpack.c.l.b16 %v46_v25 }
  0x97   :  { %v45_v30 = vmul.f32 0.00390625, %v40_v29  ;;  %v72_v34 = vunpack.c.l.b16 %v48_v26 }
  0x98   :  { %v47_v33 = vpack.c.bf16 %v43_v28, %v43_v28  ;;  %v79_v38 = vrot.slane %v70_v32, %v78_v31  ;;  %v208_v32 = vld [vmem:[%s331_s4] sm:$0x3] }
  0x99   :  { %v49_v35 = vpack.c.bf16 %v45_v30, %v45_v30  ;;  %v87_v40 = vrot.slane %v72_v34, %v78_v31 }
  0x9a   :  { %v71_v36 = vunpack.c.l.b16 %v47_v33 }
  0x9b   :  { %v73_v37 = vunpack.c.l.b16 %v49_v35 }
  0x9c   :  { %v83_v39 = vrot.slane %v71_v36, %v78_v31 }
  0x9d   :  { %v91_v41 = vrot.slane %v73_v37, %v78_v31  ;;  %v194_v31 = vld [vmem:[%s330_s3] sm:$0x3] }
  0x9e   :  { %v93_v42 = vsel %vm92_vm1, %v83_v39, %v79_v38  ;;  %v199_v33 = vrot.slane %v194_v31, %v301_v46  ;;  %v203_v35 = vrot.slane %v194_v31, %v306_v48  ;;  %v213_v38 = vrot.slane %v208_v32, %v301_v46 }
  0x9f   :  { %v95_v43 = vsel %vm94_vm2, %v87_v40, %v93_v42  ;;  %v217_v40 = vrot.slane %v208_v32, %v306_v48 }
  0xa0   :  { %v97_v44 = vsel %vm96_vm3, %v91_v41, %v95_v43 }
  0xa1   :  { %v98_v45 = vpack.c.b16 %v97_v44, %v97_v44 }
  0xa3   :  { %232 = vmatmul.mubr.msk.bf16.vlgmr.msra.gmra.mrb[0].mxu0 %vm99_vm4, %v98_v45 }
 0x176   :  { %v144_v51 = vpop.f32.mrb[0].mxu0 }
 0x177   :  { %v145_v52 = vadd.f32 %v144_v51, %v59_v49  ;;  %v146_v53 = vpop.f32.mrb[1].mxu0 }
 0x178   :  { %v147_v54 = vadd.f32 %v146_v53, %v63_v50  ;;  %v148_v55 = vpop.f32.mrb[2].mxu0 }
 0x179   :  { %v151_v56 = vsel %vm103_vm0, %v145_v52, 0.0  ;;  %v149_v57 = vpop.f32.mrb[3].mxu0 }
 0x17a   :  { %v152_v58 = vrot.slane %v151_v56, 4  ;;  %v158_v59 = vsel %vm103_vm0, %v147_v54, 0.0 }
 0x17b   :  { %v159_v60 = vrot.slane %v158_v59, 4 }
 0x17c   :  { %v153_v61 = vadd.f32 %v152_v58, %v151_v56 }
 0x17d   :  { %v160_v62 = vadd.f32 %v159_v60, %v158_v59 }
 0x17e   :  { %v154_v63 = vrot.slane %v153_v61, 2 }
 0x17f   :  { %v161_v0 = vrot.slane %v160_v62, 2 }
 0x180   :  { %v155_v1 = vadd.f32 %v154_v63, %v153_v61 }
 0x181   :  { %v162_v2 = vadd.f32 %v161_v0, %v160_v62 }
 0x182   :  { %v156_v3 = vrot.slane %v155_v1, 1 }
 0x183   :  { %v163_v4 = vrot.slane %v162_v2, 1 }
 0x184   :  { %v157_v5 = vadd.f32 %v156_v3, %v155_v1 }
 0x185   :  { %v164_v6 = vadd.f32 %v163_v4, %v162_v2 }
 0x186   :  { %v166_v7 = vmul.f32 0.25, %v157_v5 }
 0x187   :  { %v167_v8 = vmul.f32 0.25, %v164_v6 }
 0x188   :  { %v168_v9 = vsub.f32 %v145_v52, %v166_v7 }
 0x189   :  { %v169_v10 = vsub.f32 %v147_v54, %v167_v8 }
 0x18a   :  { %v170_v11 = vmul.f32 %v168_v9, %v168_v9 }
 0x18b   :  { %v171_v12 = vmul.f32 %v169_v10, %v169_v10 }
 0x18c   :  { %v172_v13 = vsel %vm103_vm0, %v170_v11, 0.0 }
 0x18d   :  { %v173_v14 = vrot.slane %v172_v13, 4  ;;  %v179_v15 = vsel %vm103_vm0, %v171_v12, 0.0 }
 0x18e   :  { %v180_v16 = vrot.slane %v179_v15, 4 }
 0x18f   :  { %v174_v17 = vadd.f32 %v173_v14, %v172_v13 }
 0x190   :  { %v181_v18 = vadd.f32 %v180_v16, %v179_v15 }
 0x191   :  { %v175_v19 = vrot.slane %v174_v17, 2 }
 0x192   :  { %v182_v20 = vrot.slane %v181_v18, 2 }
 0x193   :  { %v176_v21 = vadd.f32 %v175_v19, %v174_v17 }
 0x194   :  { %v183_v22 = vadd.f32 %v182_v20, %v181_v18 }
 0x195   :  { %v177_v23 = vrot.slane %v176_v21, 1 }
 0x196   :  { %v184_v24 = vrot.slane %v183_v22, 1 }
 0x197   :  { %v178_v25 = vadd.f32 %v177_v23, %v176_v21 }
 0x198   :  { %v185_v26 = vadd.f32 %v184_v24, %v183_v22 }
 0x199   :  { %v186_v27 = vmul.f32 0.25, %v178_v25 }
 0x19a   :  { %v187_v28 = vmul.f32 0.25, %v185_v26 }
 0x19b   :  { %v188_v29 = vadd.f32 1e-05, %v186_v27 }
 0x19c   :  { %v189_v30 = vadd.f32 1e-05, %v187_v28 }
 0x19d   :  { %234 = vrsqrt.f32 %v188_v29 }
 0x19e   :  { %236 = vrsqrt.f32 %v189_v30 }
 0x1a7   :  { %v235_v34 = vpop.eup %234 }
 0x1a8   :  { %v237_v36 = vpop.eup %236  ;;  %v192_v37 = vmul.f32 %v235_v34, %v168_v9 }
 0x1a9   :  { %v193_v39 = vmul.f32 %v237_v36, %v169_v10 }
 0x1aa   :  { %v206_v41 = vmul.f32 %v199_v33, %v192_v37 }
 0x1ab   :  { %v207_v42 = vmul.f32 %v203_v35, %v193_v39 }
 0x1ac   :  { %v220_v43 = vadd.f32 %v213_v38, %v206_v41 }
 0x1ad   :  { %v221_v44 = vadd.f32 %v217_v40, %v207_v42 }
 0x1af   :  { %v224_v45 = vcombine.low %v220_v43, %v221_v44 }
 0x1b1   :  { %226 = vst [vmem:[%s332_s5] sm:$0xff] %v224_v45 }

// kernel: img2cap_forward.3
= control target key start
LH: loop header
LB: loop body
LE: loop exit
PB: predicated region body
PF: predicated region fallthrough
CT: control target
= control target key end

     0   :  { %11 = vsyncpa [#allocation5], 0  ;;  %s14628_s0 = inlined_call_operand.hbm [shape: bf16[8,16,256], index: 0, kind: input, shape index: {}]   ;;  %s14629_s1 = inlined_call_operand.hbm [shape: bf16[256,1024], index: 1, kind: input, shape index: {}]   ;;  %s14630_s2 = inlined_call_operand.hbm [shape: bf16[256,1024], index: 2, kind: input, shape index: {}]   ;;  %s14631_s3 = inlined_call_operand.hbm [shape: f32[1,1024], index: 3, kind: input, shape index: {}]   ;;  %s14632_s4 = inlined_call_operand.hbm [shape: bf16[256,512], index: 4, kind: input, shape index: {}]   ;;  %s14633_s5 = inlined_call_operand.hbm [shape: f32[1,512], index: 5, kind: input, shape index: {}]   ;;  %s14634_s6 = inlined_call_operand.hbm [shape: f32[8,16,512], index: 6, kind: output, shape index: {}]  }
   0x1   :  { %12 = vsyncpa [#allocation8], 0 }
   0x2   :  { %13 = vsyncpa [#allocation11], 0 }
   0x3   :  { %14 = vsyncpa [#allocation14], 0 }
   0x4   :  { %15 = vsyncpa [#allocation6], 0  ;;  %s13241_s21 = smov [#allocation7]   ;;  %s13077_s25 = scalar_lea.hbm %s14629_s1, 16384 }
   0x5   :  { %s33_s22 = sshll.u32 %s13241_s21, 4  ;;  %p13078_p0 = scmp.ne.s32.totalorder %s14629_s1, %s13077_s25  ;;  %s34_s22 = int_to_ptr.vmem [resolvable:$true] %s33_s22 }
   0x6   :  { %p13081_p1 = scmp.lt.u32.totalorder %s13077_s25, %s14629_s1 }
   0x8   :  { %p13083_p2 = pnand %p13081_p1, %p13078_p0 }
   0xa   :  { %13086 = shalt.err (!%p13083_p2)
}
   0xb   :  { %s13087_s30 = scalar_lea.vmem %s34_s22, 16384  ;;  %p13092_p4 = scmp.lt.s32.totalorder %s34_s22, %s34_s22 }
   0xc   :  { %p13088_p3 = scmp.ne.s32.totalorder %s34_s22, %s13087_s30  ;;  %p13093_p5 = scmp.lt.s32.totalorder %s13087_s30, %s13087_s30 }
   0xe   :  { %p13094_p6 = por %p13093_p5, %p13092_p4 }
  0x10   :  { %p13095_p7 = pnand %p13094_p6, %p13088_p3 }
  0x12   :  { %13098 = shalt.err (!%p13095_p7)
}
  0x13   :  { %s13242_s7 = smov 512   ;;  %s13243_s8 = smov 32  }
  0x14   :  { %39 = dma.hbm_to_vmem [thread:$0]  %s14629_s1, 16384, %s34_s22, [#allocation8], %s13242_s7, %s13242_s7, %s13243_s8  }
  0x15   :  { %s13244_s11 = smov [#allocation10]   ;;  %s13245_s13 = smov [#allocation4]  }
  0x16   :  { %s58_s12 = sshll.u32 %s13244_s11, 4  ;;  %s21_s14 = sshll.u32 %s13245_s13, 4  ;;  %s59_s12 = int_to_ptr.vmem [resolvable:$true] %s58_s12  ;;  %s22_s14 = int_to_ptr.vmem [resolvable:$true] %s21_s14 }
  0x17   :  { %s13099_s17 = scalar_lea.hbm %s14631_s3, 128 }
  0x18   :  { %p13100_p8 = scmp.ne.s32.totalorder %s14631_s3, %s13099_s17  ;;  %p13103_p9 = scmp.lt.u32.totalorder %s13099_s17, %s14631_s3 }
  0x1a   :  { %p13105_p10 = pnand %p13103_p9, %p13100_p8 }
  0x1c   :  { %13108 = shalt.err (!%p13105_p10)
}
  0x1d   :  { %s13109_s1 = scalar_lea.vmem %s59_s12, 128  ;;  %p13114_p12 = scmp.lt.s32.totalorder %s59_s12, %s59_s12 }
  0x1e   :  { %p13110_p11 = scmp.ne.s32.totalorder %s59_s12, %s13109_s1  ;;  %p13115_p13 = scmp.lt.s32.totalorder %s13109_s1, %s13109_s1 }
  0x20   :  { %p13116_p0 = por %p13115_p13, %p13114_p12 }
  0x22   :  { %p13117_p1 = pnand %p13116_p0, %p13110_p11 }
  0x24   :  { %13120 = shalt.err (!%p13117_p1)
}
  0x25   :  { %61 = dma.hbm_to_vmem [thread:$0]  %s14631_s3, 128, %s59_s12, [#allocation11]  }
  0x26   :  { %s13121_s26 = scalar_lea.hbm %s14628_s0, 2048 }
  0x27   :  { %p13122_p2 = scmp.ne.s32.totalorder %s14628_s0, %s13121_s26  ;;  %p13125_p3 = scmp.lt.u32.totalorder %s13121_s26, %s14628_s0 }
  0x29   :  { %p13127_p4 = pnand %p13125_p3, %p13122_p2 }
  0x2b   :  { %13130 = shalt.err (!%p13127_p4)
}
  0x2c   :  { %s13131_s9 = scalar_lea.vmem %s22_s14, 2048  ;;  %p13136_p6 = scmp.lt.s32.totalorder %s22_s14, %s22_s14 }
  0x2d   :  { %p13132_p5 = scmp.ne.s32.totalorder %s22_s14, %s13131_s9  ;;  %p13137_p7 = scmp.lt.s32.totalorder %s13131_s9, %s13131_s9 }
  0x2f   :  { %p13138_p8 = por %p13137_p7, %p13136_p6 }
  0x31   :  { %p13139_p9 = pnand %p13138_p8, %p13132_p5 }
  0x33   :  { %13142 = shalt.err (!%p13139_p9)
}
  0x34   :  { %s13246_s3 = smov 128   ;;  %s13247_s10 = smov 8  }
  0x35   :  { %27 = dma.hbm_to_vmem [thread:$0]  %s14628_s0, 2048, %s22_s14, [#allocation5], %s13246_s3, %s13246_s3, %s13247_s10  }
  0x36   :  { %s13248_s13 = smov [#allocation9]   ;;  %s13249_s16 = smov [#allocation12]  }
  0x37   :  { %s45_s15 = sshll.u32 %s13248_s13, 4  ;;  %s67_s17 = sshll.u32 %s13249_s16, 4  ;;  %s46_s15 = int_to_ptr.vmem [resolvable:$true] %s45_s15  ;;  %s68_s17 = int_to_ptr.vmem [resolvable:$true] %s67_s17 }
  0x38   :  { %s13143_s20 = scalar_lea.hbm %s14630_s2, 16384 }
  0x39   :  { %p13144_p10 = scmp.ne.s32.totalorder %s14630_s2, %s13143_s20  ;;  %p13147_p11 = scmp.lt.u32.totalorder %s13143_s20, %s14630_s2 }
  0x3b   :  { %p13149_p12 = pnand %p13147_p11, %p13144_p10 }
  0x3d   :  { %13152 = shalt.err (!%p13149_p12)
}
  0x3e   :  { %s13153_s0 = scalar_lea.vmem %s46_s15, 16384  ;;  %p13158_p0 = scmp.lt.s32.totalorder %s46_s15, %s46_s15 }
  0x3f   :  { %p13154_p13 = scmp.ne.s32.totalorder %s46_s15, %s13153_s0  ;;  %p13159_p1 = scmp.lt.s32.totalorder %s13153_s0, %s13153_s0 }
  0x41   :  { %p13160_p2 = por %p13159_p1, %p13158_p0 }
  0x43   :  { %p13161_p3 = pnand %p13160_p2, %p13154_p13 }
  0x45   :  { %13164 = shalt.err (!%p13161_p3)
}
  0x46   :  { %51 = dma.hbm_to_vmem [thread:$0]  %s14630_s2, 16384, %s46_s15, [#allocation8], %s13242_s7, %s13242_s7, %s13243_s8  }
  0x47   :  { %s13165_s27 = scalar_lea.hbm %s14632_s4, 8192 }
  0x48   :  { %p13166_p4 = scmp.ne.s32.totalorder %s14632_s4, %s13165_s27  ;;  %p13169_p5 = scmp.lt.u32.totalorder %s13165_s27, %s14632_s4 }
  0x4a   :  { %p13171_p6 = pnand %p13169_p5, %p13166_p4 }
  0x4c   :  { %13174 = shalt.err (!%p13171_p6)
}
  0x4d   :  { %s13175_s3 = scalar_lea.vmem %s68_s17, 8192  ;;  %p13180_p8 = scmp.lt.s32.totalorder %s68_s17, %s68_s17 }
  0x4e   :  { %p13176_p7 = scmp.ne.s32.totalorder %s68_s17, %s13175_s3  ;;  %p13181_p9 = scmp.lt.s32.totalorder %s13175_s3, %s13175_s3 }
  0x50   :  { %p13182_p10 = por %p13181_p9, %p13180_p8 }
  0x52   :  { %p13183_p11 = pnand %p13182_p10, %p13176_p7 }
  0x54   :  { %13186 = shalt.err (!%p13183_p11)
}
  0x55   :  { %s13250_s2 = smov 256   ;;  %s13251_s10 = smov 16  }
  0x56   :  { %73 = dma.hbm_to_vmem [thread:$0]  %s14632_s4, 8192, %s68_s17, [#allocation11], %s13250_s2, %s13250_s2, %s13251_s10  }
  0x57   :  { %s13252_s13 = smov [#allocation13]   ;;  %s13187_s19 = scalar_lea.hbm %s14633_s5, 64 }
  0x58   :  { %s80_s15 = sshll.u32 %s13252_s13, 4  ;;  %p13188_p12 = scmp.ne.s32.totalorder %s14633_s5, %s13187_s19  ;;  %s81_s15 = int_to_ptr.vmem [resolvable:$true] %s80_s15 }
  0x59   :  { %p13191_p13 = scmp.lt.u32.totalorder %s13187_s19, %s14633_s5 }
  0x5b   :  { %p13193_p0 = pnand %p13191_p13, %p13188_p12 }
  0x5d   :  { %13196 = shalt.err (!%p13193_p0)
}
  0x5e   :  { %s13197_s23 = scalar_lea.vmem %s81_s15, 64  ;;  %p13202_p2 = scmp.lt.s32.totalorder %s81_s15, %s81_s15 }
  0x5f   :  { %p13198_p1 = scmp.ne.s32.totalorder %s81_s15, %s13197_s23  ;;  %p13203_p3 = scmp.lt.s32.totalorder %s13197_s23, %s13197_s23 }
  0x61   :  { %p13204_p4 = por %p13203_p3, %p13202_p2 }
  0x63   :  { %p13205_p5 = pnand %p13204_p4, %p13198_p1 }
  0x65   :  { %13208 = shalt.err (!%p13205_p5)
}
  0x66   :  { %83 = dma.hbm_to_vmem [thread:$0]  %s14633_s5, 64, %s81_s15, [#allocation14]  }
  0x67   :  { %13231 = dma.done.wait [#allocation5], 2048  }
  0x68   :  { %13232 = vsyncadd [#allocation5], 4294965248 }
  0x69   :  { %13233 = dma.done.wait [#allocation8], 32768  }
  0x6a   :  { %13234 = vsyncadd [#allocation8], 4294934528 }
  0x6b   :  { %13235 = dma.done.wait [#allocation11], 8320  }
  0x6c   :  { %13236 = vsyncadd [#allocation11], 4294958976 }
  0x6d   :  { %13237 = dma.done.wait [#allocation14], 64  }
  0x6e   :  { %13238 = vsyncadd [#allocation14], 4294967232  ;;  %v119_v0 = vld [vmem:[#allocation7] sm:$0xff]  ;;  %v120_v2 = vld [vmem:[#allocation7 + $0x8] sm:$0xff]  ;;  %s13254_s5 = smov [#allocation15]  }
  0x6f   :  { %v123_v1 = vld [vmem:[#allocation7 + $0x20] sm:$0xff]  ;;  %v124_v4 = vld [vmem:[#allocation7 + $0x28] sm:$0xff]  ;;  %s11088_s0 = sshll.u32 %s13254_s5, 4  ;;  %s11089_s0 = int_to_ptr.vmem [resolvable:$true] %s11088_s0 }
  0x70   :  { %v11120_v3 = vcombine.high %v119_v0, %v123_v1  ;;  %v11119_v5 = vcombine.low %v119_v0, %v123_v1  ;;  %v127_v6 = vld [vmem:[#allocation7 + $0x40] sm:$0xff]  ;;  %v11122_v8 = vcombine.high %v120_v2, %v124_v4  ;;  %v11121_v9 = vcombine.low %v120_v2, %v124_v4  ;;  %v128_v11 = vld [vmem:[#allocation7 + $0x48] sm:$0xff]  ;;  %s13209_s14 = scalar_lea.vmem %s11089_s0, 8192  ;;  %p13214_p7 = scmp.lt.s32.totalorder %s11089_s0, %s11089_s0 }
  0x71   :  { %v131_v7 = vld [vmem:[#allocation7 + $0x60] sm:$0xff]  ;;  %v132_v12 = vld [vmem:[#allocation7 + $0x68] sm:$0xff]  ;;  %p13210_p6 = scmp.ne.s32.totalorder %s11089_s0, %s13209_s14  ;;  %p13215_p8 = scmp.lt.s32.totalorder %s13209_s14, %s13209_s14 }
  0x72   :  { %v11128_v10 = vcombine.high %v127_v6, %v131_v7  ;;  %v135_v13 = vld [vmem:[#allocation7 + $0x80] sm:$0xff]  ;;  %967 = vmatprep.subr.bf16.mxu0 %v11120_v3  ;;  %v11130_v14 = vcombine.high %v128_v11, %v132_v12  ;;  %v136_v16 = vld [vmem:[#allocation7 + $0x88] sm:$0xff]  ;;  %1080 = vmatprep.subr.bf16.mxu1 %v11122_v8  ;;  %v11127_v18 = vcombine.low %v127_v6, %v131_v7 }
  0x73   :  { %v139_v15 = vld [vmem:[#allocation7 + $0xa0] sm:$0xff]  ;;  %v140_v17 = vld [vmem:[#allocation7 + $0xa8] sm:$0xff]  ;;  %968 = vmatpush1.bf16.msra.mxu0 %v11119_v5  ;;  %1081 = vmatpush1.bf16.msra.mxu1 %v11121_v9  ;;  %v11129_v19 = vcombine.low %v128_v11, %v132_v12  ;;  %p13216_p9 = por %p13215_p8, %p13214_p7 }
  0x74   :  { %969 = vmatprep.subr.bf16.mxu0 %v11128_v10  ;;  %v11136_v20 = vcombine.high %v135_v13, %v139_v15  ;;  %1082 = vmatprep.subr.bf16.mxu1 %v11130_v14  ;;  %v11138_v21 = vcombine.high %v136_v16, %v140_v17  ;;  %v143_v22 = vld [vmem:[#allocation7 + $0xc0] sm:$0xff]  ;;  %v144_v24 = vld [vmem:[#allocation7 + $0xc8] sm:$0xff]  ;;  %v11135_v26 = vcombine.low %v135_v13, %v139_v15 }
  0x75   :  { %v147_v23 = vld [vmem:[#allocation7 + $0xe0] sm:$0xff]  ;;  %v148_v25 = vld [vmem:[#allocation7 + $0xe8] sm:$0xff]  ;;  %v11137_v27 = vcombine.low %v136_v16, %v140_v17  ;;  %p13217_p10 = pnand %p13216_p9, %p13210_p6 }
  0x76   :  { %v11144_v28 = vcombine.high %v143_v22, %v147_v23  ;;  %v11146_v29 = vcombine.high %v144_v24, %v148_v25  ;;  %v151_v30 = vld [vmem:[#allocation7 + $0x100] sm:$0xff]  ;;  %v152_v32 = vld [vmem:[#allocation7 + $0x108] sm:$0xff]  ;;  %v11143_v34 = vcombine.low %v143_v22, %v147_v23  ;;  %v11145_v35 = vcombine.low %v144_v24, %v148_v25 }
  0x77   :  { %970 = vmatpush1.bf16.msra.mxu0 %v11127_v18  ;;  %1083 = vmatpush1.bf16.msra.mxu1 %v11129_v19  ;;  %v155_v31 = vld [vmem:[#allocation7 + $0x120] sm:$0xff]  ;;  %v156_v33 = vld [vmem:[#allocation7 + $0x128] sm:$0xff] }
  0x78   :  { %971 = vmatprep.subr.bf16.mxu0 %v11136_v20  ;;  %1084 = vmatprep.subr.bf16.mxu1 %v11138_v21  ;;  %v11152_v36 = vcombine.high %v151_v30, %v155_v31  ;;  %v11154_v37 = vcombine.high %v152_v32, %v156_v33  ;;  %v159_v38 = vld [vmem:[#allocation7 + $0x140] sm:$0xff]  ;;  %v160_v40 = vld [vmem:[#allocation7 + $0x148] sm:$0xff]  ;;  %v11151_v42 = vcombine.low %v151_v30, %v155_v31 }
  0x79   :  { %v163_v39 = vld [vmem:[#allocation7 + $0x160] sm:$0xff]  ;;  %v164_v41 = vld [vmem:[#allocation7 + $0x168] sm:$0xff]  ;;  %v11153_v43 = vcombine.low %v152_v32, %v156_v33 }
  0x7a   :  { %v11160_v44 = vcombine.high %v159_v38, %v163_v39  ;;  %v11162_v45 = vcombine.high %v160_v40, %v164_v41  ;;  %v167_v46 = vld [vmem:[#allocation7 + $0x180] sm:$0xff]  ;;  %v168_v48 = vld [vmem:[#allocation7 + $0x188] sm:$0xff]  ;;  %v11159_v50 = vcombine.low %v159_v38, %v163_v39  ;;  %v11161_v51 = vcombine.low %v160_v40, %v164_v41 }
  0x7b   :  { %972 = vmatpush1.bf16.msra.mxu0 %v11135_v26  ;;  %1085 = vmatpush1.bf16.msra.mxu1 %v11137_v27  ;;  %v171_v47 = vld [vmem:[#allocation7 + $0x1a0] sm:$0xff]  ;;  %v172_v49 = vld [vmem:[#allocation7 + $0x1a8] sm:$0xff] }
  0x7c   :  { %973 = vmatprep.subr.bf16.mxu0 %v11144_v28  ;;  %1086 = vmatprep.subr.bf16.mxu1 %v11146_v29  ;;  %v11168_v52 = vcombine.high %v167_v46, %v171_v47  ;;  %v11170_v53 = vcombine.high %v168_v48, %v172_v49  ;;  %v175_v54 = vld [vmem:[#allocation7 + $0x1c0] sm:$0xff]  ;;  %v176_v57 = vld [vmem:[#allocation7 + $0x1c8] sm:$0xff]  ;;  %v11167_v59 = vcombine.low %v167_v46, %v171_v47 }
  0x7d   :  { %v179_v55 = vld [vmem:[#allocation7 + $0x1e0] sm:$0xff]  ;;  %v180_v58 = vld [vmem:[#allocation7 + $0x1e8] sm:$0xff]  ;;  %v11169_v60 = vcombine.low %v168_v48, %v172_v49 }
  0x7e   :  { %v13368_v56 = vld [vmem:[#allocation4 + $0x4] ss:$8 sps:$4 sm:$0xff]   ;;  %v11176_v61 = vcombine.high %v175_v54, %v179_v55  ;;  %v11178_v62 = vcombine.high %v176_v57, %v180_v58  ;;  %v11175_v3 = vcombine.low %v175_v54, %v179_v55  ;;  %v11177_v4 = vcombine.low %v176_v57, %v180_v58 }
  0x7f   :  { %974 = vmatpush1.bf16.msra.mxu0 %v11143_v34  ;;  %1087 = vmatpush1.bf16.msra.mxu1 %v11145_v35  ;;  %v183_v63 = vld [vmem:[#allocation7 + $0x200] sm:$0xff]  ;;  %v184_v1 = vld [vmem:[#allocation7 + $0x208] sm:$0xff] }
  0x80   :  { %975 = vmatprep.subr.bf16.mxu0 %v11152_v36  ;;  %1088 = vmatprep.subr.bf16.mxu1 %v11154_v37  ;;  %v187_v0 = vld [vmem:[#allocation7 + $0x220] sm:$0xff]  ;;  %v188_v2 = vld [vmem:[#allocation7 + $0x228] sm:$0xff] }
  0x81   :  { %999 = vmatprep.mubr.bf16.mxu0 %v13368_v56  ;;  %1112 = vmatprep.mubr.bf16.mxu1 %v13368_v56  ;;  %v11184_v5 = vcombine.high %v183_v63, %v187_v0  ;;  %v11186_v6 = vcombine.high %v184_v1, %v188_v2  ;;  %v191_v7 = vld [vmem:[#allocation7 + $0x240] sm:$0xff]  ;;  %v192_v9 = vld [vmem:[#allocation7 + $0x248] sm:$0xff]  ;;  %v11183_v11 = vcombine.low %v183_v63, %v187_v0  ;;  %v121_v0 = vld [vmem:[#allocation7 + $0x10] sm:$0xff] }
  0x82   :  { %v195_v8 = vld [vmem:[#allocation7 + $0x260] sm:$0xff]  ;;  %v196_v10 = vld [vmem:[#allocation7 + $0x268] sm:$0xff]  ;;  %v11185_v12 = vcombine.low %v184_v1, %v188_v2  ;;  %v125_v1 = vld [vmem:[#allocation7 + $0x30] sm:$0xff] }
  0x83   :  { %976 = vmatpush1.bf16.msra.mxu0 %v11151_v42  ;;  %1089 = vmatpush1.bf16.msra.mxu1 %v11153_v43  ;;  %v11192_v13 = vcombine.high %v191_v7, %v195_v8  ;;  %v11194_v14 = vcombine.high %v192_v9, %v196_v10  ;;  %v199_v15 = vld [vmem:[#allocation7 + $0x280] sm:$0xff]  ;;  %v200_v17 = vld [vmem:[#allocation7 + $0x288] sm:$0xff]  ;;  %v11191_v19 = vcombine.low %v191_v7, %v195_v8  ;;  %v122_v2 = vld [vmem:[#allocation7 + $0x18] sm:$0xff] }
  0x84   :  { %977 = vmatprep.subr.bf16.mxu0 %v11160_v44  ;;  %1090 = vmatprep.subr.bf16.mxu1 %v11162_v45  ;;  %v203_v16 = vld [vmem:[#allocation7 + $0x2a0] sm:$0xff]  ;;  %v204_v18 = vld [vmem:[#allocation7 + $0x2a8] sm:$0xff]  ;;  %v11193_v20 = vcombine.low %v192_v9, %v196_v10  ;;  %v129_v8 = vld [vmem:[#allocation7 + $0x50] sm:$0xff] }
  0x85   :  { %v11200_v21 = vcombine.high %v199_v15, %v203_v16  ;;  %v11202_v22 = vcombine.high %v200_v17, %v204_v18  ;;  %v207_v23 = vld [vmem:[#allocation7 + $0x2c0] sm:$0xff]  ;;  %v208_v25 = vld [vmem:[#allocation7 + $0x2c8] sm:$0xff]  ;;  %v11199_v27 = vcombine.low %v199_v15, %v203_v16  ;;  %v11201_v28 = vcombine.low %v200_v17, %v204_v18  ;;  %v133_v9 = vld [vmem:[#allocation7 + $0x70] sm:$0xff] }
  0x86   :  { %v211_v24 = vld [vmem:[#allocation7 + $0x2e0] sm:$0xff]  ;;  %v212_v26 = vld [vmem:[#allocation7 + $0x2e8] sm:$0xff]  ;;  %v11132_v15 = vcombine.high %v129_v8, %v133_v9  ;;  %v13374_v17 = vld [vmem:[#allocation4 + $0x14] ss:$8 sps:$4 sm:$0xff]  }
  0x87   :  { %978 = vmatpush1.bf16.msra.mxu0 %v11159_v50  ;;  %1091 = vmatpush1.bf16.msra.mxu1 %v11161_v51  ;;  %v11208_v29 = vcombine.high %v207_v23, %v211_v24  ;;  %v11210_v30 = vcombine.high %v208_v25, %v212_v26  ;;  %v215_v31 = vld [vmem:[#allocation7 + $0x300] sm:$0xff]  ;;  %v216_v33 = vld [vmem:[#allocation7 + $0x308] sm:$0xff]  ;;  %v11207_v35 = vcombine.low %v207_v23, %v211_v24  ;;  %v137_v18 = vld [vmem:[#allocation7 + $0x90] sm:$0xff] }
  0x88   :  { %979 = vmatprep.subr.bf16.mxu0 %v11168_v52  ;;  %1092 = vmatprep.subr.bf16.mxu1 %v11170_v53  ;;  %v219_v32 = vld [vmem:[#allocation7 + $0x320] sm:$0xff]  ;;  %v220_v34 = vld [vmem:[#allocation7 + $0x328] sm:$0xff]  ;;  %v11209_v36 = vcombine.low %v208_v25, %v212_v26  ;;  %v145_v26 = vld [vmem:[#allocation7 + $0xd0] sm:$0xff] }
  0x89   :  { %v11216_v37 = vcombine.high %v215_v31, %v219_v32  ;;  %v11218_v38 = vcombine.high %v216_v33, %v220_v34  ;;  %v223_v39 = vld [vmem:[#allocation7 + $0x340] sm:$0xff]  ;;  %v224_v41 = vld [vmem:[#allocation7 + $0x348] sm:$0xff]  ;;  %v11215_v43 = vcombine.low %v215_v31, %v219_v32  ;;  %v11217_v44 = vcombine.low %v216_v33, %v220_v34 }
  0x8a   :  { %v227_v40 = vld [vmem:[#allocation7 + $0x360] sm:$0xff]  ;;  %v228_v42 = vld [vmem:[#allocation7 + $0x368] sm:$0xff] }
  0x8b   :  { %980 = vmatpush1.bf16.msra.mxu0 %v11167_v59  ;;  %1093 = vmatpush1.bf16.msra.mxu1 %v11169_v60  ;;  %v11224_v45 = vcombine.high %v223_v39, %v227_v40  ;;  %v11226_v46 = vcombine.high %v224_v41, %v228_v42  ;;  %v231_v47 = vld [vmem:[#allocation7 + $0x380] sm:$0xff]  ;;  %v232_v49 = vld [vmem:[#allocation7 + $0x388] sm:$0xff]  ;;  %v11223_v51 = vcombine.low %v223_v39, %v227_v40  ;;  %v158_v39 = vld [vmem:[#allocation7 + $0x138] sm:$0xff] }
  0x8c   :  { %981 = vmatprep.subr.bf16.mxu0 %v11176_v61  ;;  %1094 = vmatprep.subr.bf16.mxu1 %v11178_v62  ;;  %v235_v48 = vld [vmem:[#allocation7 + $0x3a0] sm:$0xff]  ;;  %v236_v50 = vld [vmem:[#allocation7 + $0x3a8] sm:$0xff]  ;;  %v11225_v52 = vcombine.low %v224_v41, %v228_v42 }
  0x8d   :  { %v11232_v53 = vcombine.high %v231_v47, %v235_v48  ;;  %v11234_v54 = vcombine.high %v232_v49, %v236_v50  ;;  %v239_v55 = vld [vmem:[#allocation7 + $0x3c0] sm:$0xff]  ;;  %v240_v58 = vld [vmem:[#allocation7 + $0x3c8] sm:$0xff]  ;;  %v11231_v60 = vcombine.low %v231_v47, %v235_v48  ;;  %v11233_v61 = vcombine.low %v232_v49, %v236_v50  ;;  %v162_v47 = vld [vmem:[#allocation7 + $0x158] sm:$0xff] }
  0x8e   :  { %v243_v57 = vld [vmem:[#allocation7 + $0x3e0] sm:$0xff]  ;;  %v244_v59 = vld [vmem:[#allocation7 + $0x3e8] sm:$0xff]  ;;  %v166_v48 = vld [vmem:[#allocation7 + $0x178] sm:$0xff] }
  0x8f   :  { %982 = vmatpush1.bf16.msra.mxu0 %v11175_v3  ;;  %1095 = vmatpush1.bf16.msra.mxu1 %v11177_v4  ;;  %v11240_v62 = vcombine.high %v239_v55, %v243_v57  ;;  %v11242_v63 = vcombine.high %v240_v58, %v244_v59  ;;  %v126_v3 = vld [vmem:[#allocation7 + $0x38] sm:$0xff]  ;;  %v11239_v4 = vcombine.low %v239_v55, %v243_v57  ;;  %v13372_v10 = vld [vmem:[#allocation4] ss:$8 sps:$4 sm:$0xff]  }
  0x90   :  { %983 = vmatprep.subr.bf16.mxu0 %v11184_v5  ;;  %1096 = vmatprep.subr.bf16.mxu1 %v11186_v6  ;;  %v11241_v5 = vcombine.low %v240_v58, %v244_v59  ;;  %v11124_v6 = vcombine.high %v121_v0, %v125_v1  ;;  %v11126_v7 = vcombine.high %v122_v2, %v126_v3  ;;  %v13390_v50 = vld [vmem:[#allocation4 + $0x34] ss:$8 sps:$4 sm:$0xff]  }
  0x91   :  { %v170_v55 = vld [vmem:[#allocation7 + $0x198] sm:$0xff]  ;;  %v11166_v57 = vcombine.high %v162_v47, %v166_v48 }
  0x92   :  { %v174_v58 = vld [vmem:[#allocation7 + $0x1b8] sm:$0xff] }
  0x93   :  { %984 = vmatpush1.bf16.msra.mxu0 %v11183_v11  ;;  %1097 = vmatpush1.bf16.msra.mxu1 %v11185_v12  ;;  %v130_v11 = vld [vmem:[#allocation7 + $0x58] sm:$0xff] }
  0x94   :  { %985 = vmatprep.subr.bf16.mxu0 %v11192_v13  ;;  %1098 = vmatprep.subr.bf16.mxu1 %v11194_v14  ;;  %v134_v12 = vld [vmem:[#allocation7 + $0x78] sm:$0xff]  ;;  %v11123_v13 = vcombine.low %v121_v0, %v125_v1  ;;  %v11125_v14 = vcombine.low %v122_v2, %v126_v3  ;;  %v181_v0 = vld [vmem:[#allocation7 + $0x1f0] sm:$0xff]  ;;  %v11174_v2 = vcombine.high %v170_v55, %v174_v58 }
  0x95   :  { %v11134_v16 = vcombine.high %v130_v11, %v134_v12  ;;  %v11133_v23 = vcombine.low %v130_v11, %v134_v12  ;;  %v178_v1 = vld [vmem:[#allocation7 + $0x1d8] sm:$0xff] }
  0x96   :  { %v182_v3 = vld [vmem:[#allocation7 + $0x1f8] sm:$0xff] }
  0x97   :  { %986 = vmatpush1.bf16.msra.mxu0 %v11191_v19  ;;  %1099 = vmatpush1.bf16.msra.mxu1 %v11193_v20  ;;  %v141_v19 = vld [vmem:[#allocation7 + $0xb0] sm:$0xff]  ;;  %v138_v20 = vld [vmem:[#allocation7 + $0x98] sm:$0xff]  ;;  %v11182_v12 = vcombine.high %v178_v1, %v182_v3 }
  0x98   :  { %987 = vmatprep.subr.bf16.mxu0 %v11200_v21  ;;  %1100 = vmatprep.subr.bf16.mxu1 %v11202_v22  ;;  %v142_v21 = vld [vmem:[#allocation7 + $0xb8] sm:$0xff]  ;;  %v11131_v22 = vcombine.low %v129_v8, %v133_v9  ;;  %v11140_v24 = vcombine.high %v137_v18, %v141_v19  ;;  %v11139_v31 = vcombine.low %v137_v18, %v141_v19  ;;  %v185_v8 = vld [vmem:[#allocation7 + $0x210] sm:$0xff] }
  0x99   :  { %v11142_v25 = vcombine.high %v138_v20, %v142_v21  ;;  %v11141_v32 = vcombine.low %v138_v20, %v142_v21  ;;  %v189_v9 = vld [vmem:[#allocation7 + $0x230] sm:$0xff]  ;;  %v186_v11 = vld [vmem:[#allocation7 + $0x218] sm:$0xff] }
  0x9a   :  { %v11188_v18 = vcombine.high %v185_v8, %v189_v9  ;;  %v193_v19 = vld [vmem:[#allocation7 + $0x250] sm:$0xff]  ;;  %v194_v21 = vld [vmem:[#allocation7 + $0x258] sm:$0xff] }
  0x9b   :  { %988 = vmatpush1.bf16.msra.mxu0 %v11199_v27  ;;  %1101 = vmatpush1.bf16.msra.mxu1 %v11201_v28  ;;  %v149_v27 = vld [vmem:[#allocation7 + $0xf0] sm:$0xff] }
  0x9c   :  { %989 = vmatprep.subr.bf16.mxu0 %v11208_v29  ;;  %1102 = vmatprep.subr.bf16.mxu1 %v11210_v30  ;;  %v13380_v28 = vld [vmem:[#allocation4 + $0x10] ss:$8 sps:$4 sm:$0xff]   ;;  %v11148_v33 = vcombine.high %v145_v26, %v149_v27  ;;  %v11147_v40 = vcombine.low %v145_v26, %v149_v27 }
  0x9d   :  { %v146_v29 = vld [vmem:[#allocation7 + $0xd8] sm:$0xff]  ;;  %v197_v20 = vld [vmem:[#allocation7 + $0x270] sm:$0xff] }
  0x9e   :  { %v150_v30 = vld [vmem:[#allocation7 + $0xf8] sm:$0xff]  ;;  %v11196_v27 = vcombine.high %v193_v19, %v197_v20 }
  0x9f   :  { %990 = vmatpush1.bf16.msra.mxu0 %v11207_v35  ;;  %1103 = vmatpush1.bf16.msra.mxu1 %v11209_v36  ;;  %v11150_v34 = vcombine.high %v146_v29, %v150_v30  ;;  %v13382_v35 = vld [vmem:[#allocation4 + $0x24] ss:$8 sps:$4 sm:$0xff]   ;;  %v153_v36 = vld [vmem:[#allocation7 + $0x110] sm:$0xff]  ;;  %v11149_v41 = vcombine.low %v146_v29, %v150_v30 }
  0xa0   :  { %991 = vmatprep.subr.bf16.mxu0 %v11216_v37  ;;  %1104 = vmatprep.subr.bf16.mxu1 %v11218_v38  ;;  %v157_v37 = vld [vmem:[#allocation7 + $0x130] sm:$0xff]  ;;  %v154_v38 = vld [vmem:[#allocation7 + $0x118] sm:$0xff] }
  0xa1   :  { %v11156_v42 = vcombine.high %v153_v36, %v157_v37  ;;  %v11155_v49 = vcombine.low %v153_v36, %v157_v37  ;;  %v201_v29 = vld [vmem:[#allocation7 + $0x290] sm:$0xff] }
  0xa2   :  { %v205_v30 = vld [vmem:[#allocation7 + $0x2b0] sm:$0xff] }
  0xa3   :  { %992 = vmatpush1.bf16.msra.mxu0 %v11215_v43  ;;  %1105 = vmatpush1.bf16.msra.mxu1 %v11217_v44  ;;  %v11158_v43 = vcombine.high %v154_v38, %v158_v39  ;;  %v161_v44 = vld [vmem:[#allocation7 + $0x150] sm:$0xff] }
  0xa4   :  { %993 = vmatprep.subr.bf16.mxu0 %v11224_v45  ;;  %1106 = vmatprep.subr.bf16.mxu1 %v11226_v46  ;;  %v165_v45 = vld [vmem:[#allocation7 + $0x170] sm:$0xff]  ;;  %v13388_v46 = vld [vmem:[#allocation4 + $0x20] ss:$8 sps:$4 sm:$0xff]  }
  0xa5   :  { %v11163_v59 = vcombine.low %v161_v44, %v165_v45  ;;  %v13410_v37 = vld [vmem:[#allocation4 + $0x50] ss:$8 sps:$4 sm:$0xff]  }
  0xa7   :  { %994 = vmatpush1.bf16.msra.mxu0 %v11223_v51  ;;  %1107 = vmatpush1.bf16.msra.mxu1 %v11225_v52  ;;  %v11157_v51 = vcombine.low %v154_v38, %v158_v39  ;;  %v11164_v52 = vcombine.high %v161_v44, %v165_v45  ;;  %v11204_v38 = vcombine.high %v201_v29, %v205_v30  ;;  %v209_v39 = vld [vmem:[#allocation7 + $0x2d0] sm:$0xff]  ;;  %v13414_v45 = vld [vmem:[#allocation4 + $0x64] ss:$8 sps:$4 sm:$0xff]  }
  0xa8   :  { %995 = vmatprep.subr.bf16.mxu0 %v11232_v53  ;;  %1108 = vmatprep.subr.bf16.mxu1 %v11234_v54  ;;  %v169_v53 = vld [vmem:[#allocation7 + $0x190] sm:$0xff]  ;;  %v11203_v44 = vcombine.low %v201_v29, %v205_v30  ;;  %v1629_v30 = vld [vmem:[#allocation9] sm:$0xff] }
  0xa9   :  { %v173_v54 = vld [vmem:[#allocation7 + $0x1b0] sm:$0xff] }
  0xab   :  { %996 = vmatpush1.bf16.msra.mxu0 %v11231_v60  ;;  %1109 = vmatpush1.bf16.msra.mxu1 %v11233_v61  ;;  %v11165_v60 = vcombine.low %v162_v47, %v166_v48  ;;  %v13394_v61 = vld [vmem:[#allocation4 + $0x30] ss:$8 sps:$4 sm:$0xff]  }
  0xac   :  { %997 = vmatprep.subr.bf16.mxu0 %v11240_v62  ;;  %1110 = vmatprep.subr.bf16.mxu1 %v11242_v63  ;;  %v11172_v62 = vcombine.high %v169_v53, %v173_v54  ;;  %v177_v63 = vld [vmem:[#allocation7 + $0x1d0] sm:$0xff] }
  0xaf   :  { %998 = vmatpush1.bf16.msra.mxu0 %v11239_v4  ;;  %1111 = vmatpush1.bf16.msra.mxu1 %v11241_v5  ;;  %v11171_v4 = vcombine.low %v169_v53, %v173_v54  ;;  %v13398_v5 = vld [vmem:[#allocation4 + $0x44] ss:$8 sps:$4 sm:$0xff]   ;;  %v222_v54 = vld [vmem:[#allocation7 + $0x338] sm:$0xff] }
  0xb0   :  { %1193 = vmatprep.subr.bf16.mxu0 %v11124_v6  ;;  %1306 = vmatprep.subr.bf16.mxu1 %v11126_v7  ;;  %v11173_v6 = vcombine.low %v170_v55, %v174_v58  ;;  %v11180_v7 = vcombine.high %v177_v63, %v181_v0  ;;  %v13418_v58 = vld [vmem:[#allocation4 + $0x60] ss:$8 sps:$4 sm:$0xff]  }
  0xb2   :  { %1000 = vmatmul.mubr.bf16.vlgmr.msra.gmra.mrb[0].mxu0 %v13372_v10  ;;  %1113 = vmatmul.mubr.bf16.vlgmr.msra.gmra.mrb[0].mxu1 %v13372_v10 }
  0xb3   :  { %1194 = vmatpush1.bf16.msra.mxu0 %v11123_v13  ;;  %1307 = vmatpush1.bf16.msra.mxu1 %v11125_v14  ;;  %v190_v13 = vld [vmem:[#allocation7 + $0x238] sm:$0xff]  ;;  %v11179_v14 = vcombine.low %v177_v63, %v181_v0 }
  0xb4   :  { %1195 = vmatprep.subr.bf16.mxu0 %v11132_v15  ;;  %1308 = vmatprep.subr.bf16.mxu1 %v11134_v16  ;;  %v11181_v15 = vcombine.low %v178_v1, %v182_v3  ;;  %v13402_v16 = vld [vmem:[#allocation4 + $0x40] ss:$8 sps:$4 sm:$0xff]   ;;  %v11189_v26 = vcombine.low %v186_v11, %v190_v13  ;;  %v226_v63 = vld [vmem:[#allocation7 + $0x358] sm:$0xff] }
  0xb5   :  { %1009 = vmatprep.mubr.bf16.mxu0 %v13374_v17  ;;  %1122 = vmatprep.mubr.bf16.mxu1 %v13374_v17  ;;  %v230_v1 = vld [vmem:[#allocation7 + $0x378] sm:$0xff] }
  0xb7   :  { %1196 = vmatpush1.bf16.msra.mxu0 %v11131_v22  ;;  %1309 = vmatpush1.bf16.msra.mxu1 %v11133_v23  ;;  %v11190_v22 = vcombine.high %v186_v11, %v190_v13  ;;  %v198_v23 = vld [vmem:[#allocation7 + $0x278] sm:$0xff] }
  0xb8   :  { %1197 = vmatprep.subr.bf16.mxu0 %v11140_v24  ;;  %1310 = vmatprep.subr.bf16.mxu1 %v11142_v25  ;;  %v11187_v24 = vcombine.low %v185_v8, %v189_v9  ;;  %v13406_v25 = vld [vmem:[#allocation4 + $0x54] ss:$8 sps:$4 sm:$0xff]   ;;  %v11197_v36 = vcombine.low %v194_v21, %v198_v23 }
  0xb9   :  { %v233_v8 = vld [vmem:[#allocation7 + $0x390] sm:$0xff]  ;;  %v234_v11 = vld [vmem:[#allocation7 + $0x398] sm:$0xff] }
  0xba   :  { %1010 = vmatmul.mubr.bf16.gmra.mrb[4].mxu0 %v13380_v28  ;;  %1123 = vmatmul.mubr.bf16.gmra.mrb[4].mxu1 %v13380_v28  ;;  %v237_v9 = vld [vmem:[#allocation7 + $0x3b0] sm:$0xff] }
  0xbb   :  { %1198 = vmatpush1.bf16.msra.mxu0 %v11139_v31  ;;  %1311 = vmatpush1.bf16.msra.mxu1 %v11141_v32  ;;  %v202_v31 = vld [vmem:[#allocation7 + $0x298] sm:$0xff]  ;;  %v11198_v32 = vcombine.high %v194_v21, %v198_v23 }
  0xbc   :  { %1199 = vmatprep.subr.bf16.mxu0 %v11148_v33  ;;  %1312 = vmatprep.subr.bf16.mxu1 %v11150_v34  ;;  %v206_v33 = vld [vmem:[#allocation7 + $0x2b8] sm:$0xff]  ;;  %v11195_v34 = vcombine.low %v193_v19, %v197_v20  ;;  %v241_v19 = vld [vmem:[#allocation7 + $0x3d0] sm:$0xff] }
  0xbd   :  { %1019 = vmatprep.mubr.bf16.mxu0 %v13382_v35  ;;  %1132 = vmatprep.mubr.bf16.mxu1 %v13382_v35  ;;  %v11205_v47 = vcombine.low %v202_v31, %v206_v33  ;;  %v245_v20 = vld [vmem:[#allocation7 + $0x3f0] sm:$0xff]  ;;  %v246_v23 = vld [vmem:[#allocation7 + $0x3f8] sm:$0xff] }
  0xbe   :  { %v13428_v21 = vld [vmem:[#allocation4 + $0x70] ss:$8 sps:$4 sm:$0xff]  }
  0xbf   :  { %1200 = vmatpush1.bf16.msra.mxu0 %v11147_v40  ;;  %1313 = vmatpush1.bf16.msra.mxu1 %v11149_v41  ;;  %v213_v40 = vld [vmem:[#allocation7 + $0x2f0] sm:$0xff]  ;;  %v210_v41 = vld [vmem:[#allocation7 + $0x2d8] sm:$0xff] }
  0xc0   :  { %1201 = vmatprep.subr.bf16.mxu0 %v11156_v42  ;;  %1314 = vmatprep.subr.bf16.mxu1 %v11158_v43  ;;  %v11206_v42 = vcombine.high %v202_v31, %v206_v33  ;;  %v214_v43 = vld [vmem:[#allocation7 + $0x2f8] sm:$0xff]  ;;  %v11212_v48 = vcombine.high %v209_v39, %v213_v40  ;;  %v11211_v55 = vcombine.low %v209_v39, %v213_v40  ;;  %v1633_v31 = vld [vmem:[#allocation9 + $0x20] sm:$0xff]  ;;  %v1634_v33 = vld [vmem:[#allocation9 + $0x28] sm:$0xff] }
  0xc1   :  { %v11214_v53 = vcombine.high %v210_v41, %v214_v43  ;;  %v1637_v40 = vld [vmem:[#allocation9 + $0x40] sm:$0xff] }
  0xc2   :  { %1020 = vmatmul.mubr.bf16.gmra.mrb[8].mxu0 %v13388_v46  ;;  %1133 = vmatmul.mubr.bf16.gmra.mrb[8].mxu1 %v13388_v46 }
  0xc3   :  { %1202 = vmatpush1.bf16.msra.mxu0 %v11155_v49  ;;  %1315 = vmatpush1.bf16.msra.mxu1 %v11157_v51  ;;  %v217_v49 = vld [vmem:[#allocation7 + $0x310] sm:$0xff] }
  0xc4   :  { %1203 = vmatprep.subr.bf16.mxu0 %v11164_v52  ;;  %1316 = vmatprep.subr.bf16.mxu1 %v11166_v57  ;;  %v221_v51 = vld [vmem:[#allocation7 + $0x330] sm:$0xff]  ;;  %v218_v52 = vld [vmem:[#allocation7 + $0x318] sm:$0xff]  ;;  %v11213_v57 = vcombine.low %v210_v41, %v214_v43  ;;  %v1641_v41 = vld [vmem:[#allocation9 + $0x60] sm:$0xff] }
  0xc5   :  { %1029 = vmatprep.mubr.bf16.mxu0 %v13390_v50  ;;  %1142 = vmatprep.mubr.bf16.mxu1 %v13390_v50  ;;  %v11222_v0 = vcombine.high %v218_v52, %v222_v54  ;;  %v11221_v3 = vcombine.low %v218_v52, %v222_v54  ;;  %v1642_v43 = vld [vmem:[#allocation9 + $0x68] sm:$0xff]  ;;  %v1649_v52 = vld [vmem:[#allocation9 + $0xa0] sm:$0xff] }
  0xc6   :  { %v1650_v54 = vld [vmem:[#allocation9 + $0xa8] sm:$0xff] }
  0xc7   :  { %1204 = vmatpush1.bf16.msra.mxu0 %v11163_v59  ;;  %1317 = vmatpush1.bf16.msra.mxu1 %v11165_v60  ;;  %v11220_v59 = vcombine.high %v217_v49, %v221_v51  ;;  %v225_v60 = vld [vmem:[#allocation7 + $0x350] sm:$0xff] }
  0xc8   :  { %1205 = vmatprep.subr.bf16.mxu0 %v11172_v62  ;;  %1318 = vmatprep.subr.bf16.mxu1 %v11174_v2  ;;  %v229_v62 = vld [vmem:[#allocation7 + $0x370] sm:$0xff]  ;;  %v11219_v2 = vcombine.low %v217_v49, %v221_v51  ;;  %v1645_v51 = vld [vmem:[#allocation9 + $0x80] sm:$0xff] }
  0xc9   :  { %v11227_v13 = vcombine.low %v225_v60, %v229_v62 }
  0xca   :  { %1030 = vmatmul.mubr.bf16.gmra.mrb[12].mxu0 %v13394_v61  ;;  %1143 = vmatmul.mubr.bf16.gmra.mrb[12].mxu1 %v13394_v61 }
  0xcb   :  { %1206 = vmatpush1.bf16.msra.mxu0 %v11171_v4  ;;  %1319 = vmatpush1.bf16.msra.mxu1 %v11173_v6  ;;  %v11228_v4 = vcombine.high %v225_v60, %v229_v62  ;;  %v11230_v6 = vcombine.high %v226_v63, %v230_v1  ;;  %v1653_v60 = vld [vmem:[#allocation9 + $0xc0] sm:$0xff] }
  0xcc   :  { %1207 = vmatprep.subr.bf16.mxu0 %v11180_v7  ;;  %1320 = vmatprep.subr.bf16.mxu1 %v11182_v12  ;;  %v13422_v7 = vld [vmem:[#allocation4 + $0x74] ss:$8 sps:$4 sm:$0xff]   ;;  %v1657_v62 = vld [vmem:[#allocation9 + $0xe0] sm:$0xff] }
  0xcd   :  { %1039 = vmatprep.mubr.bf16.mxu0 %v13398_v5  ;;  %1152 = vmatprep.mubr.bf16.mxu1 %v13398_v5  ;;  %v238_v12 = vld [vmem:[#allocation7 + $0x3b8] sm:$0xff] }
  0xcf   :  { %1208 = vmatpush1.bf16.msra.mxu0 %v11179_v14  ;;  %1321 = vmatpush1.bf16.msra.mxu1 %v11181_v15  ;;  %v11229_v14 = vcombine.low %v226_v63, %v230_v1  ;;  %v11236_v15 = vcombine.high %v233_v8, %v237_v9  ;;  %v1654_v63 = vld [vmem:[#allocation9 + $0xc8] sm:$0xff]  ;;  %v11263_v1 = vcombine.low %v1645_v51, %v1649_v52 }
  0xd0   :  { %1209 = vmatprep.subr.bf16.mxu0 %v11188_v18  ;;  %1322 = vmatprep.subr.bf16.mxu1 %v11190_v22  ;;  %v11238_v18 = vcombine.high %v234_v11, %v238_v12  ;;  %v242_v22 = vld [vmem:[#allocation7 + $0x3d8] sm:$0xff] }
  0xd1   :  { %v11246_v29 = vcombine.high %v242_v22, %v246_v23 }
  0xd2   :  { %1040 = vmatmul.mubr.bf16.gmra.mrb[16].mxu0 %v13402_v16  ;;  %1153 = vmatmul.mubr.bf16.gmra.mrb[16].mxu1 %v13402_v16 }
  0xd3   :  { %1210 = vmatpush1.bf16.msra.mxu0 %v11187_v24  ;;  %1323 = vmatpush1.bf16.msra.mxu1 %v11189_v26  ;;  %v11235_v24 = vcombine.low %v233_v8, %v237_v9  ;;  %v11237_v26 = vcombine.low %v234_v11, %v238_v12  ;;  %v1662_v8 = vld [vmem:[#allocation9 + $0x108] sm:$0xff] }
  0xd4   :  { %1211 = vmatprep.subr.bf16.mxu0 %v11196_v27  ;;  %1324 = vmatprep.subr.bf16.mxu1 %v11198_v32  ;;  %v11244_v27 = vcombine.high %v241_v19, %v245_v20  ;;  %v1630_v32 = vld [vmem:[#allocation9 + $0x8] sm:$0xff] }
  0xd5   :  { %1049 = vmatprep.mubr.bf16.mxu0 %v13406_v25  ;;  %1162 = vmatprep.mubr.bf16.mxu1 %v13406_v25  ;;  %v11250_v39 = vcombine.high %v1630_v32, %v1634_v33  ;;  %v1666_v9 = vld [vmem:[#allocation9 + $0x128] sm:$0xff] }
  0xd7   :  { %1212 = vmatpush1.bf16.msra.mxu0 %v11195_v34  ;;  %1325 = vmatpush1.bf16.msra.mxu1 %v11197_v36  ;;  %v11243_v34 = vcombine.low %v241_v19, %v245_v20  ;;  %v11245_v36 = vcombine.low %v242_v22, %v246_v23  ;;  %v1674_v19 = vld [vmem:[#allocation9 + $0x168] sm:$0xff] }
  0xd8   :  { %1213 = vmatprep.subr.bf16.mxu0 %v11204_v38  ;;  %1326 = vmatprep.subr.bf16.mxu1 %v11206_v42  ;;  %v11248_v38 = vcombine.high %v1629_v30, %v1633_v31  ;;  %v1638_v42 = vld [vmem:[#allocation9 + $0x48] sm:$0xff] }
  0xd9   :  { %v11258_v49 = vcombine.high %v1638_v42, %v1642_v43 }
  0xda   :  { %1050 = vmatmul.mubr.bf16.gmra.mrb[20].mxu0 %v13410_v37  ;;  %1163 = vmatmul.mubr.bf16.gmra.mrb[20].mxu1 %v13410_v37 }
  0xdb   :  { %1214 = vmatpush1.bf16.msra.mxu0 %v11203_v44  ;;  %1327 = vmatpush1.bf16.msra.mxu1 %v11205_v47  ;;  %v11247_v44 = vcombine.low %v1629_v30, %v1633_v31  ;;  %v11249_v47 = vcombine.low %v1630_v32, %v1634_v33  ;;  %v1685_v33 = vld [vmem:[#allocation9 + $0x1c0] sm:$0xff] }
  0xdc   :  { %1215 = vmatprep.subr.bf16.mxu0 %v11212_v48  ;;  %1328 = vmatprep.subr.bf16.mxu1 %v11214_v53  ;;  %v11256_v48 = vcombine.high %v1637_v40, %v1641_v41  ;;  %v1646_v53 = vld [vmem:[#allocation9 + $0x88] sm:$0xff] }
  0xdd   :  { %1059 = vmatprep.mubr.bf16.mxu0 %v13414_v45  ;;  %1172 = vmatprep.mubr.bf16.mxu1 %v13414_v45 }
  0xdf   :  { %1216 = vmatpush1.bf16.msra.mxu0 %v11211_v55  ;;  %1329 = vmatpush1.bf16.msra.mxu1 %v11213_v57  ;;  %v11257_v55 = vcombine.low %v1638_v42, %v1642_v43  ;;  %v11264_v57 = vcombine.high %v1645_v51, %v1649_v52  ;;  %v1693_v42 = vld [vmem:[#allocation9 + $0x200] sm:$0xff] }
  0xe0   :  { %1217 = vmatprep.subr.bf16.mxu0 %v11220_v59  ;;  %1330 = vmatprep.subr.bf16.mxu1 %v11222_v0  ;;  %v11266_v59 = vcombine.high %v1646_v53, %v1650_v54  ;;  %v1658_v0 = vld [vmem:[#allocation9 + $0xe8] sm:$0xff]  ;;  %v1697_v43 = vld [vmem:[#allocation9 + $0x220] sm:$0xff] }
  0xe1   :  { %v11273_v11 = vcombine.low %v1654_v63, %v1658_v0  ;;  %v1701_v52 = vld [vmem:[#allocation9 + $0x240] sm:$0xff] }
  0xe2   :  { %1060 = vmatmul.mubr.bf16.gmra.mrb[24].mxu0 %v13418_v58  ;;  %1173 = vmatmul.mubr.bf16.gmra.mrb[24].mxu1 %v13418_v58 }
  0xe3   :  { %1218 = vmatpush1.bf16.msra.mxu0 %v11219_v2  ;;  %1331 = vmatpush1.bf16.msra.mxu1 %v11221_v3  ;;  %v11272_v2 = vcombine.high %v1653_v60, %v1657_v62  ;;  %v11274_v3 = vcombine.high %v1654_v63, %v1658_v0  ;;  %v1710_v63 = vld [vmem:[#allocation9 + $0x288] sm:$0xff] }
  0xe4   :  { %1219 = vmatprep.subr.bf16.mxu0 %v11228_v4  ;;  %1332 = vmatprep.subr.bf16.mxu1 %v11230_v6  ;;  %v1661_v4 = vld [vmem:[#allocation9 + $0x100] sm:$0xff]  ;;  %v1714_v0 = vld [vmem:[#allocation9 + $0x2a8] sm:$0xff] }
  0xe5   :  { %1069 = vmatprep.mubr.bf16.mxu0 %v13422_v7  ;;  %1182 = vmatprep.mubr.bf16.mxu1 %v13422_v7  ;;  %v1665_v6 = vld [vmem:[#allocation9 + $0x120] sm:$0xff] }
  0xe6   :  { %v11280_v12 = vcombine.high %v1661_v4, %v1665_v6  ;;  %v11279_v20 = vcombine.low %v1661_v4, %v1665_v6  ;;  %v1721_v4 = vld [vmem:[#allocation9 + $0x2e0] sm:$0xff]  ;;  %v1718_v6 = vld [vmem:[#allocation9 + $0x2c8] sm:$0xff] }
  0xe7   :  { %1220 = vmatpush1.bf16.msra.mxu0 %v11227_v13  ;;  %1333 = vmatpush1.bf16.msra.mxu1 %v11229_v14  ;;  %v11282_v13 = vcombine.high %v1662_v8, %v1666_v9  ;;  %v1669_v14 = vld [vmem:[#allocation9 + $0x140] sm:$0xff] }
  0xe8   :  { %1221 = vmatprep.subr.bf16.mxu0 %v11236_v15  ;;  %1334 = vmatprep.subr.bf16.mxu1 %v11238_v18  ;;  %v1673_v15 = vld [vmem:[#allocation9 + $0x160] sm:$0xff]  ;;  %v1670_v18 = vld [vmem:[#allocation9 + $0x148] sm:$0xff] }
  0xe9   :  { %v11288_v22 = vcombine.high %v1669_v14, %v1673_v15  ;;  %v11290_v23 = vcombine.high %v1670_v18, %v1674_v19  ;;  %v11289_v30 = vcombine.low %v1670_v18, %v1674_v19 }
  0xea   :  { %1070 = vmatmul.mubr.bf16.gmra.mrb[28].mxu0 %v13428_v21  ;;  %1183 = vmatmul.mubr.bf16.gmra.mrb[28].mxu1 %v13428_v21 }
  0xeb   :  { %1222 = vmatpush1.bf16.msra.mxu0 %v11235_v24  ;;  %1335 = vmatpush1.bf16.msra.mxu1 %v11237_v26  ;;  %v1677_v24 = vld [vmem:[#allocation9 + $0x180] sm:$0xff] }
  0xec   :  { %1223 = vmatprep.subr.bf16.mxu0 %v11244_v27  ;;  %1336 = vmatprep.subr.bf16.mxu1 %v11246_v29  ;;  %v1681_v26 = vld [vmem:[#allocation9 + $0x1a0] sm:$0xff]  ;;  %v1678_v27 = vld [vmem:[#allocation9 + $0x188] sm:$0xff] }
  0xed   :  { %1225 = vmatprep.mubr.bf16.mxu0 %v13368_v56  ;;  %1338 = vmatprep.mubr.bf16.mxu1 %v13368_v56  ;;  %v11255_v56 = vcombine.low %v1637_v40, %v1641_v41  ;;  %v1682_v29 = vld [vmem:[#allocation9 + $0x1a8] sm:$0xff]  ;;  %v11296_v31 = vcombine.high %v1677_v24, %v1681_v26 }
  0xee   :  { %v11298_v32 = vcombine.high %v1678_v27, %v1682_v29 }
  0xef   :  { %1224 = vmatpush1.bf16.msra.mxu0 %v11243_v34  ;;  %1337 = vmatpush1.bf16.msra.mxu1 %v11245_v36  ;;  %v1689_v34 = vld [vmem:[#allocation9 + $0x1e0] sm:$0xff]  ;;  %v1686_v36 = vld [vmem:[#allocation9 + $0x1c8] sm:$0xff] }
  0xf0   :  { %2397 = vmatprep.subr.bf16.mxu0 %v11248_v38  ;;  %2440 = vmatprep.subr.bf16.mxu1 %v11250_v39  ;;  %v1690_v38 = vld [vmem:[#allocation9 + $0x1e8] sm:$0xff]  ;;  %v11295_v39 = vcombine.low %v1677_v24, %v1681_v26  ;;  %v11304_v40 = vcombine.high %v1685_v33, %v1689_v34 }
  0xf1   :  { %v11306_v41 = vcombine.high %v1686_v36, %v1690_v38  ;;  %v1738_v24 = vld [vmem:[#allocation9 + $0x368] sm:$0xff] }
  0xf2   :  { %1226 = vmatmul.mubr.bf16.vlgmr.msra.gmra.mrb[32].mxu0 %v13372_v10  ;;  %1339 = vmatmul.mubr.bf16.vlgmr.msra.gmra.mrb[32].mxu1 %v13372_v10  ;;  %v11265_v10 = vcombine.low %v1646_v53, %v1650_v54  ;;  %v1705_v53 = vld [vmem:[#allocation9 + $0x260] sm:$0xff]  ;;  %v1702_v54 = vld [vmem:[#allocation9 + $0x248] sm:$0xff] }
  0xf3   :  { %2398 = vmatpush1.bf16.msra.mxu0 %v11247_v44  ;;  %2441 = vmatpush1.bf16.msra.mxu1 %v11249_v47  ;;  %v1694_v44 = vld [vmem:[#allocation9 + $0x208] sm:$0xff] }
  0xf4   :  { %2399 = vmatprep.subr.bf16.mxu0 %v11256_v48  ;;  %2442 = vmatprep.subr.bf16.mxu1 %v11258_v49  ;;  %v1698_v47 = vld [vmem:[#allocation9 + $0x228] sm:$0xff]  ;;  %v11305_v48 = vcombine.low %v1686_v36, %v1690_v38  ;;  %v11312_v49 = vcombine.high %v1693_v42, %v1697_v43  ;;  %v1749_v38 = vld [vmem:[#allocation9 + $0x3c0] sm:$0xff] }
  0xf5   :  { %1235 = vmatprep.mubr.bf16.mxu0 %v13374_v17  ;;  %1348 = vmatprep.mubr.bf16.mxu1 %v13374_v17  ;;  %v11271_v17 = vcombine.low %v1653_v60, %v1657_v62  ;;  %v11314_v51 = vcombine.high %v1694_v44, %v1698_v47  ;;  %v1709_v60 = vld [vmem:[#allocation9 + $0x280] sm:$0xff] }
  0xf6   :  { %v1713_v62 = vld [vmem:[#allocation9 + $0x2a0] sm:$0xff] }
  0xf7   :  { %2400 = vmatpush1.bf16.msra.mxu0 %v11255_v56  ;;  %2443 = vmatpush1.bf16.msra.mxu1 %v11257_v55  ;;  %v1706_v56 = vld [vmem:[#allocation9 + $0x268] sm:$0xff]  ;;  %v11311_v55 = vcombine.low %v1693_v42, %v1697_v43 }
  0xf8   :  { %2401 = vmatprep.subr.bf16.mxu0 %v11264_v57  ;;  %2444 = vmatprep.subr.bf16.mxu1 %v11266_v59  ;;  %v11320_v57 = vcombine.high %v1701_v52, %v1705_v53  ;;  %v11322_v59 = vcombine.high %v1702_v54, %v1706_v56 }
  0xfa   :  { %1236 = vmatmul.mubr.bf16.gmra.mrb[36].mxu0 %v13380_v28  ;;  %1349 = vmatmul.mubr.bf16.gmra.mrb[36].mxu1 %v13380_v28  ;;  %v11281_v28 = vcombine.low %v1662_v8, %v1666_v9  ;;  %v1722_v8 = vld [vmem:[#allocation9 + $0x2e8] sm:$0xff]  ;;  %v11327_v9 = vcombine.low %v1709_v60, %v1713_v62 }
  0xfb   :  { %2402 = vmatpush1.bf16.msra.mxu0 %v11263_v1  ;;  %2445 = vmatpush1.bf16.msra.mxu1 %v11265_v10  ;;  %v11321_v1 = vcombine.low %v1702_v54, %v1706_v56  ;;  %v11328_v10 = vcombine.high %v1709_v60, %v1713_v62  ;;  %v11337_v18 = vcombine.low %v1718_v6, %v1722_v8  ;;  %v1639_v54 = vld [vmem:[#allocation9 + $0x50] sm:$0xff] }
  0xfc   :  { %2403 = vmatprep.subr.bf16.mxu0 %v11272_v2  ;;  %2446 = vmatprep.subr.bf16.mxu1 %v11274_v3  ;;  %v11330_v2 = vcombine.high %v1710_v63, %v1714_v0  ;;  %v1717_v3 = vld [vmem:[#allocation9 + $0x2c0] sm:$0xff]  ;;  %v1643_v56 = vld [vmem:[#allocation9 + $0x70] sm:$0xff] }
  0xfd   :  { %1245 = vmatprep.mubr.bf16.mxu0 %v13382_v35  ;;  %1358 = vmatprep.mubr.bf16.mxu1 %v13382_v35  ;;  %v11287_v35 = vcombine.low %v1669_v14, %v1673_v15  ;;  %v1726_v14 = vld [vmem:[#allocation9 + $0x308] sm:$0xff]  ;;  %v1647_v62 = vld [vmem:[#allocation9 + $0x90] sm:$0xff] }
  0xfe   :  { %v1730_v15 = vld [vmem:[#allocation9 + $0x328] sm:$0xff] }
  0xff   :  { %2404 = vmatpush1.bf16.msra.mxu0 %v11271_v17  ;;  %2447 = vmatpush1.bf16.msra.mxu1 %v11273_v11  ;;  %v11336_v17 = vcombine.high %v1717_v3, %v1721_v4  ;;  %v11338_v11 = vcombine.high %v1718_v6, %v1722_v8  ;;  %v1659_v6 = vld [vmem:[#allocation9 + $0xf0] sm:$0xff]  ;;  %v1656_v8 = vld [vmem:[#allocation9 + $0xd8] sm:$0xff] }
 0x100   :  { %2405 = vmatprep.subr.bf16.mxu0 %v11280_v12  ;;  %2448 = vmatprep.subr.bf16.mxu1 %v11282_v13  ;;  %v1725_v12 = vld [vmem:[#allocation9 + $0x300] sm:$0xff] }
 0x101   :  { %v1729_v13 = vld [vmem:[#allocation9 + $0x320] sm:$0xff] }
 0x102   :  { %1246 = vmatmul.mubr.bf16.gmra.mrb[40].mxu0 %v13388_v46  ;;  %1359 = vmatmul.mubr.bf16.gmra.mrb[40].mxu1 %v13388_v46  ;;  %v11297_v46 = vcombine.low %v1678_v27, %v1682_v29  ;;  %v11344_v19 = vcombine.high %v1725_v12, %v1729_v13  ;;  %v11343_v26 = vcombine.low %v1725_v12, %v1729_v13  ;;  %v1663_v13 = vld [vmem:[#allocation9 + $0x110] sm:$0xff] }
 0x103   :  { %2406 = vmatpush1.bf16.msra.mxu0 %v11279_v20  ;;  %2449 = vmatpush1.bf16.msra.mxu1 %v11281_v28  ;;  %v11346_v20 = vcombine.high %v1726_v14, %v1730_v15  ;;  %v1733_v28 = vld [vmem:[#allocation9 + $0x340] sm:$0xff] }
 0x104   :  { %2407 = vmatprep.subr.bf16.mxu0 %v11288_v22  ;;  %2450 = vmatprep.subr.bf16.mxu1 %v11290_v23  ;;  %v1737_v22 = vld [vmem:[#allocation9 + $0x360] sm:$0xff]  ;;  %v1734_v23 = vld [vmem:[#allocation9 + $0x348] sm:$0xff] }
 0x105   :  { %1255 = vmatprep.mubr.bf16.mxu0 %v13390_v50  ;;  %1368 = vmatprep.mubr.bf16.mxu1 %v13390_v50  ;;  %v11303_v50 = vcombine.low %v1685_v33, %v1689_v34  ;;  %v11352_v27 = vcombine.high %v1733_v28, %v1737_v22  ;;  %v11354_v29 = vcombine.high %v1734_v23, %v1738_v24 }
 0x106   :  { %v11353_v33 = vcombine.low %v1734_v23, %v1738_v24  ;;  %v1675_v23 = vld [vmem:[#allocation9 + $0x170] sm:$0xff]  ;;  %v1672_v24 = vld [vmem:[#allocation9 + $0x158] sm:$0xff] }
 0x107   :  { %2408 = vmatpush1.bf16.msra.mxu0 %v11287_v35  ;;  %2451 = vmatpush1.bf16.msra.mxu1 %v11289_v30  ;;  %v1741_v35 = vld [vmem:[#allocation9 + $0x380] sm:$0xff] }
 0x108   :  { %2409 = vmatprep.subr.bf16.mxu0 %v11296_v31  ;;  %2452 = vmatprep.subr.bf16.mxu1 %v11298_v32  ;;  %v1745_v30 = vld [vmem:[#allocation9 + $0x3a0] sm:$0xff]  ;;  %v1742_v31 = vld [vmem:[#allocation9 + $0x388] sm:$0xff] }
 0x109   :  { %v1746_v32 = vld [vmem:[#allocation9 + $0x3a8] sm:$0xff]  ;;  %v11360_v34 = vcombine.high %v1741_v35, %v1745_v30 }
 0x10a   :  { %1256 = vmatmul.mubr.bf16.gmra.mrb[44].mxu0 %v13394_v61  ;;  %1369 = vmatmul.mubr.bf16.gmra.mrb[44].mxu1 %v13394_v61  ;;  %v11313_v61 = vcombine.low %v1694_v44, %v1698_v47  ;;  %v11362_v36 = vcombine.high %v1742_v31, %v1746_v32  ;;  %v1631_v44 = vld [vmem:[#allocation9 + $0x10] sm:$0xff] }
 0x10b   :  { %2410 = vmatpush1.bf16.msra.mxu0 %v11295_v39  ;;  %2453 = vmatpush1.bf16.msra.mxu1 %v11297_v46  ;;  %v1753_v39 = vld [vmem:[#allocation9 + $0x3e0] sm:$0xff]  ;;  %v1750_v46 = vld [vmem:[#allocation9 + $0x3c8] sm:$0xff]  ;;  %v1635_v47 = vld [vmem:[#allocation9 + $0x30] sm:$0xff] }
 0x10c   :  { %2411 = vmatprep.subr.bf16.mxu0 %v11304_v40  ;;  %2454 = vmatprep.subr.bf16.mxu1 %v11306_v41  ;;  %v1754_v40 = vld [vmem:[#allocation9 + $0x3e8] sm:$0xff]  ;;  %v11359_v41 = vcombine.low %v1741_v35, %v1745_v30  ;;  %v11368_v42 = vcombine.high %v1749_v38, %v1753_v39  ;;  %v1679_v30 = vld [vmem:[#allocation9 + $0x190] sm:$0xff] }
 0x10d   :  { %1265 = vmatprep.mubr.bf16.mxu0 %v13398_v5  ;;  %1378 = vmatprep.mubr.bf16.mxu1 %v13398_v5  ;;  %v11319_v5 = vcombine.low %v1701_v52, %v1705_v53  ;;  %v11370_v43 = vcombine.high %v1750_v46, %v1754_v40  ;;  %v13253_v52 = vmov 0  }
 0x10f   :  { %2412 = vmatpush1.bf16.msra.mxu0 %v11303_v50  ;;  %2455 = vmatpush1.bf16.msra.mxu1 %v11305_v48  ;;  %v1632_v50 = vld [vmem:[#allocation9 + $0x18] sm:$0xff] }
 0x110   :  { %2413 = vmatprep.subr.bf16.mxu0 %v11312_v49  ;;  %2456 = vmatprep.subr.bf16.mxu1 %v11314_v51  ;;  %v1636_v48 = vld [vmem:[#allocation9 + $0x38] sm:$0xff]  ;;  %v11369_v49 = vcombine.low %v1750_v46, %v1754_v40  ;;  %v11252_v51 = vcombine.high %v1631_v44, %v1635_v47  ;;  %v1691_v46 = vld [vmem:[#allocation9 + $0x1f0] sm:$0xff] }
 0x111   :  { %v11254_v53 = vcombine.high %v1632_v50, %v1636_v48  ;;  %v1688_v40 = vld [vmem:[#allocation9 + $0x1d8] sm:$0xff] }
 0x112   :  { %1266 = vmatmul.mubr.bf16.gmra.mrb[48].mxu0 %v13402_v16  ;;  %1379 = vmatmul.mubr.bf16.gmra.mrb[48].mxu1 %v13402_v16  ;;  %v11329_v16 = vcombine.low %v1710_v63, %v1714_v0  ;;  %v1651_v63 = vld [vmem:[#allocation9 + $0xb0] sm:$0xff]  ;;  %v1648_v0 = vld [vmem:[#allocation9 + $0x98] sm:$0xff] }
 0x113   :  { %2414 = vmatpush1.bf16.msra.mxu0 %v11311_v55  ;;  %2457 = vmatpush1.bf16.msra.mxu1 %v11313_v61  ;;  %v1640_v55 = vld [vmem:[#allocation9 + $0x58] sm:$0xff] }
 0x114   :  { %2415 = vmatprep.subr.bf16.mxu0 %v11320_v57  ;;  %2458 = vmatprep.subr.bf16.mxu1 %v11322_v59  ;;  %v1644_v61 = vld [vmem:[#allocation9 + $0x78] sm:$0xff]  ;;  %v11251_v57 = vcombine.low %v1631_v44, %v1635_v47  ;;  %v11260_v59 = vcombine.high %v1639_v54, %v1643_v56  ;;  %v1695_v47 = vld [vmem:[#allocation9 + $0x210] sm:$0xff] }
 0x115   :  { %1275 = vmatprep.mubr.bf16.mxu0 %v13406_v25  ;;  %1388 = vmatprep.mubr.bf16.mxu1 %v13406_v25  ;;  %v11335_v25 = vcombine.low %v1717_v3, %v1721_v4  ;;  %v11262_v60 = vcombine.high %v1640_v55, %v1644_v61  ;;  %v1655_v4 = vld [vmem:[#allocation9 + $0xd0] sm:$0xff] }
 0x117   :  { %2416 = vmatpush1.bf16.msra.mxu0 %v11319_v5  ;;  %2459 = vmatpush1.bf16.msra.mxu1 %v11321_v1  ;;  %v1652_v5 = vld [vmem:[#allocation9 + $0xb8] sm:$0xff]  ;;  %v11259_v1 = vcombine.low %v1639_v54, %v1643_v56  ;;  %v1703_v56 = vld [vmem:[#allocation9 + $0x250] sm:$0xff] }
 0x118   :  { %2417 = vmatprep.subr.bf16.mxu0 %v11328_v10  ;;  %2460 = vmatprep.subr.bf16.mxu1 %v11330_v2  ;;  %v11261_v10 = vcombine.low %v1640_v55, %v1644_v61  ;;  %v11268_v2 = vcombine.high %v1647_v62, %v1651_v63  ;;  %v11270_v3 = vcombine.high %v1648_v0, %v1652_v5  ;;  %v1707_v55 = vld [vmem:[#allocation9 + $0x270] sm:$0xff]  ;;  %v1704_v61 = vld [vmem:[#allocation9 + $0x258] sm:$0xff] }
 0x11a   :  { %1276 = vmatmul.mubr.bf16.gmra.mrb[52].mxu0 %v13410_v37  ;;  %1389 = vmatmul.mubr.bf16.gmra.mrb[52].mxu1 %v13410_v37  ;;  %v11345_v37 = vcombine.low %v1726_v14, %v1730_v15  ;;  %v1667_v14 = vld [vmem:[#allocation9 + $0x130] sm:$0xff]  ;;  %v1664_v15 = vld [vmem:[#allocation9 + $0x118] sm:$0xff] }
 0x11b   :  { %2418 = vmatpush1.bf16.msra.mxu0 %v11327_v9  ;;  %2461 = vmatpush1.bf16.msra.mxu1 %v11329_v16  ;;  %v1660_v9 = vld [vmem:[#allocation9 + $0xf8] sm:$0xff]  ;;  %v11267_v16 = vcombine.low %v1647_v62, %v1651_v63  ;;  %v1711_v63 = vld [vmem:[#allocation9 + $0x290] sm:$0xff] }
 0x11c   :  { %2419 = vmatprep.subr.bf16.mxu0 %v11336_v17  ;;  %2462 = vmatprep.subr.bf16.mxu1 %v11338_v11  ;;  %v11269_v17 = vcombine.low %v1648_v0, %v1652_v5  ;;  %v11276_v11 = vcombine.high %v1655_v4, %v1659_v6  ;;  %v11278_v12 = vcombine.high %v1656_v8, %v1660_v9  ;;  %v1715_v0 = vld [vmem:[#allocation9 + $0x2b0] sm:$0xff]  ;;  %v1712_v5 = vld [vmem:[#allocation9 + $0x298] sm:$0xff] }
 0x11d   :  { %1285 = vmatprep.mubr.bf16.mxu0 %v13414_v45  ;;  %1398 = vmatprep.mubr.bf16.mxu1 %v13414_v45  ;;  %v11351_v45 = vcombine.low %v1733_v28, %v1737_v22  ;;  %v1671_v22 = vld [vmem:[#allocation9 + $0x150] sm:$0xff] }
 0x11f   :  { %2420 = vmatpush1.bf16.msra.mxu0 %v11335_v25  ;;  %2463 = vmatpush1.bf16.msra.mxu1 %v11337_v18  ;;  %v1668_v25 = vld [vmem:[#allocation9 + $0x138] sm:$0xff]  ;;  %v11275_v18 = vcombine.low %v1655_v4, %v1659_v6  ;;  %v1719_v6 = vld [vmem:[#allocation9 + $0x2d0] sm:$0xff] }
 0x120   :  { %2421 = vmatprep.subr.bf16.mxu0 %v11344_v19  ;;  %2464 = vmatprep.subr.bf16.mxu1 %v11346_v20  ;;  %v11277_v19 = vcombine.low %v1656_v8, %v1660_v9  ;;  %v11284_v20 = vcombine.high %v1663_v13, %v1667_v14  ;;  %v11286_v28 = vcombine.high %v1664_v15, %v1668_v25  ;;  %v1723_v8 = vld [vmem:[#allocation9 + $0x2f0] sm:$0xff]  ;;  %v1720_v9 = vld [vmem:[#allocation9 + $0x2d8] sm:$0xff] }
 0x122   :  { %1286 = vmatmul.mubr.bf16.gmra.mrb[56].mxu0 %v13418_v58  ;;  %1399 = vmatmul.mubr.bf16.gmra.mrb[56].mxu1 %v13418_v58  ;;  %v11361_v58 = vcombine.low %v1742_v31, %v1746_v32  ;;  %v1683_v31 = vld [vmem:[#allocation9 + $0x1b0] sm:$0xff]  ;;  %v1680_v32 = vld [vmem:[#allocation9 + $0x198] sm:$0xff] }
 0x123   :  { %2422 = vmatpush1.bf16.msra.mxu0 %v11343_v26  ;;  %2465 = vmatpush1.bf16.msra.mxu1 %v11345_v37  ;;  %v1676_v26 = vld [vmem:[#allocation9 + $0x178] sm:$0xff]  ;;  %v11283_v37 = vcombine.low %v1663_v13, %v1667_v14  ;;  %v1727_v14 = vld [vmem:[#allocation9 + $0x310] sm:$0xff] }
 0x124   :  { %2423 = vmatprep.subr.bf16.mxu0 %v11352_v27  ;;  %2466 = vmatprep.subr.bf16.mxu1 %v11354_v29  ;;  %v11285_v27 = vcombine.low %v1664_v15, %v1668_v25  ;;  %v11292_v29 = vcombine.high %v1671_v22, %v1675_v23  ;;  %v11294_v35 = vcombine.high %v1672_v24, %v1676_v26  ;;  %v1731_v15 = vld [vmem:[#allocation9 + $0x330] sm:$0xff]  ;;  %v1728_v25 = vld [vmem:[#allocation9 + $0x318] sm:$0xff] }
 0x125   :  { %1295 = vmatprep.mubr.bf16.mxu0 %v13422_v7  ;;  %1408 = vmatprep.mubr.bf16.mxu1 %v13422_v7  ;;  %v11367_v7 = vcombine.low %v1749_v38, %v1753_v39  ;;  %v1687_v39 = vld [vmem:[#allocation9 + $0x1d0] sm:$0xff] }
 0x127   :  { %2424 = vmatpush1.bf16.msra.mxu0 %v11351_v45  ;;  %2467 = vmatpush1.bf16.msra.mxu1 %v11353_v33  ;;  %v1684_v45 = vld [vmem:[#allocation9 + $0x1b8] sm:$0xff]  ;;  %v11291_v33 = vcombine.low %v1671_v22, %v1675_v23  ;;  %v1735_v23 = vld [vmem:[#allocation9 + $0x350] sm:$0xff] }
 0x128   :  { %2425 = vmatprep.subr.bf16.mxu0 %v11360_v34  ;;  %2468 = vmatprep.subr.bf16.mxu1 %v11362_v36  ;;  %v11293_v34 = vcombine.low %v1672_v24, %v1676_v26  ;;  %v11300_v36 = vcombine.high %v1679_v30, %v1683_v31  ;;  %v11302_v38 = vcombine.high %v1680_v32, %v1684_v45  ;;  %v1739_v24 = vld [vmem:[#allocation9 + $0x370] sm:$0xff]  ;;  %v1736_v26 = vld [vmem:[#allocation9 + $0x358] sm:$0xff] }
 0x12a   :  { %1296 = vmatmul.mubr.bf16.gmra.mrb[60].mxu0 %v13428_v21  ;;  %1409 = vmatmul.mubr.bf16.gmra.mrb[60].mxu1 %v13428_v21  ;;  %v11253_v21 = vcombine.low %v1632_v50, %v1636_v48  ;;  %v1699_v50 = vld [vmem:[#allocation9 + $0x230] sm:$0xff]  ;;  %v1696_v48 = vld [vmem:[#allocation9 + $0x218] sm:$0xff] }
 0x12b   :  { %2426 = vmatpush1.bf16.msra.mxu0 %v11359_v41  ;;  %2469 = vmatpush1.bf16.msra.mxu1 %v11361_v58  ;;  %v1692_v41 = vld [vmem:[#allocation9 + $0x1f8] sm:$0xff]  ;;  %v11299_v58 = vcombine.low %v1679_v30, %v1683_v31  ;;  %v1743_v31 = vld [vmem:[#allocation9 + $0x390] sm:$0xff] }
 0x12c   :  { %2427 = vmatprep.subr.bf16.mxu0 %v11368_v42  ;;  %2470 = vmatprep.subr.bf16.mxu1 %v11370_v43  ;;  %v11301_v42 = vcombine.low %v1680_v32, %v1684_v45  ;;  %v11308_v43 = vcombine.high %v1687_v39, %v1691_v46  ;;  %v11310_v44 = vcombine.high %v1688_v40, %v1692_v41  ;;  %v1747_v32 = vld [vmem:[#allocation9 + $0x3b0] sm:$0xff]  ;;  %v1744_v45 = vld [vmem:[#allocation9 + $0x398] sm:$0xff] }
 0x12d   :  { %2429 = vmatprep.mubr.bf16.mxu0 %v13253_v52  ;;  %2472 = vmatprep.mubr.bf16.mxu1 %v13253_v52 }
 0x12f   :  { %2428 = vmatpush1.bf16.msra.mxu0 %v11367_v7  ;;  %2471 = vmatpush1.bf16.msra.mxu1 %v11369_v49  ;;  %v1700_v7 = vld [vmem:[#allocation9 + $0x238] sm:$0xff]  ;;  %v11307_v49 = vcombine.low %v1687_v39, %v1691_v46  ;;  %v1751_v46 = vld [vmem:[#allocation9 + $0x3d0] sm:$0xff] }
 0x130   :  { %2483 = vmatprep.subr.bf16.mxu0 %v11252_v51  ;;  %2526 = vmatprep.subr.bf16.mxu1 %v11254_v53  ;;  %v11309_v51 = vcombine.low %v1688_v40, %v1692_v41  ;;  %v11316_v53 = vcombine.high %v1695_v47, %v1699_v50  ;;  %v11318_v54 = vcombine.high %v1696_v48, %v1700_v7  ;;  %v1755_v40 = vld [vmem:[#allocation9 + $0x3f0] sm:$0xff]  ;;  %v1752_v41 = vld [vmem:[#allocation9 + $0x3d8] sm:$0xff] }
 0x132   :  { %2430 = vmatmul.mubr.bf16.vlgmr.msra.gmra.mrb[64].mxu0 %v13253_v52  ;;  %2473 = vmatmul.mubr.bf16.vlgmr.msra.gmra.mrb[64].mxu1 %v13253_v52 }
 0x133   :  { %2484 = vmatpush1.bf16.msra.mxu0 %v11251_v57  ;;  %2527 = vmatpush1.bf16.msra.mxu1 %v11253_v21  ;;  %v1708_v57 = vld [vmem:[#allocation9 + $0x278] sm:$0xff]  ;;  %v11315_v21 = vcombine.low %v1695_v47, %v1699_v50  ;;  %v11371_v50 = vcombine.low %v1751_v46, %v1755_v40 }
 0x134   :  { %2485 = vmatprep.subr.bf16.mxu0 %v11260_v59  ;;  %2528 = vmatprep.subr.bf16.mxu1 %v11262_v60  ;;  %v11317_v59 = vcombine.low %v1696_v48, %v1700_v7  ;;  %v11324_v60 = vcombine.high %v1703_v56, %v1707_v55  ;;  %v11326_v62 = vcombine.high %v1704_v61, %v1708_v57  ;;  %v1573_v7 = vlaneseq }
 0x135   :  { %2515 = vmatprep.mubr.bf16.mxu0 %v13253_v52  ;;  %2558 = vmatprep.mubr.bf16.mxu1 %v13253_v52 }
 0x137   :  { %2486 = vmatpush1.bf16.msra.mxu0 %v11259_v1  ;;  %2529 = vmatpush1.bf16.msra.mxu1 %v11261_v10  ;;  %v1716_v1 = vld [vmem:[#allocation9 + $0x2b8] sm:$0xff]  ;;  %v11323_v10 = vcombine.low %v1703_v56, %v1707_v55 }
 0x138   :  { %2487 = vmatprep.subr.bf16.mxu0 %v11268_v2  ;;  %2530 = vmatprep.subr.bf16.mxu1 %v11270_v3  ;;  %v11325_v2 = vcombine.low %v1704_v61, %v1708_v57  ;;  %v11332_v3 = vcombine.high %v1711_v63, %v1715_v0  ;;  %v11334_v4 = vcombine.high %v1712_v5, %v1716_v1 }
 0x13b   :  { %2488 = vmatpush1.bf16.msra.mxu0 %v11267_v16  ;;  %2531 = vmatpush1.bf16.msra.mxu1 %v11269_v17  ;;  %v1724_v16 = vld [vmem:[#allocation9 + $0x2f8] sm:$0xff]  ;;  %v11331_v17 = vcombine.low %v1711_v63, %v1715_v0 }
 0x13c   :  { %2489 = vmatprep.subr.bf16.mxu0 %v11276_v11  ;;  %2532 = vmatprep.subr.bf16.mxu1 %v11278_v12  ;;  %v11333_v11 = vcombine.low %v1712_v5, %v1716_v1  ;;  %v11340_v12 = vcombine.high %v1719_v6, %v1723_v8  ;;  %v11342_v13 = vcombine.high %v1720_v9, %v1724_v16  ;;  %v13483_v5 = vld [vmem:[#allocation10] sm:$0xff] }
 0x13f   :  { %2490 = vmatpush1.bf16.msra.mxu0 %v11275_v18  ;;  %2533 = vmatpush1.bf16.msra.mxu1 %v11277_v19  ;;  %v1732_v18 = vld [vmem:[#allocation9 + $0x338] sm:$0xff]  ;;  %v11339_v19 = vcombine.low %v1719_v6, %v1723_v8 }
 0x140   :  { %2491 = vmatprep.subr.bf16.mxu0 %v11284_v20  ;;  %2534 = vmatprep.subr.bf16.mxu1 %v11286_v28  ;;  %v11341_v20 = vcombine.low %v1720_v9, %v1724_v16  ;;  %v11348_v28 = vcombine.high %v1727_v14, %v1731_v15  ;;  %v11350_v22 = vcombine.high %v1728_v25, %v1732_v18 }
 0x143   :  { %2492 = vmatpush1.bf16.msra.mxu0 %v11283_v37  ;;  %2535 = vmatpush1.bf16.msra.mxu1 %v11285_v27  ;;  %v1740_v37 = vld [vmem:[#allocation9 + $0x378] sm:$0xff]  ;;  %v11347_v27 = vcombine.low %v1727_v14, %v1731_v15 }
 0x144   :  { %2493 = vmatprep.subr.bf16.mxu0 %v11292_v29  ;;  %2536 = vmatprep.subr.bf16.mxu1 %v11294_v35  ;;  %v11349_v29 = vcombine.low %v1728_v25, %v1732_v18  ;;  %v11356_v35 = vcombine.high %v1735_v23, %v1739_v24  ;;  %v11358_v30 = vcombine.high %v1736_v26, %v1740_v37 }
 0x147   :  { %2494 = vmatpush1.bf16.msra.mxu0 %v11291_v33  ;;  %2537 = vmatpush1.bf16.msra.mxu1 %v11293_v34  ;;  %v1748_v33 = vld [vmem:[#allocation9 + $0x3b8] sm:$0xff]  ;;  %v11355_v34 = vcombine.low %v1735_v23, %v1739_v24 }
 0x148   :  { %2495 = vmatprep.subr.bf16.mxu0 %v11300_v36  ;;  %2538 = vmatprep.subr.bf16.mxu1 %v11302_v38  ;;  %v11357_v36 = vcombine.low %v1736_v26, %v1740_v37  ;;  %v11364_v38 = vcombine.high %v1743_v31, %v1747_v32  ;;  %v11366_v39 = vcombine.high %v1744_v45, %v1748_v33 }
 0x14b   :  { %2496 = vmatpush1.bf16.msra.mxu0 %v11299_v58  ;;  %2539 = vmatpush1.bf16.msra.mxu1 %v11301_v42  ;;  %v1756_v58 = vld [vmem:[#allocation9 + $0x3f8] sm:$0xff]  ;;  %v11363_v42 = vcombine.low %v1743_v31, %v1747_v32 }
 0x14c   :  { %2497 = vmatprep.subr.bf16.mxu0 %v11308_v43  ;;  %2540 = vmatprep.subr.bf16.mxu1 %v11310_v44  ;;  %v11365_v43 = vcombine.low %v1744_v45, %v1748_v33  ;;  %v11372_v44 = vcombine.high %v1751_v46, %v1755_v40  ;;  %v11374_v47 = vcombine.high %v1752_v41, %v1756_v58 }
 0x14d   :  { %v11373_v48 = vcombine.low %v1752_v41, %v1756_v58 }
 0x14f   :  { %2498 = vmatpush1.bf16.msra.mxu0 %v11307_v49  ;;  %2541 = vmatpush1.bf16.msra.mxu1 %v11309_v51 }
 0x150   :  { %2499 = vmatprep.subr.bf16.mxu0 %v11316_v53  ;;  %2542 = vmatprep.subr.bf16.mxu1 %v11318_v54 }
 0x153   :  { %2500 = vmatpush1.bf16.msra.mxu0 %v11315_v21  ;;  %2543 = vmatpush1.bf16.msra.mxu1 %v11317_v59  ;;  %v13474_v21 = vshrl.u32 %v1573_v7, 7 }
 0x154   :  { %2501 = vmatprep.subr.bf16.mxu0 %v11324_v60  ;;  %2544 = vmatprep.subr.bf16.mxu1 %v11326_v62 }
 0x155   :  { %14641 = vst [vmem:[#allocation21_spill] sm:$0xff] %v13474_v21  ;;  %v14637_v1 = vsub.s32 2, %v13474_v21 }
 0x157   :  { %2502 = vmatpush1.bf16.msra.mxu0 %v11323_v10  ;;  %2545 = vmatpush1.bf16.msra.mxu1 %v11325_v2  ;;  %v14636_v10 = vsub.s32 1, %v13474_v21  ;;  %v13496_v15 = vrot.slane %v13483_v5, %v14637_v1 }
 0x158   :  { %2503 = vmatprep.subr.bf16.mxu0 %v11332_v3  ;;  %2546 = vmatprep.subr.bf16.mxu1 %v11334_v4  ;;  %v14635_v4 = vsub.s32 3, %v13474_v21 }
 0x159   :  { %v13501_v25 = vrot.slane %v13483_v5, %v14636_v10 }
 0x15b   :  { %2504 = vmatpush1.bf16.msra.mxu0 %v11331_v17  ;;  %2547 = vmatpush1.bf16.msra.mxu1 %v11333_v11 }
 0x15c   :  { %2505 = vmatprep.subr.bf16.mxu0 %v11340_v12  ;;  %2548 = vmatprep.subr.bf16.mxu1 %v11342_v13 }
 0x15f   :  { %2506 = vmatpush1.bf16.msra.mxu0 %v11339_v19  ;;  %2549 = vmatpush1.bf16.msra.mxu1 %v11341_v20 }
 0x160   :  { %2507 = vmatprep.subr.bf16.mxu0 %v11348_v28  ;;  %2550 = vmatprep.subr.bf16.mxu1 %v11350_v22  ;;  %v13506_v28 = vrot.slane %v13483_v5, %v14635_v4  ;;  %v13603_v4 = vld [vmem:[#allocation9 + $0x88] sm:$0xff] }
 0x163   :  { %2508 = vmatpush1.bf16.msra.mxu0 %v11347_v27  ;;  %2551 = vmatpush1.bf16.msra.mxu1 %v11349_v29 }
 0x164   :  { %2509 = vmatprep.subr.bf16.mxu0 %v11356_v35  ;;  %2552 = vmatprep.subr.bf16.mxu1 %v11358_v30 }
 0x167   :  { %2510 = vmatpush1.bf16.msra.mxu0 %v11355_v34  ;;  %2553 = vmatpush1.bf16.msra.mxu1 %v11357_v36 }
 0x168   :  { %2511 = vmatprep.subr.bf16.mxu0 %v11364_v38  ;;  %2554 = vmatprep.subr.bf16.mxu1 %v11366_v39 }
 0x16b   :  { %2512 = vmatpush1.bf16.msra.mxu0 %v11363_v42  ;;  %2555 = vmatpush1.bf16.msra.mxu1 %v11365_v43 }
 0x16c   :  { %2513 = vmatprep.subr.bf16.mxu0 %v11372_v44  ;;  %2556 = vmatprep.subr.bf16.mxu1 %v11374_v47 }
 0x16f   :  { %2514 = vmatpush1.bf16.msra.mxu0 %v11371_v50  ;;  %2557 = vmatpush1.bf16.msra.mxu1 %v11373_v48 }
 0x172   :  { %2516 = vmatmul.mubr.bf16.vlgmr.msra.gmra.mrb[68].mxu0 %v13253_v52  ;;  %2559 = vmatmul.mubr.bf16.vlgmr.msra.gmra.mrb[68].mxu1 %v13253_v52  ;;  %v14638_v52 = vsub.s32 0, %v13474_v21 }
 0x174   :  { %v13491_v11 = vrot.slane %v13483_v5, %v14638_v52 }
 0x185   :  { %v1001_v49 = vpop.f32.mrb[0].mxu0  ;;  %v1114_v51 = vpop.f32.mrb[0].mxu1 }
 0x186   :  { %v1003_v53 = vpop.f32.mrb[1].mxu0  ;;  %v1116_v54 = vpop.f32.mrb[1].mxu1 }
 0x187   :  { %v1005_v56 = vpop.f32.mrb[2].mxu0  ;;  %v1118_v61 = vpop.f32.mrb[2].mxu1 }
 0x188   :  { %v13472_v55 = vpack.c.bf16 %v1005_v56, %v1001_v49  ;;  %v1007_v57 = vpop.f32.mrb[3].mxu0  ;;  %v13476_v59 = vpack.c.bf16 %v1118_v61, %v1114_v51  ;;  %v1120_v62 = vpop.f32.mrb[3].mxu1 }
 0x189   :  { %v13478_v60 = vpack.c.bf16 %v1007_v57, %v1003_v53  ;;  %v13480_v63 = vpack.c.bf16 %v1120_v62, %v1116_v54 }
 0x18d   :  { %v1011_v0 = vpop.f32.mrb[4].mxu0  ;;  %v1124_v2 = vpop.f32.mrb[4].mxu1 }
 0x18e   :  { %v1013_v3 = vpop.f32.mrb[5].mxu0  ;;  %v1126_v6 = vpop.f32.mrb[5].mxu1 }
 0x18f   :  { %v1015_v8 = vpop.f32.mrb[6].mxu0  ;;  %v1128_v16 = vpop.f32.mrb[6].mxu1 }
 0x190   :  { %v1427_v9 = vpack.c.bf16 %v1015_v8, %v1011_v0  ;;  %v1017_v17 = vpop.f32.mrb[7].mxu0  ;;  %v1429_v12 = vpack.c.bf16 %v1128_v16, %v1124_v2  ;;  %v1130_v14 = vpop.f32.mrb[7].mxu1 }
 0x191   :  { %v1428_v13 = vpack.c.bf16 %v1017_v17, %v1013_v3  ;;  %v1430_v20 = vpack.c.bf16 %v1130_v14, %v1126_v6 }
 0x192   :  { %v2694_v18 = vunpack.c.l.bf16 %v1427_v9  ;;  %v2702_v19 = vunpack.c.h.bf16 %v1427_v9  ;;  %v2696_v22 = vunpack.c.l.bf16 %v1429_v12  ;;  %v2704_v23 = vunpack.c.h.bf16 %v1429_v12 }
 0x193   :  { %v2695_v24 = vunpack.c.l.bf16 %v1428_v13  ;;  %v2703_v26 = vunpack.c.h.bf16 %v1428_v13  ;;  %v2697_v37 = vunpack.c.l.bf16 %v1430_v20  ;;  %v2705_v27 = vunpack.c.h.bf16 %v1430_v20 }
 0x194   :  { %v13509_v29 = vadd.f32 %v2694_v18, %v13491_v11  ;;  %v13512_v35 = vadd.f32 %v2702_v19, %v13491_v11  ;;  %v13515_v31 = vadd.f32 %v2696_v22, %v13496_v15  ;;  %v13521_v45 = vadd.f32 %v2704_v23, %v13496_v15 }
 0x195   :  { %v1021_v30 = vpop.f32.mrb[8].mxu0  ;;  %v13518_v32 = vadd.f32 %v2695_v24, %v13501_v25  ;;  %v13524_v33 = vadd.f32 %v2703_v26, %v13501_v25  ;;  %v1134_v34 = vpop.f32.mrb[8].mxu1  ;;  %v13527_v38 = vadd.f32 %v2697_v37, %v13506_v28  ;;  %v13530_v39 = vadd.f32 %v2705_v27, %v13506_v28 }
 0x196   :  { %v1023_v36 = vpop.f32.mrb[9].mxu0  ;;  %v1136_v46 = vpop.f32.mrb[9].mxu1 }
 0x197   :  { %v1025_v40 = vpop.f32.mrb[10].mxu0  ;;  %v1138_v58 = vpop.f32.mrb[10].mxu1 }
 0x198   :  { %v1435_v41 = vpack.c.bf16 %v1025_v40, %v1021_v30  ;;  %v1027_v42 = vpop.f32.mrb[11].mxu0  ;;  %v1437_v43 = vpack.c.bf16 %v1138_v58, %v1134_v34  ;;  %v1140_v47 = vpop.f32.mrb[11].mxu1 }
 0x199   :  { %v1436_v44 = vpack.c.bf16 %v1027_v42, %v1023_v36  ;;  %v1438_v7 = vpack.c.bf16 %v1140_v47, %v1136_v46 }
 0x19a   :  { %v3792_v50 = vunpack.c.l.bf16 %v1435_v41  ;;  %v3800_v48 = vunpack.c.h.bf16 %v1435_v41  ;;  %v3794_v49 = vunpack.c.l.bf16 %v1437_v43  ;;  %v3802_v51 = vunpack.c.h.bf16 %v1437_v43 }
 0x19b   :  { %v3793_v53 = vunpack.c.l.bf16 %v1436_v44  ;;  %v3801_v54 = vunpack.c.h.bf16 %v1436_v44  ;;  %v3795_v56 = vunpack.c.l.bf16 %v1438_v7  ;;  %v3803_v61 = vunpack.c.h.bf16 %v1438_v7 }
 0x19c   :  { %v13533_v57 = vadd.f32 %v3792_v50, %v13491_v11  ;;  %v13536_v62 = vadd.f32 %v3800_v48, %v13491_v11  ;;  %v13539_v2 = vadd.f32 %v3794_v49, %v13496_v15  ;;  %v13545_v6 = vadd.f32 %v3802_v51, %v13496_v15 }
 0x19d   :  { %v1031_v0 = vpop.f32.mrb[12].mxu0  ;;  %v13542_v3 = vadd.f32 %v3793_v53, %v13501_v25  ;;  %v13548_v8 = vadd.f32 %v3801_v54, %v13501_v25  ;;  %v1144_v9 = vpop.f32.mrb[12].mxu1  ;;  %v13551_v17 = vadd.f32 %v3795_v56, %v13506_v28  ;;  %v13554_v12 = vadd.f32 %v3803_v61, %v13506_v28 }
 0x19e   :  { %14642 = vst [vmem:[#allocation22_spill] sm:$0xff] %v13536_v62  ;;  %14644 = vst [vmem:[#allocation24_spill] sm:$0xff] %v13545_v6  ;;  %v1033_v16 = vpop.f32.mrb[13].mxu0  ;;  %v1146_v13 = vpop.f32.mrb[13].mxu1 }
 0x19f   :  { %14643 = vst [vmem:[#allocation23_spill] sm:$0xff] %v13542_v3  ;;  %14645 = vst [vmem:[#allocation25_spill] sm:$0xff] %v13548_v8  ;;  %v1035_v14 = vpop.f32.mrb[14].mxu0  ;;  %v1148_v19 = vpop.f32.mrb[14].mxu1  ;;  %v2827_v3 = vld [vmem:[#allocation9 + $0x328] sm:$0xff] }
 0x1a0   :  { %14646 = vst [vmem:[#allocation26_spill] sm:$0xff] %v13551_v17  ;;  %14647 = vst [vmem:[#allocation27_spill] sm:$0xff] %v13554_v12  ;;  %v1443_v18 = vpack.c.bf16 %v1035_v14, %v1031_v0  ;;  %v1037_v20 = vpop.f32.mrb[15].mxu0  ;;  %v1445_v22 = vpack.c.bf16 %v1148_v19, %v1144_v9  ;;  %v1150_v24 = vpop.f32.mrb[15].mxu1  ;;  %v2730_v19 = vld [vmem:[#allocation9 + $0x20] sm:$0xff] }
 0x1a1   :  { %v1444_v23 = vpack.c.bf16 %v1037_v20, %v1033_v16  ;;  %v1446_v27 = vpack.c.bf16 %v1150_v24, %v1146_v13  ;;  %v2727_v20 = vld [vmem:[#allocation9 + $0x8] sm:$0xff]  ;;  %v2734_v24 = vld [vmem:[#allocation9 + $0x40] sm:$0xff] }
 0x1a2   :  { %v4890_v26 = vunpack.c.l.bf16 %v1443_v18  ;;  %v4898_v37 = vunpack.c.h.bf16 %v1443_v18  ;;  %v4892_v30 = vunpack.c.l.bf16 %v1445_v22  ;;  %v4900_v34 = vunpack.c.h.bf16 %v1445_v22  ;;  %v2726_v18 = vld [vmem:[#allocation9] sm:$0xff] }
 0x1a3   :  { %v4891_v36 = vunpack.c.l.bf16 %v1444_v23  ;;  %v4899_v46 = vunpack.c.h.bf16 %v1444_v23  ;;  %v4893_v40 = vunpack.c.l.bf16 %v1446_v27  ;;  %v4901_v41 = vunpack.c.h.bf16 %v1446_v27  ;;  %v2731_v23 = vld [vmem:[#allocation9 + $0x28] sm:$0xff] }
 0x1a4   :  { %v13557_v58 = vadd.f32 %v4890_v26, %v13491_v11  ;;  %v13560_v42 = vadd.f32 %v4898_v37, %v13491_v11  ;;  %v13563_v44 = vadd.f32 %v4892_v30, %v13496_v15  ;;  %v13569_v50 = vadd.f32 %v4900_v34, %v13496_v15  ;;  %v2738_v26 = vld [vmem:[#allocation9 + $0x60] sm:$0xff]  ;;  %v13588_v27 = vld [vmem:[#allocation9 + $0x48] sm:$0xff] }
 0x1a5   :  { %v1041_v43 = vpop.f32.mrb[16].mxu0  ;;  %v13566_v47 = vadd.f32 %v4891_v36, %v13501_v25  ;;  %v13572_v48 = vadd.f32 %v4899_v46, %v13501_v25  ;;  %v1154_v7 = vpop.f32.mrb[16].mxu1  ;;  %v13575_v51 = vadd.f32 %v4893_v40, %v13506_v28  ;;  %v13578_v53 = vadd.f32 %v4901_v41, %v13506_v28  ;;  %v13590_v30 = vld [vmem:[#allocation9 + $0x68] sm:$0xff] }
 0x1a6   :  { %14648 = vst [vmem:[#allocation28_spill] sm:$0xff] %v13557_v58  ;;  %14649 = vst [vmem:[#allocation29_spill] sm:$0xff] %v13560_v42  ;;  %v1043_v49 = vpop.f32.mrb[17].mxu0  ;;  %v1156_v54 = vpop.f32.mrb[17].mxu1  ;;  %v11387_v37 = vcombine.low %v2726_v18, %v2730_v19  ;;  %v11388_v34 = vcombine.high %v2726_v18, %v2730_v19  ;;  %v11389_v36 = vcombine.low %v2727_v20, %v2731_v23  ;;  %v13617_v46 = vld [vmem:[#allocation9 + $0xe8] sm:$0xff] }
 0x1a7   :  { %14650 = vst [vmem:[#allocation30_spill] sm:$0xff] %v13563_v44  ;;  %14651 = vst [vmem:[#allocation31_spill] sm:$0xff] %v13566_v47  ;;  %v1045_v56 = vpop.f32.mrb[18].mxu0  ;;  %v1158_v0 = vpop.f32.mrb[18].mxu1  ;;  %v11398_v19 = vcombine.high %v13588_v27, %v13590_v30  ;;  %v11395_v40 = vcombine.low %v2734_v24, %v2738_v26 }
 0x1a8   :  { %14652 = vst [vmem:[#allocation32_spill] sm:$0xff] %v13569_v50  ;;  %14653 = vst [vmem:[#allocation33_spill] sm:$0xff] %v13572_v48  ;;  %v13580_v61 = vpack.c.bf16 %v1045_v56, %v1041_v43  ;;  %v1047_v9 = vpop.f32.mrb[19].mxu0  ;;  %v13582_v16 = vpack.c.bf16 %v1158_v0, %v1154_v7  ;;  %v1160_v14 = vpop.f32.mrb[19].mxu1  ;;  %v11390_v43 = vcombine.high %v2727_v20, %v2731_v23  ;;  %3494 = vmatprep.subr.bf16.mxu0 %v11388_v34  ;;  %v13605_v20 = vld [vmem:[#allocation9 + $0xa8] sm:$0xff]  ;;  %v13607_v23 = vld [vmem:[#allocation9 + $0xc0] sm:$0xff] }
 0x1a9   :  { %14654 = vst [vmem:[#allocation34_spill] sm:$0xff] %v13575_v51  ;;  %14655 = vst [vmem:[#allocation35_spill] sm:$0xff] %v13578_v53  ;;  %v13584_v13 = vpack.c.bf16 %v1047_v9, %v1043_v49  ;;  %v13586_v22 = vpack.c.bf16 %v1160_v14, %v1156_v54  ;;  %v11396_v7 = vcombine.high %v2734_v24, %v2738_v26  ;;  %v13594_v49 = vld [vmem:[#allocation9 + $0x80] sm:$0xff]  ;;  %3495 = vmatpush1.bf16.msra.mxu0 %v11387_v37  ;;  %v13615_v56 = vld [vmem:[#allocation9 + $0xc8] sm:$0xff] }
 0x1aa   :  { %v13596_v54 = vld [vmem:[#allocation9 + $0xa0] sm:$0xff]  ;;  %3537 = vmatprep.subr.bf16.mxu1 %v11390_v43  ;;  %v11397_v34 = vcombine.low %v13588_v27, %v13590_v30  ;;  %v13640_v53 = vld [vmem:[#allocation9 + $0x128] sm:$0xff]  ;;  %v14658_v12 = vunpack.c.l.bf16 %v13582_v16 }
 0x1ab   :  { %v13613_v9 = vld [vmem:[#allocation9 + $0xe0] sm:$0xff]  ;;  %3538 = vmatpush1.bf16.msra.mxu1 %v11389_v36  ;;  %3496 = vmatprep.subr.bf16.mxu0 %v11396_v7  ;;  %v11403_v24 = vcombine.low %v13594_v49, %v13596_v54  ;;  %v11404_v26 = vcombine.high %v13594_v49, %v13596_v54  ;;  %v11405_v36 = vcombine.low %v13603_v4, %v13605_v20 }
 0x1ac   :  { %v13626_v37 = vld [vmem:[#allocation9 + $0x100] sm:$0xff]  ;;  %3539 = vmatprep.subr.bf16.mxu1 %v11398_v19  ;;  %v11406_v7 = vcombine.high %v13603_v4, %v13605_v20  ;;  %v11413_v54 = vcombine.low %v13615_v56, %v13617_v46  ;;  %v11414_v4 = vcombine.high %v13615_v56, %v13617_v46  ;;  %v13689_v8 = vadd.f32 %v14658_v12, %v13496_v15 }
 0x1ad   :  { %v1051_v41 = vpop.f32.mrb[20].mxu0  ;;  %v1164_v14 = vpop.f32.mrb[20].mxu1  ;;  %v13628_v27 = vld [vmem:[#allocation9 + $0x120] sm:$0xff]  ;;  %3497 = vmatpush1.bf16.msra.mxu0 %v11395_v40 }
 0x1ae   :  { %v1053_v18 = vpop.f32.mrb[21].mxu0  ;;  %v1166_v52 = vpop.f32.mrb[21].mxu1  ;;  %v11420_v19 = vcombine.high %v13626_v37, %v13628_v27  ;;  %v13659_v20 = vld [vmem:[#allocation9 + $0x160] sm:$0xff]  ;;  %3498 = vmatprep.subr.bf16.mxu0 %v11404_v26  ;;  %14659 = vst [vmem:[#allocation37_spill] sm:$0xff] %v13689_v8 }
 0x1af   :  { %v1055_v0 = vpop.f32.mrb[22].mxu0  ;;  %v1168_v10 = vpop.f32.mrb[22].mxu1  ;;  %3540 = vmatpush1.bf16.msra.mxu1 %v11397_v34  ;;  %v14660_v34 = vunpack.c.l.bf16 %v13584_v13 }
 0x1b0   :  { %v13620_v48 = vpack.c.bf16 %v1055_v0, %v1051_v41  ;;  %v1057_v1 = vpop.f32.mrb[23].mxu0  ;;  %v13630_v30 = vpack.c.bf16 %v1168_v10, %v1164_v14  ;;  %v1170_v41 = vpop.f32.mrb[23].mxu1  ;;  %v13638_v0 = vld [vmem:[#allocation9 + $0x108] sm:$0xff]  ;;  %v11411_v10 = vcombine.low %v13607_v23, %v13613_v9  ;;  %v13650_v14 = vld [vmem:[#allocation9 + $0x140] sm:$0xff]  ;;  %3541 = vmatprep.subr.bf16.mxu1 %v11406_v7 }
 0x1b1   :  { %v13632_v43 = vpack.c.bf16 %v1057_v1, %v1053_v18  ;;  %v13642_v49 = vpack.c.bf16 %v1170_v41, %v1166_v52  ;;  %v11412_v1 = vcombine.high %v13607_v23, %v13613_v9  ;;  %v13661_v9 = vld [vmem:[#allocation9 + $0x148] sm:$0xff]  ;;  %3499 = vmatpush1.bf16.msra.mxu0 %v11403_v24  ;;  %v13694_v26 = vadd.f32 %v14660_v34, %v13501_v25 }
 0x1b2   :  { %v7086_v18 = vunpack.c.l.bf16 %v13620_v48  ;;  %v13663_v23 = vld [vmem:[#allocation9 + $0x168] sm:$0xff]  ;;  %v7094_v41 = vunpack.c.h.bf16 %v13620_v48  ;;  %v7088_v50 = vunpack.c.l.bf16 %v13630_v30  ;;  %v7096_v40 = vunpack.c.h.bf16 %v13630_v30 }
 0x1b3   :  { %v7087_v56 = vunpack.c.l.bf16 %v13632_v43  ;;  %v7095_v52 = vunpack.c.h.bf16 %v13632_v43  ;;  %v7089_v42 = vunpack.c.l.bf16 %v13642_v49  ;;  %v11422_v48 = vcombine.high %v13638_v0, %v13640_v53  ;;  %14661 = vst [vmem:[#allocation38_spill] sm:$0xff] %v13694_v26  ;;  %3542 = vmatpush1.bf16.msra.mxu1 %v11405_v36  ;;  %3500 = vmatprep.subr.bf16.mxu0 %v11412_v1 }
 0x1b4   :  { %v14656_v43 = vunpack.c.l.bf16 %v13580_v61  ;;  %v14662_v30 = vunpack.c.l.bf16 %v13586_v22  ;;  %v7097_v24 = vunpack.c.h.bf16 %v13642_v49  ;;  %v14666_v34 = vunpack.c.h.bf16 %v13582_v16  ;;  %3543 = vmatprep.subr.bf16.mxu1 %v11414_v4 }
 0x1b5   :  { %v1061_v51 = vpop.f32.mrb[24].mxu0  ;;  %v1174_v47 = vpop.f32.mrb[24].mxu1  ;;  %v13723_v36 = vadd.f32 %v7086_v18, %v13491_v11  ;;  %3501 = vmatpush1.bf16.msra.mxu0 %v11411_v10  ;;  %v13732_v18 = vadd.f32 %v7089_v42, %v13506_v28  ;;  %v13742_v10 = vadd.f32 %v7096_v40, %v13496_v15 }
 0x1b6   :  { %v1063_v44 = vpop.f32.mrb[25].mxu0  ;;  %v13684_v46 = vadd.f32 %v14656_v43, %v13491_v11  ;;  %v1176_v7 = vpop.f32.mrb[25].mxu1  ;;  %v13699_v6 = vadd.f32 %v14662_v30, %v13506_v28  ;;  %v14664_v43 = vunpack.c.h.bf16 %v13580_v61  ;;  %v13710_v26 = vadd.f32 %v14666_v34, %v13496_v15  ;;  %3502 = vmatprep.subr.bf16.mxu0 %v11420_v19 }
 0x1b7   :  { %v1065_v58 = vpop.f32.mrb[26].mxu0  ;;  %v1178_v12 = vpop.f32.mrb[26].mxu1  ;;  %v14668_v30 = vunpack.c.h.bf16 %v13584_v13  ;;  %14672 = vst [vmem:[#allocation44_spill] sm:$0xff] %v13723_v36  ;;  %v13726_v34 = vadd.f32 %v7088_v50, %v13496_v15  ;;  %3544 = vmatpush1.bf16.msra.mxu1 %v11413_v54  ;;  %14675 = vst [vmem:[#allocation47_spill] sm:$0xff] %v13732_v18  ;;  %v13736_v50 = vld [vmem:[#allocation9 + $0x1a0] sm:$0xff]  ;;  %v13745_v54 = vadd.f32 %v7095_v52, %v13501_v25 }
 0x1b8   :  { %14657 = vst [vmem:[#allocation36_spill] sm:$0xff] %v13684_v46  ;;  %14663 = vst [vmem:[#allocation39_spill] sm:$0xff] %v13699_v6  ;;  %v13704_v46 = vadd.f32 %v14664_v43, %v13491_v11  ;;  %v1467_v62 = vpack.c.bf16 %v1065_v58, %v1061_v51  ;;  %v1067_v8 = vpop.f32.mrb[27].mxu0  ;;  %v1469_v61 = vpack.c.bf16 %v1178_v12, %v1174_v47  ;;  %v14670_v58 = vunpack.c.h.bf16 %v13586_v22  ;;  %v2775_v12 = vld [vmem:[#allocation9 + $0x188] sm:$0xff] }
 0x1b9   :  { %14667 = vst [vmem:[#allocation41_spill] sm:$0xff] %v13710_v26  ;;  %v13715_v6 = vadd.f32 %v14668_v30, %v13501_v25  ;;  %v1468_v43 = vpack.c.bf16 %v1067_v8, %v1063_v44  ;;  %14673 = vst [vmem:[#allocation45_spill] sm:$0xff] %v13726_v34  ;;  %v13729_v22 = vadd.f32 %v7087_v56, %v13501_v25  ;;  %3545 = vmatprep.subr.bf16.mxu1 %v11422_v48  ;;  %v2779_v48 = vld [vmem:[#allocation9 + $0x1a8] sm:$0xff] }
 0x1ba   :  { %14665 = vst [vmem:[#allocation40_spill] sm:$0xff] %v13704_v46  ;;  %v1180_v46 = vpop.f32.mrb[27].mxu1  ;;  %v13720_v51 = vadd.f32 %v14670_v58, %v13506_v28  ;;  %v8184_v16 = vunpack.c.l.bf16 %v1467_v62  ;;  %v8192_v49 = vunpack.c.h.bf16 %v1467_v62  ;;  %v8186_v13 = vunpack.c.l.bf16 %v1469_v61  ;;  %14677 = vst [vmem:[#allocation49_spill] sm:$0xff] %v13742_v10  ;;  %v2823_v26 = vld [vmem:[#allocation9 + $0x308] sm:$0xff] }
 0x1bb   :  { %14669 = vst [vmem:[#allocation42_spill] sm:$0xff] %v13715_v6  ;;  %v1470_v1 = vpack.c.bf16 %v1180_v46, %v1176_v7  ;;  %v8194_v30 = vunpack.c.h.bf16 %v1469_v61  ;;  %v8185_v47 = vunpack.c.l.bf16 %v1468_v43  ;;  %v8193_v8 = vunpack.c.h.bf16 %v1468_v43  ;;  %14674 = vst [vmem:[#allocation46_spill] sm:$0xff] %v13729_v22  ;;  %v13734_v46 = vld [vmem:[#allocation9 + $0x180] sm:$0xff] }
 0x1bc   :  { %14671 = vst [vmem:[#allocation43_spill] sm:$0xff] %v13720_v51  ;;  %v13739_v7 = vadd.f32 %v7094_v41, %v13491_v11  ;;  %14678 = vst [vmem:[#allocation50_spill] sm:$0xff] %v13745_v54  ;;  %v13748_v19 = vadd.f32 %v7097_v24, %v13506_v28  ;;  %v13751_v61 = vadd.f32 %v8184_v16, %v13491_v11  ;;  %v2826_v6 = vld [vmem:[#allocation9 + $0x320] sm:$0xff] }
 0x1bd   :  { %v8187_v44 = vunpack.c.l.bf16 %v1470_v1  ;;  %v8195_v4 = vunpack.c.h.bf16 %v1470_v1  ;;  %v1071_v62 = vpop.f32.mrb[28].mxu0  ;;  %v1184_v42 = vpop.f32.mrb[28].mxu1  ;;  %v13754_v43 = vadd.f32 %v8186_v13, %v13496_v15  ;;  %v13757_v41 = vadd.f32 %v8185_v47, %v13501_v25 }
 0x1be   :  { %14676 = vst [vmem:[#allocation48_spill] sm:$0xff] %v13739_v7  ;;  %14679 = vst [vmem:[#allocation51_spill] sm:$0xff] %v13748_v19  ;;  %v1073_v56 = vpop.f32.mrb[29].mxu0  ;;  %v1186_v52 = vpop.f32.mrb[29].mxu1  ;;  %v14684_v24 = vcombine.low %v13626_v37, %v13628_v27  ;;  %v13766_v1 = vadd.f32 %v8192_v49, %v13491_v11  ;;  %v13769_v16 = vadd.f32 %v8194_v30, %v13496_v15  ;;  %v2807_v7 = vld [vmem:[#allocation9 + $0x288] sm:$0xff] }
 0x1bf   :  { %14680 = vst [vmem:[#allocation52_spill] sm:$0xff] %v13751_v61  ;;  %14681 = vst [vmem:[#allocation53_spill] sm:$0xff] %v13754_v43  ;;  %v13760_v40 = vadd.f32 %v8187_v44, %v13506_v28  ;;  %v1075_v58 = vpop.f32.mrb[30].mxu0  ;;  %v13772_v13 = vadd.f32 %v8193_v8, %v13501_v25  ;;  %v13775_v47 = vadd.f32 %v8195_v4, %v13506_v28 }
 0x1c0   :  { %14682 = vst [vmem:[#allocation54_spill] sm:$0xff] %v13757_v41  ;;  %3503 = vmatpush1.bf16.msra.mxu0 %v14684_v24  ;;  %14685 = vst [vmem:[#allocation56_spill] sm:$0xff] %v13766_v1  ;;  %v1475_v44 = vpack.c.bf16 %v1075_v58, %v1071_v62  ;;  %v1077_v41 = vpop.f32.mrb[31].mxu0  ;;  %v14689_v43 = vcombine.low %v13638_v0, %v13640_v53  ;;  %v14690_v37 = vcombine.high %v13650_v14, %v13659_v20 }
 0x1c1   :  { %14683 = vst [vmem:[#allocation55_spill] sm:$0xff] %v13760_v40  ;;  %14686 = vst [vmem:[#allocation57_spill] sm:$0xff] %v13769_v16  ;;  %v1188_v40 = vpop.f32.mrb[30].mxu1  ;;  %v11429_v27 = vcombine.low %v13661_v9, %v13663_v23  ;;  %v11436_v49 = vcombine.high %v13734_v46, %v13736_v50  ;;  %v1476_v8 = vpack.c.bf16 %v1077_v41, %v1073_v56 }
 0x1c2   :  { %14687 = vst [vmem:[#allocation58_spill] sm:$0xff] %v13772_v13  ;;  %14688 = vst [vmem:[#allocation59_spill] sm:$0xff] %v13775_v47  ;;  %3546 = vmatpush1.bf16.msra.mxu1 %v14689_v43  ;;  %3504 = vmatprep.subr.bf16.mxu0 %v14690_v37  ;;  %v1477_v30 = vpack.c.bf16 %v1188_v40, %v1184_v42  ;;  %v1190_v4 = vpop.f32.mrb[31].mxu1  ;;  %v14691_v62 = vcombine.high %v13661_v9, %v13663_v23  ;;  %v9282_v43 = vunpack.c.l.bf16 %v1475_v44 }
 0x1c3   :  { %v11435_v53 = vcombine.low %v13734_v46, %v13736_v50  ;;  %v11438_v0 = vcombine.high %v2775_v12, %v2779_v48  ;;  %v9290_v58 = vunpack.c.h.bf16 %v1475_v44  ;;  %v1478_v24 = vpack.c.bf16 %v1190_v4, %v1186_v52  ;;  %v2782_v52 = vld [vmem:[#allocation9 + $0x1c0] sm:$0xff] }
 0x1c4   :  { %3547 = vmatprep.subr.bf16.mxu1 %v14691_v62  ;;  %v11437_v37 = vcombine.low %v2775_v12, %v2779_v48  ;;  %v9284_v47 = vunpack.c.l.bf16 %v1477_v30  ;;  %v9292_v13 = vunpack.c.h.bf16 %v1477_v30  ;;  %v9283_v16 = vunpack.c.l.bf16 %v1476_v8  ;;  %v2786_v44 = vld [vmem:[#allocation9 + $0x1e0] sm:$0xff] }
 0x1c5   :  { %v9291_v1 = vunpack.c.h.bf16 %v1476_v8  ;;  %v14692_v42 = vcombine.low %v13650_v14, %v13659_v20  ;;  %v9285_v56 = vunpack.c.l.bf16 %v1478_v24  ;;  %v9293_v41 = vunpack.c.h.bf16 %v1478_v24  ;;  %v1227_v46 = vpop.f32.mrb[32].mxu0  ;;  %v1340_v48 = vpop.f32.mrb[32].mxu1 }
 0x1c6   :  { %3548 = vmatpush1.bf16.msra.mxu1 %v11429_v27  ;;  %v13796_v9 = vadd.f32 %v9282_v43, %v13491_v11  ;;  %v13799_v23 = vadd.f32 %v9290_v58, %v13491_v11  ;;  %v13802_v50 = vadd.f32 %v9284_v47, %v13496_v15  ;;  %v13805_v12 = vadd.f32 %v9283_v16, %v13501_v25  ;;  %v1229_v40 = vpop.f32.mrb[33].mxu0  ;;  %v2783_v27 = vld [vmem:[#allocation9 + $0x1c8] sm:$0xff]  ;;  %v1342_v30 = vpop.f32.mrb[33].mxu1 }
 0x1c7   :  { %3505 = vmatpush1.bf16.msra.mxu0 %v14692_v42  ;;  %3549 = vmatprep.subr.bf16.mxu1 %v11438_v0  ;;  %v13808_v14 = vadd.f32 %v9292_v13, %v13496_v15  ;;  %v13811_v20 = vadd.f32 %v9291_v1, %v13501_v25  ;;  %v13817_v47 = vadd.f32 %v9293_v41, %v13506_v28  ;;  %v1231_v16 = vpop.f32.mrb[34].mxu0  ;;  %v2787_v13 = vld [vmem:[#allocation9 + $0x1e8] sm:$0xff]  ;;  %v1344_v1 = vpop.f32.mrb[34].mxu1 }
 0x1c8   :  { %3506 = vmatprep.subr.bf16.mxu0 %v11436_v49  ;;  %14693 = vst [vmem:[#allocation60_spill] sm:$0xff] %v13796_v9  ;;  %14694 = vst [vmem:[#allocation61_spill] sm:$0xff] %v13799_v23  ;;  %v13814_v49 = vadd.f32 %v9285_v56, %v13506_v28  ;;  %v11444_v8 = vcombine.high %v2782_v52, %v2786_v44  ;;  %v13819_v4 = vpack.c.bf16 %v1231_v16, %v1227_v46  ;;  %v1233_v62 = vpop.f32.mrb[35].mxu0  ;;  %v1346_v56 = vpop.f32.mrb[35].mxu1  ;;  %v2790_v16 = vld [vmem:[#allocation9 + $0x200] sm:$0xff] }
 0x1c9   :  { %14695 = vst [vmem:[#allocation62_spill] sm:$0xff] %v13802_v50  ;;  %14696 = vst [vmem:[#allocation63_spill] sm:$0xff] %v13805_v12  ;;  %v11443_v0 = vcombine.low %v2782_v52, %v2786_v44  ;;  %v11445_v43 = vcombine.low %v2783_v27, %v2787_v13  ;;  %v11446_v58 = vcombine.high %v2783_v27, %v2787_v13  ;;  %v1599_v46 = vsub.s32 6, %v13474_v21 }
 0x1ca   :  { %14697 = vst [vmem:[#allocation64_spill] sm:$0xff] %v13808_v14  ;;  %14698 = vst [vmem:[#allocation65_spill] sm:$0xff] %v13811_v20  ;;  %3550 = vmatpush1.bf16.msra.mxu1 %v11437_v37  ;;  %v13821_v24 = vpack.c.bf16 %v1344_v1, %v1340_v48  ;;  %v13823_v42 = vpack.c.bf16 %v1233_v62, %v1229_v40  ;;  %v13825_v41 = vpack.c.bf16 %v1346_v56, %v1342_v30  ;;  %v2791_v48 = vld [vmem:[#allocation9 + $0x208] sm:$0xff]  ;;  %v2798_v62 = vld [vmem:[#allocation9 + $0x240] sm:$0xff] }
 0x1cb   :  { %14699 = vst [vmem:[#allocation66_spill] sm:$0xff] %v13814_v49  ;;  %14700 = vst [vmem:[#allocation67_spill] sm:$0xff] %v13817_v47  ;;  %3507 = vmatpush1.bf16.msra.mxu0 %v11435_v53  ;;  %v1591_v53 = vsub.s32 4, %v13474_v21  ;;  %3551 = vmatprep.subr.bf16.mxu1 %v11446_v58  ;;  %v2794_v47 = vld [vmem:[#allocation9 + $0x220] sm:$0xff]  ;;  %v1595_v37 = vsub.s32 5, %v13474_v21  ;;  %v1603_v52 = vsub.s32 7, %v13474_v21  ;;  %v13835_v14 = vrot.slane %v13483_v5, %v1599_v46 }
 0x1cc   :  { %3508 = vmatprep.subr.bf16.mxu0 %v11444_v8  ;;  %v2795_v40 = vld [vmem:[#allocation9 + $0x228] sm:$0xff]  ;;  %v11451_v13 = vcombine.low %v2790_v16, %v2794_v47  ;;  %v11452_v1 = vcombine.high %v2790_v16, %v2794_v47  ;;  %v2802_v58 = vld [vmem:[#allocation9 + $0x260] sm:$0xff] }
 0x1cd   :  { %v1237_v44 = vpop.f32.mrb[36].mxu0  ;;  %v1350_v27 = vpop.f32.mrb[36].mxu1  ;;  %v13832_v30 = vrot.slane %v13483_v5, %v1591_v53  ;;  %v11453_v21 = vcombine.low %v2791_v48, %v2795_v40  ;;  %v11460_v23 = vcombine.high %v2798_v62, %v2802_v58  ;;  %v2803_v49 = vld [vmem:[#allocation9 + $0x268] sm:$0xff]  ;;  %v13838_v53 = vrot.slane %v13483_v5, %v1595_v37  ;;  %v2810_v37 = vld [vmem:[#allocation9 + $0x2a0] sm:$0xff] }
 0x1ce   :  { %3552 = vmatpush1.bf16.msra.mxu1 %v11445_v43  ;;  %v1239_v8 = vpop.f32.mrb[37].mxu0  ;;  %v1352_v56 = vpop.f32.mrb[37].mxu1  ;;  %v11454_v43 = vcombine.high %v2791_v48, %v2795_v40  ;;  %v13841_v47 = vrot.slane %v13483_v5, %v1603_v52  ;;  %v11459_v46 = vcombine.low %v2798_v62, %v2802_v58  ;;  %v2818_v58 = vld [vmem:[#allocation9 + $0x2e0] sm:$0xff] }
 0x1cf   :  { %3509 = vmatpush1.bf16.msra.mxu0 %v11443_v0  ;;  %v2799_v0 = vld [vmem:[#allocation9 + $0x248] sm:$0xff]  ;;  %v1241_v20 = vpop.f32.mrb[38].mxu0  ;;  %v1354_v50 = vpop.f32.mrb[38].mxu1 }
 0x1d0   :  { %v1431_v12 = vpack.c.bf16 %v1241_v20, %v1237_v44  ;;  %v1243_v9 = vpop.f32.mrb[39].mxu0  ;;  %3510 = vmatprep.subr.bf16.mxu0 %v11452_v1  ;;  %v11462_v16 = vcombine.high %v2799_v0, %v2803_v49  ;;  %v1433_v61 = vpack.c.bf16 %v1354_v50, %v1350_v27  ;;  %v1356_v54 = vpop.f32.mrb[39].mxu1  ;;  %3553 = vmatprep.subr.bf16.mxu1 %v11454_v43  ;;  %v2806_v44 = vld [vmem:[#allocation9 + $0x280] sm:$0xff]  ;;  %v2811_v50 = vld [vmem:[#allocation9 + $0x2a8] sm:$0xff] }
 0x1d1   :  { %v1432_v19 = vpack.c.bf16 %v1243_v9, %v1239_v8  ;;  %v1434_v10 = vpack.c.bf16 %v1356_v54, %v1352_v56  ;;  %v11461_v20 = vcombine.low %v2799_v0, %v2803_v49  ;;  %v11467_v8 = vcombine.low %v2806_v44, %v2810_v37  ;;  %v2815_v0 = vld [vmem:[#allocation9 + $0x2c8] sm:$0xff] }
 0x1d2   :  { %v2698_v48 = vunpack.c.l.bf16 %v1431_v12  ;;  %v2706_v40 = vunpack.c.h.bf16 %v1431_v12  ;;  %3554 = vmatpush1.bf16.msra.mxu1 %v11453_v21  ;;  %v2700_v18 = vunpack.c.l.bf16 %v1433_v61  ;;  %v2708_v5 = vunpack.c.h.bf16 %v1433_v61 }
 0x1d3   :  { %3511 = vmatpush1.bf16.msra.mxu0 %v11451_v13  ;;  %v2699_v52 = vunpack.c.l.bf16 %v1432_v19  ;;  %v2707_v1 = vunpack.c.h.bf16 %v1432_v19  ;;  %3555 = vmatprep.subr.bf16.mxu1 %v11462_v16  ;;  %v2701_v9 = vunpack.c.l.bf16 %v1434_v10  ;;  %v2709_v27 = vunpack.c.h.bf16 %v1434_v10  ;;  %v2814_v19 = vld [vmem:[#allocation9 + $0x2c0] sm:$0xff] }
 0x1d4   :  { %3512 = vmatprep.subr.bf16.mxu0 %v11460_v23  ;;  %v11468_v13 = vcombine.high %v2806_v44, %v2810_v37  ;;  %v11469_v12 = vcombine.low %v2807_v7, %v2811_v50  ;;  %v11470_v54 = vcombine.high %v2807_v7, %v2811_v50  ;;  %v13844_v21 = vadd.f32 %v2698_v48, %v13832_v30 }
 0x1d5   :  { %v1247_v62 = vpop.f32.mrb[40].mxu0  ;;  %v13847_v23 = vadd.f32 %v2700_v18, %v13835_v14  ;;  %v1360_v49 = vpop.f32.mrb[40].mxu1  ;;  %v13850_v10 = vadd.f32 %v2699_v52, %v13838_v53  ;;  %v13853_v56 = vadd.f32 %v2701_v9, %v13841_v47  ;;  %v13856_v7 = vadd.f32 %v2706_v40, %v13832_v30 }
 0x1d6   :  { %v1249_v61 = vpop.f32.mrb[41].mxu0  ;;  %3556 = vmatpush1.bf16.msra.mxu1 %v11461_v20  ;;  %v1362_v43 = vpop.f32.mrb[41].mxu1  ;;  %v11476_v18 = vcombine.high %v2814_v19, %v2818_v58  ;;  %v13859_v48 = vadd.f32 %v2708_v5, %v13835_v14  ;;  %v13862_v20 = vadd.f32 %v2707_v1, %v13838_v53  ;;  %v13865_v44 = vadd.f32 %v2709_v27, %v13841_v47  ;;  %v2822_v1 = vld [vmem:[#allocation9 + $0x300] sm:$0xff] }
 0x1d7   :  { %3513 = vmatpush1.bf16.msra.mxu0 %v11459_v46  ;;  %v1251_v16 = vpop.f32.mrb[42].mxu0  ;;  %3557 = vmatprep.subr.bf16.mxu1 %v11470_v54  ;;  %v2819_v46 = vld [vmem:[#allocation9 + $0x2e8] sm:$0xff]  ;;  %v1364_v52 = vpop.f32.mrb[42].mxu1  ;;  %v11475_v54 = vcombine.low %v2814_v19, %v2818_v58  ;;  %v11485_v58 = vcombine.low %v2823_v26, %v2827_v3 }
 0x1d8   :  { %3514 = vmatprep.subr.bf16.mxu0 %v11468_v13  ;;  %v1439_v37 = vpack.c.bf16 %v1251_v16, %v1247_v62  ;;  %v1253_v50 = vpop.f32.mrb[43].mxu0  ;;  %v11478_v9 = vcombine.high %v2815_v0, %v2819_v46  ;;  %v1441_v40 = vpack.c.bf16 %v1364_v52, %v1360_v49  ;;  %v1366_v22 = vpop.f32.mrb[43].mxu1  ;;  %v11477_v5 = vcombine.low %v2815_v0, %v2819_v46  ;;  %v2830_v46 = vld [vmem:[#allocation9 + $0x340] sm:$0xff] }
 0x1d9   :  { %v1440_v13 = vpack.c.bf16 %v1253_v50, %v1249_v61  ;;  %v1442_v51 = vpack.c.bf16 %v1366_v22, %v1362_v43  ;;  %v11483_v52 = vcombine.low %v2822_v1, %v2826_v6  ;;  %v11486_v22 = vcombine.high %v2823_v26, %v2827_v3  ;;  %v2831_v50 = vld [vmem:[#allocation9 + $0x348] sm:$0xff] }
 0x1da   :  { %v3796_v34 = vunpack.c.l.bf16 %v1439_v37  ;;  %v3804_v36 = vunpack.c.h.bf16 %v1439_v37  ;;  %3558 = vmatpush1.bf16.msra.mxu1 %v11469_v12  ;;  %v3798_v27 = vunpack.c.l.bf16 %v1441_v40  ;;  %v3806_v17 = vunpack.c.h.bf16 %v1441_v40  ;;  %v2834_v37 = vld [vmem:[#allocation9 + $0x360] sm:$0xff]  ;;  %v2835_v40 = vld [vmem:[#allocation9 + $0x368] sm:$0xff] }
 0x1db   :  { %3515 = vmatpush1.bf16.msra.mxu0 %v11467_v8  ;;  %v3797_v62 = vunpack.c.l.bf16 %v1440_v13  ;;  %v3805_v16 = vunpack.c.h.bf16 %v1440_v13  ;;  %3559 = vmatprep.subr.bf16.mxu1 %v11478_v9  ;;  %v3799_v49 = vunpack.c.l.bf16 %v1442_v51  ;;  %v3807_v61 = vunpack.c.h.bf16 %v1442_v51 }
 0x1dc   :  { %3516 = vmatprep.subr.bf16.mxu0 %v11476_v18  ;;  %v11484_v8 = vcombine.high %v2822_v1, %v2826_v6  ;;  %v13868_v12 = vadd.f32 %v3796_v34, %v13832_v30  ;;  %v13871_v0 = vadd.f32 %v3798_v27, %v13835_v14  ;;  %v13880_v3 = vadd.f32 %v3804_v36, %v13832_v30 }
 0x1dd   :  { %v1257_v19 = vpop.f32.mrb[44].mxu0  ;;  %v1370_v43 = vpop.f32.mrb[44].mxu1  ;;  %v13874_v51 = vadd.f32 %v3797_v62, %v13838_v53  ;;  %v13877_v6 = vadd.f32 %v3799_v49, %v13841_v47  ;;  %v11492_v9 = vcombine.high %v2830_v46, %v2834_v37  ;;  %v13883_v13 = vadd.f32 %v3806_v17, %v13835_v14 }
 0x1de   :  { %14701 = vst [vmem:[#allocation68_spill] sm:$0xff] %v13868_v12  ;;  %14702 = vst [vmem:[#allocation69_spill] sm:$0xff] %v13871_v0  ;;  %v1259_v18 = vpop.f32.mrb[45].mxu0  ;;  %3560 = vmatpush1.bf16.msra.mxu1 %v11477_v5  ;;  %v1372_v26 = vpop.f32.mrb[45].mxu1  ;;  %v13889_v5 = vadd.f32 %v3807_v61, %v13841_v47  ;;  %v11494_v49 = vcombine.high %v2831_v50, %v2835_v40  ;;  %v11493_v17 = vcombine.low %v2831_v50, %v2835_v40  ;;  %v2843_v12 = vld [vmem:[#allocation9 + $0x3a8] sm:$0xff]  ;;  %v2846_v40 = vld [vmem:[#allocation9 + $0x3c0] sm:$0xff] }
 0x1df   :  { %3517 = vmatpush1.bf16.msra.mxu0 %v11475_v54  ;;  %14703 = vst [vmem:[#allocation70_spill] sm:$0xff] %v13874_v51  ;;  %14704 = vst [vmem:[#allocation71_spill] sm:$0xff] %v13877_v6  ;;  %v1261_v34 = vpop.f32.mrb[46].mxu0  ;;  %3561 = vmatprep.subr.bf16.mxu1 %v11486_v22  ;;  %v13886_v54 = vadd.f32 %v3805_v16, %v13838_v53  ;;  %v1374_v27 = vpop.f32.mrb[46].mxu1  ;;  %v11491_v22 = vcombine.low %v2830_v46, %v2834_v37  ;;  %v2838_v16 = vld [vmem:[#allocation9 + $0x380] sm:$0xff] }
 0x1e0   :  { %3518 = vmatprep.subr.bf16.mxu0 %v11484_v8  ;;  %14705 = vst [vmem:[#allocation72_spill] sm:$0xff] %v13880_v3  ;;  %14706 = vst [vmem:[#allocation73_spill] sm:$0xff] %v13883_v13  ;;  %v1447_v1 = vpack.c.bf16 %v1261_v34, %v1257_v19  ;;  %v1263_v62 = vpop.f32.mrb[47].mxu0  ;;  %v1449_v36 = vpack.c.bf16 %v1374_v27, %v1370_v43  ;;  %v1376_v3 = vpop.f32.mrb[47].mxu1  ;;  %v2839_v13 = vld [vmem:[#allocation9 + $0x388] sm:$0xff] }
 0x1e1   :  { %14707 = vst [vmem:[#allocation74_spill] sm:$0xff] %v13886_v54  ;;  %14708 = vst [vmem:[#allocation75_spill] sm:$0xff] %v13889_v5  ;;  %v1448_v8 = vpack.c.bf16 %v1263_v62, %v1259_v18  ;;  %v1450_v0 = vpack.c.bf16 %v1376_v3, %v1372_v26  ;;  %v2842_v54 = vld [vmem:[#allocation9 + $0x3a0] sm:$0xff]  ;;  %v11501_v37 = vcombine.low %v2839_v13, %v2843_v12  ;;  %v2847_v62 = vld [vmem:[#allocation9 + $0x3c8] sm:$0xff] }
 0x1e2   :  { %v4894_v6 = vunpack.c.l.bf16 %v1447_v1  ;;  %v4902_v51 = vunpack.c.h.bf16 %v1447_v1  ;;  %3562 = vmatpush1.bf16.msra.mxu1 %v11485_v58  ;;  %v4896_v61 = vunpack.c.l.bf16 %v1449_v36  ;;  %v4904_v5 = vunpack.c.h.bf16 %v1449_v36  ;;  %v2850_v1 = vld [vmem:[#allocation9 + $0x3e0] sm:$0xff]  ;;  %v2851_v36 = vld [vmem:[#allocation9 + $0x3e8] sm:$0xff] }
 0x1e3   :  { %3519 = vmatpush1.bf16.msra.mxu0 %v11483_v52  ;;  %v4895_v19 = vunpack.c.l.bf16 %v1448_v8  ;;  %v4903_v34 = vunpack.c.h.bf16 %v1448_v8  ;;  %3563 = vmatprep.subr.bf16.mxu1 %v11494_v49  ;;  %v4897_v43 = vunpack.c.l.bf16 %v1450_v0  ;;  %v4905_v18 = vunpack.c.h.bf16 %v1450_v0 }
 0x1e4   :  { %3520 = vmatprep.subr.bf16.mxu0 %v11492_v9  ;;  %v11499_v27 = vcombine.low %v2838_v16, %v2842_v54  ;;  %v11500_v52 = vcombine.high %v2838_v16, %v2842_v54  ;;  %v11502_v3 = vcombine.high %v2839_v13, %v2843_v12  ;;  %v13892_v58 = vadd.f32 %v4894_v6, %v13832_v30 }
 0x1e5   :  { %v1267_v46 = vpop.f32.mrb[48].mxu0  ;;  %v13895_v50 = vadd.f32 %v4896_v61, %v13835_v14  ;;  %v1380_v26 = vpop.f32.mrb[48].mxu1  ;;  %v13898_v0 = vadd.f32 %v4895_v19, %v13838_v53  ;;  %v13901_v54 = vadd.f32 %v4897_v43, %v13841_v47  ;;  %v13904_v12 = vadd.f32 %v4902_v51, %v13832_v30 }
 0x1e6   :  { %14709 = vst [vmem:[#allocation76_spill] sm:$0xff] %v13892_v58  ;;  %v1269_v9 = vpop.f32.mrb[49].mxu0  ;;  %3564 = vmatpush1.bf16.msra.mxu1 %v11493_v17  ;;  %v1382_v6 = vpop.f32.mrb[49].mxu1  ;;  %v11508_v49 = vcombine.high %v2846_v40, %v2850_v1  ;;  %v13907_v8 = vadd.f32 %v4904_v5, %v13835_v14  ;;  %v13913_v17 = vadd.f32 %v4905_v18, %v13841_v47  ;;  %v13919_v18 = vld [vmem:[#allocation9 + $0x18] sm:$0xff] }
 0x1e7   :  { %3521 = vmatpush1.bf16.msra.mxu0 %v11491_v22  ;;  %14710 = vst [vmem:[#allocation77_spill] sm:$0xff] %v13895_v50  ;;  %14711 = vst [vmem:[#allocation78_spill] sm:$0xff] %v13898_v0  ;;  %v1271_v13 = vpop.f32.mrb[50].mxu0  ;;  %3565 = vmatprep.subr.bf16.mxu1 %v11502_v3  ;;  %v13910_v22 = vadd.f32 %v4903_v34, %v13838_v53  ;;  %v1384_v61 = vpop.f32.mrb[50].mxu1  ;;  %v11510_v43 = vcombine.high %v2847_v62, %v2851_v36  ;;  %v13915_v34 = vld [vmem:[#allocation9 + $0x10] sm:$0xff] }
 0x1e8   :  { %3522 = vmatprep.subr.bf16.mxu0 %v11500_v52  ;;  %14712 = vst [vmem:[#allocation79_spill] sm:$0xff] %v13901_v54  ;;  %14713 = vst [vmem:[#allocation80_spill] sm:$0xff] %v13904_v12  ;;  %v1455_v16 = vpack.c.bf16 %v1271_v13, %v1267_v46  ;;  %v1273_v19 = vpop.f32.mrb[51].mxu0  ;;  %v1457_v51 = vpack.c.bf16 %v1384_v61, %v1380_v26  ;;  %v1386_v12 = vpop.f32.mrb[51].mxu1  ;;  %v11507_v3 = vcombine.low %v2846_v40, %v2850_v1 }
 0x1e9   :  { %14714 = vst [vmem:[#allocation81_spill] sm:$0xff] %v13907_v8  ;;  %14715 = vst [vmem:[#allocation82_spill] sm:$0xff] %v13910_v22  ;;  %v1456_v52 = vpack.c.bf16 %v1273_v19, %v1269_v9  ;;  %v1458_v50 = vpack.c.bf16 %v1386_v12, %v1382_v6  ;;  %v11509_v5 = vcombine.low %v2847_v62, %v2851_v36  ;;  %v13917_v22 = vld [vmem:[#allocation9 + $0x30] sm:$0xff]  ;;  %v13921_v9 = vld [vmem:[#allocation9 + $0x38] sm:$0xff] }
 0x1ea   :  { %14716 = vst [vmem:[#allocation83_spill] sm:$0xff] %v13913_v17  ;;  %v5992_v54 = vunpack.c.l.bf16 %v1455_v16  ;;  %v6000_v0 = vunpack.c.h.bf16 %v1455_v16  ;;  %3566 = vmatpush1.bf16.msra.mxu1 %v11501_v37  ;;  %v5994_v46 = vunpack.c.l.bf16 %v1457_v51  ;;  %v6002_v13 = vunpack.c.h.bf16 %v1457_v51 }
 0x1eb   :  { %3523 = vmatpush1.bf16.msra.mxu0 %v11499_v27  ;;  %v5993_v17 = vunpack.c.l.bf16 %v1456_v52  ;;  %v6001_v26 = vunpack.c.h.bf16 %v1456_v52  ;;  %3567 = vmatprep.subr.bf16.mxu1 %v11510_v43  ;;  %v5995_v27 = vunpack.c.l.bf16 %v1458_v50  ;;  %v6003_v40 = vunpack.c.h.bf16 %v1458_v50 }
 0x1ec   :  { %3524 = vmatprep.subr.bf16.mxu0 %v11508_v49  ;;  %v11392_v1 = vcombine.high %v13915_v34, %v13917_v22  ;;  %v11394_v6 = vcombine.high %v13919_v18, %v13921_v9  ;;  %v13932_v49 = vadd.f32 %v5992_v54, %v13832_v30  ;;  %v13935_v36 = vadd.f32 %v5994_v46, %v13835_v14 }
 0x1ed   :  { %v1277_v62 = vpop.f32.mrb[52].mxu0  ;;  %v1390_v50 = vpop.f32.mrb[52].mxu1  ;;  %v13938_v61 = vadd.f32 %v5993_v17, %v13838_v53  ;;  %v13941_v19 = vadd.f32 %v5995_v27, %v13841_v47  ;;  %v13944_v43 = vadd.f32 %v6000_v0, %v13832_v30  ;;  %v13947_v54 = vadd.f32 %v6002_v13, %v13835_v14 }
 0x1ee   :  { %14717 = vst [vmem:[#allocation84_spill] sm:$0xff] %v13932_v49  ;;  %14718 = vst [vmem:[#allocation85_spill] sm:$0xff] %v13935_v36  ;;  %v1279_v16 = vpop.f32.mrb[53].mxu0  ;;  %3568 = vmatpush1.bf16.msra.mxu1 %v11509_v5  ;;  %v1392_v51 = vpop.f32.mrb[53].mxu1  ;;  %v13953_v5 = vadd.f32 %v6003_v40, %v13841_v47 }
 0x1ef   :  { %3525 = vmatpush1.bf16.msra.mxu0 %v11507_v3  ;;  %14719 = vst [vmem:[#allocation86_spill] sm:$0xff] %v13938_v61  ;;  %14720 = vst [vmem:[#allocation87_spill] sm:$0xff] %v13941_v19  ;;  %v1281_v52 = vpop.f32.mrb[54].mxu0  ;;  %3623 = vmatprep.subr.bf16.mxu1 %v11394_v6  ;;  %v13950_v3 = vadd.f32 %v6001_v26, %v13838_v53  ;;  %v1394_v46 = vpop.f32.mrb[54].mxu1 }
 0x1f0   :  { %3580 = vmatprep.subr.bf16.mxu0 %v11392_v1  ;;  %14721 = vst [vmem:[#allocation88_spill] sm:$0xff] %v13944_v43  ;;  %14722 = vst [vmem:[#allocation89_spill] sm:$0xff] %v13947_v54  ;;  %v1463_v17 = vpack.c.bf16 %v1281_v52, %v1277_v62  ;;  %v1283_v1 = vpop.f32.mrb[55].mxu0  ;;  %v1465_v27 = vpack.c.bf16 %v1394_v46, %v1390_v50  ;;  %v1396_v37 = vpop.f32.mrb[55].mxu1 }
 0x1f1   :  { %14723 = vst [vmem:[#allocation90_spill] sm:$0xff] %v13950_v3  ;;  %14724 = vst [vmem:[#allocation91_spill] sm:$0xff] %v13953_v5  ;;  %v1464_v12 = vpack.c.bf16 %v1283_v1, %v1279_v16  ;;  %v1466_v19 = vpack.c.bf16 %v1396_v37, %v1392_v51 }
 0x1f2   :  { %v7090_v0 = vunpack.c.l.bf16 %v1463_v17  ;;  %v7098_v43 = vunpack.c.h.bf16 %v1463_v17  ;;  %v7092_v61 = vunpack.c.l.bf16 %v1465_v27  ;;  %v7100_v6 = vunpack.c.h.bf16 %v1465_v27 }
 0x1f3   :  { %v7091_v36 = vunpack.c.l.bf16 %v1464_v12  ;;  %v7099_v13 = vunpack.c.h.bf16 %v1464_v12  ;;  %v7093_v54 = vunpack.c.l.bf16 %v1466_v19  ;;  %v7101_v49 = vunpack.c.h.bf16 %v1466_v19 }
 0x1f4   :  { %v13956_v3 = vadd.f32 %v7090_v0, %v13832_v30  ;;  %v13959_v40 = vadd.f32 %v7092_v61, %v13835_v14  ;;  %v13968_v51 = vadd.f32 %v7098_v43, %v13832_v30  ;;  %v13971_v12 = vadd.f32 %v7100_v6, %v13835_v14 }
 0x1f5   :  { %v1287_v26 = vpop.f32.mrb[56].mxu0  ;;  %v1400_v62 = vpop.f32.mrb[56].mxu1  ;;  %v13962_v16 = vadd.f32 %v7091_v36, %v13838_v53  ;;  %v13965_v37 = vadd.f32 %v7093_v54, %v13841_v47  ;;  %v13974_v17 = vadd.f32 %v7099_v13, %v13838_v53  ;;  %v13977_v61 = vadd.f32 %v7101_v49, %v13841_v47 }
 0x1f6   :  { %14725 = vst [vmem:[#allocation92_spill] sm:$0xff] %v13956_v3  ;;  %14726 = vst [vmem:[#allocation93_spill] sm:$0xff] %v13959_v40  ;;  %v1289_v50 = vpop.f32.mrb[57].mxu0  ;;  %v1402_v19 = vpop.f32.mrb[57].mxu1  ;;  %v1556_v13 = vunpack.c.l.bf16 %v13472_v55  ;;  %v1564_v49 = vunpack.c.h.bf16 %v13472_v55 }
 0x1f7   :  { %14727 = vst [vmem:[#allocation94_spill] sm:$0xff] %v13962_v16  ;;  %14728 = vst [vmem:[#allocation95_spill] sm:$0xff] %v13965_v37  ;;  %v1291_v52 = vpop.f32.mrb[58].mxu0  ;;  %v1404_v36 = vpop.f32.mrb[58].mxu1 }
 0x1f8   :  { %14729 = vst [vmem:[#allocation96_spill] sm:$0xff] %v13968_v51  ;;  %14730 = vst [vmem:[#allocation97_spill] sm:$0xff] %v13971_v12  ;;  %v1471_v46 = vpack.c.bf16 %v1291_v52, %v1287_v26  ;;  %v1293_v1 = vpop.f32.mrb[59].mxu0  ;;  %v1473_v27 = vpack.c.bf16 %v1404_v36, %v1400_v62  ;;  %v1406_v0 = vpop.f32.mrb[59].mxu1  ;;  %v1566_v36 = vunpack.c.h.bf16 %v13476_v59 }
 0x1f9   :  { %14731 = vst [vmem:[#allocation98_spill] sm:$0xff] %v13974_v17  ;;  %14732 = vst [vmem:[#allocation99_spill] sm:$0xff] %v13977_v61  ;;  %v1472_v54 = vpack.c.bf16 %v1293_v1, %v1289_v50  ;;  %v1474_v51 = vpack.c.bf16 %v1406_v0, %v1402_v19  ;;  %v1559_v0 = vunpack.c.l.bf16 %v13480_v63 }
 0x1fa   :  { %v8188_v37 = vunpack.c.l.bf16 %v1471_v46  ;;  %v8196_v43 = vunpack.c.h.bf16 %v1471_v46  ;;  %v8190_v16 = vunpack.c.l.bf16 %v1473_v27  ;;  %v8198_v6 = vunpack.c.h.bf16 %v1473_v27 }
 0x1fb   :  { %v8189_v12 = vunpack.c.l.bf16 %v1472_v54  ;;  %v8197_v40 = vunpack.c.h.bf16 %v1472_v54  ;;  %v8191_v3 = vunpack.c.l.bf16 %v1474_v51  ;;  %v8199_v5 = vunpack.c.h.bf16 %v1474_v51 }
 0x1fc   :  { %v13982_v26 = vadd.f32 %v8188_v37, %v13832_v30  ;;  %v13985_v62 = vadd.f32 %v8190_v16, %v13835_v14  ;;  %v13994_v51 = vadd.f32 %v8196_v43, %v13832_v30  ;;  %v13997_v55 = vadd.f32 %v8198_v6, %v13835_v14 }
 0x1fd   :  { %v1297_v61 = vpop.f32.mrb[60].mxu0  ;;  %v1410_v50 = vpop.f32.mrb[60].mxu1  ;;  %v13988_v19 = vadd.f32 %v8189_v12, %v13838_v53  ;;  %v13991_v46 = vadd.f32 %v8191_v3, %v13841_v47  ;;  %v1558_v37 = vunpack.c.l.bf16 %v13476_v59  ;;  %v14002_v27 = vadd.f32 %v8197_v40, %v13838_v53 }
 0x1fe   :  { %14733 = vst [vmem:[#allocation100_spill] sm:$0xff] %v13982_v26  ;;  %14734 = vst [vmem:[#allocation101_spill] sm:$0xff] %v13985_v62  ;;  %v1299_v52 = vpop.f32.mrb[61].mxu0  ;;  %v1412_v16 = vpop.f32.mrb[61].mxu1  ;;  %v14005_v12 = vadd.f32 %v8199_v5, %v13841_v47  ;;  %v1557_v3 = vunpack.c.l.bf16 %v13478_v60  ;;  %v1565_v54 = vunpack.c.h.bf16 %v13478_v60  ;;  %v1613_v40 = vadd.f32 %v13491_v11, %v1556_v13 }
 0x1ff   :  { %14735 = vst [vmem:[#allocation102_spill] sm:$0xff] %v13988_v19  ;;  %14736 = vst [vmem:[#allocation103_spill] sm:$0xff] %v13991_v46  ;;  %v1301_v1 = vpop.f32.mrb[62].mxu0  ;;  %v1414_v6 = vpop.f32.mrb[62].mxu1 }
 0x200   :  { %14737 = vst [vmem:[#allocation104_spill] sm:$0xff] %v13994_v51  ;;  %14738 = vst [vmem:[#allocation105_spill] sm:$0xff] %v13997_v55  ;;  %v1479_v43 = vpack.c.bf16 %v1301_v1, %v1297_v61  ;;  %v1303_v55 = vpop.f32.mrb[63].mxu0  ;;  %v1567_v51 = vunpack.c.h.bf16 %v13480_v63  ;;  %v1481_v59 = vpack.c.bf16 %v1414_v6, %v1410_v50  ;;  %v1416_v19 = vpop.f32.mrb[63].mxu1  ;;  %v1615_v61 = vadd.f32 %v13496_v15, %v1558_v37 }
 0x201   :  { %14739 = vst [vmem:[#allocation106_spill] sm:$0xff] %v14002_v27  ;;  %14740 = vst [vmem:[#allocation107_spill] sm:$0xff] %v14005_v12  ;;  %v1480_v46 = vpack.c.bf16 %v1303_v55, %v1299_v52  ;;  %v1482_v5 = vpack.c.bf16 %v1416_v19, %v1412_v16  ;;  %v1621_v12 = vadd.f32 %v13491_v11, %v1564_v49 }
 0x202   :  { %v9286_v27 = vunpack.c.l.bf16 %v1479_v43  ;;  %v9294_v62 = vunpack.c.h.bf16 %v1479_v43  ;;  %v9288_v26 = vunpack.c.l.bf16 %v1481_v59  ;;  %v9296_v17 = vunpack.c.h.bf16 %v1481_v59 }
 0x203   :  { %v9287_v60 = vunpack.c.l.bf16 %v1480_v46  ;;  %v9295_v8 = vunpack.c.h.bf16 %v1480_v46  ;;  %v9289_v58 = vunpack.c.l.bf16 %v1482_v5  ;;  %v1614_v1 = vadd.f32 %v13501_v25, %v1557_v3 }
 0x204   :  { %v1623_v63 = vadd.f32 %v13496_v15, %v1566_v36  ;;  %v1616_v52 = vadd.f32 %v13506_v28, %v1559_v0  ;;  %v1622_v13 = vadd.f32 %v13501_v25, %v1565_v54  ;;  %v14019_v19 = vadd.f32 %v9286_v27, %v13832_v30 }
 0x205   :  { %v2431_v50 = vpop.f32.mrb[64].mxu0  ;;  %v14022_v11 = vadd.f32 %v9288_v26, %v13835_v14  ;;  %v2474_v46 = vpop.f32.mrb[64].mxu1  ;;  %v14025_v37 = vadd.f32 %v9287_v60, %v13838_v53  ;;  %v14028_v16 = vadd.f32 %v9289_v58, %v13841_v47  ;;  %v14031_v15 = vadd.f32 %v9294_v62, %v13832_v30 }
 0x206   :  { %v2569_v49 = vadd.f32 %v2431_v50, %v1613_v40  ;;  %v2433_v55 = vpop.f32.mrb[65].mxu0  ;;  %v2571_v36 = vadd.f32 %v2474_v46, %v1615_v61  ;;  %v2476_v3 = vpop.f32.mrb[65].mxu1  ;;  %v14034_v54 = vadd.f32 %v9296_v17, %v13835_v14  ;;  %v14037_v26 = vadd.f32 %v9295_v8, %v13838_v53 }
 0x207   :  { %v2570_v25 = vadd.f32 %v2433_v55, %v1614_v1  ;;  %v2435_v27 = vpop.f32.mrb[66].mxu0  ;;  %v2572_v0 = vadd.f32 %v2476_v3, %v1616_v52  ;;  %v2478_v6 = vpop.f32.mrb[66].mxu1  ;;  %v1624_v58 = vadd.f32 %v13506_v28, %v1567_v51  ;;  %v9297_v50 = vunpack.c.h.bf16 %v1482_v5 }
 0x208   :  { %14741 = vst [vmem:[#allocation108_spill] sm:$0xff] %v14034_v54  ;;  %v2577_v43 = vadd.f32 %v2435_v27, %v1621_v12  ;;  %v2437_v59 = vpop.f32.mrb[67].mxu0  ;;  %v2579_v40 = vadd.f32 %v2478_v6, %v1623_v63  ;;  %v2480_v62 = vpop.f32.mrb[67].mxu1  ;;  %v11375_v46 = vmul.f32 -1.442695, %v2569_v49 }
 0x209   :  { %v2578_v60 = vadd.f32 %v2437_v59, %v1622_v13  ;;  %v2580_v61 = vadd.f32 %v2480_v62, %v1624_v58  ;;  %v14041_v1 = vadd.f32 %v9297_v50, %v13841_v47  ;;  %v11379_v17 = vmul.f32 -1.442695, %v2571_v36 }
 0x20a   :  { %v11376_v55 = vmul.f32 -1.442695, %v2570_v25  ;;  %v11380_v54 = vmul.f32 -1.442695, %v2572_v0  ;;  %12565 = vpow2.f32 %v11375_v46  ;;  %v11377_v8 = vmul.f32 -1.442695, %v2577_v43 }
 0x20b   :  { %12567 = vpow2.f32 %v11379_v17  ;;  %v11381_v12 = vmul.f32 -1.442695, %v2579_v40  ;;  %v11378_v52 = vmul.f32 -1.442695, %v2578_v60  ;;  %v11382_v28 = vmul.f32 -1.442695, %v2580_v61 }
 0x20c   :  { %12569 = vpow2.f32 %v11376_v55  ;;  %v1560_v59 = vunpack.c.l.bf16 %v13819_v4  ;;  %v1562_v40 = vunpack.c.l.bf16 %v13821_v24  ;;  %v1561_v60 = vunpack.c.l.bf16 %v13823_v42 }
 0x20d   :  { %12571 = vpow2.f32 %v11380_v54  ;;  %v1568_v54 = vunpack.c.h.bf16 %v13819_v4  ;;  %v1570_v50 = vunpack.c.h.bf16 %v13821_v24  ;;  %v1563_v61 = vunpack.c.l.bf16 %v13825_v41 }
 0x20e   :  { %12573 = vpow2.f32 %v11377_v8  ;;  %v1569_v17 = vunpack.c.h.bf16 %v13823_v42  ;;  %v1571_v4 = vunpack.c.h.bf16 %v13825_v41  ;;  %v1617_v8 = vadd.f32 %v13832_v30, %v1560_v59 }
 0x20f   :  { %12575 = vpow2.f32 %v11381_v12  ;;  %v1625_v24 = vadd.f32 %v13832_v30, %v1568_v54  ;;  %v1620_v42 = vadd.f32 %v13841_v47, %v1563_v61 }
 0x210   :  { %12577 = vpow2.f32 %v11378_v52  ;;  %v1619_v52 = vadd.f32 %v13835_v14, %v1562_v40 }
 0x211   :  { %12579 = vpow2.f32 %v11382_v28  ;;  %v1618_v28 = vadd.f32 %v13838_v53, %v1561_v60 }
 0x214   :  { %v12566_v51 = vpop.eup %12565 }
 0x215   :  { %v12568_v5 = vpop.eup %12567  ;;  %v2597_v49 = vadd.f32 1.0, %v12566_v51 }
 0x216   :  { %v12570_v63 = vpop.eup %12569  ;;  %v2621_v25 = vadd.f32 1.0, %v12568_v5 }
 0x217   :  { %v12572_v13 = vpop.eup %12571  ;;  %v2598_v27 = vadd.f32 1.0, %v12570_v63  ;;  %12581 = vrcp.f32 %v2597_v49 }
 0x218   :  { %v12574_v36 = vpop.eup %12573  ;;  %v2622_v43 = vadd.f32 1.0, %v12572_v13  ;;  %12583 = vrcp.f32 %v2621_v25  ;;  %v1627_v13 = vadd.f32 %v13835_v14, %v1570_v50 }
 0x219   :  { %v12576_v3 = vpop.eup %12575  ;;  %v2599_v58 = vadd.f32 1.0, %v12574_v36  ;;  %12585 = vrcp.f32 %v2598_v27 }
 0x21a   :  { %v12578_v0 = vpop.eup %12577  ;;  %v2623_v62 = vadd.f32 1.0, %v12576_v3  ;;  %12587 = vrcp.f32 %v2622_v43  ;;  %v1626_v3 = vadd.f32 %v13838_v53, %v1569_v17 }
 0x21b   :  { %v12580_v6 = vpop.eup %12579  ;;  %v2600_v46 = vadd.f32 1.0, %v12578_v0  ;;  %12589 = vrcp.f32 %v2599_v58 }
 0x21c   :  { %v2624_v55 = vadd.f32 1.0, %v12580_v6  ;;  %12591 = vrcp.f32 %v2623_v62  ;;  %v1628_v6 = vadd.f32 %v13841_v47, %v1571_v4 }
 0x21d   :  { %12593 = vrcp.f32 %v2600_v46 }
 0x21e   :  { %12595 = vrcp.f32 %v2624_v55 }
 0x221   :  { %v12582_v14 = vpop.eup %12581 }
 0x222   :  { %v12584_v50 = vpop.eup %12583 }
 0x223   :  { %v12586_v53 = vpop.eup %12585 }
 0x224   :  { %v12588_v17 = vpop.eup %12587 }
 0x225   :  { %v12590_v55 = vpop.eup %12589 }
 0x226   :  { %v12592_v47 = vpop.eup %12591 }
 0x227   :  { %v12594_v4 = vpop.eup %12593 }
 0x245   :  { %v2517_v12 = vpop.f32.mrb[68].mxu0  ;;  %v2560_v5 = vpop.f32.mrb[68].mxu1 }
 0x246   :  { %v2573_v51 = vadd.f32 %v2517_v12, %v1617_v8  ;;  %v2519_v63 = vpop.f32.mrb[69].mxu0  ;;  %v2575_v41 = vadd.f32 %v2560_v5, %v1619_v52  ;;  %v2562_v36 = vpop.f32.mrb[69].mxu1  ;;  %v2662_v5 = vmul.f32 0.0, %v12588_v17 }
 0x247   :  { %v2574_v49 = vadd.f32 %v2519_v63, %v1618_v28  ;;  %v2521_v25 = vpop.f32.mrb[70].mxu0  ;;  %v2576_v27 = vadd.f32 %v2562_v36, %v1620_v42  ;;  %v2564_v43 = vpop.f32.mrb[70].mxu1  ;;  %v2661_v28 = vmul.f32 0.0, %v12584_v50 }
 0x248   :  { %12597 = vtanh.f32 %v2573_v51  ;;  %v2581_v0 = vadd.f32 %v2521_v25, %v1625_v24  ;;  %v2523_v30 = vpop.f32.mrb[71].mxu0  ;;  %v11383_v59 = vmul.f32 -1.442695, %v2575_v41  ;;  %v2583_v54 = vadd.f32 %v2564_v43, %v1627_v13  ;;  %v2566_v40 = vpop.f32.mrb[71].mxu1 }
 0x249   :  { %12599 = vtanh.f32 %v2574_v49  ;;  %v2582_v58 = vadd.f32 %v2523_v30, %v1626_v3  ;;  %v11384_v60 = vmul.f32 -1.442695, %v2576_v27  ;;  %v2584_v62 = vadd.f32 %v2566_v40, %v1628_v6  ;;  %v12596_v8 = vpop.eup %12595 }
 0x24a   :  { %12601 = vtanh.f32 %v2581_v0  ;;  %v11385_v61 = vmul.f32 -1.442695, %v2583_v54  ;;  %v2663_v13 = vmul.f32 0.0, %v12592_v47  ;;  %v2664_v54 = vmul.f32 0.0, %v12596_v8 }
 0x24b   :  { %12603 = vpow2.f32 %v11383_v59  ;;  %v11386_v46 = vmul.f32 -1.442695, %v2584_v62 }
 0x24c   :  { %12605 = vpow2.f32 %v11384_v60 }
 0x24d   :  { %12607 = vpow2.f32 %v11385_v61 }
 0x24e   :  { %12609 = vtanh.f32 %v2582_v58 }
 0x24f   :  { %12611 = vpow2.f32 %v11386_v46 }
 0x252   :  { %v12598_v12 = vpop.eup %12597 }
 0x253   :  { %v12600_v52 = vpop.eup %12599  ;;  %v2665_v24 = vmul.f32 %v12598_v12, %v12582_v14 }
 0x254   :  { %v12602_v51 = vpop.eup %12601  ;;  %v2666_v63 = vmul.f32 %v12600_v52, %v12586_v53 }
 0x255   :  { %v12604_v42 = vpop.eup %12603  ;;  %v14059_v41 = vadd.f32 %v2665_v24, %v2661_v28  ;;  %v2667_v49 = vmul.f32 %v12602_v51, %v12590_v55  ;;  %v2736_v28 = vld [vmem:[#allocation9 + $0x50] sm:$0xff]  ;;  %v2737_v51 = vld [vmem:[#allocation9 + $0x58] sm:$0xff] }
 0x256   :  { %v12606_v36 = vpop.eup %12605  ;;  %v2649_v25 = vadd.f32 1.0, %v12604_v42  ;;  %v14061_v3 = vadd.f32 %v2666_v63, %v2662_v5  ;;  %v2740_v24 = vld [vmem:[#allocation9 + $0x70] sm:$0xff]  ;;  %v2741_v5 = vld [vmem:[#allocation9 + $0x78] sm:$0xff] }
 0x257   :  { %v12608_v27 = vpop.eup %12607  ;;  %12613 = vtanh.f32 %v14059_v41  ;;  %v2650_v0 = vadd.f32 1.0, %v12606_v36  ;;  %v14064_v43 = vadd.f32 %v2667_v49, %v2663_v13  ;;  %v2744_v42 = vld [vmem:[#allocation9 + $0x90] sm:$0xff]  ;;  %v11400_v13 = vcombine.high %v2736_v28, %v2740_v24 }
 0x258   :  { %v12610_v30 = vpop.eup %12609  ;;  %12615 = vrcp.f32 %v2649_v25  ;;  %v2651_v6 = vadd.f32 1.0, %v12608_v27  ;;  %v11402_v49 = vcombine.high %v2737_v51, %v2741_v5  ;;  %v2748_v36 = vld [vmem:[#allocation9 + $0xb0] sm:$0xff]  ;;  %v2745_v25 = vld [vmem:[#allocation9 + $0x98] sm:$0xff] }
 0x259   :  { %v12612_v59 = vpop.eup %12611  ;;  %12617 = vtanh.f32 %v14061_v3  ;;  %v2668_v58 = vmul.f32 %v12610_v30, %v12594_v4  ;;  %v2749_v27 = vld [vmem:[#allocation9 + $0xb8] sm:$0xff]  ;;  %v14743_v30 = vcombine.low %v13919_v18, %v13921_v9 }
 0x25a   :  { %12619 = vrcp.f32 %v2650_v0  ;;  %v2652_v40 = vadd.f32 1.0, %v12612_v59  ;;  %v14742_v0 = vcombine.low %v13915_v34, %v13917_v22  ;;  %v11401_v59 = vcombine.low %v2737_v51, %v2741_v5  ;;  %v2773_v51 = vld [vmem:[#allocation9 + $0x178] sm:$0xff] }
 0x25b   :  { %12621 = vtanh.f32 %v14064_v43  ;;  %v14068_v14 = vadd.f32 %v2668_v58, %v2664_v54  ;;  %v11408_v54 = vcombine.high %v2744_v42, %v2748_v36  ;;  %v11410_v58 = vcombine.high %v2745_v25, %v2749_v27 }
 0x25c   :  { %12623 = vrcp.f32 %v2651_v6  ;;  %v11399_v6 = vcombine.low %v2736_v28, %v2740_v24  ;;  %v11407_v22 = vcombine.low %v2744_v42, %v2748_v36  ;;  %v11409_v34 = vcombine.low %v2745_v25, %v2749_v27  ;;  %v2772_v28 = vld [vmem:[#allocation9 + $0x170] sm:$0xff]  ;;  %v2769_v24 = vld [vmem:[#allocation9 + $0x158] sm:$0xff] }
 0x25d   :  { %12625 = vtanh.f32 %v14068_v14  ;;  %v2776_v36 = vld [vmem:[#allocation9 + $0x190] sm:$0xff]  ;;  %v2777_v27 = vld [vmem:[#allocation9 + $0x198] sm:$0xff] }
 0x25e   :  { %12627 = vrcp.f32 %v2652_v40  ;;  %v2752_v40 = vld [vmem:[#allocation9 + $0xd0] sm:$0xff] }
 0x25f   :  { %v2780_v25 = vld [vmem:[#allocation9 + $0x1b0] sm:$0xff] }
 0x261   :  { %v12614_v60 = vpop.eup %12613 }
 0x262   :  { %v12616_v62 = vpop.eup %12615 }
 0x263   :  { %v12618_v50 = vpop.eup %12617  ;;  %v2677_v55 = vmul.f32 %v12616_v62, %v12614_v60  ;;  %v2756_v60 = vld [vmem:[#allocation9 + $0xf0] sm:$0xff]  ;;  %v2753_v62 = vld [vmem:[#allocation9 + $0xd8] sm:$0xff] }
 0x264   :  { %v12620_v61 = vpop.eup %12619  ;;  %v11416_v18 = vcombine.high %v2752_v40, %v2756_v60 }
 0x265   :  { %v12622_v53 = vpop.eup %12621  ;;  %v2678_v8 = vmul.f32 %v12620_v61, %v12618_v50  ;;  %v2757_v50 = vld [vmem:[#allocation9 + $0xf8] sm:$0xff]  ;;  %v2760_v61 = vld [vmem:[#allocation9 + $0x110] sm:$0xff] }
 0x266   :  { %v12624_v46 = vpop.eup %12623  ;;  %v11418_v9 = vcombine.high %v2753_v62, %v2757_v50 }
 0x267   :  { %v12626_v17 = vpop.eup %12625  ;;  %v2679_v47 = vmul.f32 %v12624_v46, %v12622_v53  ;;  %v2764_v53 = vld [vmem:[#allocation9 + $0x130] sm:$0xff]  ;;  %v2761_v46 = vld [vmem:[#allocation9 + $0x118] sm:$0xff] }
 0x268   :  { %v12628_v4 = vpop.eup %12627  ;;  %v11423_v5 = vcombine.low %v2760_v61, %v2764_v53 }
 0x269   :  { %v2680_v12 = vmul.f32 %v12628_v4, %v12626_v17  ;;  %v14071_v52 = vpack.c.bf16 %v2679_v47, %v2677_v55  ;;  %v2765_v17 = vld [vmem:[#allocation9 + $0x138] sm:$0xff]  ;;  %v11415_v55 = vcombine.low %v2752_v40, %v2756_v60  ;;  %v11417_v47 = vcombine.low %v2753_v62, %v2757_v50  ;;  %v2788_v40 = vld [vmem:[#allocation9 + $0x1f0] sm:$0xff] }
 0x26a   :  { %v11424_v4 = vcombine.high %v2760_v61, %v2764_v53  ;;  %v11425_v42 = vcombine.low %v2761_v46, %v2765_v17  ;;  %v2785_v60 = vld [vmem:[#allocation9 + $0x1d8] sm:$0xff]  ;;  %v11439_v50 = vcombine.low %v2776_v36, %v2780_v25  ;;  %v2796_v61 = vld [vmem:[#allocation9 + $0x230] sm:$0xff] }
 0x26b   :  { %v14073_v63 = vpack.c.bf16 %v2680_v12, %v2678_v8  ;;  %v11426_v8 = vcombine.high %v2761_v46, %v2765_v17  ;;  %v2768_v12 = vld [vmem:[#allocation9 + $0x150] sm:$0xff]  ;;  %v2789_v62 = vld [vmem:[#allocation9 + $0x1f8] sm:$0xff] }
 0x26c   :  { %v2793_v53 = vld [vmem:[#allocation9 + $0x218] sm:$0xff] }
 0x26d   :  { %3526 = vmatprep.mubr.bf16.mxu0 %v14073_v63  ;;  %3569 = vmatprep.mubr.bf16.mxu1 %v14073_v63  ;;  %v2797_v46 = vld [vmem:[#allocation9 + $0x238] sm:$0xff] }
 0x26e   :  { %3527 = vmatmul.mubr.bf16.vlgmr.msra.gmra.mrb[72].mxu0 %v14071_v52  ;;  %3570 = vmatmul.mubr.bf16.vlgmr.msra.gmra.mrb[72].mxu1 %v14071_v52 }
 0x26f   :  { %3581 = vmatpush1.bf16.msra.mxu0 %v14742_v0  ;;  %3624 = vmatpush1.bf16.msra.mxu1 %v14743_v30  ;;  %v2781_v0 = vld [vmem:[#allocation9 + $0x1b8] sm:$0xff]  ;;  %v11431_v30 = vcombine.low %v2768_v12, %v2772_v28 }
 0x270   :  { %3612 = vmatprep.mubr.bf16.mxu0 %v14073_v63  ;;  %3655 = vmatprep.mubr.bf16.mxu1 %v14073_v63 }
 0x271   :  { %3582 = vmatprep.subr.bf16.mxu0 %v11400_v13  ;;  %3625 = vmatprep.subr.bf16.mxu1 %v11402_v49  ;;  %v11432_v13 = vcombine.high %v2768_v12, %v2772_v28  ;;  %v11434_v49 = vcombine.high %v2769_v24, %v2773_v51  ;;  %v2804_v12 = vld [vmem:[#allocation9 + $0x270] sm:$0xff]  ;;  %v2801_v28 = vld [vmem:[#allocation9 + $0x258] sm:$0xff] }
 0x273   :  { %3583 = vmatpush1.bf16.msra.mxu0 %v11399_v6  ;;  %3626 = vmatpush1.bf16.msra.mxu1 %v11401_v59  ;;  %v11433_v6 = vcombine.low %v2769_v24, %v2773_v51  ;;  %v11440_v59 = vcombine.high %v2776_v36, %v2780_v25  ;;  %v2805_v24 = vld [vmem:[#allocation9 + $0x278] sm:$0xff]  ;;  %v2812_v36 = vld [vmem:[#allocation9 + $0x2b0] sm:$0xff] }
 0x274   :  { %3584 = vmatprep.subr.bf16.mxu0 %v11408_v54  ;;  %3627 = vmatprep.subr.bf16.mxu1 %v11410_v58  ;;  %v11442_v54 = vcombine.high %v2777_v27, %v2781_v0  ;;  %v2784_v58 = vld [vmem:[#allocation9 + $0x1d0] sm:$0xff]  ;;  %v2809_v25 = vld [vmem:[#allocation9 + $0x298] sm:$0xff] }
 0x275   :  { %v11447_v17 = vcombine.low %v2784_v58, %v2788_v40 }
 0x277   :  { %3585 = vmatpush1.bf16.msra.mxu0 %v11407_v22  ;;  %3628 = vmatpush1.bf16.msra.mxu1 %v11409_v34  ;;  %v11441_v22 = vcombine.low %v2777_v27, %v2781_v0  ;;  %v11448_v34 = vcombine.high %v2784_v58, %v2788_v40  ;;  %v2813_v27 = vld [vmem:[#allocation9 + $0x2b8] sm:$0xff]  ;;  %v2820_v58 = vld [vmem:[#allocation9 + $0x2f0] sm:$0xff] }
 0x278   :  { %3586 = vmatprep.subr.bf16.mxu0 %v11416_v18  ;;  %3629 = vmatprep.subr.bf16.mxu1 %v11418_v9  ;;  %v11450_v18 = vcombine.high %v2785_v60, %v2789_v62  ;;  %v2792_v9 = vld [vmem:[#allocation9 + $0x210] sm:$0xff]  ;;  %v2817_v40 = vld [vmem:[#allocation9 + $0x2d8] sm:$0xff] }
 0x279   :  { %v11455_v51 = vcombine.low %v2792_v9, %v2796_v61 }
 0x27b   :  { %3587 = vmatpush1.bf16.msra.mxu0 %v11415_v55  ;;  %3630 = vmatpush1.bf16.msra.mxu1 %v11417_v47  ;;  %v11449_v55 = vcombine.low %v2785_v60, %v2789_v62  ;;  %v11456_v47 = vcombine.high %v2792_v9, %v2796_v61  ;;  %v2821_v60 = vld [vmem:[#allocation9 + $0x2f8] sm:$0xff]  ;;  %v2828_v9 = vld [vmem:[#allocation9 + $0x330] sm:$0xff] }
 0x27c   :  { %3588 = vmatprep.subr.bf16.mxu0 %v11424_v4  ;;  %3631 = vmatprep.subr.bf16.mxu1 %v11426_v8  ;;  %v11458_v4 = vcombine.high %v2793_v53, %v2797_v46  ;;  %v2800_v8 = vld [vmem:[#allocation9 + $0x250] sm:$0xff]  ;;  %v2825_v61 = vld [vmem:[#allocation9 + $0x318] sm:$0xff] }
 0x27d   :  { %v11463_v0 = vcombine.low %v2800_v8, %v2804_v12 }
 0x27f   :  { %3589 = vmatpush1.bf16.msra.mxu0 %v11423_v5  ;;  %3632 = vmatpush1.bf16.msra.mxu1 %v11425_v42  ;;  %v11457_v5 = vcombine.low %v2793_v53, %v2797_v46  ;;  %v11464_v42 = vcombine.high %v2800_v8, %v2804_v12  ;;  %v2829_v53 = vld [vmem:[#allocation9 + $0x338] sm:$0xff]  ;;  %v2836_v8 = vld [vmem:[#allocation9 + $0x370] sm:$0xff] }
 0x280   :  { %3590 = vmatprep.subr.bf16.mxu0 %v11432_v13  ;;  %3633 = vmatprep.subr.bf16.mxu1 %v11434_v49  ;;  %v11466_v13 = vcombine.high %v2801_v28, %v2805_v24  ;;  %v2808_v49 = vld [vmem:[#allocation9 + $0x290] sm:$0xff]  ;;  %v2833_v12 = vld [vmem:[#allocation9 + $0x358] sm:$0xff] }
 0x281   :  { %v11471_v62 = vcombine.low %v2808_v49, %v2812_v36 }
 0x283   :  { %3591 = vmatpush1.bf16.msra.mxu0 %v11431_v30  ;;  %3634 = vmatpush1.bf16.msra.mxu1 %v11433_v6  ;;  %v11465_v30 = vcombine.low %v2801_v28, %v2805_v24  ;;  %v11472_v6 = vcombine.high %v2808_v49, %v2812_v36  ;;  %v2837_v28 = vld [vmem:[#allocation9 + $0x378] sm:$0xff]  ;;  %v2844_v49 = vld [vmem:[#allocation9 + $0x3b0] sm:$0xff] }
 0x284   :  { %3592 = vmatprep.subr.bf16.mxu0 %v11440_v59  ;;  %3635 = vmatprep.subr.bf16.mxu1 %v11442_v54  ;;  %v11474_v59 = vcombine.high %v2809_v25, %v2813_v27  ;;  %v2816_v54 = vld [vmem:[#allocation9 + $0x2d0] sm:$0xff]  ;;  %v2841_v36 = vld [vmem:[#allocation9 + $0x398] sm:$0xff] }
 0x285   :  { %v11479_v46 = vcombine.low %v2816_v54, %v2820_v58 }
 0x287   :  { %3593 = vmatpush1.bf16.msra.mxu0 %v11439_v50  ;;  %3636 = vmatpush1.bf16.msra.mxu1 %v11441_v22  ;;  %v11473_v50 = vcombine.low %v2809_v25, %v2813_v27  ;;  %v11480_v22 = vcombine.high %v2816_v54, %v2820_v58  ;;  %v2845_v25 = vld [vmem:[#allocation9 + $0x3b8] sm:$0xff]  ;;  %v2852_v54 = vld [vmem:[#allocation9 + $0x3f0] sm:$0xff] }
 0x288   :  { %3594 = vmatprep.subr.bf16.mxu0 %v11448_v34  ;;  %3637 = vmatprep.subr.bf16.mxu1 %v11450_v18  ;;  %v11482_v34 = vcombine.high %v2817_v40, %v2821_v60  ;;  %v2824_v18 = vld [vmem:[#allocation9 + $0x310] sm:$0xff]  ;;  %v2849_v58 = vld [vmem:[#allocation9 + $0x3d8] sm:$0xff] }
 0x289   :  { %v11487_v24 = vcombine.low %v2824_v18, %v2828_v9 }
 0x28b   :  { %3595 = vmatpush1.bf16.msra.mxu0 %v11447_v17  ;;  %3638 = vmatpush1.bf16.msra.mxu1 %v11449_v55  ;;  %v11481_v17 = vcombine.low %v2817_v40, %v2821_v60  ;;  %v11488_v55 = vcombine.high %v2824_v18, %v2828_v9  ;;  %v2853_v40 = vld [vmem:[#allocation9 + $0x3f8] sm:$0xff]  ;;  %v3824_v9 = vld [vmem:[#allocation9] sm:$0xff] }
 0x28c   :  { %3596 = vmatprep.subr.bf16.mxu0 %v11456_v47  ;;  %3639 = vmatprep.subr.bf16.mxu1 %v11458_v4  ;;  %v11490_v47 = vcombine.high %v2825_v61, %v2829_v53  ;;  %v2832_v4 = vld [vmem:[#allocation9 + $0x350] sm:$0xff]  ;;  %v11513_v18 = vcombine.low %v2849_v58, %v2853_v40 }
 0x28d   :  { %v11495_v27 = vcombine.low %v2832_v4, %v2836_v8 }
 0x28f   :  { %3597 = vmatpush1.bf16.msra.mxu0 %v11455_v51  ;;  %3640 = vmatpush1.bf16.msra.mxu1 %v11457_v5  ;;  %v11489_v51 = vcombine.low %v2825_v61, %v2829_v53  ;;  %v11496_v5 = vcombine.high %v2832_v4, %v2836_v8  ;;  %v3828_v61 = vld [vmem:[#allocation9 + $0x20] sm:$0xff]  ;;  %v3825_v53 = vld [vmem:[#allocation9 + $0x8] sm:$0xff] }
 0x290   :  { %3598 = vmatprep.subr.bf16.mxu0 %v11464_v42  ;;  %3641 = vmatprep.subr.bf16.mxu1 %v11466_v13  ;;  %v11498_v42 = vcombine.high %v2833_v12, %v2837_v28  ;;  %v2840_v13 = vld [vmem:[#allocation9 + $0x390] sm:$0xff]  ;;  %v3836_v4 = vld [vmem:[#allocation9 + $0x60] sm:$0xff] }
 0x291   :  { %v11503_v60 = vcombine.low %v2840_v13, %v2844_v49 }
 0x293   :  { %3599 = vmatpush1.bf16.msra.mxu0 %v11463_v0  ;;  %3642 = vmatpush1.bf16.msra.mxu1 %v11465_v30  ;;  %v11497_v0 = vcombine.low %v2833_v12, %v2837_v28  ;;  %v11504_v30 = vcombine.high %v2840_v13, %v2844_v49  ;;  %v3844_v13 = vld [vmem:[#allocation9 + $0xa0] sm:$0xff]  ;;  %v3841_v49 = vld [vmem:[#allocation9 + $0x88] sm:$0xff] }
 0x294   :  { %3600 = vmatprep.subr.bf16.mxu0 %v11472_v6  ;;  %3643 = vmatprep.subr.bf16.mxu1 %v11474_v59  ;;  %v11506_v6 = vcombine.high %v2841_v36, %v2845_v25  ;;  %v2848_v59 = vld [vmem:[#allocation9 + $0x3d0] sm:$0xff] }
 0x297   :  { %3601 = vmatpush1.bf16.msra.mxu0 %v11471_v62  ;;  %3644 = vmatpush1.bf16.msra.mxu1 %v11473_v50  ;;  %v11505_v62 = vcombine.low %v2841_v36, %v2845_v25  ;;  %v11512_v50 = vcombine.high %v2848_v59, %v2852_v54  ;;  %v3845_v36 = vld [vmem:[#allocation9 + $0xa8] sm:$0xff] }
 0x298   :  { %3602 = vmatprep.subr.bf16.mxu0 %v11480_v22  ;;  %3645 = vmatprep.subr.bf16.mxu1 %v11482_v34  ;;  %v11514_v22 = vcombine.high %v2849_v58, %v2853_v40  ;;  %v11511_v34 = vcombine.low %v2848_v59, %v2852_v54  ;;  %v3852_v59 = vld [vmem:[#allocation9 + $0xe0] sm:$0xff]  ;;  %v3849_v54 = vld [vmem:[#allocation9 + $0xc8] sm:$0xff] }
 0x299   :  { %v3853_v58 = vld [vmem:[#allocation9 + $0xe8] sm:$0xff] }
 0x29b   :  { %3603 = vmatpush1.bf16.msra.mxu0 %v11479_v46  ;;  %3646 = vmatpush1.bf16.msra.mxu1 %v11481_v17  ;;  %v11527_v46 = vcombine.low %v3824_v9, %v3828_v61  ;;  %v11528_v17 = vcombine.high %v3824_v9, %v3828_v61  ;;  %v3861_v9 = vld [vmem:[#allocation9 + $0x128] sm:$0xff] }
 0x29c   :  { %3604 = vmatprep.subr.bf16.mxu0 %v11488_v55  ;;  %3647 = vmatprep.subr.bf16.mxu1 %v11490_v47  ;;  %v3829_v55 = vld [vmem:[#allocation9 + $0x28] sm:$0xff]  ;;  %v3832_v47 = vld [vmem:[#allocation9 + $0x40] sm:$0xff] }
 0x29d   :  { %v11529_v8 = vcombine.low %v3825_v53, %v3829_v55  ;;  %v11530_v12 = vcombine.high %v3825_v53, %v3829_v55  ;;  %v11536_v28 = vcombine.high %v3832_v47, %v3836_v4  ;;  %v11535_v25 = vcombine.low %v3832_v47, %v3836_v4  ;;  %v3864_v55 = vld [vmem:[#allocation9 + $0x140] sm:$0xff]  ;;  %v3865_v4 = vld [vmem:[#allocation9 + $0x148] sm:$0xff] }
 0x29e   :  { %v11553_v53 = vcombine.low %v3849_v54, %v3853_v58  ;;  %v3868_v47 = vld [vmem:[#allocation9 + $0x160] sm:$0xff] }
 0x29f   :  { %3605 = vmatpush1.bf16.msra.mxu0 %v11487_v24  ;;  %3648 = vmatpush1.bf16.msra.mxu1 %v11489_v51  ;;  %v3833_v24 = vld [vmem:[#allocation9 + $0x48] sm:$0xff] }
 0x2a0   :  { %3606 = vmatprep.subr.bf16.mxu0 %v11496_v5  ;;  %3649 = vmatprep.subr.bf16.mxu1 %v11498_v42  ;;  %v3837_v51 = vld [vmem:[#allocation9 + $0x68] sm:$0xff]  ;;  %v3840_v5 = vld [vmem:[#allocation9 + $0x80] sm:$0xff] }
 0x2a1   :  { %v11538_v42 = vcombine.high %v3833_v24, %v3837_v51  ;;  %v11543_v40 = vcombine.low %v3840_v5, %v3844_v13 }
 0x2a3   :  { %3607 = vmatpush1.bf16.msra.mxu0 %v11495_v27  ;;  %3650 = vmatpush1.bf16.msra.mxu1 %v11497_v0  ;;  %v11537_v27 = vcombine.low %v3833_v24, %v3837_v51  ;;  %v11544_v0 = vcombine.high %v3840_v5, %v3844_v13  ;;  %v11568_v24 = vcombine.high %v3864_v55, %v3868_v47  ;;  %v3872_v5 = vld [vmem:[#allocation9 + $0x180] sm:$0xff]  ;;  %v3873_v13 = vld [vmem:[#allocation9 + $0x188] sm:$0xff] }
 0x2a4   :  { %3608 = vmatprep.subr.bf16.mxu0 %v11504_v30  ;;  %3651 = vmatprep.subr.bf16.mxu1 %v11506_v6  ;;  %v11546_v30 = vcombine.high %v3841_v49, %v3845_v36  ;;  %v3848_v6 = vld [vmem:[#allocation9 + $0xc0] sm:$0xff] }
 0x2a5   :  { %v11551_v61 = vcombine.low %v3848_v6, %v3852_v59 }
 0x2a7   :  { %3609 = vmatpush1.bf16.msra.mxu0 %v11503_v60  ;;  %3652 = vmatpush1.bf16.msra.mxu1 %v11505_v62  ;;  %v11545_v60 = vcombine.low %v3841_v49, %v3845_v36  ;;  %v11552_v62 = vcombine.high %v3848_v6, %v3852_v59  ;;  %v3877_v49 = vld [vmem:[#allocation9 + $0x1a8] sm:$0xff]  ;;  %v11567_v36 = vcombine.low %v3864_v55, %v3868_v47  ;;  %v3880_v59 = vld [vmem:[#allocation9 + $0x1c0] sm:$0xff] }
 0x2a8   :  { %3610 = vmatprep.subr.bf16.mxu0 %v11512_v50  ;;  %3653 = vmatprep.subr.bf16.mxu1 %v11514_v22  ;;  %v11554_v50 = vcombine.high %v3849_v54, %v3853_v58  ;;  %v3856_v22 = vld [vmem:[#allocation9 + $0x100] sm:$0xff]  ;;  %v11577_v6 = vcombine.low %v3873_v13, %v3877_v49  ;;  %v3881_v58 = vld [vmem:[#allocation9 + $0x1c8] sm:$0xff] }
 0x2a9   :  { %v3884_v54 = vld [vmem:[#allocation9 + $0x1e0] sm:$0xff] }
 0x2aa   :  { %v3896_v47 = vld [vmem:[#allocation9 + $0x240] sm:$0xff] }
 0x2ab   :  { %3611 = vmatpush1.bf16.msra.mxu0 %v11511_v34  ;;  %3654 = vmatpush1.bf16.msra.mxu1 %v11513_v18  ;;  %v3860_v34 = vld [vmem:[#allocation9 + $0x120] sm:$0xff]  ;;  %v3857_v18 = vld [vmem:[#allocation9 + $0x108] sm:$0xff] }
 0x2ac   :  { %4592 = vmatprep.subr.bf16.mxu0 %v11528_v17  ;;  %4635 = vmatprep.subr.bf16.mxu1 %v11530_v12  ;;  %v11562_v17 = vcombine.high %v3857_v18, %v3861_v9  ;;  %v11559_v12 = vcombine.low %v3856_v22, %v3860_v34 }
 0x2ae   :  { %3613 = vmatmul.mubr.bf16.vlgmr.msra.gmra.mrb[76].mxu0 %v14071_v52  ;;  %3656 = vmatmul.mubr.bf16.vlgmr.msra.gmra.mrb[76].mxu1 %v14071_v52 }
 0x2af   :  { %4593 = vmatpush1.bf16.msra.mxu0 %v11527_v46  ;;  %4636 = vmatpush1.bf16.msra.mxu1 %v11529_v8  ;;  %v11560_v46 = vcombine.high %v3856_v22, %v3860_v34  ;;  %v3869_v8 = vld [vmem:[#allocation9 + $0x168] sm:$0xff]  ;;  %v3888_v34 = vld [vmem:[#allocation9 + $0x200] sm:$0xff] }
 0x2b0   :  { %4594 = vmatprep.subr.bf16.mxu0 %v11536_v28  ;;  %4637 = vmatprep.subr.bf16.mxu1 %v11538_v42  ;;  %v11561_v28 = vcombine.low %v3857_v18, %v3861_v9  ;;  %v11570_v51 = vcombine.high %v3865_v4, %v3869_v8  ;;  %v3876_v42 = vld [vmem:[#allocation9 + $0x1a0] sm:$0xff]  ;;  %v3889_v9 = vld [vmem:[#allocation9 + $0x208] sm:$0xff] }
 0x2b1   :  { %v3892_v18 = vld [vmem:[#allocation9 + $0x220] sm:$0xff] }
 0x2b3   :  { %4595 = vmatpush1.bf16.msra.mxu0 %v11535_v25  ;;  %4638 = vmatpush1.bf16.msra.mxu1 %v11537_v27  ;;  %v11569_v25 = vcombine.low %v3865_v4, %v3869_v8  ;;  %v11576_v27 = vcombine.high %v3872_v5, %v3876_v42  ;;  %v3900_v4 = vld [vmem:[#allocation9 + $0x260] sm:$0xff]  ;;  %v3897_v8 = vld [vmem:[#allocation9 + $0x248] sm:$0xff] }
 0x2b4   :  { %4596 = vmatprep.subr.bf16.mxu0 %v11544_v0  ;;  %4639 = vmatprep.subr.bf16.mxu1 %v11546_v30  ;;  %v11578_v0 = vcombine.high %v3873_v13, %v3877_v49  ;;  %v11575_v30 = vcombine.low %v3872_v5, %v3876_v42  ;;  %v3904_v42 = vld [vmem:[#allocation9 + $0x280] sm:$0xff]  ;;  %v3905_v49 = vld [vmem:[#allocation9 + $0x288] sm:$0xff] }
 0x2b5   :  { %v3908_v13 = vld [vmem:[#allocation9 + $0x2a0] sm:$0xff] }
 0x2b7   :  { %4597 = vmatpush1.bf16.msra.mxu0 %v11543_v40  ;;  %4640 = vmatpush1.bf16.msra.mxu1 %v11545_v60  ;;  %v11584_v40 = vcombine.high %v3880_v59, %v3884_v54  ;;  %v3885_v60 = vld [vmem:[#allocation9 + $0x1e8] sm:$0xff] }
 0x2b8   :  { %4598 = vmatprep.subr.bf16.mxu0 %v11552_v62  ;;  %4641 = vmatprep.subr.bf16.mxu1 %v11554_v50  ;;  %v11583_v62 = vcombine.low %v3880_v59, %v3884_v54  ;;  %v11585_v50 = vcombine.low %v3881_v58, %v3885_v60  ;;  %v11586_v22 = vcombine.high %v3881_v58, %v3885_v60  ;;  %v3916_v59 = vld [vmem:[#allocation9 + $0x2e0] sm:$0xff]  ;;  %v3913_v54 = vld [vmem:[#allocation9 + $0x2c8] sm:$0xff] }
 0x2bb   :  { %4599 = vmatpush1.bf16.msra.mxu0 %v11551_v61  ;;  %4642 = vmatpush1.bf16.msra.mxu1 %v11553_v53  ;;  %v11592_v61 = vcombine.high %v3888_v34, %v3892_v18  ;;  %v3893_v53 = vld [vmem:[#allocation9 + $0x228] sm:$0xff] }
 0x2bc   :  { %4600 = vmatprep.subr.bf16.mxu0 %v11560_v46  ;;  %4643 = vmatprep.subr.bf16.mxu1 %v11562_v17  ;;  %v11591_v46 = vcombine.low %v3888_v34, %v3892_v18  ;;  %v11593_v17 = vcombine.low %v3889_v9, %v3893_v53  ;;  %v11594_v55 = vcombine.high %v3889_v9, %v3893_v53  ;;  %v3924_v34 = vld [vmem:[#allocation9 + $0x320] sm:$0xff]  ;;  %v3921_v18 = vld [vmem:[#allocation9 + $0x308] sm:$0xff] }
 0x2bf   :  { %4601 = vmatpush1.bf16.msra.mxu0 %v11559_v12  ;;  %4644 = vmatpush1.bf16.msra.mxu1 %v11561_v28  ;;  %v11600_v12 = vcombine.high %v3896_v47, %v3900_v4  ;;  %v3901_v28 = vld [vmem:[#allocation9 + $0x268] sm:$0xff] }
 0x2c0   :  { %4602 = vmatprep.subr.bf16.mxu0 %v11568_v24  ;;  %4645 = vmatprep.subr.bf16.mxu1 %v11570_v51  ;;  %v11599_v24 = vcombine.low %v3896_v47, %v3900_v4  ;;  %v11601_v51 = vcombine.low %v3897_v8, %v3901_v28  ;;  %v11602_v5 = vcombine.high %v3897_v8, %v3901_v28  ;;  %v3932_v47 = vld [vmem:[#allocation9 + $0x360] sm:$0xff]  ;;  %v3929_v4 = vld [vmem:[#allocation9 + $0x348] sm:$0xff] }
 0x2c3   :  { %4603 = vmatpush1.bf16.msra.mxu0 %v11567_v36  ;;  %4646 = vmatpush1.bf16.msra.mxu1 %v11569_v25  ;;  %v11608_v36 = vcombine.high %v3904_v42, %v3908_v13  ;;  %v3909_v25 = vld [vmem:[#allocation9 + $0x2a8] sm:$0xff] }
 0x2c4   :  { %4604 = vmatprep.subr.bf16.mxu0 %v11576_v27  ;;  %4647 = vmatprep.subr.bf16.mxu1 %v11578_v0  ;;  %v11607_v27 = vcombine.low %v3904_v42, %v3908_v13  ;;  %v11609_v0 = vcombine.low %v3905_v49, %v3909_v25  ;;  %v3940_v42 = vld [vmem:[#allocation9 + $0x3a0] sm:$0xff]  ;;  %v3937_v13 = vld [vmem:[#allocation9 + $0x388] sm:$0xff] }
 0x2c7   :  { %4605 = vmatpush1.bf16.msra.mxu0 %v11575_v30  ;;  %4648 = vmatpush1.bf16.msra.mxu1 %v11577_v6  ;;  %v11610_v30 = vcombine.high %v3905_v49, %v3909_v25  ;;  %v3912_v6 = vld [vmem:[#allocation9 + $0x2c0] sm:$0xff] }
 0x2c8   :  { %4606 = vmatprep.subr.bf16.mxu0 %v11584_v40  ;;  %4649 = vmatprep.subr.bf16.mxu1 %v11586_v22  ;;  %v11616_v58 = vcombine.high %v3912_v6, %v3916_v59  ;;  %v3917_v40 = vld [vmem:[#allocation9 + $0x2e8] sm:$0xff]  ;;  %v11615_v60 = vcombine.low %v3912_v6, %v3916_v59  ;;  %v3920_v22 = vld [vmem:[#allocation9 + $0x300] sm:$0xff] }
 0x2c9   :  { %v11624_v9 = vcombine.high %v3920_v22, %v3924_v34  ;;  %v11623_v53 = vcombine.low %v3920_v22, %v3924_v34  ;;  %v3948_v6 = vld [vmem:[#allocation9 + $0x3e0] sm:$0xff]  ;;  %v3945_v59 = vld [vmem:[#allocation9 + $0x3c8] sm:$0xff]  ;;  %v14091_v22 = vld [vmem:[#allocation9 + $0x30] sm:$0xff] }
 0x2ca   :  { %v14093_v34 = vld [vmem:[#allocation9 + $0x18] sm:$0xff] }
 0x2cb   :  { %4607 = vmatpush1.bf16.msra.mxu0 %v11583_v62  ;;  %4650 = vmatpush1.bf16.msra.mxu1 %v11585_v50  ;;  %v11617_v62 = vcombine.low %v3913_v54, %v3917_v40  ;;  %v11618_v50 = vcombine.high %v3913_v54, %v3917_v40 }
 0x2cc   :  { %4608 = vmatprep.subr.bf16.mxu0 %v11592_v61  ;;  %4651 = vmatprep.subr.bf16.mxu1 %v11594_v55  ;;  %v3925_v61 = vld [vmem:[#allocation9 + $0x328] sm:$0xff]  ;;  %v3928_v55 = vld [vmem:[#allocation9 + $0x340] sm:$0xff] }
 0x2cd   :  { %v11632_v8 = vcombine.high %v3928_v55, %v3932_v47  ;;  %v11631_v28 = vcombine.low %v3928_v55, %v3932_v47 }
 0x2cf   :  { %4609 = vmatpush1.bf16.msra.mxu0 %v11591_v46  ;;  %4652 = vmatpush1.bf16.msra.mxu1 %v11593_v17  ;;  %v11625_v46 = vcombine.low %v3921_v18, %v3925_v61  ;;  %v11626_v17 = vcombine.high %v3921_v18, %v3925_v61 }
 0x2d0   :  { %4610 = vmatprep.subr.bf16.mxu0 %v11600_v12  ;;  %4653 = vmatprep.subr.bf16.mxu1 %v11602_v5  ;;  %v3933_v12 = vld [vmem:[#allocation9 + $0x368] sm:$0xff]  ;;  %v3936_v5 = vld [vmem:[#allocation9 + $0x380] sm:$0xff] }
 0x2d1   :  { %v11640_v49 = vcombine.high %v3936_v5, %v3940_v42  ;;  %v11639_v25 = vcombine.low %v3936_v5, %v3940_v42 }
 0x2d3   :  { %4611 = vmatpush1.bf16.msra.mxu0 %v11599_v24  ;;  %4654 = vmatpush1.bf16.msra.mxu1 %v11601_v51  ;;  %v11633_v24 = vcombine.low %v3929_v4, %v3933_v12  ;;  %v11634_v51 = vcombine.high %v3929_v4, %v3933_v12 }
 0x2d4   :  { %4612 = vmatprep.subr.bf16.mxu0 %v11608_v36  ;;  %4655 = vmatprep.subr.bf16.mxu1 %v11610_v30  ;;  %v3941_v36 = vld [vmem:[#allocation9 + $0x3a8] sm:$0xff]  ;;  %v3944_v30 = vld [vmem:[#allocation9 + $0x3c0] sm:$0xff] }
 0x2d5   :  { %v11648_v54 = vcombine.high %v3944_v30, %v3948_v6  ;;  %v11647_v40 = vcombine.low %v3944_v30, %v3948_v6 }
 0x2d7   :  { %4613 = vmatpush1.bf16.msra.mxu0 %v11607_v27  ;;  %4656 = vmatpush1.bf16.msra.mxu1 %v11609_v0  ;;  %v11641_v27 = vcombine.low %v3937_v13, %v3941_v36  ;;  %v11642_v0 = vcombine.high %v3937_v13, %v3941_v36 }
 0x2d8   :  { %4614 = vmatprep.subr.bf16.mxu0 %v11616_v58  ;;  %4657 = vmatprep.subr.bf16.mxu1 %v11618_v50  ;;  %v3949_v58 = vld [vmem:[#allocation9 + $0x3e8] sm:$0xff]  ;;  %v14089_v50 = vld [vmem:[#allocation9 + $0x10] sm:$0xff] }
 0x2d9   :  { %v11532_v18 = vcombine.high %v14089_v50, %v14091_v22  ;;  %v11531_v61 = vcombine.low %v14089_v50, %v14091_v22 }
 0x2db   :  { %4615 = vmatpush1.bf16.msra.mxu0 %v11615_v60  ;;  %4658 = vmatpush1.bf16.msra.mxu1 %v11617_v62  ;;  %v11649_v60 = vcombine.low %v3945_v59, %v3949_v58  ;;  %v11650_v62 = vcombine.high %v3945_v59, %v3949_v58 }
 0x2dc   :  { %4616 = vmatprep.subr.bf16.mxu0 %v11624_v9  ;;  %4659 = vmatprep.subr.bf16.mxu1 %v11626_v17  ;;  %v14097_v9 = vld [vmem:[#allocation9 + $0x38] sm:$0xff] }
 0x2df   :  { %4617 = vmatpush1.bf16.msra.mxu0 %v11623_v53  ;;  %4660 = vmatpush1.bf16.msra.mxu1 %v11625_v46  ;;  %v11533_v53 = vcombine.low %v14093_v34, %v14097_v9  ;;  %v11534_v46 = vcombine.high %v14093_v34, %v14097_v9 }
 0x2e0   :  { %4618 = vmatprep.subr.bf16.mxu0 %v11632_v8  ;;  %4661 = vmatprep.subr.bf16.mxu1 %v11634_v51 }
 0x2e3   :  { %4619 = vmatpush1.bf16.msra.mxu0 %v11631_v28  ;;  %4662 = vmatpush1.bf16.msra.mxu1 %v11633_v24 }
 0x2e4   :  { %4620 = vmatprep.subr.bf16.mxu0 %v11640_v49  ;;  %4663 = vmatprep.subr.bf16.mxu1 %v11642_v0 }
 0x2e7   :  { %4621 = vmatpush1.bf16.msra.mxu0 %v11639_v25  ;;  %4664 = vmatpush1.bf16.msra.mxu1 %v11641_v27 }
 0x2e8   :  { %4622 = vmatprep.subr.bf16.mxu0 %v11648_v54  ;;  %4665 = vmatprep.subr.bf16.mxu1 %v11650_v62 }
 0x2eb   :  { %4623 = vmatpush1.bf16.msra.mxu0 %v11647_v40  ;;  %4666 = vmatpush1.bf16.msra.mxu1 %v11649_v60 }
 0x2ec   :  { %4678 = vmatprep.subr.bf16.mxu0 %v11532_v18  ;;  %4721 = vmatprep.subr.bf16.mxu1 %v11534_v46 }
 0x341   :  { %v3528_v17 = vpop.f32.mrb[72].mxu0  ;;  %v3571_v55 = vpop.f32.mrb[72].mxu1 }
 0x342   :  { %v3666_v47 = vadd.f32 %v3528_v17, %v13509_v29  ;;  %v3668_v4 = vadd.f32 %v3571_v55, %v13515_v31  ;;  %v3530_v8 = vpop.f32.mrb[73].mxu0  ;;  %v3573_v12 = vpop.f32.mrb[73].mxu1 }
 0x343   :  { %v3667_v28 = vadd.f32 %v3530_v8, %v13518_v32  ;;  %v3669_v24 = vadd.f32 %v3573_v12, %v13527_v38  ;;  %v3532_v51 = vpop.f32.mrb[74].mxu0  ;;  %v3575_v5 = vpop.f32.mrb[74].mxu1 }
 0x344   :  { %v3674_v42 = vadd.f32 %v3532_v51, %v13512_v35  ;;  %v3676_v13 = vadd.f32 %v3575_v5, %v13521_v45  ;;  %v3534_v49 = vpop.f32.mrb[75].mxu0  ;;  %v3577_v36 = vpop.f32.mrb[75].mxu1  ;;  %v11515_v27 = vmul.f32 -1.442695, %v3666_v47  ;;  %v11519_v31 = vmul.f32 -1.442695, %v3668_v4 }
 0x345   :  { %v3675_v25 = vadd.f32 %v3534_v49, %v13524_v33  ;;  %v3677_v29 = vadd.f32 %v3577_v36, %v13530_v39  ;;  %v11516_v0 = vmul.f32 -1.442695, %v3667_v28  ;;  %v11520_v30 = vmul.f32 -1.442695, %v3669_v24 }
 0x346   :  { %12629 = vpow2.f32 %v11515_v27  ;;  %v11517_v32 = vmul.f32 -1.442695, %v3674_v42  ;;  %v11521_v38 = vmul.f32 -1.442695, %v3676_v13 }
 0x347   :  { %12631 = vpow2.f32 %v11519_v31  ;;  %v11518_v6 = vmul.f32 -1.442695, %v3675_v25  ;;  %v11522_v35 = vmul.f32 -1.442695, %v3677_v29 }
 0x348   :  { %12633 = vpow2.f32 %v11516_v0 }
 0x349   :  { %12635 = vpow2.f32 %v11520_v30 }
 0x34a   :  { %12637 = vpow2.f32 %v11517_v32 }
 0x34b   :  { %12639 = vpow2.f32 %v11521_v38 }
 0x34c   :  { %12641 = vpow2.f32 %v11518_v6 }
 0x34d   :  { %12643 = vpow2.f32 %v11522_v35 }
 0x350   :  { %v12630_v45 = vpop.eup %12629 }
 0x351   :  { %v12632_v33 = vpop.eup %12631  ;;  %v3694_v54 = vadd.f32 1.0, %v12630_v45 }
 0x352   :  { %v12634_v59 = vpop.eup %12633  ;;  %v3718_v40 = vadd.f32 1.0, %v12632_v33 }
 0x353   :  { %v12636_v39 = vpop.eup %12635  ;;  %v3695_v62 = vadd.f32 1.0, %v12634_v59  ;;  %12645 = vrcp.f32 %v3694_v54 }
 0x354   :  { %v12638_v58 = vpop.eup %12637  ;;  %v3719_v46 = vadd.f32 1.0, %v12636_v39  ;;  %12647 = vrcp.f32 %v3718_v40 }
 0x355   :  { %v12640_v60 = vpop.eup %12639  ;;  %v3696_v55 = vadd.f32 1.0, %v12638_v58  ;;  %12649 = vrcp.f32 %v3695_v62 }
 0x356   :  { %v12642_v18 = vpop.eup %12641  ;;  %v3720_v47 = vadd.f32 1.0, %v12640_v60  ;;  %12651 = vrcp.f32 %v3719_v46 }
 0x357   :  { %v12644_v17 = vpop.eup %12643  ;;  %v3697_v4 = vadd.f32 1.0, %v12642_v18  ;;  %12653 = vrcp.f32 %v3696_v55 }
 0x358   :  { %v3721_v8 = vadd.f32 1.0, %v12644_v17  ;;  %12655 = vrcp.f32 %v3720_v47 }
 0x359   :  { %12657 = vrcp.f32 %v3697_v4 }
 0x35a   :  { %12659 = vrcp.f32 %v3721_v8 }
 0x35d   :  { %v12646_v38 = vpop.eup %12645 }
 0x381   :  { %v3614_v12 = vpop.f32.mrb[76].mxu0  ;;  %v3657_v28 = vpop.f32.mrb[76].mxu1 }
 0x382   :  { %v3670_v24 = vadd.f32 %v3614_v12, %v13844_v21  ;;  %v3672_v51 = vadd.f32 %v3657_v28, %v13847_v23  ;;  %v3616_v5 = vpop.f32.mrb[77].mxu0  ;;  %v3659_v42 = vpop.f32.mrb[77].mxu1 }
 0x383   :  { %v3671_v13 = vadd.f32 %v3616_v5, %v13850_v10  ;;  %v3673_v49 = vadd.f32 %v3659_v42, %v13853_v56  ;;  %v3618_v36 = vpop.f32.mrb[78].mxu0  ;;  %v3661_v25 = vpop.f32.mrb[78].mxu1 }
 0x384   :  { %12661 = vtanh.f32 %v3670_v24  ;;  %v11523_v29 = vmul.f32 -1.442695, %v3672_v51  ;;  %v3678_v27 = vadd.f32 %v3618_v36, %v13856_v7  ;;  %v3680_v31 = vadd.f32 %v3661_v25, %v13859_v48  ;;  %v3620_v0 = vpop.f32.mrb[79].mxu0  ;;  %v3663_v30 = vpop.f32.mrb[79].mxu1 }
 0x385   :  { %12663 = vtanh.f32 %v3671_v13  ;;  %v11524_v21 = vmul.f32 -1.442695, %v3673_v49  ;;  %v3679_v23 = vadd.f32 %v3620_v0, %v13862_v20  ;;  %v3681_v32 = vadd.f32 %v3663_v30, %v13865_v44  ;;  %v12648_v56 = vpop.eup %12647 }
 0x386   :  { %12665 = vpow2.f32 %v11523_v29  ;;  %v11525_v10 = vmul.f32 -1.442695, %v3680_v31  ;;  %v12650_v35 = vpop.eup %12649  ;;  %v3758_v44 = vmul.f32 %v12648_v56, %v14059_v41  ;;  %v3835_v56 = vld [vmem:[#allocation9 + $0x58] sm:$0xff] }
 0x387   :  { %12667 = vpow2.f32 %v11524_v21  ;;  %v11526_v6 = vmul.f32 -1.442695, %v3681_v32  ;;  %v12652_v45 = vpop.eup %12651 }
 0x388   :  { %12669 = vtanh.f32 %v3678_v27  ;;  %v12654_v7 = vpop.eup %12653  ;;  %v3759_v40 = vmul.f32 %v12652_v45, %v14061_v3  ;;  %v3842_v45 = vld [vmem:[#allocation9 + $0x90] sm:$0xff] }
 0x389   :  { %12671 = vpow2.f32 %v11525_v10  ;;  %v12656_v48 = vpop.eup %12655  ;;  %v3838_v10 = vld [vmem:[#allocation9 + $0x70] sm:$0xff] }
 0x38a   :  { %12673 = vtanh.f32 %v3679_v23  ;;  %v12658_v33 = vpop.eup %12657  ;;  %v3760_v8 = vmul.f32 %v12656_v48, %v14064_v43 }
 0x38b   :  { %12675 = vpow2.f32 %v11526_v6  ;;  %v12660_v59 = vpop.eup %12659  ;;  %v3839_v6 = vld [vmem:[#allocation9 + $0x78] sm:$0xff] }
 0x38c   :  { %v3761_v3 = vmul.f32 %v12660_v59, %v14068_v14  ;;  %v11542_v48 = vcombine.high %v3835_v56, %v3839_v6  ;;  %v3843_v59 = vld [vmem:[#allocation9 + $0x98] sm:$0xff] }
 0x38e   :  { %v12662_v39 = vpop.eup %12661 }
 0x38f   :  { %v12664_v20 = vpop.eup %12663  ;;  %v3762_v54 = vmul.f32 %v12662_v39, %v12646_v38  ;;  %v3834_v38 = vld [vmem:[#allocation9 + $0x50] sm:$0xff]  ;;  %v3847_v39 = vld [vmem:[#allocation9 + $0xb8] sm:$0xff] }
 0x390   :  { %v12666_v58 = vpop.eup %12665  ;;  %v3763_v60 = vmul.f32 %v12664_v20, %v12650_v35  ;;  %v11539_v20 = vcombine.low %v3834_v38, %v3838_v10  ;;  %v11549_v22 = vcombine.low %v3843_v59, %v3847_v39 }
 0x391   :  { %v12668_v62 = vpop.eup %12667  ;;  %v14123_v18 = vadd.f32 %v3762_v54, %v3758_v44  ;;  %v3746_v46 = vadd.f32 1.0, %v12666_v58  ;;  %v11541_v44 = vcombine.low %v3835_v56, %v3839_v6  ;;  %v11550_v58 = vcombine.high %v3843_v59, %v3847_v39  ;;  %v3887_v56 = vld [vmem:[#allocation9 + $0x1f8] sm:$0xff]  ;;  %v3894_v59 = vld [vmem:[#allocation9 + $0x230] sm:$0xff] }
 0x392   :  { %v12670_v17 = vpop.eup %12669  ;;  %v14125_v55 = vadd.f32 %v3763_v60, %v3759_v40  ;;  %v3747_v47 = vadd.f32 1.0, %v12668_v62  ;;  %v3850_v40 = vld [vmem:[#allocation9 + $0xd0] sm:$0xff]  ;;  %v3851_v62 = vld [vmem:[#allocation9 + $0xd8] sm:$0xff] }
 0x393   :  { %v12672_v4 = vpop.eup %12671  ;;  %12677 = vtanh.f32 %v14123_v18  ;;  %v3764_v12 = vmul.f32 %v12670_v17, %v12654_v7  ;;  %v11540_v7 = vcombine.high %v3834_v38, %v3838_v10  ;;  %v3854_v60 = vld [vmem:[#allocation9 + $0xf0] sm:$0xff]  ;;  %v3859_v17 = vld [vmem:[#allocation9 + $0x118] sm:$0xff] }
 0x394   :  { %v12674_v41 = vpop.eup %12673  ;;  %12679 = vrcp.f32 %v3746_v46  ;;  %v3748_v28 = vadd.f32 1.0, %v12672_v4  ;;  %v3855_v46 = vld [vmem:[#allocation9 + $0xf8] sm:$0xff]  ;;  %v11556_v34 = vcombine.high %v3850_v40, %v3854_v60  ;;  %v11555_v4 = vcombine.low %v3850_v40, %v3854_v60  ;;  %v3886_v38 = vld [vmem:[#allocation9 + $0x1f0] sm:$0xff] }
 0x395   :  { %v12676_v24 = vpop.eup %12675  ;;  %12681 = vtanh.f32 %v14125_v55  ;;  %v14131_v51 = vadd.f32 %v3764_v12, %v3760_v8  ;;  %v3765_v5 = vmul.f32 %v12674_v41, %v12658_v33  ;;  %v3846_v33 = vld [vmem:[#allocation9 + $0xb0] sm:$0xff]  ;;  %v11558_v9 = vcombine.high %v3851_v62, %v3855_v46  ;;  %v3883_v10 = vld [vmem:[#allocation9 + $0x1d8] sm:$0xff] }
 0x396   :  { %12683 = vrcp.f32 %v3747_v47  ;;  %v3749_v42 = vadd.f32 1.0, %v12676_v24  ;;  %v11548_v54 = vcombine.high %v3842_v45, %v3846_v33  ;;  %v11547_v50 = vcombine.low %v3842_v45, %v3846_v33  ;;  %v3863_v47 = vld [vmem:[#allocation9 + $0x138] sm:$0xff]  ;;  %v3870_v24 = vld [vmem:[#allocation9 + $0x170] sm:$0xff] }
 0x397   :  { %12685 = vtanh.f32 %v14131_v51  ;;  %v14134_v13 = vadd.f32 %v3765_v5, %v3761_v3  ;;  %v11557_v8 = vcombine.low %v3851_v62, %v3855_v46  ;;  %v11566_v41 = vcombine.high %v3859_v17, %v3863_v47  ;;  %v3867_v3 = vld [vmem:[#allocation9 + $0x158] sm:$0xff]  ;;  %v3890_v33 = vld [vmem:[#allocation9 + $0x210] sm:$0xff] }
 0x398   :  { %12687 = vrcp.f32 %v3748_v28  ;;  %v3866_v28 = vld [vmem:[#allocation9 + $0x150] sm:$0xff]  ;;  %v3871_v5 = vld [vmem:[#allocation9 + $0x178] sm:$0xff] }
 0x399   :  { %12689 = vtanh.f32 %v14134_v13  ;;  %v3891_v39 = vld [vmem:[#allocation9 + $0x218] sm:$0xff]  ;;  %v3898_v60 = vld [vmem:[#allocation9 + $0x250] sm:$0xff] }
 0x39a   :  { %12691 = vrcp.f32 %v3749_v42  ;;  %v3902_v62 = vld [vmem:[#allocation9 + $0x270] sm:$0xff]  ;;  %v3899_v46 = vld [vmem:[#allocation9 + $0x258] sm:$0xff] }
 0x39d   :  { %v12678_v43 = vpop.eup %12677 }
 0x39e   :  { %v12680_v49 = vpop.eup %12679 }
 0x39f   :  { %v12682_v36 = vpop.eup %12681  ;;  %v3774_v31 = vmul.f32 %v12680_v49, %v12678_v43  ;;  %v11565_v43 = vcombine.low %v3859_v17, %v3863_v47  ;;  %v11572_v49 = vcombine.high %v3866_v28, %v3870_v24  ;;  %v3910_v17 = vld [vmem:[#allocation9 + $0x2b0] sm:$0xff]  ;;  %v3907_v47 = vld [vmem:[#allocation9 + $0x298] sm:$0xff] }
 0x3a0   :  { %v12684_v25 = vpop.eup %12683 }
 0x3a1   :  { %v12686_v14 = vpop.eup %12685  ;;  %v3775_v21 = vmul.f32 %v12684_v25, %v12682_v36  ;;  %v11574_v36 = vcombine.high %v3867_v3, %v3871_v5  ;;  %v3874_v25 = vld [vmem:[#allocation9 + $0x190] sm:$0xff] }
 0x3a2   :  { %v12688_v29 = vpop.eup %12687 }
 0x3a3   :  { %v12690_v27 = vpop.eup %12689  ;;  %v3776_v0 = vmul.f32 %v12688_v29, %v12686_v14  ;;  %v3878_v14 = vld [vmem:[#allocation9 + $0x1b0] sm:$0xff]  ;;  %v3875_v29 = vld [vmem:[#allocation9 + $0x198] sm:$0xff] }
 0x3a4   :  { %v12692_v30 = vpop.eup %12691  ;;  %v11579_v6 = vcombine.low %v3874_v25, %v3878_v14 }
 0x3a5   :  { %v3777_v23 = vmul.f32 %v12692_v30, %v12690_v27  ;;  %v14137_v32 = vpack.c.bf16 %v3776_v0, %v3774_v31  ;;  %v3879_v27 = vld [vmem:[#allocation9 + $0x1b8] sm:$0xff]  ;;  %v11571_v31 = vcombine.low %v3866_v28, %v3870_v24  ;;  %v11573_v0 = vcombine.low %v3867_v3, %v3871_v5  ;;  %v3914_v24 = vld [vmem:[#allocation9 + $0x2d0] sm:$0xff] }
 0x3a6   :  { %v11580_v30 = vcombine.high %v3874_v25, %v3878_v14  ;;  %v11581_v45 = vcombine.low %v3875_v29, %v3879_v27  ;;  %v3918_v3 = vld [vmem:[#allocation9 + $0x2f0] sm:$0xff]  ;;  %v3915_v5 = vld [vmem:[#allocation9 + $0x2d8] sm:$0xff] }
 0x3a7   :  { %v14139_v35 = vpack.c.bf16 %v3777_v23, %v3775_v21  ;;  %v11582_v21 = vcombine.high %v3875_v29, %v3879_v27  ;;  %v3882_v23 = vld [vmem:[#allocation9 + $0x1d0] sm:$0xff]  ;;  %v3923_v27 = vld [vmem:[#allocation9 + $0x318] sm:$0xff] }
 0x3a8   :  { %v3922_v14 = vld [vmem:[#allocation9 + $0x310] sm:$0xff] }
 0x3a9   :  { %4624 = vmatprep.mubr.bf16.mxu0 %v14139_v35  ;;  %4667 = vmatprep.mubr.bf16.mxu1 %v14139_v35  ;;  %v3926_v29 = vld [vmem:[#allocation9 + $0x330] sm:$0xff] }
 0x3aa   :  { %4625 = vmatmul.mubr.bf16.vlgmr.msra.gmra.mrb[80].mxu0 %v14137_v32  ;;  %4668 = vmatmul.mubr.bf16.vlgmr.msra.gmra.mrb[80].mxu1 %v14137_v32 }
 0x3ab   :  { %4679 = vmatpush1.bf16.msra.mxu0 %v11531_v61  ;;  %4722 = vmatpush1.bf16.msra.mxu1 %v11533_v53  ;;  %v3858_v61 = vld [vmem:[#allocation9 + $0x110] sm:$0xff] }
 0x3ac   :  { %4710 = vmatprep.mubr.bf16.mxu0 %v14139_v35  ;;  %4753 = vmatprep.mubr.bf16.mxu1 %v14139_v35  ;;  %v3862_v53 = vld [vmem:[#allocation9 + $0x130] sm:$0xff] }
 0x3ad   :  { %4680 = vmatprep.subr.bf16.mxu0 %v11540_v7  ;;  %4723 = vmatprep.subr.bf16.mxu1 %v11542_v48  ;;  %v11564_v12 = vcombine.high %v3858_v61, %v3862_v53  ;;  %v11563_v42 = vcombine.low %v3858_v61, %v3862_v53  ;;  %v11588_v7 = vcombine.high %v3882_v23, %v3886_v38  ;;  %v3906_v53 = vld [vmem:[#allocation9 + $0x290] sm:$0xff] }
 0x3ae   :  { %v11590_v48 = vcombine.high %v3883_v10, %v3887_v56 }
 0x3af   :  { %4681 = vmatpush1.bf16.msra.mxu0 %v11539_v20  ;;  %4724 = vmatpush1.bf16.msra.mxu1 %v11541_v44  ;;  %v3895_v20 = vld [vmem:[#allocation9 + $0x238] sm:$0xff]  ;;  %v11587_v44 = vcombine.low %v3882_v23, %v3886_v38  ;;  %v3930_v38 = vld [vmem:[#allocation9 + $0x350] sm:$0xff] }
 0x3b0   :  { %4682 = vmatprep.subr.bf16.mxu0 %v11548_v54  ;;  %4725 = vmatprep.subr.bf16.mxu1 %v11550_v58  ;;  %v11589_v54 = vcombine.low %v3883_v10, %v3887_v56  ;;  %v11596_v58 = vcombine.high %v3890_v33, %v3894_v59  ;;  %v11598_v40 = vcombine.high %v3891_v39, %v3895_v20  ;;  %v3934_v10 = vld [vmem:[#allocation9 + $0x370] sm:$0xff]  ;;  %v3931_v56 = vld [vmem:[#allocation9 + $0x358] sm:$0xff] }
 0x3b3   :  { %4683 = vmatpush1.bf16.msra.mxu0 %v11547_v50  ;;  %4726 = vmatpush1.bf16.msra.mxu1 %v11549_v22  ;;  %v3903_v50 = vld [vmem:[#allocation9 + $0x278] sm:$0xff]  ;;  %v11595_v22 = vcombine.low %v3890_v33, %v3894_v59  ;;  %v3938_v59 = vld [vmem:[#allocation9 + $0x390] sm:$0xff] }
 0x3b4   :  { %4684 = vmatprep.subr.bf16.mxu0 %v11556_v34  ;;  %4727 = vmatprep.subr.bf16.mxu1 %v11558_v9  ;;  %v11597_v34 = vcombine.low %v3891_v39, %v3895_v20  ;;  %v11604_v9 = vcombine.high %v3898_v60, %v3902_v62  ;;  %v11606_v61 = vcombine.high %v3899_v46, %v3903_v50  ;;  %v3942_v39 = vld [vmem:[#allocation9 + $0x3b0] sm:$0xff]  ;;  %v3939_v20 = vld [vmem:[#allocation9 + $0x398] sm:$0xff] }
 0x3b7   :  { %4685 = vmatpush1.bf16.msra.mxu0 %v11555_v4  ;;  %4728 = vmatpush1.bf16.msra.mxu1 %v11557_v8  ;;  %v3911_v4 = vld [vmem:[#allocation9 + $0x2b8] sm:$0xff]  ;;  %v11603_v8 = vcombine.low %v3898_v60, %v3902_v62  ;;  %v3946_v62 = vld [vmem:[#allocation9 + $0x3d0] sm:$0xff] }
 0x3b8   :  { %4686 = vmatprep.subr.bf16.mxu0 %v11564_v12  ;;  %4729 = vmatprep.subr.bf16.mxu1 %v11566_v41  ;;  %v11605_v12 = vcombine.low %v3899_v46, %v3903_v50  ;;  %v11612_v41 = vcombine.high %v3906_v53, %v3910_v17  ;;  %v11614_v28 = vcombine.high %v3907_v47, %v3911_v4  ;;  %v3950_v46 = vld [vmem:[#allocation9 + $0x3f0] sm:$0xff]  ;;  %v3947_v50 = vld [vmem:[#allocation9 + $0x3d8] sm:$0xff] }
 0x3bb   :  { %4687 = vmatpush1.bf16.msra.mxu0 %v11563_v42  ;;  %4730 = vmatpush1.bf16.msra.mxu1 %v11565_v43  ;;  %v3919_v42 = vld [vmem:[#allocation9 + $0x2f8] sm:$0xff]  ;;  %v11611_v43 = vcombine.low %v3906_v53, %v3910_v17  ;;  %v11651_v17 = vcombine.low %v3946_v62, %v3950_v46 }
 0x3bc   :  { %4688 = vmatprep.subr.bf16.mxu0 %v11572_v49  ;;  %4731 = vmatprep.subr.bf16.mxu1 %v11574_v36  ;;  %v11613_v49 = vcombine.low %v3907_v47, %v3911_v4  ;;  %v11620_v36 = vcombine.high %v3914_v24, %v3918_v3  ;;  %v11622_v25 = vcombine.high %v3915_v5, %v3919_v42  ;;  %v4922_v4 = vld [vmem:[#allocation9] sm:$0xff] }
 0x3bf   :  { %4689 = vmatpush1.bf16.msra.mxu0 %v11571_v31  ;;  %4732 = vmatpush1.bf16.msra.mxu1 %v11573_v0  ;;  %v3927_v31 = vld [vmem:[#allocation9 + $0x338] sm:$0xff]  ;;  %v11619_v0 = vcombine.low %v3914_v24, %v3918_v3  ;;  %v4927_v24 = vld [vmem:[#allocation9 + $0x28] sm:$0xff]  ;;  %v4930_v3 = vld [vmem:[#allocation9 + $0x40] sm:$0xff] }
 0x3c0   :  { %4690 = vmatprep.subr.bf16.mxu0 %v11580_v30  ;;  %4733 = vmatprep.subr.bf16.mxu1 %v11582_v21  ;;  %v11621_v30 = vcombine.low %v3915_v5, %v3919_v42  ;;  %v11628_v21 = vcombine.high %v3922_v14, %v3926_v29  ;;  %v11630_v23 = vcombine.high %v3923_v27, %v3927_v31  ;;  %v4934_v5 = vld [vmem:[#allocation9 + $0x60] sm:$0xff] }
 0x3c3   :  { %4691 = vmatpush1.bf16.msra.mxu0 %v11579_v6  ;;  %4734 = vmatpush1.bf16.msra.mxu1 %v11581_v45  ;;  %v3935_v6 = vld [vmem:[#allocation9 + $0x378] sm:$0xff]  ;;  %v11627_v45 = vcombine.low %v3922_v14, %v3926_v29  ;;  %v4938_v14 = vld [vmem:[#allocation9 + $0x80] sm:$0xff] }
 0x3c4   :  { %4692 = vmatprep.subr.bf16.mxu0 %v11588_v7  ;;  %4735 = vmatprep.subr.bf16.mxu1 %v11590_v48  ;;  %v11629_v7 = vcombine.low %v3923_v27, %v3927_v31  ;;  %v11636_v48 = vcombine.high %v3930_v38, %v3934_v10  ;;  %v11638_v33 = vcombine.high %v3931_v56, %v3935_v6  ;;  %v4942_v27 = vld [vmem:[#allocation9 + $0xa0] sm:$0xff]  ;;  %v4939_v31 = vld [vmem:[#allocation9 + $0x88] sm:$0xff] }
 0x3c7   :  { %4693 = vmatpush1.bf16.msra.mxu0 %v11587_v44  ;;  %4736 = vmatpush1.bf16.msra.mxu1 %v11589_v54  ;;  %v3943_v44 = vld [vmem:[#allocation9 + $0x3b8] sm:$0xff]  ;;  %v11635_v54 = vcombine.low %v3930_v38, %v3934_v10  ;;  %v4946_v10 = vld [vmem:[#allocation9 + $0xc0] sm:$0xff] }
 0x3c8   :  { %4694 = vmatprep.subr.bf16.mxu0 %v11596_v58  ;;  %4737 = vmatprep.subr.bf16.mxu1 %v11598_v40  ;;  %v11637_v58 = vcombine.low %v3931_v56, %v3935_v6  ;;  %v11644_v40 = vcombine.high %v3938_v59, %v3942_v39  ;;  %v11646_v60 = vcombine.high %v3939_v20, %v3943_v44  ;;  %v4950_v56 = vld [vmem:[#allocation9 + $0xe0] sm:$0xff]  ;;  %v4947_v6 = vld [vmem:[#allocation9 + $0xc8] sm:$0xff] }
 0x3cb   :  { %4695 = vmatpush1.bf16.msra.mxu0 %v11595_v22  ;;  %4738 = vmatpush1.bf16.msra.mxu1 %v11597_v34  ;;  %v3951_v22 = vld [vmem:[#allocation9 + $0x3f8] sm:$0xff]  ;;  %v11643_v34 = vcombine.low %v3938_v59, %v3942_v39  ;;  %v4954_v39 = vld [vmem:[#allocation9 + $0x100] sm:$0xff] }
 0x3cc   :  { %4696 = vmatprep.subr.bf16.mxu0 %v11604_v9  ;;  %4739 = vmatprep.subr.bf16.mxu1 %v11606_v61  ;;  %v11645_v9 = vcombine.low %v3939_v20, %v3943_v44  ;;  %v11652_v61 = vcombine.high %v3946_v62, %v3950_v46  ;;  %v11654_v53 = vcombine.high %v3947_v50, %v3951_v22  ;;  %v4958_v20 = vld [vmem:[#allocation9 + $0x120] sm:$0xff]  ;;  %v4955_v44 = vld [vmem:[#allocation9 + $0x108] sm:$0xff] }
 0x3cd   :  { %v11653_v47 = vcombine.low %v3947_v50, %v3951_v22  ;;  %v4962_v46 = vld [vmem:[#allocation9 + $0x140] sm:$0xff]  ;;  %v4963_v22 = vld [vmem:[#allocation9 + $0x148] sm:$0xff] }
 0x3ce   :  { %v4966_v50 = vld [vmem:[#allocation9 + $0x160] sm:$0xff] }
 0x3cf   :  { %4697 = vmatpush1.bf16.msra.mxu0 %v11603_v8  ;;  %4740 = vmatpush1.bf16.msra.mxu1 %v11605_v12  ;;  %v4926_v8 = vld [vmem:[#allocation9 + $0x20] sm:$0xff]  ;;  %v4923_v12 = vld [vmem:[#allocation9 + $0x8] sm:$0xff] }
 0x3d0   :  { %4698 = vmatprep.subr.bf16.mxu0 %v11612_v41  ;;  %4741 = vmatprep.subr.bf16.mxu1 %v11614_v28  ;;  %v11667_v41 = vcombine.low %v4922_v4, %v4926_v8  ;;  %v11668_v28 = vcombine.high %v4922_v4, %v4926_v8  ;;  %v11669_v42 = vcombine.low %v4923_v12, %v4927_v24  ;;  %v4974_v4 = vld [vmem:[#allocation9 + $0x1a0] sm:$0xff]  ;;  %v4971_v8 = vld [vmem:[#allocation9 + $0x188] sm:$0xff] }
 0x3d3   :  { %4699 = vmatpush1.bf16.msra.mxu0 %v11611_v43  ;;  %4742 = vmatpush1.bf16.msra.mxu1 %v11613_v49  ;;  %v11670_v43 = vcombine.high %v4923_v12, %v4927_v24  ;;  %v11676_v49 = vcombine.high %v4930_v3, %v4934_v5  ;;  %v4975_v12 = vld [vmem:[#allocation9 + $0x1a8] sm:$0xff] }
 0x3d4   :  { %4700 = vmatprep.subr.bf16.mxu0 %v11620_v36  ;;  %4743 = vmatprep.subr.bf16.mxu1 %v11622_v25  ;;  %v4931_v36 = vld [vmem:[#allocation9 + $0x48] sm:$0xff] }
 0x3d5   :  { %v4935_v25 = vld [vmem:[#allocation9 + $0x68] sm:$0xff] }
 0x3d6   :  { %v11678_v29 = vcombine.high %v4931_v36, %v4935_v25 }
 0x3d7   :  { %4701 = vmatpush1.bf16.msra.mxu0 %v11619_v0  ;;  %4744 = vmatpush1.bf16.msra.mxu1 %v11621_v30  ;;  %v4943_v0 = vld [vmem:[#allocation9 + $0xa8] sm:$0xff]  ;;  %v11675_v30 = vcombine.low %v4930_v3, %v4934_v5  ;;  %v11718_v3 = vcombine.high %v4971_v8, %v4975_v12 }
 0x3d8   :  { %4702 = vmatprep.subr.bf16.mxu0 %v11628_v21  ;;  %4745 = vmatprep.subr.bf16.mxu1 %v11630_v23  ;;  %v11677_v21 = vcombine.low %v4931_v36, %v4935_v25  ;;  %v11684_v23 = vcombine.high %v4938_v14, %v4942_v27  ;;  %v11686_v38 = vcombine.high %v4939_v31, %v4943_v0  ;;  %v4979_v36 = vld [vmem:[#allocation9 + $0x1c8] sm:$0xff] }
 0x3db   :  { %4703 = vmatpush1.bf16.msra.mxu0 %v11627_v45  ;;  %4746 = vmatpush1.bf16.msra.mxu1 %v11629_v7  ;;  %v4951_v45 = vld [vmem:[#allocation9 + $0xe8] sm:$0xff]  ;;  %v11683_v7 = vcombine.low %v4938_v14, %v4942_v27 }
 0x3dc   :  { %4704 = vmatprep.subr.bf16.mxu0 %v11636_v48  ;;  %4747 = vmatprep.subr.bf16.mxu1 %v11638_v33  ;;  %v11685_v48 = vcombine.low %v4939_v31, %v4943_v0  ;;  %v11692_v33 = vcombine.high %v4946_v10, %v4950_v56  ;;  %v11694_v59 = vcombine.high %v4947_v6, %v4951_v45  ;;  %v4983_v14 = vld [vmem:[#allocation9 + $0x1e8] sm:$0xff]  ;;  %v4986_v0 = vld [vmem:[#allocation9 + $0x200] sm:$0xff] }
 0x3dd   :  { %v11725_v27 = vcombine.low %v4979_v36, %v4983_v14  ;;  %v11726_v31 = vcombine.high %v4979_v36, %v4983_v14  ;;  %v5030_v36 = vld [vmem:[#allocation9 + $0x360] sm:$0xff] }
 0x3df   :  { %4705 = vmatpush1.bf16.msra.mxu0 %v11635_v54  ;;  %4748 = vmatpush1.bf16.msra.mxu1 %v11637_v58  ;;  %v4959_v54 = vld [vmem:[#allocation9 + $0x128] sm:$0xff]  ;;  %v11691_v58 = vcombine.low %v4946_v10, %v4950_v56 }
 0x3e0   :  { %4706 = vmatprep.subr.bf16.mxu0 %v11644_v40  ;;  %4749 = vmatprep.subr.bf16.mxu1 %v11646_v60  ;;  %v11693_v40 = vcombine.low %v4947_v6, %v4951_v45  ;;  %v11700_v60 = vcombine.high %v4954_v39, %v4958_v20  ;;  %v11702_v62 = vcombine.high %v4955_v44, %v4959_v54  ;;  %v4994_v45 = vld [vmem:[#allocation9 + $0x240] sm:$0xff] }
 0x3e3   :  { %4707 = vmatpush1.bf16.msra.mxu0 %v11643_v34  ;;  %4750 = vmatpush1.bf16.msra.mxu1 %v11645_v9  ;;  %v4967_v34 = vld [vmem:[#allocation9 + $0x168] sm:$0xff]  ;;  %v11699_v9 = vcombine.low %v4954_v39, %v4958_v20 }
 0x3e4   :  { %4708 = vmatprep.subr.bf16.mxu0 %v11652_v61  ;;  %4751 = vmatprep.subr.bf16.mxu1 %v11654_v53  ;;  %v11701_v61 = vcombine.low %v4955_v44, %v4959_v54  ;;  %v11708_v53 = vcombine.high %v4962_v46, %v4966_v50  ;;  %v5002_v54 = vld [vmem:[#allocation9 + $0x280] sm:$0xff] }
 0x3e7   :  { %4709 = vmatpush1.bf16.msra.mxu0 %v11651_v17  ;;  %4752 = vmatpush1.bf16.msra.mxu1 %v11653_v47  ;;  %v11710_v17 = vcombine.high %v4963_v22, %v4967_v34  ;;  %v4970_v47 = vld [vmem:[#allocation9 + $0x180] sm:$0xff] }
 0x3e8   :  { %5690 = vmatprep.subr.bf16.mxu0 %v11668_v28  ;;  %5733 = vmatprep.subr.bf16.mxu1 %v11670_v43  ;;  %v11709_v28 = vcombine.low %v4963_v22, %v4967_v34  ;;  %v11716_v24 = vcombine.high %v4970_v47, %v4974_v4  ;;  %v11715_v5 = vcombine.low %v4970_v47, %v4974_v4  ;;  %v4978_v43 = vld [vmem:[#allocation9 + $0x1c0] sm:$0xff] }
 0x3e9   :  { %v5010_v34 = vld [vmem:[#allocation9 + $0x2c0] sm:$0xff] }
 0x3ea   :  { %4711 = vmatmul.mubr.bf16.vlgmr.msra.gmra.mrb[84].mxu0 %v14137_v32  ;;  %4754 = vmatmul.mubr.bf16.vlgmr.msra.gmra.mrb[84].mxu1 %v14137_v32 }
 0x3eb   :  { %5691 = vmatpush1.bf16.msra.mxu0 %v11667_v41  ;;  %5734 = vmatpush1.bf16.msra.mxu1 %v11669_v42  ;;  %v11707_v41 = vcombine.low %v4962_v46, %v4966_v50  ;;  %v11717_v42 = vcombine.low %v4971_v8, %v4975_v12  ;;  %v5018_v12 = vld [vmem:[#allocation9 + $0x300] sm:$0xff] }
 0x3ec   :  { %5692 = vmatprep.subr.bf16.mxu0 %v11676_v49  ;;  %5735 = vmatprep.subr.bf16.mxu1 %v11678_v29  ;;  %v4982_v49 = vld [vmem:[#allocation9 + $0x1e0] sm:$0xff] }
 0x3ed   :  { %v11724_v25 = vcombine.high %v4978_v43, %v4982_v49  ;;  %v11723_v29 = vcombine.low %v4978_v43, %v4982_v49  ;;  %v5026_v49 = vld [vmem:[#allocation9 + $0x340] sm:$0xff] }
 0x3ee   :  { %v11772_v14 = vcombine.high %v5026_v49, %v5030_v36 }
 0x3ef   :  { %5693 = vmatpush1.bf16.msra.mxu0 %v11675_v30  ;;  %5736 = vmatpush1.bf16.msra.mxu1 %v11677_v21  ;;  %v4990_v30 = vld [vmem:[#allocation9 + $0x220] sm:$0xff]  ;;  %v4987_v21 = vld [vmem:[#allocation9 + $0x208] sm:$0xff] }
 0x3f0   :  { %5694 = vmatprep.subr.bf16.mxu0 %v11684_v23  ;;  %5737 = vmatprep.subr.bf16.mxu1 %v11686_v38  ;;  %v11732_v23 = vcombine.high %v4986_v0, %v4990_v30  ;;  %v4991_v38 = vld [vmem:[#allocation9 + $0x228] sm:$0xff]  ;;  %v11731_v10 = vcombine.low %v4986_v0, %v4990_v30  ;;  %v5034_v30 = vld [vmem:[#allocation9 + $0x380] sm:$0xff] }
 0x3f1   :  { %v11733_v56 = vcombine.low %v4987_v21, %v4991_v38  ;;  %v11734_v6 = vcombine.high %v4987_v21, %v4991_v38  ;;  %v5038_v21 = vld [vmem:[#allocation9 + $0x3a0] sm:$0xff] }
 0x3f2   :  { %v11780_v38 = vcombine.high %v5034_v30, %v5038_v21 }
 0x3f3   :  { %5695 = vmatpush1.bf16.msra.mxu0 %v11683_v7  ;;  %5738 = vmatpush1.bf16.msra.mxu1 %v11685_v48  ;;  %v4998_v7 = vld [vmem:[#allocation9 + $0x260] sm:$0xff]  ;;  %v4995_v48 = vld [vmem:[#allocation9 + $0x248] sm:$0xff] }
 0x3f4   :  { %5696 = vmatprep.subr.bf16.mxu0 %v11692_v33  ;;  %5739 = vmatprep.subr.bf16.mxu1 %v11694_v59  ;;  %v11740_v33 = vcombine.high %v4994_v45, %v4998_v7  ;;  %v4999_v59 = vld [vmem:[#allocation9 + $0x268] sm:$0xff]  ;;  %v11739_v39 = vcombine.low %v4994_v45, %v4998_v7  ;;  %v5042_v7 = vld [vmem:[#allocation9 + $0x3c0] sm:$0xff] }
 0x3f5   :  { %v11741_v20 = vcombine.low %v4995_v48, %v4999_v59  ;;  %v11742_v44 = vcombine.high %v4995_v48, %v4999_v59  ;;  %v5046_v48 = vld [vmem:[#allocation9 + $0x3e0] sm:$0xff] }
 0x3f6   :  { %v11788_v59 = vcombine.high %v5042_v7, %v5046_v48 }
 0x3f7   :  { %5697 = vmatpush1.bf16.msra.mxu0 %v11691_v58  ;;  %5740 = vmatpush1.bf16.msra.mxu1 %v11693_v40  ;;  %v5006_v58 = vld [vmem:[#allocation9 + $0x2a0] sm:$0xff]  ;;  %v5003_v40 = vld [vmem:[#allocation9 + $0x288] sm:$0xff] }
 0x3f8   :  { %5698 = vmatprep.subr.bf16.mxu0 %v11700_v60  ;;  %5741 = vmatprep.subr.bf16.mxu1 %v11702_v62  ;;  %v11748_v60 = vcombine.high %v5002_v54, %v5006_v58  ;;  %v5007_v62 = vld [vmem:[#allocation9 + $0x2a8] sm:$0xff]  ;;  %v11747_v46 = vcombine.low %v5002_v54, %v5006_v58  ;;  %v14155_v58 = vld [vmem:[#allocation9 + $0x10] sm:$0xff] }
 0x3f9   :  { %v11749_v50 = vcombine.low %v5003_v40, %v5007_v62  ;;  %v11750_v22 = vcombine.high %v5003_v40, %v5007_v62  ;;  %v14157_v40 = vld [vmem:[#allocation9 + $0x30] sm:$0xff] }
 0x3fa   :  { %v11672_v62 = vcombine.high %v14155_v58, %v14157_v40 }
 0x3fb   :  { %5699 = vmatpush1.bf16.msra.mxu0 %v11699_v9  ;;  %5742 = vmatpush1.bf16.msra.mxu1 %v11701_v61  ;;  %v5014_v9 = vld [vmem:[#allocation9 + $0x2e0] sm:$0xff]  ;;  %v5011_v61 = vld [vmem:[#allocation9 + $0x2c8] sm:$0xff] }
 0x3fc   :  { %5700 = vmatprep.subr.bf16.mxu0 %v11708_v53  ;;  %5743 = vmatprep.subr.bf16.mxu1 %v11710_v17  ;;  %v11756_v53 = vcombine.high %v5010_v34, %v5014_v9  ;;  %v5015_v17 = vld [vmem:[#allocation9 + $0x2e8] sm:$0xff]  ;;  %v11755_v47 = vcombine.low %v5010_v34, %v5014_v9 }
 0x3fd   :  { %v11757_v4 = vcombine.low %v5011_v61, %v5015_v17  ;;  %v11758_v8 = vcombine.high %v5011_v61, %v5015_v17 }
 0x3ff   :  { %5701 = vmatpush1.bf16.msra.mxu0 %v11707_v41  ;;  %5744 = vmatpush1.bf16.msra.mxu1 %v11709_v28  ;;  %v5022_v41 = vld [vmem:[#allocation9 + $0x320] sm:$0xff]  ;;  %v5019_v28 = vld [vmem:[#allocation9 + $0x308] sm:$0xff] }
 0x400   :  { %5702 = vmatprep.subr.bf16.mxu0 %v11716_v24  ;;  %5745 = vmatprep.subr.bf16.mxu1 %v11718_v3  ;;  %v11764_v24 = vcombine.high %v5018_v12, %v5022_v41  ;;  %v5023_v3 = vld [vmem:[#allocation9 + $0x328] sm:$0xff] }
 0x401   :  { %v11766_v43 = vcombine.high %v5019_v28, %v5023_v3 }
 0x403   :  { %5703 = vmatpush1.bf16.msra.mxu0 %v11715_v5  ;;  %5746 = vmatpush1.bf16.msra.mxu1 %v11717_v42  ;;  %v11763_v5 = vcombine.low %v5018_v12, %v5022_v41  ;;  %v11765_v42 = vcombine.low %v5019_v28, %v5023_v3  ;;  %v14745_v41 = vld [vmem:[#allocation26_spill] sm:$0xff] }
 0x404   :  { %5704 = vmatprep.subr.bf16.mxu0 %v11724_v25  ;;  %5747 = vmatprep.subr.bf16.mxu1 %v11726_v31  ;;  %v5027_v25 = vld [vmem:[#allocation9 + $0x348] sm:$0xff] }
 0x407   :  { %5705 = vmatpush1.bf16.msra.mxu0 %v11723_v29  ;;  %5748 = vmatpush1.bf16.msra.mxu1 %v11725_v27  ;;  %v5031_v29 = vld [vmem:[#allocation9 + $0x368] sm:$0xff]  ;;  %v11771_v27 = vcombine.low %v5026_v49, %v5030_v36 }
 0x408   :  { %5706 = vmatprep.subr.bf16.mxu0 %v11732_v23  ;;  %5749 = vmatprep.subr.bf16.mxu1 %v11734_v6  ;;  %v11773_v31 = vcombine.low %v5027_v25, %v5031_v29  ;;  %v11774_v0 = vcombine.high %v5027_v25, %v5031_v29  ;;  %v5035_v23 = vld [vmem:[#allocation9 + $0x388] sm:$0xff] }
 0x40b   :  { %5707 = vmatpush1.bf16.msra.mxu0 %v11731_v10  ;;  %5750 = vmatpush1.bf16.msra.mxu1 %v11733_v56  ;;  %v5039_v10 = vld [vmem:[#allocation9 + $0x3a8] sm:$0xff]  ;;  %v11779_v56 = vcombine.low %v5034_v30, %v5038_v21 }
 0x40c   :  { %5708 = vmatprep.subr.bf16.mxu0 %v11740_v33  ;;  %5751 = vmatprep.subr.bf16.mxu1 %v11742_v44  ;;  %v11781_v6 = vcombine.low %v5035_v23, %v5039_v10  ;;  %v11782_v45 = vcombine.high %v5035_v23, %v5039_v10  ;;  %v5043_v33 = vld [vmem:[#allocation9 + $0x3c8] sm:$0xff] }
 0x40f   :  { %5709 = vmatpush1.bf16.msra.mxu0 %v11739_v39  ;;  %5752 = vmatpush1.bf16.msra.mxu1 %v11741_v20  ;;  %v5047_v39 = vld [vmem:[#allocation9 + $0x3e8] sm:$0xff]  ;;  %v11787_v20 = vcombine.low %v5042_v7, %v5046_v48 }
 0x410   :  { %5710 = vmatprep.subr.bf16.mxu0 %v11748_v60  ;;  %5753 = vmatprep.subr.bf16.mxu1 %v11750_v22  ;;  %v11789_v44 = vcombine.low %v5043_v33, %v5047_v39  ;;  %v11790_v54 = vcombine.high %v5043_v33, %v5047_v39  ;;  %v14159_v60 = vld [vmem:[#allocation9 + $0x18] sm:$0xff] }
 0x413   :  { %5711 = vmatpush1.bf16.msra.mxu0 %v11747_v46  ;;  %5754 = vmatpush1.bf16.msra.mxu1 %v11749_v50  ;;  %v14163_v46 = vld [vmem:[#allocation9 + $0x38] sm:$0xff]  ;;  %v11671_v50 = vcombine.low %v14155_v58, %v14157_v40 }
 0x414   :  { %5712 = vmatprep.subr.bf16.mxu0 %v11756_v53  ;;  %5755 = vmatprep.subr.bf16.mxu1 %v11758_v8  ;;  %v11673_v22 = vcombine.low %v14159_v60, %v14163_v46  ;;  %v11674_v34 = vcombine.high %v14159_v60, %v14163_v46  ;;  %v14744_v8 = vld [vmem:[#allocation23_spill] sm:$0xff] }
 0x417   :  { %5713 = vmatpush1.bf16.msra.mxu0 %v11755_v47  ;;  %5756 = vmatpush1.bf16.msra.mxu1 %v11757_v4 }
 0x418   :  { %5714 = vmatprep.subr.bf16.mxu0 %v11764_v24  ;;  %5757 = vmatprep.subr.bf16.mxu1 %v11766_v43  ;;  %v14747_v43 = vld [vmem:[#allocation24_spill] sm:$0xff] }
 0x41b   :  { %5715 = vmatpush1.bf16.msra.mxu0 %v11763_v5  ;;  %5758 = vmatpush1.bf16.msra.mxu1 %v11765_v42  ;;  %v14746_v5 = vld [vmem:[#allocation22_spill] sm:$0xff] }
 0x41c   :  { %5716 = vmatprep.subr.bf16.mxu0 %v11772_v14  ;;  %5759 = vmatprep.subr.bf16.mxu1 %v11774_v0  ;;  %v14748_v14 = vld [vmem:[#allocation25_spill] sm:$0xff] }
 0x41f   :  { %5717 = vmatpush1.bf16.msra.mxu0 %v11771_v27  ;;  %5760 = vmatpush1.bf16.msra.mxu1 %v11773_v31  ;;  %v14749_v27 = vld [vmem:[#allocation27_spill] sm:$0xff] }
 0x420   :  { %5718 = vmatprep.subr.bf16.mxu0 %v11780_v38  ;;  %5761 = vmatprep.subr.bf16.mxu1 %v11782_v45 }
 0x423   :  { %5719 = vmatpush1.bf16.msra.mxu0 %v11779_v56  ;;  %5762 = vmatpush1.bf16.msra.mxu1 %v11781_v6 }
 0x424   :  { %5720 = vmatprep.subr.bf16.mxu0 %v11788_v59  ;;  %5763 = vmatprep.subr.bf16.mxu1 %v11790_v54 }
 0x427   :  { %5721 = vmatpush1.bf16.msra.mxu0 %v11787_v20  ;;  %5764 = vmatpush1.bf16.msra.mxu1 %v11789_v44 }
 0x428   :  { %5776 = vmatprep.subr.bf16.mxu0 %v11672_v62  ;;  %5819 = vmatprep.subr.bf16.mxu1 %v11674_v34 }
 0x47d   :  { %v4626_v9 = vpop.f32.mrb[80].mxu0  ;;  %v4669_v61 = vpop.f32.mrb[80].mxu1 }
 0x47e   :  { %v4764_v53 = vadd.f32 %v4626_v9, %v13533_v57  ;;  %v4766_v17 = vadd.f32 %v4669_v61, %v13539_v2  ;;  %v4628_v47 = vpop.f32.mrb[81].mxu0  ;;  %v4671_v4 = vpop.f32.mrb[81].mxu1 }
 0x47f   :  { %v4765_v12 = vadd.f32 %v4628_v47, %v14744_v8  ;;  %v4767_v28 = vadd.f32 %v4671_v4, %v14745_v41  ;;  %v4630_v24 = vpop.f32.mrb[82].mxu0  ;;  %v4673_v3 = vpop.f32.mrb[82].mxu1  ;;  %v14750_v4 = vld [vmem:[#allocation68_spill] sm:$0xff] }
 0x480   :  { %v4772_v42 = vadd.f32 %v4630_v24, %v14746_v5  ;;  %v4774_v49 = vadd.f32 %v4673_v3, %v14747_v43  ;;  %v4632_v36 = vpop.f32.mrb[83].mxu0  ;;  %v4675_v25 = vpop.f32.mrb[83].mxu1  ;;  %v11655_v31 = vmul.f32 -1.442695, %v4764_v53  ;;  %v11659_v2 = vmul.f32 -1.442695, %v4766_v17 }
 0x481   :  { %v4773_v29 = vadd.f32 %v4632_v36, %v14748_v14  ;;  %v4775_v57 = vadd.f32 %v4675_v25, %v14749_v27  ;;  %v11656_v0 = vmul.f32 -1.442695, %v4765_v12  ;;  %v11660_v30 = vmul.f32 -1.442695, %v4767_v28  ;;  %v14751_v12 = vld [vmem:[#allocation69_spill] sm:$0xff]  ;;  %v14752_v3 = vld [vmem:[#allocation70_spill] sm:$0xff] }
 0x482   :  { %12693 = vpow2.f32 %v11655_v31  ;;  %v11657_v21 = vmul.f32 -1.442695, %v4772_v42  ;;  %v11661_v23 = vmul.f32 -1.442695, %v4774_v49  ;;  %v14753_v42 = vld [vmem:[#allocation71_spill] sm:$0xff]  ;;  %v14754_v14 = vld [vmem:[#allocation72_spill] sm:$0xff] }
 0x483   :  { %12695 = vpow2.f32 %v11659_v2  ;;  %v11658_v38 = vmul.f32 -1.442695, %v4773_v29  ;;  %v11662_v10 = vmul.f32 -1.442695, %v4775_v57  ;;  %v14755_v27 = vld [vmem:[#allocation73_spill] sm:$0xff] }
 0x484   :  { %12697 = vpow2.f32 %v11656_v0 }
 0x485   :  { %12699 = vpow2.f32 %v11660_v30  ;;  %v14756_v30 = vld [vmem:[#allocation74_spill] sm:$0xff] }
 0x486   :  { %12701 = vpow2.f32 %v11657_v21 }
 0x487   :  { %12703 = vpow2.f32 %v11661_v23  ;;  %v14757_v23 = vld [vmem:[#allocation75_spill] sm:$0xff] }
 0x488   :  { %12705 = vpow2.f32 %v11658_v38 }
 0x489   :  { %12707 = vpow2.f32 %v11662_v10 }
 0x48c   :  { %v12694_v56 = vpop.eup %12693 }
 0x48d   :  { %v12696_v6 = vpop.eup %12695  ;;  %v4792_v48 = vadd.f32 1.0, %v12694_v56 }
 0x48e   :  { %v12698_v45 = vpop.eup %12697  ;;  %v4816_v59 = vadd.f32 1.0, %v12696_v6 }
 0x48f   :  { %v12700_v7 = vpop.eup %12699  ;;  %v4793_v20 = vadd.f32 1.0, %v12698_v45  ;;  %12709 = vrcp.f32 %v4792_v48 }
 0x490   :  { %v12702_v33 = vpop.eup %12701  ;;  %v4817_v54 = vadd.f32 1.0, %v12700_v7  ;;  %12711 = vrcp.f32 %v4816_v59 }
 0x491   :  { %v12704_v39 = vpop.eup %12703  ;;  %v4794_v34 = vadd.f32 1.0, %v12702_v33  ;;  %12713 = vrcp.f32 %v4793_v20 }
 0x492   :  { %v12706_v44 = vpop.eup %12705  ;;  %v4818_v9 = vadd.f32 1.0, %v12704_v39  ;;  %12715 = vrcp.f32 %v4817_v54 }
 0x493   :  { %v12708_v62 = vpop.eup %12707  ;;  %v4795_v61 = vadd.f32 1.0, %v12706_v44  ;;  %12717 = vrcp.f32 %v4794_v34 }
 0x494   :  { %v4819_v53 = vadd.f32 1.0, %v12708_v62  ;;  %12719 = vrcp.f32 %v4818_v9 }
 0x495   :  { %12721 = vrcp.f32 %v4795_v61 }
 0x496   :  { %12723 = vrcp.f32 %v4819_v53 }
 0x499   :  { %v12710_v10 = vpop.eup %12709 }
 0x49a   :  { %v12712_v6 = vpop.eup %12711 }
 0x49b   :  { %v12714_v7 = vpop.eup %12713  ;;  %v4856_v62 = vmul.f32 %v12712_v6, %v14123_v18  ;;  %v4933_v6 = vld [vmem:[#allocation9 + $0x58] sm:$0xff] }
 0x49c   :  { %v12716_v48 = vpop.eup %12715 }
 0x49d   :  { %v12718_v33 = vpop.eup %12717  ;;  %v4857_v61 = vmul.f32 %v12716_v48, %v14125_v55  ;;  %v4940_v48 = vld [vmem:[#allocation9 + $0x90] sm:$0xff] }
 0x49e   :  { %v12720_v59 = vpop.eup %12719 }
 0x49f   :  { %v12722_v39 = vpop.eup %12721 }
 0x4a0   :  { %v12724_v20 = vpop.eup %12723 }
 0x4a1   :  { %v4859_v55 = vmul.f32 %v12724_v20, %v14134_v13  ;;  %v4941_v20 = vld [vmem:[#allocation9 + $0x98] sm:$0xff] }
 0x4bd   :  { %v4712_v17 = vpop.f32.mrb[84].mxu0  ;;  %v4755_v47 = vpop.f32.mrb[84].mxu1 }
 0x4be   :  { %v4768_v8 = vadd.f32 %v4712_v17, %v14750_v4  ;;  %v4770_v41 = vadd.f32 %v4755_v47, %v14751_v12  ;;  %v4714_v28 = vpop.f32.mrb[85].mxu0  ;;  %v4757_v24 = vpop.f32.mrb[85].mxu1 }
 0x4bf   :  { %v4769_v5 = vadd.f32 %v4714_v28, %v14752_v3  ;;  %v4771_v43 = vadd.f32 %v4757_v24, %v14753_v42  ;;  %v4716_v49 = vpop.f32.mrb[86].mxu0  ;;  %v4759_v36 = vpop.f32.mrb[86].mxu1  ;;  %v4858_v24 = vmul.f32 %v12720_v59, %v14131_v51 }
 0x4c0   :  { %12725 = vtanh.f32 %v4768_v8  ;;  %v11663_v25 = vmul.f32 -1.442695, %v4770_v41  ;;  %v4776_v29 = vadd.f32 %v4716_v49, %v14754_v14  ;;  %v4778_v57 = vadd.f32 %v4759_v36, %v14755_v27  ;;  %v4718_v31 = vpop.f32.mrb[87].mxu0  ;;  %v4761_v2 = vpop.f32.mrb[87].mxu1 }
 0x4c1   :  { %12727 = vtanh.f32 %v4769_v5  ;;  %v11664_v0 = vmul.f32 -1.442695, %v4771_v43  ;;  %v4777_v21 = vadd.f32 %v4718_v31, %v14756_v30  ;;  %v4779_v38 = vadd.f32 %v4761_v2, %v14757_v23 }
 0x4c2   :  { %12729 = vpow2.f32 %v11663_v25  ;;  %v11665_v56 = vmul.f32 -1.442695, %v4778_v57 }
 0x4c3   :  { %12731 = vpow2.f32 %v11664_v0  ;;  %v11666_v45 = vmul.f32 -1.442695, %v4779_v38 }
 0x4c4   :  { %12733 = vtanh.f32 %v4776_v29 }
 0x4c5   :  { %12735 = vpow2.f32 %v11665_v56  ;;  %v4936_v56 = vld [vmem:[#allocation9 + $0x70] sm:$0xff] }
 0x4c6   :  { %12737 = vtanh.f32 %v4777_v21 }
 0x4c7   :  { %12739 = vpow2.f32 %v11666_v45  ;;  %v4937_v45 = vld [vmem:[#allocation9 + $0x78] sm:$0xff] }
 0x4c8   :  { %v11682_v59 = vcombine.high %v4933_v6, %v4937_v45 }
 0x4ca   :  { %v12726_v44 = vpop.eup %12725 }
 0x4cb   :  { %v12728_v54 = vpop.eup %12727  ;;  %v4860_v34 = vmul.f32 %v12726_v44, %v12710_v10  ;;  %v4932_v10 = vld [vmem:[#allocation9 + $0x50] sm:$0xff]  ;;  %v4945_v44 = vld [vmem:[#allocation9 + $0xb8] sm:$0xff] }
 0x4cc   :  { %v12730_v9 = vpop.eup %12729  ;;  %v4861_v53 = vmul.f32 %v12728_v54, %v12714_v7  ;;  %v11679_v54 = vcombine.low %v4932_v10, %v4936_v56  ;;  %v11689_v40 = vcombine.low %v4941_v20, %v4945_v44 }
 0x4cd   :  { %v12732_v17 = vpop.eup %12731  ;;  %v14189_v47 = vadd.f32 %v4860_v34, %v4856_v62  ;;  %v4844_v4 = vadd.f32 1.0, %v12730_v9  ;;  %v11681_v62 = vcombine.low %v4933_v6, %v4937_v45  ;;  %v11690_v9 = vcombine.high %v4941_v20, %v4945_v44  ;;  %v4985_v6 = vld [vmem:[#allocation9 + $0x1f8] sm:$0xff]  ;;  %v4992_v20 = vld [vmem:[#allocation9 + $0x230] sm:$0xff] }
 0x4ce   :  { %v12734_v8 = vpop.eup %12733  ;;  %v14191_v12 = vadd.f32 %v4861_v53, %v4857_v61  ;;  %v4845_v41 = vadd.f32 1.0, %v12732_v17  ;;  %v4948_v61 = vld [vmem:[#allocation9 + $0xd0] sm:$0xff]  ;;  %v4949_v17 = vld [vmem:[#allocation9 + $0xd8] sm:$0xff] }
 0x4cf   :  { %v12736_v28 = vpop.eup %12735  ;;  %12741 = vtanh.f32 %v14189_v47  ;;  %v4862_v3 = vmul.f32 %v12734_v8, %v12718_v33  ;;  %v11680_v33 = vcombine.high %v4932_v10, %v4936_v56  ;;  %v4952_v53 = vld [vmem:[#allocation9 + $0xf0] sm:$0xff]  ;;  %v4957_v8 = vld [vmem:[#allocation9 + $0x118] sm:$0xff] }
 0x4d0   :  { %v12738_v18 = vpop.eup %12737  ;;  %12743 = vrcp.f32 %v4844_v4  ;;  %v4846_v5 = vadd.f32 1.0, %v12736_v28  ;;  %v4953_v4 = vld [vmem:[#allocation9 + $0xf8] sm:$0xff]  ;;  %v11696_v60 = vcombine.high %v4948_v61, %v4952_v53  ;;  %v11695_v28 = vcombine.low %v4948_v61, %v4952_v53  ;;  %v4984_v10 = vld [vmem:[#allocation9 + $0x1f0] sm:$0xff] }
 0x4d1   :  { %v12740_v42 = vpop.eup %12739  ;;  %12745 = vtanh.f32 %v14191_v12  ;;  %v14197_v43 = vadd.f32 %v4862_v3, %v4858_v24  ;;  %v4863_v49 = vmul.f32 %v12738_v18, %v12722_v39  ;;  %v4944_v39 = vld [vmem:[#allocation9 + $0xb0] sm:$0xff]  ;;  %v11698_v46 = vcombine.high %v4949_v17, %v4953_v4  ;;  %v4981_v56 = vld [vmem:[#allocation9 + $0x1d8] sm:$0xff] }
 0x4d2   :  { %12747 = vrcp.f32 %v4845_v41  ;;  %v4847_v36 = vadd.f32 1.0, %v12740_v42  ;;  %v11688_v34 = vcombine.high %v4940_v48, %v4944_v39  ;;  %v11687_v58 = vcombine.low %v4940_v48, %v4944_v39  ;;  %v4961_v41 = vld [vmem:[#allocation9 + $0x138] sm:$0xff]  ;;  %v4968_v42 = vld [vmem:[#allocation9 + $0x170] sm:$0xff] }
 0x4d3   :  { %12749 = vtanh.f32 %v14197_v43  ;;  %v14200_v25 = vadd.f32 %v4863_v49, %v4859_v55  ;;  %v11697_v24 = vcombine.low %v4949_v17, %v4953_v4  ;;  %v11706_v18 = vcombine.high %v4957_v8, %v4961_v41  ;;  %v4965_v55 = vld [vmem:[#allocation9 + $0x158] sm:$0xff]  ;;  %v4988_v39 = vld [vmem:[#allocation9 + $0x210] sm:$0xff] }
 0x4d4   :  { %12751 = vrcp.f32 %v4846_v5  ;;  %v4964_v5 = vld [vmem:[#allocation9 + $0x150] sm:$0xff]  ;;  %v4969_v49 = vld [vmem:[#allocation9 + $0x178] sm:$0xff] }
 0x4d5   :  { %12753 = vtanh.f32 %v14200_v25  ;;  %v4989_v44 = vld [vmem:[#allocation9 + $0x218] sm:$0xff]  ;;  %v4996_v53 = vld [vmem:[#allocation9 + $0x250] sm:$0xff] }
 0x4d6   :  { %12755 = vrcp.f32 %v4847_v36  ;;  %v5000_v17 = vld [vmem:[#allocation9 + $0x270] sm:$0xff]  ;;  %v4997_v4 = vld [vmem:[#allocation9 + $0x258] sm:$0xff] }
 0x4d9   :  { %v12742_v51 = vpop.eup %12741 }
 0x4da   :  { %v12744_v14 = vpop.eup %12743 }
 0x4db   :  { %v12746_v29 = vpop.eup %12745  ;;  %v4872_v2 = vmul.f32 %v12744_v14, %v12742_v51  ;;  %v11705_v51 = vcombine.low %v4957_v8, %v4961_v41  ;;  %v11712_v14 = vcombine.high %v4964_v5, %v4968_v42  ;;  %v5008_v8 = vld [vmem:[#allocation9 + $0x2b0] sm:$0xff]  ;;  %v5005_v41 = vld [vmem:[#allocation9 + $0x298] sm:$0xff] }
 0x4dc   :  { %v12748_v27 = vpop.eup %12747 }
 0x4dd   :  { %v12750_v13 = vpop.eup %12749  ;;  %v4873_v21 = vmul.f32 %v12748_v27, %v12746_v29  ;;  %v11714_v29 = vcombine.high %v4965_v55, %v4969_v49  ;;  %v4972_v27 = vld [vmem:[#allocation9 + $0x190] sm:$0xff] }
 0x4de   :  { %v12752_v57 = vpop.eup %12751 }
 0x4df   :  { %v12754_v31 = vpop.eup %12753  ;;  %v4874_v0 = vmul.f32 %v12752_v57, %v12750_v13  ;;  %v4976_v13 = vld [vmem:[#allocation9 + $0x1b0] sm:$0xff]  ;;  %v4973_v57 = vld [vmem:[#allocation9 + $0x198] sm:$0xff] }
 0x4e0   :  { %v12756_v30 = vpop.eup %12755  ;;  %v11719_v45 = vcombine.low %v4972_v27, %v4976_v13 }
 0x4e1   :  { %v4875_v23 = vmul.f32 %v12756_v30, %v12754_v31  ;;  %v14203_v38 = vpack.c.bf16 %v4874_v0, %v4872_v2  ;;  %v4977_v31 = vld [vmem:[#allocation9 + $0x1b8] sm:$0xff]  ;;  %v11711_v2 = vcombine.low %v4964_v5, %v4968_v42  ;;  %v11713_v0 = vcombine.low %v4965_v55, %v4969_v49  ;;  %v5012_v42 = vld [vmem:[#allocation9 + $0x2d0] sm:$0xff] }
 0x4e2   :  { %v11720_v30 = vcombine.high %v4972_v27, %v4976_v13  ;;  %v11721_v48 = vcombine.low %v4973_v57, %v4977_v31  ;;  %v5016_v55 = vld [vmem:[#allocation9 + $0x2f0] sm:$0xff]  ;;  %v5013_v49 = vld [vmem:[#allocation9 + $0x2d8] sm:$0xff] }
 0x4e3   :  { %v14205_v7 = vpack.c.bf16 %v4875_v23, %v4873_v21  ;;  %v11722_v21 = vcombine.high %v4973_v57, %v4977_v31  ;;  %v4980_v23 = vld [vmem:[#allocation9 + $0x1d0] sm:$0xff]  ;;  %v5021_v31 = vld [vmem:[#allocation9 + $0x318] sm:$0xff] }
 0x4e4   :  { %v5020_v13 = vld [vmem:[#allocation9 + $0x310] sm:$0xff] }
 0x4e5   :  { %5722 = vmatprep.mubr.bf16.mxu0 %v14205_v7  ;;  %5765 = vmatprep.mubr.bf16.mxu1 %v14205_v7  ;;  %v5024_v57 = vld [vmem:[#allocation9 + $0x330] sm:$0xff] }
 0x4e6   :  { %5723 = vmatmul.mubr.bf16.vlgmr.msra.gmra.mrb[88].mxu0 %v14203_v38  ;;  %5766 = vmatmul.mubr.bf16.vlgmr.msra.gmra.mrb[88].mxu1 %v14203_v38 }
 0x4e7   :  { %5777 = vmatpush1.bf16.msra.mxu0 %v11671_v50  ;;  %5820 = vmatpush1.bf16.msra.mxu1 %v11673_v22  ;;  %v4956_v50 = vld [vmem:[#allocation9 + $0x110] sm:$0xff] }
 0x4e8   :  { %5808 = vmatprep.mubr.bf16.mxu0 %v14205_v7  ;;  %5851 = vmatprep.mubr.bf16.mxu1 %v14205_v7  ;;  %v4960_v22 = vld [vmem:[#allocation9 + $0x130] sm:$0xff] }
 0x4e9   :  { %5778 = vmatprep.subr.bf16.mxu0 %v11680_v33  ;;  %5821 = vmatprep.subr.bf16.mxu1 %v11682_v59  ;;  %v11704_v3 = vcombine.high %v4956_v50, %v4960_v22  ;;  %v11703_v36 = vcombine.low %v4956_v50, %v4960_v22  ;;  %v11728_v33 = vcombine.high %v4980_v23, %v4984_v10  ;;  %v5004_v22 = vld [vmem:[#allocation9 + $0x290] sm:$0xff] }
 0x4ea   :  { %v11730_v59 = vcombine.high %v4981_v56, %v4985_v6 }
 0x4eb   :  { %5779 = vmatpush1.bf16.msra.mxu0 %v11679_v54  ;;  %5822 = vmatpush1.bf16.msra.mxu1 %v11681_v62  ;;  %v4993_v54 = vld [vmem:[#allocation9 + $0x238] sm:$0xff]  ;;  %v11727_v62 = vcombine.low %v4980_v23, %v4984_v10  ;;  %v5028_v10 = vld [vmem:[#allocation9 + $0x350] sm:$0xff] }
 0x4ec   :  { %5780 = vmatprep.subr.bf16.mxu0 %v11688_v34  ;;  %5823 = vmatprep.subr.bf16.mxu1 %v11690_v9  ;;  %v11729_v34 = vcombine.low %v4981_v56, %v4985_v6  ;;  %v11736_v9 = vcombine.high %v4988_v39, %v4992_v20  ;;  %v11738_v61 = vcombine.high %v4989_v44, %v4993_v54  ;;  %v5032_v56 = vld [vmem:[#allocation9 + $0x370] sm:$0xff]  ;;  %v5029_v6 = vld [vmem:[#allocation9 + $0x358] sm:$0xff] }
 0x4ef   :  { %5781 = vmatpush1.bf16.msra.mxu0 %v11687_v58  ;;  %5824 = vmatpush1.bf16.msra.mxu1 %v11689_v40  ;;  %v5001_v58 = vld [vmem:[#allocation9 + $0x278] sm:$0xff]  ;;  %v11735_v40 = vcombine.low %v4988_v39, %v4992_v20  ;;  %v5036_v20 = vld [vmem:[#allocation9 + $0x390] sm:$0xff] }
 0x4f0   :  { %5782 = vmatprep.subr.bf16.mxu0 %v11696_v60  ;;  %5825 = vmatprep.subr.bf16.mxu1 %v11698_v46  ;;  %v11737_v60 = vcombine.low %v4989_v44, %v4993_v54  ;;  %v11744_v46 = vcombine.high %v4996_v53, %v5000_v17  ;;  %v11746_v50 = vcombine.high %v4997_v4, %v5001_v58  ;;  %v5040_v44 = vld [vmem:[#allocation9 + $0x3b0] sm:$0xff]  ;;  %v5037_v54 = vld [vmem:[#allocation9 + $0x398] sm:$0xff] }
 0x4f3   :  { %5783 = vmatpush1.bf16.msra.mxu0 %v11695_v28  ;;  %5826 = vmatpush1.bf16.msra.mxu1 %v11697_v24  ;;  %v5009_v28 = vld [vmem:[#allocation9 + $0x2b8] sm:$0xff]  ;;  %v11743_v24 = vcombine.low %v4996_v53, %v5000_v17  ;;  %v5044_v17 = vld [vmem:[#allocation9 + $0x3d0] sm:$0xff] }
 0x4f4   :  { %5784 = vmatprep.subr.bf16.mxu0 %v11704_v3  ;;  %5827 = vmatprep.subr.bf16.mxu1 %v11706_v18  ;;  %v11745_v3 = vcombine.low %v4997_v4, %v5001_v58  ;;  %v11752_v18 = vcombine.high %v5004_v22, %v5008_v8  ;;  %v11754_v5 = vcombine.high %v5005_v41, %v5009_v28  ;;  %v5048_v4 = vld [vmem:[#allocation9 + $0x3f0] sm:$0xff]  ;;  %v5045_v58 = vld [vmem:[#allocation9 + $0x3d8] sm:$0xff] }
 0x4f7   :  { %5785 = vmatpush1.bf16.msra.mxu0 %v11703_v36  ;;  %5828 = vmatpush1.bf16.msra.mxu1 %v11705_v51  ;;  %v5017_v36 = vld [vmem:[#allocation9 + $0x2f8] sm:$0xff]  ;;  %v11751_v51 = vcombine.low %v5004_v22, %v5008_v8  ;;  %v11791_v8 = vcombine.low %v5044_v17, %v5048_v4 }
 0x4f8   :  { %5786 = vmatprep.subr.bf16.mxu0 %v11712_v14  ;;  %5829 = vmatprep.subr.bf16.mxu1 %v11714_v29  ;;  %v11753_v14 = vcombine.low %v5005_v41, %v5009_v28  ;;  %v11760_v29 = vcombine.high %v5012_v42, %v5016_v55  ;;  %v11762_v27 = vcombine.high %v5013_v49, %v5017_v36  ;;  %v6020_v28 = vld [vmem:[#allocation9] sm:$0xff] }
 0x4fb   :  { %5787 = vmatpush1.bf16.msra.mxu0 %v11711_v2  ;;  %5830 = vmatpush1.bf16.msra.mxu1 %v11713_v0  ;;  %v5025_v2 = vld [vmem:[#allocation9 + $0x338] sm:$0xff]  ;;  %v11759_v0 = vcombine.low %v5012_v42, %v5016_v55  ;;  %v6025_v42 = vld [vmem:[#allocation9 + $0x28] sm:$0xff]  ;;  %v6028_v55 = vld [vmem:[#allocation9 + $0x40] sm:$0xff] }
 0x4fc   :  { %5788 = vmatprep.subr.bf16.mxu0 %v11720_v30  ;;  %5831 = vmatprep.subr.bf16.mxu1 %v11722_v21  ;;  %v11761_v30 = vcombine.low %v5013_v49, %v5017_v36  ;;  %v11768_v21 = vcombine.high %v5020_v13, %v5024_v57  ;;  %v11770_v23 = vcombine.high %v5021_v31, %v5025_v2  ;;  %v6032_v49 = vld [vmem:[#allocation9 + $0x60] sm:$0xff] }
 0x4ff   :  { %5789 = vmatpush1.bf16.msra.mxu0 %v11719_v45  ;;  %5832 = vmatpush1.bf16.msra.mxu1 %v11721_v48  ;;  %v5033_v45 = vld [vmem:[#allocation9 + $0x378] sm:$0xff]  ;;  %v11767_v48 = vcombine.low %v5020_v13, %v5024_v57  ;;  %v6036_v13 = vld [vmem:[#allocation9 + $0x80] sm:$0xff] }
 0x500   :  { %5790 = vmatprep.subr.bf16.mxu0 %v11728_v33  ;;  %5833 = vmatprep.subr.bf16.mxu1 %v11730_v59  ;;  %v11769_v33 = vcombine.low %v5021_v31, %v5025_v2  ;;  %v11776_v59 = vcombine.high %v5028_v10, %v5032_v56  ;;  %v11778_v39 = vcombine.high %v5029_v6, %v5033_v45  ;;  %v6040_v31 = vld [vmem:[#allocation9 + $0xa0] sm:$0xff]  ;;  %v6037_v2 = vld [vmem:[#allocation9 + $0x88] sm:$0xff] }
 0x503   :  { %5791 = vmatpush1.bf16.msra.mxu0 %v11727_v62  ;;  %5834 = vmatpush1.bf16.msra.mxu1 %v11729_v34  ;;  %v5041_v62 = vld [vmem:[#allocation9 + $0x3b8] sm:$0xff]  ;;  %v11775_v34 = vcombine.low %v5028_v10, %v5032_v56  ;;  %v6044_v56 = vld [vmem:[#allocation9 + $0xc0] sm:$0xff] }
 0x504   :  { %5792 = vmatprep.subr.bf16.mxu0 %v11736_v9  ;;  %5835 = vmatprep.subr.bf16.mxu1 %v11738_v61  ;;  %v11777_v9 = vcombine.low %v5029_v6, %v5033_v45  ;;  %v11784_v61 = vcombine.high %v5036_v20, %v5040_v44  ;;  %v11786_v53 = vcombine.high %v5037_v54, %v5041_v62  ;;  %v6048_v6 = vld [vmem:[#allocation9 + $0xe0] sm:$0xff]  ;;  %v6045_v45 = vld [vmem:[#allocation9 + $0xc8] sm:$0xff] }
 0x507   :  { %5793 = vmatpush1.bf16.msra.mxu0 %v11735_v40  ;;  %5836 = vmatpush1.bf16.msra.mxu1 %v11737_v60  ;;  %v5049_v40 = vld [vmem:[#allocation9 + $0x3f8] sm:$0xff]  ;;  %v11783_v60 = vcombine.low %v5036_v20, %v5040_v44  ;;  %v6052_v44 = vld [vmem:[#allocation9 + $0x100] sm:$0xff] }
 0x508   :  { %5794 = vmatprep.subr.bf16.mxu0 %v11744_v46  ;;  %5837 = vmatprep.subr.bf16.mxu1 %v11746_v50  ;;  %v11785_v46 = vcombine.low %v5037_v54, %v5041_v62  ;;  %v11792_v50 = vcombine.high %v5044_v17, %v5048_v4  ;;  %v11794_v22 = vcombine.high %v5045_v58, %v5049_v40  ;;  %v6056_v54 = vld [vmem:[#allocation9 + $0x120] sm:$0xff]  ;;  %v6053_v62 = vld [vmem:[#allocation9 + $0x108] sm:$0xff] }
 0x509   :  { %v11793_v41 = vcombine.low %v5045_v58, %v5049_v40  ;;  %v6060_v4 = vld [vmem:[#allocation9 + $0x140] sm:$0xff]  ;;  %v6061_v40 = vld [vmem:[#allocation9 + $0x148] sm:$0xff] }
 0x50a   :  { %v6064_v58 = vld [vmem:[#allocation9 + $0x160] sm:$0xff] }
 0x50b   :  { %5795 = vmatpush1.bf16.msra.mxu0 %v11743_v24  ;;  %5838 = vmatpush1.bf16.msra.mxu1 %v11745_v3  ;;  %v6024_v24 = vld [vmem:[#allocation9 + $0x20] sm:$0xff]  ;;  %v6021_v3 = vld [vmem:[#allocation9 + $0x8] sm:$0xff] }
 0x50c   :  { %5796 = vmatprep.subr.bf16.mxu0 %v11752_v18  ;;  %5839 = vmatprep.subr.bf16.mxu1 %v11754_v5  ;;  %v11807_v18 = vcombine.low %v6020_v28, %v6024_v24  ;;  %v11808_v5 = vcombine.high %v6020_v28, %v6024_v24  ;;  %v11809_v36 = vcombine.low %v6021_v3, %v6025_v42  ;;  %v6072_v28 = vld [vmem:[#allocation9 + $0x1a0] sm:$0xff]  ;;  %v6069_v24 = vld [vmem:[#allocation9 + $0x188] sm:$0xff] }
 0x50f   :  { %5797 = vmatpush1.bf16.msra.mxu0 %v11751_v51  ;;  %5840 = vmatpush1.bf16.msra.mxu1 %v11753_v14  ;;  %v11810_v51 = vcombine.high %v6021_v3, %v6025_v42  ;;  %v11816_v14 = vcombine.high %v6028_v55, %v6032_v49  ;;  %v6073_v3 = vld [vmem:[#allocation9 + $0x1a8] sm:$0xff] }
 0x510   :  { %5798 = vmatprep.subr.bf16.mxu0 %v11760_v29  ;;  %5841 = vmatprep.subr.bf16.mxu1 %v11762_v27  ;;  %v6029_v29 = vld [vmem:[#allocation9 + $0x48] sm:$0xff] }
 0x511   :  { %v6033_v27 = vld [vmem:[#allocation9 + $0x68] sm:$0xff] }
 0x512   :  { %v11818_v57 = vcombine.high %v6029_v29, %v6033_v27 }
 0x513   :  { %5799 = vmatpush1.bf16.msra.mxu0 %v11759_v0  ;;  %5842 = vmatpush1.bf16.msra.mxu1 %v11761_v30  ;;  %v6041_v0 = vld [vmem:[#allocation9 + $0xa8] sm:$0xff]  ;;  %v11815_v30 = vcombine.low %v6028_v55, %v6032_v49  ;;  %v11858_v55 = vcombine.high %v6069_v24, %v6073_v3 }
 0x514   :  { %5800 = vmatprep.subr.bf16.mxu0 %v11768_v21  ;;  %5843 = vmatprep.subr.bf16.mxu1 %v11770_v23  ;;  %v11817_v21 = vcombine.low %v6029_v29, %v6033_v27  ;;  %v11824_v23 = vcombine.high %v6036_v13, %v6040_v31  ;;  %v11826_v10 = vcombine.high %v6037_v2, %v6041_v0  ;;  %v6077_v29 = vld [vmem:[#allocation9 + $0x1c8] sm:$0xff] }
 0x517   :  { %5801 = vmatpush1.bf16.msra.mxu0 %v11767_v48  ;;  %5844 = vmatpush1.bf16.msra.mxu1 %v11769_v33  ;;  %v6049_v48 = vld [vmem:[#allocation9 + $0xe8] sm:$0xff]  ;;  %v11823_v33 = vcombine.low %v6036_v13, %v6040_v31 }
 0x518   :  { %5802 = vmatprep.subr.bf16.mxu0 %v11776_v59  ;;  %5845 = vmatprep.subr.bf16.mxu1 %v11778_v39  ;;  %v11825_v59 = vcombine.low %v6037_v2, %v6041_v0  ;;  %v11832_v39 = vcombine.high %v6044_v56, %v6048_v6  ;;  %v11834_v20 = vcombine.high %v6045_v45, %v6049_v48  ;;  %v6081_v13 = vld [vmem:[#allocation9 + $0x1e8] sm:$0xff]  ;;  %v6084_v0 = vld [vmem:[#allocation9 + $0x200] sm:$0xff] }
 0x519   :  { %v11865_v31 = vcombine.low %v6077_v29, %v6081_v13  ;;  %v11866_v2 = vcombine.high %v6077_v29, %v6081_v13  ;;  %v6128_v29 = vld [vmem:[#allocation9 + $0x360] sm:$0xff] }
 0x51b   :  { %5803 = vmatpush1.bf16.msra.mxu0 %v11775_v34  ;;  %5846 = vmatpush1.bf16.msra.mxu1 %v11777_v9  ;;  %v6057_v34 = vld [vmem:[#allocation9 + $0x128] sm:$0xff]  ;;  %v11831_v9 = vcombine.low %v6044_v56, %v6048_v6 }
 0x51c   :  { %5804 = vmatprep.subr.bf16.mxu0 %v11784_v61  ;;  %5847 = vmatprep.subr.bf16.mxu1 %v11786_v53  ;;  %v11833_v61 = vcombine.low %v6045_v45, %v6049_v48  ;;  %v11840_v53 = vcombine.high %v6052_v44, %v6056_v54  ;;  %v11842_v17 = vcombine.high %v6053_v62, %v6057_v34  ;;  %v6092_v48 = vld [vmem:[#allocation9 + $0x240] sm:$0xff] }
 0x51f   :  { %5805 = vmatpush1.bf16.msra.mxu0 %v11783_v60  ;;  %5848 = vmatpush1.bf16.msra.mxu1 %v11785_v46  ;;  %v6065_v60 = vld [vmem:[#allocation9 + $0x168] sm:$0xff]  ;;  %v11839_v46 = vcombine.low %v6052_v44, %v6056_v54 }
 0x520   :  { %5806 = vmatprep.subr.bf16.mxu0 %v11792_v50  ;;  %5849 = vmatprep.subr.bf16.mxu1 %v11794_v22  ;;  %v11841_v50 = vcombine.low %v6053_v62, %v6057_v34  ;;  %v11848_v22 = vcombine.high %v6060_v4, %v6064_v58  ;;  %v6100_v34 = vld [vmem:[#allocation9 + $0x280] sm:$0xff] }
 0x523   :  { %5807 = vmatpush1.bf16.msra.mxu0 %v11791_v8  ;;  %5850 = vmatpush1.bf16.msra.mxu1 %v11793_v41  ;;  %v11850_v8 = vcombine.high %v6061_v40, %v6065_v60  ;;  %v6068_v41 = vld [vmem:[#allocation9 + $0x180] sm:$0xff] }
 0x524   :  { %6788 = vmatprep.subr.bf16.mxu0 %v11808_v5  ;;  %6831 = vmatprep.subr.bf16.mxu1 %v11810_v51  ;;  %v11849_v5 = vcombine.low %v6061_v40, %v6065_v60  ;;  %v11856_v42 = vcombine.high %v6068_v41, %v6072_v28  ;;  %v11855_v49 = vcombine.low %v6068_v41, %v6072_v28  ;;  %v6076_v51 = vld [vmem:[#allocation9 + $0x1c0] sm:$0xff] }
 0x525   :  { %v6108_v60 = vld [vmem:[#allocation9 + $0x2c0] sm:$0xff] }
 0x526   :  { %5809 = vmatmul.mubr.bf16.vlgmr.msra.gmra.mrb[92].mxu0 %v14203_v38  ;;  %5852 = vmatmul.mubr.bf16.vlgmr.msra.gmra.mrb[92].mxu1 %v14203_v38 }
 0x527   :  { %6789 = vmatpush1.bf16.msra.mxu0 %v11807_v18  ;;  %6832 = vmatpush1.bf16.msra.mxu1 %v11809_v36  ;;  %v11847_v18 = vcombine.low %v6060_v4, %v6064_v58  ;;  %v11857_v36 = vcombine.low %v6069_v24, %v6073_v3  ;;  %v6116_v3 = vld [vmem:[#allocation9 + $0x300] sm:$0xff] }
 0x528   :  { %6790 = vmatprep.subr.bf16.mxu0 %v11816_v14  ;;  %6833 = vmatprep.subr.bf16.mxu1 %v11818_v57  ;;  %v6080_v14 = vld [vmem:[#allocation9 + $0x1e0] sm:$0xff] }
 0x529   :  { %v11864_v27 = vcombine.high %v6076_v51, %v6080_v14  ;;  %v11863_v57 = vcombine.low %v6076_v51, %v6080_v14  ;;  %v6124_v14 = vld [vmem:[#allocation9 + $0x340] sm:$0xff] }
 0x52a   :  { %v11912_v13 = vcombine.high %v6124_v14, %v6128_v29 }
 0x52b   :  { %6791 = vmatpush1.bf16.msra.mxu0 %v11815_v30  ;;  %6834 = vmatpush1.bf16.msra.mxu1 %v11817_v21  ;;  %v6088_v30 = vld [vmem:[#allocation9 + $0x220] sm:$0xff]  ;;  %v6085_v21 = vld [vmem:[#allocation9 + $0x208] sm:$0xff] }
 0x52c   :  { %6792 = vmatprep.subr.bf16.mxu0 %v11824_v23  ;;  %6835 = vmatprep.subr.bf16.mxu1 %v11826_v10  ;;  %v11872_v23 = vcombine.high %v6084_v0, %v6088_v30  ;;  %v6089_v10 = vld [vmem:[#allocation9 + $0x228] sm:$0xff]  ;;  %v11871_v56 = vcombine.low %v6084_v0, %v6088_v30  ;;  %v6132_v30 = vld [vmem:[#allocation9 + $0x380] sm:$0xff] }
 0x52d   :  { %v11873_v6 = vcombine.low %v6085_v21, %v6089_v10  ;;  %v11874_v45 = vcombine.high %v6085_v21, %v6089_v10  ;;  %v6136_v21 = vld [vmem:[#allocation9 + $0x3a0] sm:$0xff] }
 0x52e   :  { %v11920_v10 = vcombine.high %v6132_v30, %v6136_v21 }
 0x52f   :  { %6793 = vmatpush1.bf16.msra.mxu0 %v11823_v33  ;;  %6836 = vmatpush1.bf16.msra.mxu1 %v11825_v59  ;;  %v6096_v33 = vld [vmem:[#allocation9 + $0x260] sm:$0xff]  ;;  %v6093_v59 = vld [vmem:[#allocation9 + $0x248] sm:$0xff] }
 0x530   :  { %6794 = vmatprep.subr.bf16.mxu0 %v11832_v39  ;;  %6837 = vmatprep.subr.bf16.mxu1 %v11834_v20  ;;  %v11880_v39 = vcombine.high %v6092_v48, %v6096_v33  ;;  %v6097_v20 = vld [vmem:[#allocation9 + $0x268] sm:$0xff]  ;;  %v11879_v44 = vcombine.low %v6092_v48, %v6096_v33  ;;  %v6140_v33 = vld [vmem:[#allocation9 + $0x3c0] sm:$0xff] }
 0x531   :  { %v11881_v54 = vcombine.low %v6093_v59, %v6097_v20  ;;  %v11882_v62 = vcombine.high %v6093_v59, %v6097_v20  ;;  %v6144_v59 = vld [vmem:[#allocation9 + $0x3e0] sm:$0xff] }
 0x532   :  { %v11928_v20 = vcombine.high %v6140_v33, %v6144_v59 }
 0x533   :  { %6795 = vmatpush1.bf16.msra.mxu0 %v11831_v9  ;;  %6838 = vmatpush1.bf16.msra.mxu1 %v11833_v61  ;;  %v6104_v9 = vld [vmem:[#allocation9 + $0x2a0] sm:$0xff]  ;;  %v6101_v61 = vld [vmem:[#allocation9 + $0x288] sm:$0xff] }
 0x534   :  { %6796 = vmatprep.subr.bf16.mxu0 %v11840_v53  ;;  %6839 = vmatprep.subr.bf16.mxu1 %v11842_v17  ;;  %v11888_v53 = vcombine.high %v6100_v34, %v6104_v9  ;;  %v6105_v17 = vld [vmem:[#allocation9 + $0x2a8] sm:$0xff]  ;;  %v11887_v4 = vcombine.low %v6100_v34, %v6104_v9  ;;  %v14221_v9 = vld [vmem:[#allocation9 + $0x10] sm:$0xff] }
 0x535   :  { %v11889_v58 = vcombine.low %v6101_v61, %v6105_v17  ;;  %v11890_v40 = vcombine.high %v6101_v61, %v6105_v17  ;;  %v14223_v61 = vld [vmem:[#allocation9 + $0x30] sm:$0xff] }
 0x536   :  { %v11812_v17 = vcombine.high %v14221_v9, %v14223_v61 }
 0x537   :  { %6797 = vmatpush1.bf16.msra.mxu0 %v11839_v46  ;;  %6840 = vmatpush1.bf16.msra.mxu1 %v11841_v50  ;;  %v6112_v46 = vld [vmem:[#allocation9 + $0x2e0] sm:$0xff]  ;;  %v6109_v50 = vld [vmem:[#allocation9 + $0x2c8] sm:$0xff] }
 0x538   :  { %6798 = vmatprep.subr.bf16.mxu0 %v11848_v22  ;;  %6841 = vmatprep.subr.bf16.mxu1 %v11850_v8  ;;  %v11896_v22 = vcombine.high %v6108_v60, %v6112_v46  ;;  %v6113_v8 = vld [vmem:[#allocation9 + $0x2e8] sm:$0xff]  ;;  %v11895_v41 = vcombine.low %v6108_v60, %v6112_v46 }
 0x539   :  { %v11897_v28 = vcombine.low %v6109_v50, %v6113_v8  ;;  %v11898_v24 = vcombine.high %v6109_v50, %v6113_v8 }
 0x53b   :  { %6799 = vmatpush1.bf16.msra.mxu0 %v11847_v18  ;;  %6842 = vmatpush1.bf16.msra.mxu1 %v11849_v5  ;;  %v6120_v18 = vld [vmem:[#allocation9 + $0x320] sm:$0xff]  ;;  %v6117_v5 = vld [vmem:[#allocation9 + $0x308] sm:$0xff] }
 0x53c   :  { %6800 = vmatprep.subr.bf16.mxu0 %v11856_v42  ;;  %6843 = vmatprep.subr.bf16.mxu1 %v11858_v55  ;;  %v11904_v42 = vcombine.high %v6116_v3, %v6120_v18  ;;  %v6121_v55 = vld [vmem:[#allocation9 + $0x328] sm:$0xff] }
 0x53d   :  { %v11906_v51 = vcombine.high %v6117_v5, %v6121_v55 }
 0x53f   :  { %6801 = vmatpush1.bf16.msra.mxu0 %v11855_v49  ;;  %6844 = vmatpush1.bf16.msra.mxu1 %v11857_v36  ;;  %v11903_v49 = vcombine.low %v6116_v3, %v6120_v18  ;;  %v11905_v36 = vcombine.low %v6117_v5, %v6121_v55  ;;  %v14760_v18 = vld [vmem:[#allocation31_spill] sm:$0xff] }
 0x540   :  { %6802 = vmatprep.subr.bf16.mxu0 %v11864_v27  ;;  %6845 = vmatprep.subr.bf16.mxu1 %v11866_v2  ;;  %v6125_v27 = vld [vmem:[#allocation9 + $0x348] sm:$0xff] }
 0x543   :  { %6803 = vmatpush1.bf16.msra.mxu0 %v11863_v57  ;;  %6846 = vmatpush1.bf16.msra.mxu1 %v11865_v31  ;;  %v6129_v57 = vld [vmem:[#allocation9 + $0x368] sm:$0xff]  ;;  %v11911_v31 = vcombine.low %v6124_v14, %v6128_v29 }
 0x544   :  { %6804 = vmatprep.subr.bf16.mxu0 %v11872_v23  ;;  %6847 = vmatprep.subr.bf16.mxu1 %v11874_v45  ;;  %v11913_v2 = vcombine.low %v6125_v27, %v6129_v57  ;;  %v11914_v0 = vcombine.high %v6125_v27, %v6129_v57  ;;  %v6133_v23 = vld [vmem:[#allocation9 + $0x388] sm:$0xff] }
 0x545   :  { %v14763_v29 = vld [vmem:[#allocation32_spill] sm:$0xff] }
 0x547   :  { %6805 = vmatpush1.bf16.msra.mxu0 %v11871_v56  ;;  %6848 = vmatpush1.bf16.msra.mxu1 %v11873_v6  ;;  %v6137_v56 = vld [vmem:[#allocation9 + $0x3a8] sm:$0xff]  ;;  %v11919_v6 = vcombine.low %v6132_v30, %v6136_v21 }
 0x548   :  { %6806 = vmatprep.subr.bf16.mxu0 %v11880_v39  ;;  %6849 = vmatprep.subr.bf16.mxu1 %v11882_v62  ;;  %v11921_v45 = vcombine.low %v6133_v23, %v6137_v56  ;;  %v11922_v48 = vcombine.high %v6133_v23, %v6137_v56  ;;  %v6141_v39 = vld [vmem:[#allocation9 + $0x3c8] sm:$0xff] }
 0x54b   :  { %6807 = vmatpush1.bf16.msra.mxu0 %v11879_v44  ;;  %6850 = vmatpush1.bf16.msra.mxu1 %v11881_v54  ;;  %v6145_v44 = vld [vmem:[#allocation9 + $0x3e8] sm:$0xff]  ;;  %v11927_v54 = vcombine.low %v6140_v33, %v6144_v59 }
 0x54c   :  { %6808 = vmatprep.subr.bf16.mxu0 %v11888_v53  ;;  %6851 = vmatprep.subr.bf16.mxu1 %v11890_v40  ;;  %v11929_v62 = vcombine.low %v6141_v39, %v6145_v44  ;;  %v11930_v34 = vcombine.high %v6141_v39, %v6145_v44  ;;  %v14225_v53 = vld [vmem:[#allocation9 + $0x18] sm:$0xff] }
 0x54f   :  { %6809 = vmatpush1.bf16.msra.mxu0 %v11887_v4  ;;  %6852 = vmatpush1.bf16.msra.mxu1 %v11889_v58  ;;  %v14229_v4 = vld [vmem:[#allocation9 + $0x38] sm:$0xff]  ;;  %v11811_v58 = vcombine.low %v14221_v9, %v14223_v61 }
 0x550   :  { %6810 = vmatprep.subr.bf16.mxu0 %v11896_v22  ;;  %6853 = vmatprep.subr.bf16.mxu1 %v11898_v24  ;;  %v11813_v40 = vcombine.low %v14225_v53, %v14229_v4  ;;  %v11814_v60 = vcombine.high %v14225_v53, %v14229_v4  ;;  %v14758_v22 = vld [vmem:[#allocation28_spill] sm:$0xff] }
 0x553   :  { %6811 = vmatpush1.bf16.msra.mxu0 %v11895_v41  ;;  %6854 = vmatpush1.bf16.msra.mxu1 %v11897_v28  ;;  %v14759_v41 = vld [vmem:[#allocation30_spill] sm:$0xff] }
 0x554   :  { %6812 = vmatprep.subr.bf16.mxu0 %v11904_v42  ;;  %6855 = vmatprep.subr.bf16.mxu1 %v11906_v51  ;;  %v14761_v42 = vld [vmem:[#allocation34_spill] sm:$0xff]  ;;  %v14762_v51 = vld [vmem:[#allocation29_spill] sm:$0xff] }
 0x557   :  { %6813 = vmatpush1.bf16.msra.mxu0 %v11903_v49  ;;  %6856 = vmatpush1.bf16.msra.mxu1 %v11905_v36 }
 0x558   :  { %6814 = vmatprep.subr.bf16.mxu0 %v11912_v13  ;;  %6857 = vmatprep.subr.bf16.mxu1 %v11914_v0  ;;  %v14765_v0 = vld [vmem:[#allocation35_spill] sm:$0xff] }
 0x55b   :  { %6815 = vmatpush1.bf16.msra.mxu0 %v11911_v31  ;;  %6858 = vmatpush1.bf16.msra.mxu1 %v11913_v2  ;;  %v14764_v31 = vld [vmem:[#allocation33_spill] sm:$0xff] }
 0x55c   :  { %6816 = vmatprep.subr.bf16.mxu0 %v11920_v10  ;;  %6859 = vmatprep.subr.bf16.mxu1 %v11922_v48 }
 0x55f   :  { %6817 = vmatpush1.bf16.msra.mxu0 %v11919_v6  ;;  %6860 = vmatpush1.bf16.msra.mxu1 %v11921_v45 }
 0x560   :  { %6818 = vmatprep.subr.bf16.mxu0 %v11928_v20  ;;  %6861 = vmatprep.subr.bf16.mxu1 %v11930_v34 }
 0x563   :  { %6819 = vmatpush1.bf16.msra.mxu0 %v11927_v54  ;;  %6862 = vmatpush1.bf16.msra.mxu1 %v11929_v62 }
 0x564   :  { %6874 = vmatprep.subr.bf16.mxu0 %v11812_v17  ;;  %6917 = vmatprep.subr.bf16.mxu1 %v11814_v60 }
 0x5b9   :  { %v5724_v46 = vpop.f32.mrb[88].mxu0  ;;  %v5767_v50 = vpop.f32.mrb[88].mxu1 }
 0x5ba   :  { %v5862_v8 = vadd.f32 %v5724_v46, %v14758_v22  ;;  %v5864_v28 = vadd.f32 %v5767_v50, %v14759_v41  ;;  %v5726_v24 = vpop.f32.mrb[89].mxu0  ;;  %v5769_v3 = vpop.f32.mrb[89].mxu1 }
 0x5bb   :  { %v5863_v5 = vadd.f32 %v5726_v24, %v14760_v18  ;;  %v5865_v55 = vadd.f32 %v5769_v3, %v14761_v42  ;;  %v5728_v49 = vpop.f32.mrb[90].mxu0  ;;  %v5771_v36 = vpop.f32.mrb[90].mxu1 }
 0x5bc   :  { %v5870_v14 = vadd.f32 %v5728_v49, %v14762_v51  ;;  %v5872_v27 = vadd.f32 %v5771_v36, %v14763_v29  ;;  %v5730_v13 = vpop.f32.mrb[91].mxu0  ;;  %v5773_v57 = vpop.f32.mrb[91].mxu1  ;;  %v11795_v21 = vmul.f32 -1.442695, %v5862_v8  ;;  %v11799_v23 = vmul.f32 -1.442695, %v5864_v28 }
 0x5bd   :  { %v5871_v2 = vadd.f32 %v5730_v13, %v14764_v31  ;;  %v5873_v30 = vadd.f32 %v5773_v57, %v14765_v0  ;;  %v11796_v10 = vmul.f32 -1.442695, %v5863_v5  ;;  %v11800_v56 = vmul.f32 -1.442695, %v5865_v55  ;;  %v14766_v5 = vld [vmem:[#allocation76_spill] sm:$0xff]  ;;  %v14767_v55 = vld [vmem:[#allocation77_spill] sm:$0xff] }
 0x5be   :  { %12757 = vpow2.f32 %v11795_v21  ;;  %v11797_v6 = vmul.f32 -1.442695, %v5870_v14  ;;  %v11801_v45 = vmul.f32 -1.442695, %v5872_v27  ;;  %v14768_v14 = vld [vmem:[#allocation78_spill] sm:$0xff]  ;;  %v14769_v27 = vld [vmem:[#allocation79_spill] sm:$0xff] }
 0x5bf   :  { %12759 = vpow2.f32 %v11799_v23  ;;  %v11798_v48 = vmul.f32 -1.442695, %v5871_v2  ;;  %v11802_v33 = vmul.f32 -1.442695, %v5873_v30  ;;  %v14770_v0 = vld [vmem:[#allocation80_spill] sm:$0xff]  ;;  %v14771_v21 = vld [vmem:[#allocation81_spill] sm:$0xff] }
 0x5c0   :  { %12761 = vpow2.f32 %v11796_v10 }
 0x5c1   :  { %12763 = vpow2.f32 %v11800_v56 }
 0x5c2   :  { %12765 = vpow2.f32 %v11797_v6 }
 0x5c3   :  { %12767 = vpow2.f32 %v11801_v45  ;;  %v14772_v45 = vld [vmem:[#allocation82_spill] sm:$0xff] }
 0x5c4   :  { %12769 = vpow2.f32 %v11798_v48 }
 0x5c5   :  { %12771 = vpow2.f32 %v11802_v33  ;;  %v14773_v33 = vld [vmem:[#allocation83_spill] sm:$0xff] }
 0x5c8   :  { %v12758_v59 = vpop.eup %12757 }
 0x5c9   :  { %v12760_v39 = vpop.eup %12759  ;;  %v5890_v54 = vadd.f32 1.0, %v12758_v59 }
 0x5ca   :  { %v12762_v20 = vpop.eup %12761  ;;  %v5914_v34 = vadd.f32 1.0, %v12760_v39 }
 0x5cb   :  { %v12764_v44 = vpop.eup %12763  ;;  %v5891_v60 = vadd.f32 1.0, %v12762_v20  ;;  %12773 = vrcp.f32 %v5890_v54 }
 0x5cc   :  { %v12766_v62 = vpop.eup %12765  ;;  %v5915_v50 = vadd.f32 1.0, %v12764_v44  ;;  %12775 = vrcp.f32 %v5914_v34 }
 0x5cd   :  { %v12768_v17 = vpop.eup %12767  ;;  %v5892_v8 = vadd.f32 1.0, %v12766_v62  ;;  %12777 = vrcp.f32 %v5891_v60 }
 0x5ce   :  { %v12770_v46 = vpop.eup %12769  ;;  %v5916_v41 = vadd.f32 1.0, %v12768_v17  ;;  %12779 = vrcp.f32 %v5915_v50 }
 0x5cf   :  { %v12772_v22 = vpop.eup %12771  ;;  %v5893_v28 = vadd.f32 1.0, %v12770_v46  ;;  %12781 = vrcp.f32 %v5892_v8 }
 0x5d0   :  { %v5917_v24 = vadd.f32 1.0, %v12772_v22  ;;  %12783 = vrcp.f32 %v5916_v41 }
 0x5d1   :  { %12785 = vrcp.f32 %v5893_v28 }
 0x5d2   :  { %12787 = vrcp.f32 %v5917_v24 }
 0x5d5   :  { %v12774_v39 = vpop.eup %12773 }
 0x5d6   :  { %v12776_v44 = vpop.eup %12775 }
 0x5d7   :  { %v12778_v62 = vpop.eup %12777  ;;  %v5954_v41 = vmul.f32 %v12776_v44, %v14189_v47  ;;  %v6030_v44 = vld [vmem:[#allocation9 + $0x50] sm:$0xff] }
 0x5d8   :  { %v12780_v34 = vpop.eup %12779 }
 0x5d9   :  { %v12782_v17 = vpop.eup %12781 }
 0x5da   :  { %v12784_v60 = vpop.eup %12783 }
 0x5db   :  { %v12786_v46 = vpop.eup %12785 }
 0x5dc   :  { %v12788_v50 = vpop.eup %12787 }
 0x5f9   :  { %v5810_v3 = vpop.f32.mrb[92].mxu0  ;;  %v5853_v18 = vpop.f32.mrb[92].mxu1 }
 0x5fa   :  { %v5866_v42 = vadd.f32 %v5810_v3, %v14766_v5  ;;  %v5868_v49 = vadd.f32 %v5853_v18, %v14767_v55  ;;  %v5812_v36 = vpop.f32.mrb[93].mxu0  ;;  %v5855_v51 = vpop.f32.mrb[93].mxu1  ;;  %v5955_v3 = vmul.f32 %v12780_v34, %v14191_v12  ;;  %v5957_v12 = vmul.f32 %v12788_v50, %v14200_v25  ;;  %v6035_v34 = vld [vmem:[#allocation9 + $0x78] sm:$0xff] }
 0x5fb   :  { %v5867_v29 = vadd.f32 %v5812_v36, %v14768_v14  ;;  %v5869_v13 = vadd.f32 %v5855_v51, %v14769_v27  ;;  %v5814_v57 = vpop.f32.mrb[94].mxu0  ;;  %v5857_v31 = vpop.f32.mrb[94].mxu1 }
 0x5fc   :  { %12789 = vtanh.f32 %v5866_v42  ;;  %v11803_v2 = vmul.f32 -1.442695, %v5868_v49  ;;  %v5874_v30 = vadd.f32 %v5814_v57, %v14770_v0  ;;  %v5876_v23 = vadd.f32 %v5857_v31, %v14771_v21  ;;  %v5816_v10 = vpop.f32.mrb[95].mxu0  ;;  %v5859_v56 = vpop.f32.mrb[95].mxu1 }
 0x5fd   :  { %12791 = vtanh.f32 %v5867_v29  ;;  %v11804_v6 = vmul.f32 -1.442695, %v5869_v13  ;;  %v5875_v48 = vadd.f32 %v5816_v10, %v14772_v45  ;;  %v5877_v59 = vadd.f32 %v5859_v56, %v14773_v33 }
 0x5fe   :  { %12793 = vpow2.f32 %v11803_v2  ;;  %v11805_v20 = vmul.f32 -1.442695, %v5876_v23  ;;  %v5956_v29 = vmul.f32 %v12784_v60, %v14197_v43  ;;  %v6038_v60 = vld [vmem:[#allocation9 + $0x90] sm:$0xff] }
 0x5ff   :  { %12795 = vpow2.f32 %v11804_v6  ;;  %v11806_v54 = vmul.f32 -1.442695, %v5877_v59 }
 0x600   :  { %12797 = vtanh.f32 %v5874_v30 }
 0x601   :  { %12799 = vpow2.f32 %v11805_v20 }
 0x602   :  { %12801 = vtanh.f32 %v5875_v48 }
 0x603   :  { %12803 = vpow2.f32 %v11806_v54  ;;  %v6034_v54 = vld [vmem:[#allocation9 + $0x70] sm:$0xff] }
 0x606   :  { %v12790_v22 = vpop.eup %12789 }
 0x607   :  { %v12792_v8 = vpop.eup %12791  ;;  %v5958_v28 = vmul.f32 %v12790_v22, %v12774_v39  ;;  %v6042_v22 = vld [vmem:[#allocation9 + $0xb0] sm:$0xff] }
 0x608   :  { %v12794_v24 = vpop.eup %12793  ;;  %v5959_v18 = vmul.f32 %v12792_v8, %v12778_v62  ;;  %v6031_v62 = vld [vmem:[#allocation9 + $0x58] sm:$0xff]  ;;  %v11827_v9 = vcombine.low %v6038_v60, %v6042_v22 }
 0x609   :  { %v12796_v5 = vpop.eup %12795  ;;  %v14255_v42 = vadd.f32 %v5958_v28, %v5954_v41  ;;  %v5942_v55 = vadd.f32 1.0, %v12794_v24  ;;  %v11822_v50 = vcombine.high %v6031_v62, %v6035_v34  ;;  %v6039_v8 = vld [vmem:[#allocation9 + $0x98] sm:$0xff]  ;;  %v11819_v28 = vcombine.low %v6030_v44, %v6034_v54 }
 0x60a   :  { %v12798_v49 = vpop.eup %12797  ;;  %v14257_v36 = vadd.f32 %v5959_v18, %v5955_v3  ;;  %v5943_v51 = vadd.f32 1.0, %v12796_v5  ;;  %v6043_v41 = vld [vmem:[#allocation9 + $0xb8] sm:$0xff]  ;;  %v11821_v24 = vcombine.low %v6031_v62, %v6035_v34  ;;  %v11828_v3 = vcombine.high %v6038_v60, %v6042_v22  ;;  %v6046_v5 = vld [vmem:[#allocation9 + $0xd0] sm:$0xff] }
 0x60b   :  { %v12800_v14 = vpop.eup %12799  ;;  %12805 = vtanh.f32 %v14255_v42  ;;  %v5960_v27 = vmul.f32 %v12798_v49, %v12782_v17  ;;  %v11830_v18 = vcombine.high %v6039_v8, %v6043_v41  ;;  %v6047_v49 = vld [vmem:[#allocation9 + $0xd8] sm:$0xff]  ;;  %v11829_v61 = vcombine.low %v6039_v8, %v6043_v41  ;;  %v6082_v62 = vld [vmem:[#allocation9 + $0x1f0] sm:$0xff] }
 0x60c   :  { %v12802_v47 = vpop.eup %12801  ;;  %12807 = vrcp.f32 %v5942_v55  ;;  %v5944_v13 = vadd.f32 1.0, %v12800_v14  ;;  %v6050_v55 = vld [vmem:[#allocation9 + $0xf0] sm:$0xff]  ;;  %v6055_v14 = vld [vmem:[#allocation9 + $0x118] sm:$0xff] }
 0x60d   :  { %v12804_v57 = vpop.eup %12803  ;;  %12809 = vtanh.f32 %v14257_v36  ;;  %v14263_v31 = vadd.f32 %v5960_v27, %v5956_v29  ;;  %v5961_v2 = vmul.f32 %v12802_v47, %v12786_v46  ;;  %v11820_v46 = vcombine.high %v6030_v44, %v6034_v54  ;;  %v6059_v29 = vld [vmem:[#allocation9 + $0x138] sm:$0xff]  ;;  %v6078_v54 = vld [vmem:[#allocation9 + $0x1d0] sm:$0xff] }
 0x60e   :  { %12811 = vrcp.f32 %v5943_v51  ;;  %v5945_v0 = vadd.f32 1.0, %v12804_v57  ;;  %v6051_v51 = vld [vmem:[#allocation9 + $0xf8] sm:$0xff]  ;;  %v11836_v53 = vcombine.high %v6046_v5, %v6050_v55  ;;  %v11835_v27 = vcombine.low %v6046_v5, %v6050_v55  ;;  %v6086_v41 = vld [vmem:[#allocation9 + $0x210] sm:$0xff] }
 0x60f   :  { %12813 = vtanh.f32 %v14263_v31  ;;  %v14266_v30 = vadd.f32 %v5961_v2, %v5957_v12  ;;  %v11838_v4 = vcombine.high %v6047_v49, %v6051_v51  ;;  %v11837_v47 = vcombine.low %v6047_v49, %v6051_v51  ;;  %v6062_v12 = vld [vmem:[#allocation9 + $0x150] sm:$0xff]  ;;  %v6079_v34 = vld [vmem:[#allocation9 + $0x1d8] sm:$0xff] }
 0x610   :  { %12815 = vrcp.f32 %v5944_v13  ;;  %v11846_v57 = vcombine.high %v6055_v14, %v6059_v29  ;;  %v6066_v2 = vld [vmem:[#allocation9 + $0x170] sm:$0xff]  ;;  %v6083_v60 = vld [vmem:[#allocation9 + $0x1f8] sm:$0xff]  ;;  %v11868_v22 = vcombine.high %v6078_v54, %v6082_v62 }
 0x611   :  { %12817 = vtanh.f32 %v14266_v30  ;;  %v11870_v8 = vcombine.high %v6079_v34, %v6083_v60  ;;  %v11869_v5 = vcombine.low %v6079_v34, %v6083_v60  ;;  %v6094_v51 = vld [vmem:[#allocation9 + $0x250] sm:$0xff] }
 0x612   :  { %12819 = vrcp.f32 %v5945_v0  ;;  %v6063_v0 = vld [vmem:[#allocation9 + $0x158] sm:$0xff]  ;;  %v6126_v60 = vld [vmem:[#allocation9 + $0x350] sm:$0xff] }
 0x615   :  { %v12806_v43 = vpop.eup %12805 }
 0x616   :  { %v12808_v21 = vpop.eup %12807 }
 0x617   :  { %v12810_v23 = vpop.eup %12809  ;;  %v5970_v45 = vmul.f32 %v12808_v21, %v12806_v43  ;;  %v6067_v43 = vld [vmem:[#allocation9 + $0x178] sm:$0xff] }
 0x618   :  { %v12812_v10 = vpop.eup %12811 }
 0x619   :  { %v12814_v25 = vpop.eup %12813  ;;  %v5971_v59 = vmul.f32 %v12812_v10, %v12810_v23  ;;  %v11845_v23 = vcombine.low %v6055_v14, %v6059_v29  ;;  %v11852_v10 = vcombine.high %v6062_v12, %v6066_v2  ;;  %v6102_v29 = vld [vmem:[#allocation9 + $0x290] sm:$0xff] }
 0x61a   :  { %v12816_v56 = vpop.eup %12815 }
 0x61b   :  { %v12818_v6 = vpop.eup %12817  ;;  %v5972_v48 = vmul.f32 %v12816_v56, %v12814_v25  ;;  %v11854_v25 = vcombine.high %v6063_v0, %v6067_v43  ;;  %v6070_v56 = vld [vmem:[#allocation9 + $0x190] sm:$0xff] }
 0x61c   :  { %v12820_v33 = vpop.eup %12819 }
 0x61d   :  { %v5973_v39 = vmul.f32 %v12820_v33, %v12818_v6  ;;  %v14269_v20 = vpack.c.bf16 %v5972_v48, %v5970_v45  ;;  %v6074_v6 = vld [vmem:[#allocation9 + $0x1b0] sm:$0xff]  ;;  %v6071_v45 = vld [vmem:[#allocation9 + $0x198] sm:$0xff]  ;;  %v11851_v33 = vcombine.low %v6062_v12, %v6066_v2 }
 0x61e   :  { %v6075_v48 = vld [vmem:[#allocation9 + $0x1b8] sm:$0xff] }
 0x61f   :  { %v14271_v17 = vpack.c.bf16 %v5973_v39, %v5971_v59  ;;  %v11853_v59 = vcombine.low %v6063_v0, %v6067_v43  ;;  %v11860_v39 = vcombine.high %v6070_v56, %v6074_v6  ;;  %v11862_v44 = vcombine.high %v6071_v45, %v6075_v48  ;;  %v6110_v43 = vld [vmem:[#allocation9 + $0x2d0] sm:$0xff] }
 0x621   :  { %6820 = vmatprep.mubr.bf16.mxu0 %v14271_v17  ;;  %6863 = vmatprep.mubr.bf16.mxu1 %v14271_v17 }
 0x622   :  { %6821 = vmatmul.mubr.bf16.vlgmr.msra.gmra.mrb[96].mxu0 %v14269_v20  ;;  %6864 = vmatmul.mubr.bf16.vlgmr.msra.gmra.mrb[96].mxu1 %v14269_v20 }
 0x623   :  { %6875 = vmatpush1.bf16.msra.mxu0 %v11811_v58  ;;  %6918 = vmatpush1.bf16.msra.mxu1 %v11813_v40  ;;  %v6054_v58 = vld [vmem:[#allocation9 + $0x110] sm:$0xff] }
 0x624   :  { %6906 = vmatprep.mubr.bf16.mxu0 %v14271_v17  ;;  %6949 = vmatprep.mubr.bf16.mxu1 %v14271_v17  ;;  %v6058_v40 = vld [vmem:[#allocation9 + $0x130] sm:$0xff] }
 0x625   :  { %6876 = vmatprep.subr.bf16.mxu0 %v11820_v46  ;;  %6919 = vmatprep.subr.bf16.mxu1 %v11822_v50  ;;  %v11844_v13 = vcombine.high %v6054_v58, %v6058_v40  ;;  %v11843_v21 = vcombine.low %v6054_v58, %v6058_v40  ;;  %v11859_v46 = vcombine.low %v6070_v56, %v6074_v6 }
 0x626   :  { %v11861_v50 = vcombine.low %v6071_v45, %v6075_v48  ;;  %v6118_v48 = vld [vmem:[#allocation9 + $0x310] sm:$0xff] }
 0x627   :  { %6877 = vmatpush1.bf16.msra.mxu0 %v11819_v28  ;;  %6920 = vmatpush1.bf16.msra.mxu1 %v11821_v24  ;;  %v6090_v28 = vld [vmem:[#allocation9 + $0x230] sm:$0xff]  ;;  %v6087_v24 = vld [vmem:[#allocation9 + $0x218] sm:$0xff] }
 0x628   :  { %6878 = vmatprep.subr.bf16.mxu0 %v11828_v3  ;;  %6921 = vmatprep.subr.bf16.mxu1 %v11830_v18  ;;  %v6091_v3 = vld [vmem:[#allocation9 + $0x238] sm:$0xff]  ;;  %v11867_v18 = vcombine.low %v6078_v54, %v6082_v62  ;;  %v11876_v55 = vcombine.high %v6086_v41, %v6090_v28 }
 0x629   :  { %v11878_v49 = vcombine.high %v6087_v24, %v6091_v3  ;;  %v11877_v58 = vcombine.low %v6087_v24, %v6091_v3  ;;  %v6134_v3 = vld [vmem:[#allocation9 + $0x390] sm:$0xff] }
 0x62b   :  { %6879 = vmatpush1.bf16.msra.mxu0 %v11827_v9  ;;  %6922 = vmatpush1.bf16.msra.mxu1 %v11829_v61  ;;  %v6098_v9 = vld [vmem:[#allocation9 + $0x270] sm:$0xff]  ;;  %v6095_v61 = vld [vmem:[#allocation9 + $0x258] sm:$0xff] }
 0x62c   :  { %6880 = vmatprep.subr.bf16.mxu0 %v11836_v53  ;;  %6923 = vmatprep.subr.bf16.mxu1 %v11838_v4  ;;  %v6099_v53 = vld [vmem:[#allocation9 + $0x278] sm:$0xff]  ;;  %v11875_v4 = vcombine.low %v6086_v41, %v6090_v28  ;;  %v11884_v40 = vcombine.high %v6094_v51, %v6098_v9 }
 0x62d   :  { %v11886_v14 = vcombine.high %v6095_v61, %v6099_v53  ;;  %v11885_v12 = vcombine.low %v6095_v61, %v6099_v53  ;;  %v6142_v53 = vld [vmem:[#allocation9 + $0x3d0] sm:$0xff] }
 0x62f   :  { %6881 = vmatpush1.bf16.msra.mxu0 %v11835_v27  ;;  %6924 = vmatpush1.bf16.msra.mxu1 %v11837_v47  ;;  %v6106_v27 = vld [vmem:[#allocation9 + $0x2b0] sm:$0xff]  ;;  %v6103_v47 = vld [vmem:[#allocation9 + $0x298] sm:$0xff] }
 0x630   :  { %6882 = vmatprep.subr.bf16.mxu0 %v11844_v13  ;;  %6925 = vmatprep.subr.bf16.mxu1 %v11846_v57  ;;  %v6107_v13 = vld [vmem:[#allocation9 + $0x2b8] sm:$0xff]  ;;  %v11883_v57 = vcombine.low %v6094_v51, %v6098_v9  ;;  %v11892_v2 = vcombine.high %v6102_v29, %v6106_v27 }
 0x631   :  { %v11894_v0 = vcombine.high %v6103_v47, %v6107_v13  ;;  %v11893_v56 = vcombine.low %v6103_v47, %v6107_v13 }
 0x633   :  { %6883 = vmatpush1.bf16.msra.mxu0 %v11843_v21  ;;  %6926 = vmatpush1.bf16.msra.mxu1 %v11845_v23  ;;  %v6114_v21 = vld [vmem:[#allocation9 + $0x2f0] sm:$0xff]  ;;  %v6111_v23 = vld [vmem:[#allocation9 + $0x2d8] sm:$0xff] }
 0x634   :  { %6884 = vmatprep.subr.bf16.mxu0 %v11852_v10  ;;  %6927 = vmatprep.subr.bf16.mxu1 %v11854_v25  ;;  %v6115_v10 = vld [vmem:[#allocation9 + $0x2f8] sm:$0xff]  ;;  %v11891_v25 = vcombine.low %v6102_v29, %v6106_v27  ;;  %v11900_v6 = vcombine.high %v6110_v43, %v6114_v21 }
 0x635   :  { %v11902_v45 = vcombine.high %v6111_v23, %v6115_v10  ;;  %v11901_v54 = vcombine.low %v6111_v23, %v6115_v10  ;;  %v7123_v23 = vld [vmem:[#allocation9 + $0x28] sm:$0xff]  ;;  %v7126_v10 = vld [vmem:[#allocation9 + $0x40] sm:$0xff] }
 0x637   :  { %6885 = vmatpush1.bf16.msra.mxu0 %v11851_v33  ;;  %6928 = vmatpush1.bf16.msra.mxu1 %v11853_v59  ;;  %v6122_v33 = vld [vmem:[#allocation9 + $0x330] sm:$0xff]  ;;  %v6119_v59 = vld [vmem:[#allocation9 + $0x318] sm:$0xff] }
 0x638   :  { %6886 = vmatprep.subr.bf16.mxu0 %v11860_v39  ;;  %6929 = vmatprep.subr.bf16.mxu1 %v11862_v44  ;;  %v6123_v39 = vld [vmem:[#allocation9 + $0x338] sm:$0xff]  ;;  %v11899_v44 = vcombine.low %v6110_v43, %v6114_v21  ;;  %v11908_v62 = vcombine.high %v6118_v48, %v6122_v33 }
 0x639   :  { %v11910_v34 = vcombine.high %v6119_v59, %v6123_v39  ;;  %v11909_v41 = vcombine.low %v6119_v59, %v6123_v39  ;;  %v7134_v59 = vld [vmem:[#allocation9 + $0x80] sm:$0xff] }
 0x63b   :  { %6887 = vmatpush1.bf16.msra.mxu0 %v11859_v46  ;;  %6930 = vmatpush1.bf16.msra.mxu1 %v11861_v50  ;;  %v6130_v46 = vld [vmem:[#allocation9 + $0x370] sm:$0xff]  ;;  %v6127_v50 = vld [vmem:[#allocation9 + $0x358] sm:$0xff] }
 0x63c   :  { %6888 = vmatprep.subr.bf16.mxu0 %v11868_v22  ;;  %6931 = vmatprep.subr.bf16.mxu1 %v11870_v8  ;;  %v6131_v22 = vld [vmem:[#allocation9 + $0x378] sm:$0xff]  ;;  %v11907_v8 = vcombine.low %v6118_v48, %v6122_v33  ;;  %v11916_v28 = vcombine.high %v6126_v60, %v6130_v46  ;;  %v7127_v48 = vld [vmem:[#allocation9 + $0x48] sm:$0xff] }
 0x63d   :  { %v11918_v24 = vcombine.high %v6127_v50, %v6131_v22  ;;  %v11917_v51 = vcombine.low %v6127_v50, %v6131_v22  ;;  %v7131_v33 = vld [vmem:[#allocation9 + $0x68] sm:$0xff]  ;;  %v7142_v22 = vld [vmem:[#allocation9 + $0xc0] sm:$0xff] }
 0x63e   :  { %v11958_v39 = vcombine.high %v7127_v48, %v7131_v33 }
 0x63f   :  { %6889 = vmatpush1.bf16.msra.mxu0 %v11867_v18  ;;  %6932 = vmatpush1.bf16.msra.mxu1 %v11869_v5  ;;  %v6138_v18 = vld [vmem:[#allocation9 + $0x3b0] sm:$0xff]  ;;  %v6135_v5 = vld [vmem:[#allocation9 + $0x398] sm:$0xff] }
 0x640   :  { %6890 = vmatprep.subr.bf16.mxu0 %v11876_v55  ;;  %6933 = vmatprep.subr.bf16.mxu1 %v11878_v49  ;;  %v6139_v55 = vld [vmem:[#allocation9 + $0x3b8] sm:$0xff]  ;;  %v11915_v49 = vcombine.low %v6126_v60, %v6130_v46  ;;  %v11924_v9 = vcombine.high %v6134_v3, %v6138_v18  ;;  %v11957_v60 = vcombine.low %v7127_v48, %v7131_v33  ;;  %v7174_v48 = vld [vmem:[#allocation9 + $0x1c0] sm:$0xff] }
 0x641   :  { %v11926_v61 = vcombine.high %v6135_v5, %v6139_v55  ;;  %v11925_v29 = vcombine.low %v6135_v5, %v6139_v55  ;;  %v7150_v55 = vld [vmem:[#allocation9 + $0x100] sm:$0xff] }
 0x642   :  { %v7178_v33 = vld [vmem:[#allocation9 + $0x1e0] sm:$0xff] }
 0x643   :  { %6891 = vmatpush1.bf16.msra.mxu0 %v11875_v4  ;;  %6934 = vmatpush1.bf16.msra.mxu1 %v11877_v58  ;;  %v6146_v4 = vld [vmem:[#allocation9 + $0x3f0] sm:$0xff]  ;;  %v6143_v58 = vld [vmem:[#allocation9 + $0x3d8] sm:$0xff] }
 0x644   :  { %6892 = vmatprep.subr.bf16.mxu0 %v11884_v40  ;;  %6935 = vmatprep.subr.bf16.mxu1 %v11886_v14  ;;  %v6147_v40 = vld [vmem:[#allocation9 + $0x3f8] sm:$0xff]  ;;  %v11923_v14 = vcombine.low %v6134_v3, %v6138_v18  ;;  %v11932_v27 = vcombine.high %v6142_v53, %v6146_v4  ;;  %v11931_v13 = vcombine.low %v6142_v53, %v6146_v4 }
 0x645   :  { %v11934_v47 = vcombine.high %v6143_v58, %v6147_v40 }
 0x647   :  { %6893 = vmatpush1.bf16.msra.mxu0 %v11883_v57  ;;  %6936 = vmatpush1.bf16.msra.mxu1 %v11885_v12  ;;  %v11933_v57 = vcombine.low %v6143_v58, %v6147_v40  ;;  %v7118_v12 = vld [vmem:[#allocation9] sm:$0xff] }
 0x648   :  { %6894 = vmatprep.subr.bf16.mxu0 %v11892_v2  ;;  %6937 = vmatprep.subr.bf16.mxu1 %v11894_v0  ;;  %v7122_v2 = vld [vmem:[#allocation9 + $0x20] sm:$0xff]  ;;  %v7119_v0 = vld [vmem:[#allocation9 + $0x8] sm:$0xff] }
 0x649   :  { %v11947_v43 = vcombine.low %v7118_v12, %v7122_v2  ;;  %v11948_v21 = vcombine.high %v7118_v12, %v7122_v2  ;;  %v7158_v40 = vld [vmem:[#allocation9 + $0x140] sm:$0xff] }
 0x64a   :  { %v7166_v2 = vld [vmem:[#allocation9 + $0x180] sm:$0xff] }
 0x64b   :  { %6895 = vmatpush1.bf16.msra.mxu0 %v11891_v25  ;;  %6938 = vmatpush1.bf16.msra.mxu1 %v11893_v56  ;;  %v7130_v25 = vld [vmem:[#allocation9 + $0x60] sm:$0xff]  ;;  %v11949_v56 = vcombine.low %v7119_v0, %v7123_v23 }
 0x64c   :  { %6896 = vmatprep.subr.bf16.mxu0 %v11900_v6  ;;  %6939 = vmatprep.subr.bf16.mxu1 %v11902_v45  ;;  %v11950_v6 = vcombine.high %v7119_v0, %v7123_v23  ;;  %v11956_v45 = vcombine.high %v7126_v10, %v7130_v25  ;;  %v7170_v0 = vld [vmem:[#allocation9 + $0x1a0] sm:$0xff] }
 0x64f   :  { %6897 = vmatpush1.bf16.msra.mxu0 %v11899_v44  ;;  %6940 = vmatpush1.bf16.msra.mxu1 %v11901_v54  ;;  %v7138_v44 = vld [vmem:[#allocation9 + $0xa0] sm:$0xff]  ;;  %v7135_v54 = vld [vmem:[#allocation9 + $0x88] sm:$0xff] }
 0x650   :  { %6898 = vmatprep.subr.bf16.mxu0 %v11908_v62  ;;  %6941 = vmatprep.subr.bf16.mxu1 %v11910_v34  ;;  %v7139_v62 = vld [vmem:[#allocation9 + $0xa8] sm:$0xff]  ;;  %v11955_v34 = vcombine.low %v7126_v10, %v7130_v25  ;;  %v11964_v46 = vcombine.high %v7134_v59, %v7138_v44  ;;  %v11996_v25 = vcombine.high %v7166_v2, %v7170_v0 }
 0x651   :  { %v11966_v50 = vcombine.high %v7135_v54, %v7139_v62  ;;  %v11965_v3 = vcombine.low %v7135_v54, %v7139_v62  ;;  %v12003_v54 = vcombine.low %v7174_v48, %v7178_v33 }
 0x653   :  { %6899 = vmatpush1.bf16.msra.mxu0 %v11907_v8  ;;  %6942 = vmatpush1.bf16.msra.mxu1 %v11909_v41  ;;  %v7146_v8 = vld [vmem:[#allocation9 + $0xe0] sm:$0xff]  ;;  %v7143_v41 = vld [vmem:[#allocation9 + $0xc8] sm:$0xff] }
 0x654   :  { %6900 = vmatprep.subr.bf16.mxu0 %v11916_v28  ;;  %6943 = vmatprep.subr.bf16.mxu1 %v11918_v24  ;;  %v7147_v28 = vld [vmem:[#allocation9 + $0xe8] sm:$0xff]  ;;  %v11963_v24 = vcombine.low %v7134_v59, %v7138_v44  ;;  %v11972_v18 = vcombine.high %v7142_v22, %v7146_v8 }
 0x655   :  { %v11974_v5 = vcombine.high %v7143_v41, %v7147_v28  ;;  %v11973_v53 = vcombine.low %v7143_v41, %v7147_v28  ;;  %v7175_v59 = vld [vmem:[#allocation9 + $0x1c8] sm:$0xff] }
 0x656   :  { %v7179_v44 = vld [vmem:[#allocation9 + $0x1e8] sm:$0xff] }
 0x657   :  { %6901 = vmatpush1.bf16.msra.mxu0 %v11915_v49  ;;  %6944 = vmatpush1.bf16.msra.mxu1 %v11917_v51  ;;  %v7154_v49 = vld [vmem:[#allocation9 + $0x120] sm:$0xff]  ;;  %v7151_v51 = vld [vmem:[#allocation9 + $0x108] sm:$0xff]  ;;  %v12005_v62 = vcombine.low %v7175_v59, %v7179_v44 }
 0x658   :  { %6902 = vmatprep.subr.bf16.mxu0 %v11924_v9  ;;  %6945 = vmatprep.subr.bf16.mxu1 %v11926_v61  ;;  %v7155_v9 = vld [vmem:[#allocation9 + $0x128] sm:$0xff]  ;;  %v11971_v61 = vcombine.low %v7142_v22, %v7146_v8  ;;  %v11980_v4 = vcombine.high %v7150_v55, %v7154_v49 }
 0x659   :  { %v11982_v58 = vcombine.high %v7151_v51, %v7155_v9  ;;  %v7187_v8 = vld [vmem:[#allocation9 + $0x228] sm:$0xff] }
 0x65b   :  { %6903 = vmatpush1.bf16.msra.mxu0 %v11923_v14  ;;  %6946 = vmatpush1.bf16.msra.mxu1 %v11925_v29  ;;  %v7162_v14 = vld [vmem:[#allocation9 + $0x160] sm:$0xff]  ;;  %v7159_v29 = vld [vmem:[#allocation9 + $0x148] sm:$0xff] }
 0x65c   :  { %6904 = vmatprep.subr.bf16.mxu0 %v11932_v27  ;;  %6947 = vmatprep.subr.bf16.mxu1 %v11934_v47  ;;  %v7163_v27 = vld [vmem:[#allocation9 + $0x168] sm:$0xff]  ;;  %v11979_v47 = vcombine.low %v7150_v55, %v7154_v49  ;;  %v11987_v23 = vcombine.low %v7158_v40, %v7162_v14 }
 0x65d   :  { %v11990_v12 = vcombine.high %v7159_v29, %v7163_v27  ;;  %v11989_v10 = vcombine.low %v7159_v29, %v7163_v27  ;;  %v7195_v49 = vld [vmem:[#allocation9 + $0x268] sm:$0xff] }
 0x65f   :  { %6905 = vmatpush1.bf16.msra.mxu0 %v11931_v13  ;;  %6948 = vmatpush1.bf16.msra.mxu1 %v11933_v57  ;;  %v11981_v13 = vcombine.low %v7151_v51, %v7155_v9  ;;  %v11988_v57 = vcombine.high %v7158_v40, %v7162_v14  ;;  %v7203_v14 = vld [vmem:[#allocation9 + $0x2a8] sm:$0xff] }
 0x660   :  { %7886 = vmatprep.subr.bf16.mxu0 %v11948_v21  ;;  %7929 = vmatprep.subr.bf16.mxu1 %v11950_v6  ;;  %v7171_v21 = vld [vmem:[#allocation9 + $0x1a8] sm:$0xff]  ;;  %v11995_v6 = vcombine.low %v7166_v2, %v7170_v0 }
 0x661   :  { %v7211_v0 = vld [vmem:[#allocation9 + $0x2e8] sm:$0xff] }
 0x662   :  { %6907 = vmatmul.mubr.bf16.vlgmr.msra.gmra.mrb[100].mxu0 %v14269_v20  ;;  %6950 = vmatmul.mubr.bf16.vlgmr.msra.gmra.mrb[100].mxu1 %v14269_v20 }
 0x663   :  { %7887 = vmatpush1.bf16.msra.mxu0 %v11947_v43  ;;  %7930 = vmatpush1.bf16.msra.mxu1 %v11949_v56  ;;  %v7167_v43 = vld [vmem:[#allocation9 + $0x188] sm:$0xff] }
 0x664   :  { %7888 = vmatprep.subr.bf16.mxu0 %v11956_v45  ;;  %7931 = vmatprep.subr.bf16.mxu1 %v11958_v39  ;;  %v11998_v56 = vcombine.high %v7167_v43, %v7171_v21  ;;  %v11997_v45 = vcombine.low %v7167_v43, %v7171_v21  ;;  %v12004_v39 = vcombine.high %v7174_v48, %v7178_v33 }
 0x667   :  { %7889 = vmatpush1.bf16.msra.mxu0 %v11955_v34  ;;  %7932 = vmatpush1.bf16.msra.mxu1 %v11957_v60  ;;  %v12006_v34 = vcombine.high %v7175_v59, %v7179_v44  ;;  %v7182_v60 = vld [vmem:[#allocation9 + $0x200] sm:$0xff] }
 0x668   :  { %7890 = vmatprep.subr.bf16.mxu0 %v11964_v46  ;;  %7933 = vmatprep.subr.bf16.mxu1 %v11966_v50  ;;  %v7186_v46 = vld [vmem:[#allocation9 + $0x220] sm:$0xff]  ;;  %v7183_v50 = vld [vmem:[#allocation9 + $0x208] sm:$0xff] }
 0x669   :  { %v12012_v22 = vcombine.high %v7182_v60, %v7186_v46  ;;  %v12011_v41 = vcombine.low %v7182_v60, %v7186_v46  ;;  %v12013_v28 = vcombine.low %v7183_v50, %v7187_v8  ;;  %v7226_v44 = vld [vmem:[#allocation9 + $0x360] sm:$0xff] }
 0x66b   :  { %7891 = vmatpush1.bf16.msra.mxu0 %v11963_v24  ;;  %7934 = vmatpush1.bf16.msra.mxu1 %v11965_v3  ;;  %v12014_v24 = vcombine.high %v7183_v50, %v7187_v8  ;;  %v7190_v3 = vld [vmem:[#allocation9 + $0x240] sm:$0xff] }
 0x66c   :  { %7892 = vmatprep.subr.bf16.mxu0 %v11972_v18  ;;  %7935 = vmatprep.subr.bf16.mxu1 %v11974_v5  ;;  %v7194_v18 = vld [vmem:[#allocation9 + $0x260] sm:$0xff]  ;;  %v7191_v5 = vld [vmem:[#allocation9 + $0x248] sm:$0xff] }
 0x66d   :  { %v12020_v55 = vcombine.high %v7190_v3, %v7194_v18  ;;  %v12019_v51 = vcombine.low %v7190_v3, %v7194_v18  ;;  %v12021_v9 = vcombine.low %v7191_v5, %v7195_v49  ;;  %v7234_v8 = vld [vmem:[#allocation9 + $0x3a0] sm:$0xff] }
 0x66f   :  { %7893 = vmatpush1.bf16.msra.mxu0 %v11971_v61  ;;  %7936 = vmatpush1.bf16.msra.mxu1 %v11973_v53  ;;  %v12022_v61 = vcombine.high %v7191_v5, %v7195_v49  ;;  %v7198_v53 = vld [vmem:[#allocation9 + $0x280] sm:$0xff] }
 0x670   :  { %7894 = vmatprep.subr.bf16.mxu0 %v11980_v4  ;;  %7937 = vmatprep.subr.bf16.mxu1 %v11982_v58  ;;  %v7202_v4 = vld [vmem:[#allocation9 + $0x2a0] sm:$0xff]  ;;  %v7199_v58 = vld [vmem:[#allocation9 + $0x288] sm:$0xff] }
 0x671   :  { %v12028_v40 = vcombine.high %v7198_v53, %v7202_v4  ;;  %v12027_v29 = vcombine.low %v7198_v53, %v7202_v4  ;;  %v12029_v27 = vcombine.low %v7199_v58, %v7203_v14  ;;  %v7242_v49 = vld [vmem:[#allocation9 + $0x3e0] sm:$0xff] }
 0x673   :  { %7895 = vmatpush1.bf16.msra.mxu0 %v11979_v47  ;;  %7938 = vmatpush1.bf16.msra.mxu1 %v11981_v13  ;;  %v12030_v47 = vcombine.high %v7199_v58, %v7203_v14  ;;  %v7206_v13 = vld [vmem:[#allocation9 + $0x2c0] sm:$0xff]  ;;  %v14289_v14 = vld [vmem:[#allocation9 + $0x30] sm:$0xff] }
 0x674   :  { %7896 = vmatprep.subr.bf16.mxu0 %v11988_v57  ;;  %7939 = vmatprep.subr.bf16.mxu1 %v11990_v12  ;;  %v7210_v57 = vld [vmem:[#allocation9 + $0x2e0] sm:$0xff]  ;;  %v7207_v12 = vld [vmem:[#allocation9 + $0x2c8] sm:$0xff] }
 0x675   :  { %v12036_v2 = vcombine.high %v7206_v13, %v7210_v57  ;;  %v12035_v43 = vcombine.low %v7206_v13, %v7210_v57  ;;  %v12037_v21 = vcombine.low %v7207_v12, %v7211_v0 }
 0x677   :  { %7897 = vmatpush1.bf16.msra.mxu0 %v11987_v23  ;;  %7940 = vmatpush1.bf16.msra.mxu1 %v11989_v10  ;;  %v12038_v23 = vcombine.high %v7207_v12, %v7211_v0  ;;  %v7214_v10 = vld [vmem:[#allocation9 + $0x300] sm:$0xff] }
 0x678   :  { %7898 = vmatprep.subr.bf16.mxu0 %v11996_v25  ;;  %7941 = vmatprep.subr.bf16.mxu1 %v11998_v56  ;;  %v7218_v25 = vld [vmem:[#allocation9 + $0x320] sm:$0xff]  ;;  %v7215_v56 = vld [vmem:[#allocation9 + $0x308] sm:$0xff] }
 0x679   :  { %v12043_v48 = vcombine.low %v7214_v10, %v7218_v25 }
 0x67b   :  { %7899 = vmatpush1.bf16.msra.mxu0 %v11995_v6  ;;  %7942 = vmatpush1.bf16.msra.mxu1 %v11997_v45  ;;  %v12044_v6 = vcombine.high %v7214_v10, %v7218_v25  ;;  %v7219_v45 = vld [vmem:[#allocation9 + $0x328] sm:$0xff] }
 0x67c   :  { %7900 = vmatprep.subr.bf16.mxu0 %v12004_v39  ;;  %7943 = vmatprep.subr.bf16.mxu1 %v12006_v34  ;;  %v12045_v33 = vcombine.low %v7215_v56, %v7219_v45  ;;  %v12046_v59 = vcombine.high %v7215_v56, %v7219_v45  ;;  %v7222_v39 = vld [vmem:[#allocation9 + $0x340] sm:$0xff]  ;;  %v7227_v34 = vld [vmem:[#allocation9 + $0x368] sm:$0xff] }
 0x67d   :  { %v12051_v60 = vcombine.low %v7222_v39, %v7226_v44 }
 0x67f   :  { %7901 = vmatpush1.bf16.msra.mxu0 %v12003_v54  ;;  %7944 = vmatpush1.bf16.msra.mxu1 %v12005_v62  ;;  %v7223_v54 = vld [vmem:[#allocation9 + $0x348] sm:$0xff]  ;;  %v12052_v62 = vcombine.high %v7222_v39, %v7226_v44 }
 0x680   :  { %7902 = vmatprep.subr.bf16.mxu0 %v12012_v22  ;;  %7945 = vmatprep.subr.bf16.mxu1 %v12014_v24  ;;  %v12053_v46 = vcombine.low %v7223_v54, %v7227_v34  ;;  %v12054_v50 = vcombine.high %v7223_v54, %v7227_v34  ;;  %v7230_v22 = vld [vmem:[#allocation9 + $0x380] sm:$0xff]  ;;  %v7235_v24 = vld [vmem:[#allocation9 + $0x3a8] sm:$0xff] }
 0x681   :  { %v12059_v3 = vcombine.low %v7230_v22, %v7234_v8  ;;  %v14778_v44 = vld [vmem:[#allocation40_spill] sm:$0xff] }
 0x683   :  { %7903 = vmatpush1.bf16.msra.mxu0 %v12011_v41  ;;  %7946 = vmatpush1.bf16.msra.mxu1 %v12013_v28  ;;  %v7231_v41 = vld [vmem:[#allocation9 + $0x388] sm:$0xff]  ;;  %v12060_v28 = vcombine.high %v7230_v22, %v7234_v8  ;;  %v14781_v8 = vld [vmem:[#allocation43_spill] sm:$0xff] }
 0x684   :  { %7904 = vmatprep.subr.bf16.mxu0 %v12020_v55  ;;  %7947 = vmatprep.subr.bf16.mxu1 %v12022_v61  ;;  %v12061_v18 = vcombine.low %v7231_v41, %v7235_v24  ;;  %v12062_v5 = vcombine.high %v7231_v41, %v7235_v24  ;;  %v7238_v55 = vld [vmem:[#allocation9 + $0x3c0] sm:$0xff]  ;;  %v7243_v61 = vld [vmem:[#allocation9 + $0x3e8] sm:$0xff] }
 0x685   :  { %v12067_v53 = vcombine.low %v7238_v55, %v7242_v49 }
 0x687   :  { %7905 = vmatpush1.bf16.msra.mxu0 %v12019_v51  ;;  %7948 = vmatpush1.bf16.msra.mxu1 %v12021_v9  ;;  %v7239_v51 = vld [vmem:[#allocation9 + $0x3c8] sm:$0xff]  ;;  %v12068_v9 = vcombine.high %v7238_v55, %v7242_v49 }
 0x688   :  { %7906 = vmatprep.subr.bf16.mxu0 %v12028_v40  ;;  %7949 = vmatprep.subr.bf16.mxu1 %v12030_v47  ;;  %v12069_v4 = vcombine.low %v7239_v51, %v7243_v61  ;;  %v12070_v58 = vcombine.high %v7239_v51, %v7243_v61  ;;  %v14287_v40 = vld [vmem:[#allocation9 + $0x10] sm:$0xff]  ;;  %v14295_v47 = vld [vmem:[#allocation9 + $0x38] sm:$0xff] }
 0x689   :  { %v11951_v13 = vcombine.low %v14287_v40, %v14289_v14 }
 0x68b   :  { %7907 = vmatpush1.bf16.msra.mxu0 %v12027_v29  ;;  %7950 = vmatpush1.bf16.msra.mxu1 %v12029_v27  ;;  %v14291_v29 = vld [vmem:[#allocation9 + $0x18] sm:$0xff]  ;;  %v11952_v27 = vcombine.high %v14287_v40, %v14289_v14 }
 0x68c   :  { %7908 = vmatprep.subr.bf16.mxu0 %v12036_v2  ;;  %7951 = vmatprep.subr.bf16.mxu1 %v12038_v23  ;;  %v11953_v57 = vcombine.low %v14291_v29, %v14295_v47  ;;  %v11954_v12 = vcombine.high %v14291_v29, %v14295_v47  ;;  %v14775_v23 = vld [vmem:[#allocation37_spill] sm:$0xff] }
 0x68f   :  { %7909 = vmatpush1.bf16.msra.mxu0 %v12035_v43  ;;  %7952 = vmatpush1.bf16.msra.mxu1 %v12037_v21  ;;  %v14774_v43 = vld [vmem:[#allocation36_spill] sm:$0xff] }
 0x690   :  { %7910 = vmatprep.subr.bf16.mxu0 %v12044_v6  ;;  %7953 = vmatprep.subr.bf16.mxu1 %v12046_v59  ;;  %v14776_v6 = vld [vmem:[#allocation38_spill] sm:$0xff] }
 0x693   :  { %7911 = vmatpush1.bf16.msra.mxu0 %v12043_v48  ;;  %7954 = vmatpush1.bf16.msra.mxu1 %v12045_v33  ;;  %v14777_v48 = vld [vmem:[#allocation39_spill] sm:$0xff] }
 0x694   :  { %7912 = vmatprep.subr.bf16.mxu0 %v12052_v62  ;;  %7955 = vmatprep.subr.bf16.mxu1 %v12054_v50  ;;  %v14779_v62 = vld [vmem:[#allocation41_spill] sm:$0xff]  ;;  %v14780_v50 = vld [vmem:[#allocation42_spill] sm:$0xff] }
 0x697   :  { %7913 = vmatpush1.bf16.msra.mxu0 %v12051_v60  ;;  %7956 = vmatpush1.bf16.msra.mxu1 %v12053_v46 }
 0x698   :  { %7914 = vmatprep.subr.bf16.mxu0 %v12060_v28  ;;  %7957 = vmatprep.subr.bf16.mxu1 %v12062_v5 }
 0x69b   :  { %7915 = vmatpush1.bf16.msra.mxu0 %v12059_v3  ;;  %7958 = vmatpush1.bf16.msra.mxu1 %v12061_v18 }
 0x69c   :  { %7916 = vmatprep.subr.bf16.mxu0 %v12068_v9  ;;  %7959 = vmatprep.subr.bf16.mxu1 %v12070_v58 }
 0x69f   :  { %7917 = vmatpush1.bf16.msra.mxu0 %v12067_v53  ;;  %7960 = vmatpush1.bf16.msra.mxu1 %v12069_v4 }
 0x6a0   :  { %7972 = vmatprep.subr.bf16.mxu0 %v11952_v27  ;;  %8015 = vmatprep.subr.bf16.mxu1 %v11954_v12 }
 0x6f5   :  { %v6822_v2 = vpop.f32.mrb[96].mxu0  ;;  %v6865_v0 = vpop.f32.mrb[96].mxu1 }
 0x6f6   :  { %v6960_v21 = vadd.f32 %v6822_v2, %v14774_v43  ;;  %v6962_v10 = vadd.f32 %v6865_v0, %v14775_v23  ;;  %v6824_v25 = vpop.f32.mrb[97].mxu0  ;;  %v6867_v56 = vpop.f32.mrb[97].mxu1 }
 0x6f7   :  { %v6961_v45 = vadd.f32 %v6824_v25, %v14776_v6  ;;  %v6963_v33 = vadd.f32 %v6867_v56, %v14777_v48  ;;  %v6826_v59 = vpop.f32.mrb[98].mxu0  ;;  %v6869_v39 = vpop.f32.mrb[98].mxu1 }
 0x6f8   :  { %v6968_v54 = vadd.f32 %v6826_v59, %v14778_v44  ;;  %v6970_v34 = vadd.f32 %v6869_v39, %v14779_v62  ;;  %v6828_v60 = vpop.f32.mrb[99].mxu0  ;;  %v6871_v46 = vpop.f32.mrb[99].mxu1  ;;  %v11935_v28 = vmul.f32 -1.442695, %v6960_v21  ;;  %v11939_v24 = vmul.f32 -1.442695, %v6962_v10 }
 0x6f9   :  { %v6969_v22 = vadd.f32 %v6828_v60, %v14780_v50  ;;  %v6971_v41 = vadd.f32 %v6871_v46, %v14781_v8  ;;  %v11936_v3 = vmul.f32 -1.442695, %v6961_v45  ;;  %v11940_v18 = vmul.f32 -1.442695, %v6963_v33  ;;  %v14782_v33 = vld [vmem:[#allocation84_spill] sm:$0xff]  ;;  %v14783_v39 = vld [vmem:[#allocation85_spill] sm:$0xff] }
 0x6fa   :  { %12821 = vpow2.f32 %v11935_v28  ;;  %v11937_v5 = vmul.f32 -1.442695, %v6968_v54  ;;  %v11941_v55 = vmul.f32 -1.442695, %v6970_v34  ;;  %v14784_v34 = vld [vmem:[#allocation86_spill] sm:$0xff]  ;;  %v14785_v46 = vld [vmem:[#allocation87_spill] sm:$0xff] }
 0x6fb   :  { %12823 = vpow2.f32 %v11939_v24  ;;  %v11938_v49 = vmul.f32 -1.442695, %v6969_v22  ;;  %v11942_v51 = vmul.f32 -1.442695, %v6971_v41  ;;  %v14786_v28 = vld [vmem:[#allocation88_spill] sm:$0xff] }
 0x6fc   :  { %12825 = vpow2.f32 %v11936_v3  ;;  %v14787_v3 = vld [vmem:[#allocation89_spill] sm:$0xff] }
 0x6fd   :  { %12827 = vpow2.f32 %v11940_v18 }
 0x6fe   :  { %12829 = vpow2.f32 %v11937_v5 }
 0x6ff   :  { %12831 = vpow2.f32 %v11941_v55 }
 0x700   :  { %12833 = vpow2.f32 %v11938_v49 }
 0x701   :  { %12835 = vpow2.f32 %v11942_v51  ;;  %v14788_v51 = vld [vmem:[#allocation90_spill] sm:$0xff] }
 0x704   :  { %v12822_v9 = vpop.eup %12821 }
 0x705   :  { %v12824_v61 = vpop.eup %12823  ;;  %v6988_v58 = vadd.f32 1.0, %v12822_v9 }
 0x706   :  { %v12826_v53 = vpop.eup %12825  ;;  %v7012_v12 = vadd.f32 1.0, %v12824_v61  ;;  %v14789_v61 = vld [vmem:[#allocation91_spill] sm:$0xff] }
 0x707   :  { %v12828_v4 = vpop.eup %12827  ;;  %v6989_v0 = vadd.f32 1.0, %v12826_v53  ;;  %12837 = vrcp.f32 %v6988_v58 }
 0x708   :  { %v12830_v27 = vpop.eup %12829  ;;  %v7013_v21 = vadd.f32 1.0, %v12828_v4  ;;  %12839 = vrcp.f32 %v7012_v12 }
 0x709   :  { %v12832_v2 = vpop.eup %12831  ;;  %v6990_v10 = vadd.f32 1.0, %v12830_v27  ;;  %12841 = vrcp.f32 %v6989_v0 }
 0x70a   :  { %v12834_v43 = vpop.eup %12833  ;;  %v7014_v25 = vadd.f32 1.0, %v12832_v2  ;;  %12843 = vrcp.f32 %v7013_v21 }
 0x70b   :  { %v12836_v23 = vpop.eup %12835  ;;  %v6991_v56 = vadd.f32 1.0, %v12834_v43  ;;  %12845 = vrcp.f32 %v6990_v10 }
 0x70c   :  { %v7015_v6 = vadd.f32 1.0, %v12836_v23  ;;  %12847 = vrcp.f32 %v7014_v25 }
 0x70d   :  { %12849 = vrcp.f32 %v6991_v56 }
 0x70e   :  { %12851 = vrcp.f32 %v7015_v6 }
 0x711   :  { %v12838_v4 = vpop.eup %12837 }
 0x712   :  { %v12840_v27 = vpop.eup %12839 }
 0x713   :  { %v12842_v2 = vpop.eup %12841  ;;  %v7052_v6 = vmul.f32 %v12840_v27, %v14255_v42 }
 0x714   :  { %v12844_v0 = vpop.eup %12843 }
 0x715   :  { %v12846_v43 = vpop.eup %12845 }
 0x716   :  { %v12848_v21 = vpop.eup %12847 }
 0x717   :  { %v12850_v23 = vpop.eup %12849 }
 0x718   :  { %v12852_v10 = vpop.eup %12851 }
 0x735   :  { %v6908_v45 = vpop.f32.mrb[100].mxu0  ;;  %v6951_v48 = vpop.f32.mrb[100].mxu1 }
 0x736   :  { %v6964_v59 = vadd.f32 %v6908_v45, %v14782_v33  ;;  %v6966_v44 = vadd.f32 %v6951_v48, %v14783_v39  ;;  %v6910_v54 = vpop.f32.mrb[101].mxu0  ;;  %v6953_v62 = vpop.f32.mrb[101].mxu1  ;;  %v7053_v33 = vmul.f32 %v12844_v0, %v14257_v36  ;;  %v7055_v36 = vmul.f32 %v12852_v10, %v14266_v30  ;;  %v7132_v0 = vld [vmem:[#allocation9 + $0x70] sm:$0xff] }
 0x737   :  { %v6965_v60 = vadd.f32 %v6910_v54, %v14784_v34  ;;  %v6967_v50 = vadd.f32 %v6953_v62, %v14785_v46  ;;  %v6912_v22 = vpop.f32.mrb[102].mxu0  ;;  %v6955_v8 = vpop.f32.mrb[102].mxu1  ;;  %v7136_v10 = vld [vmem:[#allocation9 + $0x90] sm:$0xff] }
 0x738   :  { %12853 = vtanh.f32 %v6964_v59  ;;  %v11943_v41 = vmul.f32 -1.442695, %v6966_v44  ;;  %v6972_v24 = vadd.f32 %v6912_v22, %v14786_v28  ;;  %v6974_v18 = vadd.f32 %v6955_v8, %v14787_v3  ;;  %v6914_v5 = vpop.f32.mrb[103].mxu0  ;;  %v6957_v55 = vpop.f32.mrb[103].mxu1 }
 0x739   :  { %12855 = vtanh.f32 %v6965_v60  ;;  %v11944_v49 = vmul.f32 -1.442695, %v6967_v50  ;;  %v6973_v9 = vadd.f32 %v6914_v5, %v14788_v51  ;;  %v6975_v53 = vadd.f32 %v6957_v55, %v14789_v61 }
 0x73a   :  { %12857 = vpow2.f32 %v11943_v41  ;;  %v11945_v58 = vmul.f32 -1.442695, %v6974_v18  ;;  %v7054_v50 = vmul.f32 %v12848_v21, %v14263_v31  ;;  %v7133_v21 = vld [vmem:[#allocation9 + $0x78] sm:$0xff] }
 0x73b   :  { %12859 = vpow2.f32 %v11944_v49  ;;  %v11946_v12 = vmul.f32 -1.442695, %v6975_v53 }
 0x73c   :  { %12861 = vtanh.f32 %v6972_v24 }
 0x73d   :  { %12863 = vpow2.f32 %v11945_v58 }
 0x73e   :  { %12865 = vtanh.f32 %v6973_v9 }
 0x73f   :  { %12867 = vpow2.f32 %v11946_v12 }
 0x742   :  { %v12854_v25 = vpop.eup %12853 }
 0x743   :  { %v12856_v56 = vpop.eup %12855  ;;  %v7056_v45 = vmul.f32 %v12854_v25, %v12838_v4 }
 0x744   :  { %v12858_v48 = vpop.eup %12857  ;;  %v7057_v59 = vmul.f32 %v12856_v56, %v12842_v2  ;;  %v7128_v2 = vld [vmem:[#allocation9 + $0x50] sm:$0xff] }
 0x745   :  { %v12860_v39 = vpop.eup %12859  ;;  %v14321_v44 = vadd.f32 %v7056_v45, %v7052_v6  ;;  %v7040_v54 = vadd.f32 1.0, %v12858_v48  ;;  %v11960_v25 = vcombine.high %v7128_v2, %v7132_v0  ;;  %v7140_v6 = vld [vmem:[#allocation9 + $0xb0] sm:$0xff]  ;;  %v7137_v45 = vld [vmem:[#allocation9 + $0x98] sm:$0xff] }
 0x746   :  { %v12862_v62 = vpop.eup %12861  ;;  %v14323_v34 = vadd.f32 %v7057_v59, %v7053_v33  ;;  %v7041_v60 = vadd.f32 1.0, %v12860_v39  ;;  %v7141_v48 = vld [vmem:[#allocation9 + $0xb8] sm:$0xff]  ;;  %v11959_v33 = vcombine.low %v7128_v2, %v7132_v0  ;;  %v11968_v39 = vcombine.high %v7136_v10, %v7140_v6 }
 0x747   :  { %v12864_v46 = vpop.eup %12863  ;;  %12869 = vtanh.f32 %v14321_v44  ;;  %v7058_v22 = vmul.f32 %v12862_v62, %v12846_v43  ;;  %v7129_v43 = vld [vmem:[#allocation9 + $0x58] sm:$0xff]  ;;  %v7144_v62 = vld [vmem:[#allocation9 + $0xd0] sm:$0xff]  ;;  %v11967_v40 = vcombine.low %v7136_v10, %v7140_v6  ;;  %v11969_v14 = vcombine.low %v7137_v45, %v7141_v48 }
 0x748   :  { %v12866_v42 = vpop.eup %12865  ;;  %12871 = vrcp.f32 %v7040_v54  ;;  %v7042_v8 = vadd.f32 1.0, %v12864_v46  ;;  %v11962_v56 = vcombine.high %v7129_v43, %v7133_v21  ;;  %v11961_v59 = vcombine.low %v7129_v43, %v7133_v21  ;;  %v7145_v46 = vld [vmem:[#allocation9 + $0xd8] sm:$0xff]  ;;  %v7176_v21 = vld [vmem:[#allocation9 + $0x1d0] sm:$0xff] }
 0x749   :  { %v12868_v41 = vpop.eup %12867  ;;  %12873 = vtanh.f32 %v14323_v34  ;;  %v14329_v28 = vadd.f32 %v7058_v22, %v7054_v50  ;;  %v7059_v24 = vmul.f32 %v12866_v42, %v12850_v23  ;;  %v11970_v54 = vcombine.high %v7137_v45, %v7141_v48  ;;  %v7149_v50 = vld [vmem:[#allocation9 + $0xf8] sm:$0xff]  ;;  %v7180_v10 = vld [vmem:[#allocation9 + $0x1f0] sm:$0xff] }
 0x74a   :  { %12875 = vrcp.f32 %v7041_v60  ;;  %v7043_v3 = vadd.f32 1.0, %v12868_v41  ;;  %v7148_v60 = vld [vmem:[#allocation9 + $0xf0] sm:$0xff]  ;;  %v11978_v47 = vcombine.high %v7145_v46, %v7149_v50  ;;  %v7153_v22 = vld [vmem:[#allocation9 + $0x118] sm:$0xff]  ;;  %v11977_v41 = vcombine.low %v7145_v46, %v7149_v50 }
 0x74b   :  { %12877 = vtanh.f32 %v14329_v28  ;;  %v14332_v18 = vadd.f32 %v7059_v24, %v7055_v36  ;;  %v11976_v29 = vcombine.high %v7144_v62, %v7148_v60  ;;  %v7157_v42 = vld [vmem:[#allocation9 + $0x138] sm:$0xff]  ;;  %v12008_v48 = vcombine.high %v7176_v21, %v7180_v10 }
 0x74c   :  { %12879 = vrcp.f32 %v7042_v8  ;;  %v11975_v8 = vcombine.low %v7144_v62, %v7148_v60  ;;  %v11986_v24 = vcombine.high %v7153_v22, %v7157_v42  ;;  %v7189_v62 = vld [vmem:[#allocation9 + $0x238] sm:$0xff]  ;;  %v12007_v60 = vcombine.low %v7176_v21, %v7180_v10 }
 0x74d   :  { %12881 = vtanh.f32 %v14332_v18  ;;  %v7221_v21 = vld [vmem:[#allocation9 + $0x338] sm:$0xff] }
 0x74e   :  { %12883 = vrcp.f32 %v7043_v3  ;;  %v7160_v3 = vld [vmem:[#allocation9 + $0x150] sm:$0xff] }
 0x751   :  { %v12870_v31 = vpop.eup %12869 }
 0x752   :  { %v12872_v5 = vpop.eup %12871 }
 0x753   :  { %v12874_v55 = vpop.eup %12873  ;;  %v7068_v61 = vmul.f32 %v12872_v5, %v12870_v31  ;;  %v7164_v31 = vld [vmem:[#allocation9 + $0x170] sm:$0xff]  ;;  %v7161_v5 = vld [vmem:[#allocation9 + $0x158] sm:$0xff] }
 0x754   :  { %v12876_v49 = vpop.eup %12875 }
 0x755   :  { %v12878_v30 = vpop.eup %12877  ;;  %v7069_v58 = vmul.f32 %v12876_v49, %v12874_v55  ;;  %v7165_v55 = vld [vmem:[#allocation9 + $0x178] sm:$0xff] }
 0x756   :  { %v12880_v51 = vpop.eup %12879  ;;  %v11993_v2 = vcombine.low %v7161_v5, %v7165_v55 }
 0x757   :  { %v12882_v9 = vpop.eup %12881  ;;  %v7070_v53 = vmul.f32 %v12880_v51, %v12878_v30  ;;  %v11985_v30 = vcombine.low %v7153_v22, %v7157_v42  ;;  %v11992_v51 = vcombine.high %v7160_v3, %v7164_v31 }
 0x758   :  { %v12884_v4 = vpop.eup %12883 }
 0x759   :  { %v7071_v27 = vmul.f32 %v12884_v4, %v12882_v9  ;;  %v14335_v12 = vpack.c.bf16 %v7070_v53, %v7068_v61  ;;  %v11994_v9 = vcombine.high %v7161_v5, %v7165_v55  ;;  %v7168_v61 = vld [vmem:[#allocation9 + $0x190] sm:$0xff]  ;;  %v7169_v4 = vld [vmem:[#allocation9 + $0x198] sm:$0xff] }
 0x75a   :  { %v7172_v53 = vld [vmem:[#allocation9 + $0x1b0] sm:$0xff] }
 0x75b   :  { %v14337_v23 = vpack.c.bf16 %v7071_v27, %v7069_v58  ;;  %v7173_v58 = vld [vmem:[#allocation9 + $0x1b8] sm:$0xff]  ;;  %v11991_v27 = vcombine.low %v7160_v3, %v7164_v31  ;;  %v12000_v0 = vcombine.high %v7168_v61, %v7172_v53  ;;  %v11999_v6 = vcombine.low %v7168_v61, %v7172_v53 }
 0x75c   :  { %v12002_v43 = vcombine.high %v7169_v4, %v7173_v58  ;;  %v12001_v45 = vcombine.low %v7169_v4, %v7173_v58  ;;  %v7205_v3 = vld [vmem:[#allocation9 + $0x2b8] sm:$0xff] }
 0x75d   :  { %7918 = vmatprep.mubr.bf16.mxu0 %v14337_v23  ;;  %7961 = vmatprep.mubr.bf16.mxu1 %v14337_v23  ;;  %v7213_v61 = vld [vmem:[#allocation9 + $0x2f8] sm:$0xff] }
 0x75e   :  { %7919 = vmatmul.mubr.bf16.vlgmr.msra.gmra.mrb[104].mxu0 %v14335_v12  ;;  %7962 = vmatmul.mubr.bf16.vlgmr.msra.gmra.mrb[104].mxu1 %v14335_v12 }
 0x75f   :  { %7973 = vmatpush1.bf16.msra.mxu0 %v11951_v13  ;;  %8016 = vmatpush1.bf16.msra.mxu1 %v11953_v57  ;;  %v7152_v13 = vld [vmem:[#allocation9 + $0x110] sm:$0xff] }
 0x760   :  { %8004 = vmatprep.mubr.bf16.mxu0 %v14337_v23  ;;  %8047 = vmatprep.mubr.bf16.mxu1 %v14337_v23  ;;  %v7156_v57 = vld [vmem:[#allocation9 + $0x130] sm:$0xff] }
 0x761   :  { %7974 = vmatprep.subr.bf16.mxu0 %v11960_v25  ;;  %8017 = vmatprep.subr.bf16.mxu1 %v11962_v56  ;;  %v11984_v36 = vcombine.high %v7152_v13, %v7156_v57  ;;  %v11983_v49 = vcombine.low %v7152_v13, %v7156_v57  ;;  %v7177_v25 = vld [vmem:[#allocation9 + $0x1d8] sm:$0xff] }
 0x762   :  { %v7181_v56 = vld [vmem:[#allocation9 + $0x1f8] sm:$0xff] }
 0x763   :  { %7975 = vmatpush1.bf16.msra.mxu0 %v11959_v33  ;;  %8018 = vmatpush1.bf16.msra.mxu1 %v11961_v59  ;;  %v12010_v33 = vcombine.high %v7177_v25, %v7181_v56  ;;  %v7184_v59 = vld [vmem:[#allocation9 + $0x210] sm:$0xff]  ;;  %v12009_v46 = vcombine.low %v7177_v25, %v7181_v56  ;;  %v7197_v13 = vld [vmem:[#allocation9 + $0x278] sm:$0xff] }
 0x764   :  { %7976 = vmatprep.subr.bf16.mxu0 %v11968_v39  ;;  %8019 = vmatprep.subr.bf16.mxu1 %v11970_v54  ;;  %v7188_v39 = vld [vmem:[#allocation9 + $0x230] sm:$0xff]  ;;  %v7185_v54 = vld [vmem:[#allocation9 + $0x218] sm:$0xff] }
 0x765   :  { %v12016_v50 = vcombine.high %v7184_v59, %v7188_v39  ;;  %v12015_v57 = vcombine.low %v7184_v59, %v7188_v39  ;;  %v12017_v22 = vcombine.low %v7185_v54, %v7189_v62  ;;  %v7229_v59 = vld [vmem:[#allocation9 + $0x378] sm:$0xff] }
 0x767   :  { %7977 = vmatpush1.bf16.msra.mxu0 %v11967_v40  ;;  %8020 = vmatpush1.bf16.msra.mxu1 %v11969_v14  ;;  %v12018_v40 = vcombine.high %v7185_v54, %v7189_v62  ;;  %v7192_v14 = vld [vmem:[#allocation9 + $0x250] sm:$0xff] }
 0x768   :  { %7978 = vmatprep.subr.bf16.mxu0 %v11976_v29  ;;  %8021 = vmatprep.subr.bf16.mxu1 %v11978_v47  ;;  %v7196_v29 = vld [vmem:[#allocation9 + $0x270] sm:$0xff]  ;;  %v7193_v47 = vld [vmem:[#allocation9 + $0x258] sm:$0xff] }
 0x769   :  { %v12024_v42 = vcombine.high %v7192_v14, %v7196_v29  ;;  %v12023_v31 = vcombine.low %v7192_v14, %v7196_v29  ;;  %v12025_v5 = vcombine.low %v7193_v47, %v7197_v13  ;;  %v7237_v14 = vld [vmem:[#allocation9 + $0x3b8] sm:$0xff] }
 0x76b   :  { %7979 = vmatpush1.bf16.msra.mxu0 %v11975_v8  ;;  %8022 = vmatpush1.bf16.msra.mxu1 %v11977_v41  ;;  %v12026_v8 = vcombine.high %v7193_v47, %v7197_v13  ;;  %v7200_v41 = vld [vmem:[#allocation9 + $0x290] sm:$0xff] }
 0x76c   :  { %7980 = vmatprep.subr.bf16.mxu0 %v11984_v36  ;;  %8023 = vmatprep.subr.bf16.mxu1 %v11986_v24  ;;  %v7204_v36 = vld [vmem:[#allocation9 + $0x2b0] sm:$0xff]  ;;  %v7201_v24 = vld [vmem:[#allocation9 + $0x298] sm:$0xff] }
 0x76d   :  { %v12032_v55 = vcombine.high %v7200_v41, %v7204_v36  ;;  %v12031_v53 = vcombine.low %v7200_v41, %v7204_v36  ;;  %v12033_v4 = vcombine.low %v7201_v24, %v7205_v3  ;;  %v7245_v41 = vld [vmem:[#allocation9 + $0x3f8] sm:$0xff] }
 0x76f   :  { %7981 = vmatpush1.bf16.msra.mxu0 %v11983_v49  ;;  %8024 = vmatpush1.bf16.msra.mxu1 %v11985_v30  ;;  %v12034_v49 = vcombine.high %v7201_v24, %v7205_v3  ;;  %v7208_v30 = vld [vmem:[#allocation9 + $0x2d0] sm:$0xff] }
 0x770   :  { %7982 = vmatprep.subr.bf16.mxu0 %v11992_v51  ;;  %8025 = vmatprep.subr.bf16.mxu1 %v11994_v9  ;;  %v7212_v51 = vld [vmem:[#allocation9 + $0x2f0] sm:$0xff]  ;;  %v7209_v9 = vld [vmem:[#allocation9 + $0x2d8] sm:$0xff] }
 0x771   :  { %v12040_v58 = vcombine.high %v7208_v30, %v7212_v51  ;;  %v12039_v10 = vcombine.low %v7208_v30, %v7212_v51  ;;  %v12041_v25 = vcombine.low %v7209_v9, %v7213_v61  ;;  %v8220_v30 = vld [vmem:[#allocation9 + $0x20] sm:$0xff]  ;;  %v8217_v51 = vld [vmem:[#allocation9 + $0x8] sm:$0xff] }
 0x773   :  { %7983 = vmatpush1.bf16.msra.mxu0 %v11991_v27  ;;  %8026 = vmatpush1.bf16.msra.mxu1 %v11993_v2  ;;  %v12042_v27 = vcombine.high %v7209_v9, %v7213_v61  ;;  %v7216_v2 = vld [vmem:[#allocation9 + $0x310] sm:$0xff] }
 0x774   :  { %7984 = vmatprep.subr.bf16.mxu0 %v12000_v0  ;;  %8027 = vmatprep.subr.bf16.mxu1 %v12002_v43  ;;  %v7220_v0 = vld [vmem:[#allocation9 + $0x330] sm:$0xff]  ;;  %v7217_v43 = vld [vmem:[#allocation9 + $0x318] sm:$0xff] }
 0x775   :  { %v12048_v56 = vcombine.high %v7216_v2, %v7220_v0  ;;  %v12047_v39 = vcombine.low %v7216_v2, %v7220_v0  ;;  %v12049_v54 = vcombine.low %v7217_v43, %v7221_v21 }
 0x777   :  { %7985 = vmatpush1.bf16.msra.mxu0 %v11999_v6  ;;  %8028 = vmatpush1.bf16.msra.mxu1 %v12001_v45  ;;  %v12050_v6 = vcombine.high %v7217_v43, %v7221_v21  ;;  %v7224_v45 = vld [vmem:[#allocation9 + $0x350] sm:$0xff]  ;;  %v8225_v43 = vld [vmem:[#allocation9 + $0x48] sm:$0xff] }
 0x778   :  { %7986 = vmatprep.subr.bf16.mxu0 %v12008_v48  ;;  %8029 = vmatprep.subr.bf16.mxu1 %v12010_v33  ;;  %v7228_v48 = vld [vmem:[#allocation9 + $0x370] sm:$0xff]  ;;  %v7225_v33 = vld [vmem:[#allocation9 + $0x358] sm:$0xff]  ;;  %v8229_v21 = vld [vmem:[#allocation9 + $0x68] sm:$0xff] }
 0x779   :  { %v12056_v62 = vcombine.high %v7224_v45, %v7228_v48  ;;  %v12055_v29 = vcombine.low %v7224_v45, %v7228_v48  ;;  %v12057_v47 = vcombine.low %v7225_v33, %v7229_v59  ;;  %v8237_v45 = vld [vmem:[#allocation9 + $0xa8] sm:$0xff] }
 0x77b   :  { %7987 = vmatpush1.bf16.msra.mxu0 %v12007_v60  ;;  %8030 = vmatpush1.bf16.msra.mxu1 %v12009_v46  ;;  %v12058_v60 = vcombine.high %v7225_v33, %v7229_v59  ;;  %v7232_v46 = vld [vmem:[#allocation9 + $0x390] sm:$0xff]  ;;  %v12097_v33 = vcombine.low %v8225_v43, %v8229_v21 }
 0x77c   :  { %7988 = vmatprep.subr.bf16.mxu0 %v12016_v50  ;;  %8031 = vmatprep.subr.bf16.mxu1 %v12018_v40  ;;  %v7236_v50 = vld [vmem:[#allocation9 + $0x3b0] sm:$0xff]  ;;  %v7233_v40 = vld [vmem:[#allocation9 + $0x398] sm:$0xff] }
 0x77d   :  { %v12064_v13 = vcombine.high %v7232_v46, %v7236_v50  ;;  %v12063_v36 = vcombine.low %v7232_v46, %v7236_v50  ;;  %v12065_v24 = vcombine.low %v7233_v40, %v7237_v14  ;;  %v8245_v46 = vld [vmem:[#allocation9 + $0xe8] sm:$0xff] }
 0x77f   :  { %7989 = vmatpush1.bf16.msra.mxu0 %v12015_v57  ;;  %8032 = vmatpush1.bf16.msra.mxu1 %v12017_v22  ;;  %v12066_v57 = vcombine.high %v7233_v40, %v7237_v14  ;;  %v7240_v22 = vld [vmem:[#allocation9 + $0x3d0] sm:$0xff] }
 0x780   :  { %7990 = vmatprep.subr.bf16.mxu0 %v12024_v42  ;;  %8033 = vmatprep.subr.bf16.mxu1 %v12026_v8  ;;  %v7244_v42 = vld [vmem:[#allocation9 + $0x3f0] sm:$0xff]  ;;  %v7241_v8 = vld [vmem:[#allocation9 + $0x3d8] sm:$0xff] }
 0x781   :  { %v12072_v3 = vcombine.high %v7240_v22, %v7244_v42 }
 0x783   :  { %7991 = vmatpush1.bf16.msra.mxu0 %v12023_v31  ;;  %8034 = vmatpush1.bf16.msra.mxu1 %v12025_v5  ;;  %v12074_v31 = vcombine.high %v7241_v8, %v7245_v41  ;;  %v12071_v5 = vcombine.low %v7240_v22, %v7244_v42  ;;  %v8253_v22 = vld [vmem:[#allocation9 + $0x128] sm:$0xff] }
 0x784   :  { %7992 = vmatprep.subr.bf16.mxu0 %v12032_v55  ;;  %8035 = vmatprep.subr.bf16.mxu1 %v12034_v49  ;;  %v12073_v55 = vcombine.low %v7241_v8, %v7245_v41  ;;  %v8216_v49 = vld [vmem:[#allocation9] sm:$0xff] }
 0x785   :  { %v12087_v9 = vcombine.low %v8216_v49, %v8220_v30  ;;  %v12088_v61 = vcombine.high %v8216_v49, %v8220_v30 }
 0x787   :  { %7993 = vmatpush1.bf16.msra.mxu0 %v12031_v53  ;;  %8036 = vmatpush1.bf16.msra.mxu1 %v12033_v4  ;;  %v8221_v53 = vld [vmem:[#allocation9 + $0x28] sm:$0xff]  ;;  %v8224_v4 = vld [vmem:[#allocation9 + $0x40] sm:$0xff] }
 0x788   :  { %7994 = vmatprep.subr.bf16.mxu0 %v12040_v58  ;;  %8037 = vmatprep.subr.bf16.mxu1 %v12042_v27  ;;  %v8228_v58 = vld [vmem:[#allocation9 + $0x60] sm:$0xff]  ;;  %v12089_v27 = vcombine.low %v8217_v51, %v8221_v53  ;;  %v12090_v2 = vcombine.high %v8217_v51, %v8221_v53  ;;  %v8265_v53 = vld [vmem:[#allocation9 + $0x188] sm:$0xff] }
 0x789   :  { %v12096_v0 = vcombine.high %v8224_v4, %v8228_v58  ;;  %v12095_v48 = vcombine.low %v8224_v4, %v8228_v58  ;;  %v8269_v4 = vld [vmem:[#allocation9 + $0x1a8] sm:$0xff] }
 0x78b   :  { %7995 = vmatpush1.bf16.msra.mxu0 %v12039_v10  ;;  %8038 = vmatpush1.bf16.msra.mxu1 %v12041_v25  ;;  %v8232_v10 = vld [vmem:[#allocation9 + $0x80] sm:$0xff]  ;;  %v12098_v25 = vcombine.high %v8225_v43, %v8229_v21  ;;  %v12137_v21 = vcombine.low %v8265_v53, %v8269_v4 }
 0x78c   :  { %7996 = vmatprep.subr.bf16.mxu0 %v12048_v56  ;;  %8039 = vmatprep.subr.bf16.mxu1 %v12050_v6  ;;  %v8236_v56 = vld [vmem:[#allocation9 + $0xa0] sm:$0xff]  ;;  %v8233_v6 = vld [vmem:[#allocation9 + $0x88] sm:$0xff] }
 0x78d   :  { %v12104_v59 = vcombine.high %v8232_v10, %v8236_v56  ;;  %v12103_v50 = vcombine.low %v8232_v10, %v8236_v56  ;;  %v12105_v40 = vcombine.low %v8233_v6, %v8237_v45  ;;  %v8272_v10 = vld [vmem:[#allocation9 + $0x1c0] sm:$0xff]  ;;  %v8273_v56 = vld [vmem:[#allocation9 + $0x1c8] sm:$0xff] }
 0x78f   :  { %7997 = vmatpush1.bf16.msra.mxu0 %v12047_v39  ;;  %8040 = vmatpush1.bf16.msra.mxu1 %v12049_v54  ;;  %v12106_v39 = vcombine.high %v8233_v6, %v8237_v45  ;;  %v8240_v54 = vld [vmem:[#allocation9 + $0xc0] sm:$0xff]  ;;  %v8277_v45 = vld [vmem:[#allocation9 + $0x1e8] sm:$0xff] }
 0x790   :  { %7998 = vmatprep.subr.bf16.mxu0 %v12056_v62  ;;  %8041 = vmatprep.subr.bf16.mxu1 %v12058_v60  ;;  %v8244_v62 = vld [vmem:[#allocation9 + $0xe0] sm:$0xff]  ;;  %v8241_v60 = vld [vmem:[#allocation9 + $0xc8] sm:$0xff] }
 0x791   :  { %v12112_v14 = vcombine.high %v8240_v54, %v8244_v62  ;;  %v12111_v42 = vcombine.low %v8240_v54, %v8244_v62  ;;  %v12113_v8 = vcombine.low %v8241_v60, %v8245_v46  ;;  %v8284_v54 = vld [vmem:[#allocation9 + $0x220] sm:$0xff]  ;;  %v8281_v62 = vld [vmem:[#allocation9 + $0x208] sm:$0xff] }
 0x793   :  { %7999 = vmatpush1.bf16.msra.mxu0 %v12055_v29  ;;  %8042 = vmatpush1.bf16.msra.mxu1 %v12057_v47  ;;  %v12114_v29 = vcombine.high %v8241_v60, %v8245_v46  ;;  %v8248_v47 = vld [vmem:[#allocation9 + $0x100] sm:$0xff]  ;;  %v8285_v46 = vld [vmem:[#allocation9 + $0x228] sm:$0xff] }
 0x794   :  { %8000 = vmatprep.subr.bf16.mxu0 %v12064_v13  ;;  %8043 = vmatprep.subr.bf16.mxu1 %v12066_v57  ;;  %v8252_v13 = vld [vmem:[#allocation9 + $0x120] sm:$0xff]  ;;  %v8249_v57 = vld [vmem:[#allocation9 + $0x108] sm:$0xff] }
 0x795   :  { %v12120_v41 = vcombine.high %v8248_v47, %v8252_v13  ;;  %v12121_v49 = vcombine.low %v8249_v57, %v8253_v22 }
 0x797   :  { %8001 = vmatpush1.bf16.msra.mxu0 %v12063_v36  ;;  %8044 = vmatpush1.bf16.msra.mxu1 %v12065_v24  ;;  %v12122_v36 = vcombine.high %v8249_v57, %v8253_v22  ;;  %v8256_v24 = vld [vmem:[#allocation9 + $0x140] sm:$0xff]  ;;  %v8293_v22 = vld [vmem:[#allocation9 + $0x268] sm:$0xff] }
 0x798   :  { %8002 = vmatprep.subr.bf16.mxu0 %v12072_v3  ;;  %8045 = vmatprep.subr.bf16.mxu1 %v12074_v31  ;;  %v8260_v3 = vld [vmem:[#allocation9 + $0x160] sm:$0xff]  ;;  %v8257_v31 = vld [vmem:[#allocation9 + $0x148] sm:$0xff] }
 0x799   :  { %v12128_v30 = vcombine.high %v8256_v24, %v8260_v3  ;;  %v12127_v58 = vcombine.low %v8256_v24, %v8260_v3  ;;  %v8300_v24 = vld [vmem:[#allocation9 + $0x2a0] sm:$0xff]  ;;  %v8297_v3 = vld [vmem:[#allocation9 + $0x288] sm:$0xff] }
 0x79b   :  { %8003 = vmatpush1.bf16.msra.mxu0 %v12071_v5  ;;  %8046 = vmatpush1.bf16.msra.mxu1 %v12073_v55  ;;  %v8261_v5 = vld [vmem:[#allocation9 + $0x168] sm:$0xff]  ;;  %v12119_v55 = vcombine.low %v8248_v47, %v8252_v13  ;;  %v8292_v47 = vld [vmem:[#allocation9 + $0x260] sm:$0xff] }
 0x79c   :  { %8984 = vmatprep.subr.bf16.mxu0 %v12088_v61  ;;  %9027 = vmatprep.subr.bf16.mxu1 %v12090_v2  ;;  %v12130_v51 = vcombine.high %v8257_v31, %v8261_v5  ;;  %v8268_v61 = vld [vmem:[#allocation9 + $0x1a0] sm:$0xff]  ;;  %v8289_v13 = vld [vmem:[#allocation9 + $0x248] sm:$0xff] }
 0x79e   :  { %8005 = vmatmul.mubr.bf16.vlgmr.msra.gmra.mrb[108].mxu0 %v14335_v12  ;;  %8048 = vmatmul.mubr.bf16.vlgmr.msra.gmra.mrb[108].mxu1 %v14335_v12 }
 0x79f   :  { %8985 = vmatpush1.bf16.msra.mxu0 %v12087_v9  ;;  %9028 = vmatpush1.bf16.msra.mxu1 %v12089_v27  ;;  %v8264_v9 = vld [vmem:[#allocation9 + $0x180] sm:$0xff]  ;;  %v12129_v27 = vcombine.low %v8257_v31, %v8261_v5  ;;  %v8301_v5 = vld [vmem:[#allocation9 + $0x2a8] sm:$0xff] }
 0x7a0   :  { %8986 = vmatprep.subr.bf16.mxu0 %v12096_v0  ;;  %9029 = vmatprep.subr.bf16.mxu1 %v12098_v25  ;;  %v12136_v2 = vcombine.high %v8264_v9, %v8268_v61  ;;  %v12138_v0 = vcombine.high %v8265_v53, %v8269_v4  ;;  %v12135_v43 = vcombine.low %v8264_v9, %v8268_v61  ;;  %v8276_v25 = vld [vmem:[#allocation9 + $0x1e0] sm:$0xff]  ;;  %v8305_v61 = vld [vmem:[#allocation9 + $0x2c8] sm:$0xff] }
 0x7a1   :  { %v12144_v6 = vcombine.high %v8272_v10, %v8276_v25  ;;  %v8308_v9 = vld [vmem:[#allocation9 + $0x2e0] sm:$0xff]  ;;  %v8309_v4 = vld [vmem:[#allocation9 + $0x2e8] sm:$0xff] }
 0x7a3   :  { %8987 = vmatpush1.bf16.msra.mxu0 %v12095_v48  ;;  %9030 = vmatpush1.bf16.msra.mxu1 %v12097_v33  ;;  %v12143_v48 = vcombine.low %v8272_v10, %v8276_v25  ;;  %v12145_v33 = vcombine.low %v8273_v56, %v8277_v45  ;;  %v8317_v25 = vld [vmem:[#allocation9 + $0x328] sm:$0xff] }
 0x7a4   :  { %8988 = vmatprep.subr.bf16.mxu0 %v12104_v59  ;;  %9031 = vmatprep.subr.bf16.mxu1 %v12106_v39  ;;  %v12146_v59 = vcombine.high %v8273_v56, %v8277_v45  ;;  %v8280_v39 = vld [vmem:[#allocation9 + $0x200] sm:$0xff] }
 0x7a5   :  { %v12152_v60 = vcombine.high %v8280_v39, %v8284_v54 }
 0x7a7   :  { %8989 = vmatpush1.bf16.msra.mxu0 %v12103_v50  ;;  %9032 = vmatpush1.bf16.msra.mxu1 %v12105_v40  ;;  %v12151_v50 = vcombine.low %v8280_v39, %v8284_v54  ;;  %v12153_v40 = vcombine.low %v8281_v62, %v8285_v46  ;;  %v8325_v54 = vld [vmem:[#allocation9 + $0x368] sm:$0xff] }
 0x7a8   :  { %8990 = vmatprep.subr.bf16.mxu0 %v12112_v14  ;;  %9033 = vmatprep.subr.bf16.mxu1 %v12114_v29  ;;  %v12154_v14 = vcombine.high %v8281_v62, %v8285_v46  ;;  %v8288_v29 = vld [vmem:[#allocation9 + $0x240] sm:$0xff] }
 0x7a9   :  { %v12160_v57 = vcombine.high %v8288_v29, %v8292_v47 }
 0x7ab   :  { %8991 = vmatpush1.bf16.msra.mxu0 %v12111_v42  ;;  %9034 = vmatpush1.bf16.msra.mxu1 %v12113_v8  ;;  %v12159_v42 = vcombine.low %v8288_v29, %v8292_v47  ;;  %v12161_v8 = vcombine.low %v8289_v13, %v8293_v22  ;;  %v8333_v47 = vld [vmem:[#allocation9 + $0x3a8] sm:$0xff] }
 0x7ac   :  { %8992 = vmatprep.subr.bf16.mxu0 %v12120_v41  ;;  %9035 = vmatprep.subr.bf16.mxu1 %v12122_v36  ;;  %v12162_v41 = vcombine.high %v8289_v13, %v8293_v22  ;;  %v8296_v36 = vld [vmem:[#allocation9 + $0x280] sm:$0xff] }
 0x7ad   :  { %v12168_v31 = vcombine.high %v8296_v36, %v8300_v24 }
 0x7af   :  { %8993 = vmatpush1.bf16.msra.mxu0 %v12119_v55  ;;  %9036 = vmatpush1.bf16.msra.mxu1 %v12121_v49  ;;  %v12167_v55 = vcombine.low %v8296_v36, %v8300_v24  ;;  %v12169_v49 = vcombine.low %v8297_v3, %v8301_v5  ;;  %v8341_v24 = vld [vmem:[#allocation9 + $0x3e8] sm:$0xff] }
 0x7b0   :  { %8994 = vmatprep.subr.bf16.mxu0 %v12128_v30  ;;  %9037 = vmatprep.subr.bf16.mxu1 %v12130_v51  ;;  %v12170_v30 = vcombine.high %v8297_v3, %v8301_v5  ;;  %v8304_v51 = vld [vmem:[#allocation9 + $0x2c0] sm:$0xff] }
 0x7b1   :  { %v12176_v53 = vcombine.high %v8304_v51, %v8308_v9 }
 0x7b3   :  { %8995 = vmatpush1.bf16.msra.mxu0 %v12127_v58  ;;  %9038 = vmatpush1.bf16.msra.mxu1 %v12129_v27  ;;  %v12175_v58 = vcombine.low %v8304_v51, %v8308_v9  ;;  %v12177_v27 = vcombine.low %v8305_v61, %v8309_v4  ;;  %v14361_v9 = vld [vmem:[#allocation9 + $0x38] sm:$0xff] }
 0x7b4   :  { %8996 = vmatprep.subr.bf16.mxu0 %v12136_v2  ;;  %9039 = vmatprep.subr.bf16.mxu1 %v12138_v0  ;;  %v12178_v2 = vcombine.high %v8305_v61, %v8309_v4  ;;  %v8312_v0 = vld [vmem:[#allocation9 + $0x300] sm:$0xff] }
 0x7b7   :  { %8997 = vmatpush1.bf16.msra.mxu0 %v12135_v43  ;;  %9040 = vmatpush1.bf16.msra.mxu1 %v12137_v21  ;;  %v8316_v43 = vld [vmem:[#allocation9 + $0x320] sm:$0xff]  ;;  %v8313_v21 = vld [vmem:[#allocation9 + $0x308] sm:$0xff] }
 0x7b8   :  { %8998 = vmatprep.subr.bf16.mxu0 %v12144_v6  ;;  %9041 = vmatprep.subr.bf16.mxu1 %v12146_v59  ;;  %v12184_v10 = vcombine.high %v8312_v0, %v8316_v43  ;;  %v12183_v56 = vcombine.low %v8312_v0, %v8316_v43  ;;  %v12185_v6 = vcombine.low %v8313_v21, %v8317_v25  ;;  %v8321_v59 = vld [vmem:[#allocation9 + $0x348] sm:$0xff] }
 0x7b9   :  { %v12186_v45 = vcombine.high %v8313_v21, %v8317_v25  ;;  %v12194_v46 = vcombine.high %v8321_v59, %v8325_v54  ;;  %v14791_v43 = vld [vmem:[#allocation45_spill] sm:$0xff] }
 0x7bb   :  { %8999 = vmatpush1.bf16.msra.mxu0 %v12143_v48  ;;  %9042 = vmatpush1.bf16.msra.mxu1 %v12145_v33  ;;  %v8320_v48 = vld [vmem:[#allocation9 + $0x340] sm:$0xff] }
 0x7bc   :  { %9000 = vmatprep.subr.bf16.mxu0 %v12152_v60  ;;  %9043 = vmatprep.subr.bf16.mxu1 %v12154_v14  ;;  %v8324_v33 = vld [vmem:[#allocation9 + $0x360] sm:$0xff]  ;;  %v12193_v60 = vcombine.low %v8321_v59, %v8325_v54  ;;  %v8329_v14 = vld [vmem:[#allocation9 + $0x388] sm:$0xff] }
 0x7bd   :  { %v12192_v39 = vcombine.high %v8320_v48, %v8324_v33  ;;  %v12191_v62 = vcombine.low %v8320_v48, %v8324_v33  ;;  %v12202_v22 = vcombine.high %v8329_v14, %v8333_v47 }
 0x7bf   :  { %9001 = vmatpush1.bf16.msra.mxu0 %v12151_v50  ;;  %9044 = vmatpush1.bf16.msra.mxu1 %v12153_v40  ;;  %v8328_v50 = vld [vmem:[#allocation9 + $0x380] sm:$0xff] }
 0x7c0   :  { %9002 = vmatprep.subr.bf16.mxu0 %v12160_v57  ;;  %9045 = vmatprep.subr.bf16.mxu1 %v12162_v41  ;;  %v8332_v40 = vld [vmem:[#allocation9 + $0x3a0] sm:$0xff]  ;;  %v12201_v57 = vcombine.low %v8329_v14, %v8333_v47  ;;  %v8337_v41 = vld [vmem:[#allocation9 + $0x3c8] sm:$0xff] }
 0x7c1   :  { %v12200_v29 = vcombine.high %v8328_v50, %v8332_v40  ;;  %v12199_v13 = vcombine.low %v8328_v50, %v8332_v40  ;;  %v12210_v5 = vcombine.high %v8337_v41, %v8341_v24  ;;  %v14796_v40 = vld [vmem:[#allocation50_spill] sm:$0xff] }
 0x7c3   :  { %9003 = vmatpush1.bf16.msra.mxu0 %v12159_v42  ;;  %9046 = vmatpush1.bf16.msra.mxu1 %v12161_v8  ;;  %v8336_v42 = vld [vmem:[#allocation9 + $0x3c0] sm:$0xff] }
 0x7c4   :  { %9004 = vmatprep.subr.bf16.mxu0 %v12168_v31  ;;  %9047 = vmatprep.subr.bf16.mxu1 %v12170_v30  ;;  %v8340_v8 = vld [vmem:[#allocation9 + $0x3e0] sm:$0xff]  ;;  %v12209_v31 = vcombine.low %v8337_v41, %v8341_v24  ;;  %v14357_v30 = vld [vmem:[#allocation9 + $0x18] sm:$0xff] }
 0x7c5   :  { %v12208_v36 = vcombine.high %v8336_v42, %v8340_v8  ;;  %v12207_v3 = vcombine.low %v8336_v42, %v8340_v8  ;;  %v12094_v4 = vcombine.high %v14357_v30, %v14361_v9 }
 0x7c7   :  { %9005 = vmatpush1.bf16.msra.mxu0 %v12167_v55  ;;  %9048 = vmatpush1.bf16.msra.mxu1 %v12169_v49  ;;  %v14353_v55 = vld [vmem:[#allocation9 + $0x10] sm:$0xff] }
 0x7c8   :  { %9006 = vmatprep.subr.bf16.mxu0 %v12176_v53  ;;  %9049 = vmatprep.subr.bf16.mxu1 %v12178_v2  ;;  %v14355_v49 = vld [vmem:[#allocation9 + $0x30] sm:$0xff]  ;;  %v12093_v53 = vcombine.low %v14357_v30, %v14361_v9  ;;  %v14790_v2 = vld [vmem:[#allocation44_spill] sm:$0xff] }
 0x7c9   :  { %v12092_v51 = vcombine.high %v14353_v55, %v14355_v49  ;;  %v12091_v61 = vcombine.low %v14353_v55, %v14355_v49 }
 0x7cb   :  { %9007 = vmatpush1.bf16.msra.mxu0 %v12175_v58  ;;  %9050 = vmatpush1.bf16.msra.mxu1 %v12177_v27 }
 0x7cc   :  { %9008 = vmatprep.subr.bf16.mxu0 %v12184_v10  ;;  %9051 = vmatprep.subr.bf16.mxu1 %v12186_v45  ;;  %v14793_v45 = vld [vmem:[#allocation47_spill] sm:$0xff] }
 0x7cf   :  { %9009 = vmatpush1.bf16.msra.mxu0 %v12183_v56  ;;  %9052 = vmatpush1.bf16.msra.mxu1 %v12185_v6  ;;  %v14792_v56 = vld [vmem:[#allocation46_spill] sm:$0xff] }
 0x7d0   :  { %9010 = vmatprep.subr.bf16.mxu0 %v12192_v39  ;;  %9053 = vmatprep.subr.bf16.mxu1 %v12194_v46  ;;  %v14794_v39 = vld [vmem:[#allocation48_spill] sm:$0xff] }
 0x7d3   :  { %9011 = vmatpush1.bf16.msra.mxu0 %v12191_v62  ;;  %9054 = vmatpush1.bf16.msra.mxu1 %v12193_v60  ;;  %v14795_v62 = vld [vmem:[#allocation49_spill] sm:$0xff] }
 0x7d4   :  { %9012 = vmatprep.subr.bf16.mxu0 %v12200_v29  ;;  %9055 = vmatprep.subr.bf16.mxu1 %v12202_v22  ;;  %v14797_v29 = vld [vmem:[#allocation51_spill] sm:$0xff] }
 0x7d7   :  { %9013 = vmatpush1.bf16.msra.mxu0 %v12199_v13  ;;  %9056 = vmatpush1.bf16.msra.mxu1 %v12201_v57 }
 0x7d8   :  { %9014 = vmatprep.subr.bf16.mxu0 %v12208_v36  ;;  %9057 = vmatprep.subr.bf16.mxu1 %v12210_v5 }
 0x7db   :  { %9015 = vmatpush1.bf16.msra.mxu0 %v12207_v3  ;;  %9058 = vmatpush1.bf16.msra.mxu1 %v12209_v31 }
 0x7dc   :  { %9070 = vmatprep.subr.bf16.mxu0 %v12092_v51  ;;  %9113 = vmatprep.subr.bf16.mxu1 %v12094_v4 }
 0x831   :  { %v7920_v58 = vpop.f32.mrb[104].mxu0  ;;  %v7963_v27 = vpop.f32.mrb[104].mxu1 }
 0x832   :  { %v8058_v0 = vadd.f32 %v7920_v58, %v14790_v2  ;;  %v8060_v21 = vadd.f32 %v7963_v27, %v14791_v43  ;;  %v7922_v10 = vpop.f32.mrb[105].mxu0  ;;  %v7965_v25 = vpop.f32.mrb[105].mxu1 }
 0x833   :  { %v8059_v6 = vadd.f32 %v7922_v10, %v14792_v56  ;;  %v8061_v48 = vadd.f32 %v7965_v25, %v14793_v45  ;;  %v7924_v33 = vpop.f32.mrb[106].mxu0  ;;  %v7967_v59 = vpop.f32.mrb[106].mxu1 }
 0x834   :  { %v8066_v54 = vadd.f32 %v7924_v33, %v14794_v39  ;;  %v8068_v60 = vadd.f32 %v7967_v59, %v14795_v62  ;;  %v7926_v46 = vpop.f32.mrb[107].mxu0  ;;  %v7969_v50 = vpop.f32.mrb[107].mxu1  ;;  %v12075_v13 = vmul.f32 -1.442695, %v8058_v0  ;;  %v12079_v57 = vmul.f32 -1.442695, %v8060_v21 }
 0x835   :  { %v8067_v14 = vadd.f32 %v7926_v46, %v14796_v40  ;;  %v8069_v47 = vadd.f32 %v7969_v50, %v14797_v29  ;;  %v12076_v22 = vmul.f32 -1.442695, %v8059_v6  ;;  %v12080_v42 = vmul.f32 -1.442695, %v8061_v48  ;;  %v14798_v59 = vld [vmem:[#allocation92_spill] sm:$0xff]  ;;  %v14800_v50 = vld [vmem:[#allocation94_spill] sm:$0xff] }
 0x836   :  { %12885 = vpow2.f32 %v12075_v13  ;;  %v12077_v8 = vmul.f32 -1.442695, %v8066_v54  ;;  %v12081_v41 = vmul.f32 -1.442695, %v8068_v60  ;;  %v14799_v54 = vld [vmem:[#allocation93_spill] sm:$0xff] }
 0x837   :  { %12887 = vpow2.f32 %v12079_v57  ;;  %v12078_v36 = vmul.f32 -1.442695, %v8067_v14  ;;  %v12082_v24 = vmul.f32 -1.442695, %v8069_v47  ;;  %v14801_v14 = vld [vmem:[#allocation95_spill] sm:$0xff] }
 0x838   :  { %12889 = vpow2.f32 %v12076_v22  ;;  %v14802_v22 = vld [vmem:[#allocation96_spill] sm:$0xff] }
 0x839   :  { %12891 = vpow2.f32 %v12080_v42 }
 0x83a   :  { %12893 = vpow2.f32 %v12077_v8  ;;  %v14803_v8 = vld [vmem:[#allocation97_spill] sm:$0xff] }
 0x83b   :  { %12895 = vpow2.f32 %v12081_v41 }
 0x83c   :  { %12897 = vpow2.f32 %v12078_v36 }
 0x83d   :  { %12899 = vpow2.f32 %v12082_v24 }
 0x840   :  { %v12886_v3 = vpop.eup %12885 }
 0x841   :  { %v12888_v31 = vpop.eup %12887  ;;  %v8086_v4 = vadd.f32 1.0, %v12886_v3 }
 0x842   :  { %v12890_v5 = vpop.eup %12889  ;;  %v8110_v27 = vadd.f32 1.0, %v12888_v31  ;;  %v14804_v31 = vld [vmem:[#allocation98_spill] sm:$0xff] }
 0x843   :  { %v12892_v51 = vpop.eup %12891  ;;  %v8087_v0 = vadd.f32 1.0, %v12890_v5  ;;  %12901 = vrcp.f32 %v8086_v4 }
 0x844   :  { %v12894_v58 = vpop.eup %12893  ;;  %v8111_v21 = vadd.f32 1.0, %v12892_v51  ;;  %12903 = vrcp.f32 %v8110_v27  ;;  %v14805_v51 = vld [vmem:[#allocation99_spill] sm:$0xff] }
 0x845   :  { %v12896_v2 = vpop.eup %12895  ;;  %v8088_v25 = vadd.f32 1.0, %v12894_v58  ;;  %12905 = vrcp.f32 %v8087_v0 }
 0x846   :  { %v12898_v43 = vpop.eup %12897  ;;  %v8112_v56 = vadd.f32 1.0, %v12896_v2  ;;  %12907 = vrcp.f32 %v8111_v21 }
 0x847   :  { %v12900_v10 = vpop.eup %12899  ;;  %v8089_v6 = vadd.f32 1.0, %v12898_v43  ;;  %12909 = vrcp.f32 %v8088_v25 }
 0x848   :  { %v8113_v45 = vadd.f32 1.0, %v12900_v10  ;;  %12911 = vrcp.f32 %v8112_v56 }
 0x849   :  { %12913 = vrcp.f32 %v8089_v6 }
 0x84a   :  { %12915 = vrcp.f32 %v8113_v45 }
 0x84d   :  { %v12902_v58 = vpop.eup %12901 }
 0x84e   :  { %v12904_v2 = vpop.eup %12903 }
 0x84f   :  { %v12906_v43 = vpop.eup %12905 }
 0x850   :  { %v12908_v21 = vpop.eup %12907 }
 0x851   :  { %v12910_v10 = vpop.eup %12909 }
 0x852   :  { %v12912_v25 = vpop.eup %12911 }
 0x853   :  { %v12914_v56 = vpop.eup %12913 }
 0x854   :  { %v12916_v6 = vpop.eup %12915 }
 0x871   :  { %v8006_v48 = vpop.f32.mrb[108].mxu0  ;;  %v8049_v33 = vpop.f32.mrb[108].mxu1 }
 0x872   :  { %v8062_v39 = vadd.f32 %v8006_v48, %v14798_v59  ;;  %v8064_v62 = vadd.f32 %v8049_v33, %v14799_v54  ;;  %v8008_v60 = vpop.f32.mrb[109].mxu0  ;;  %v8051_v46 = vpop.f32.mrb[109].mxu1  ;;  %v8150_v33 = vmul.f32 %v12904_v2, %v14321_v44  ;;  %v8151_v54 = vmul.f32 %v12908_v21, %v14323_v34 }
 0x873   :  { %v8063_v40 = vadd.f32 %v8008_v60, %v14800_v50  ;;  %v8065_v29 = vadd.f32 %v8051_v46, %v14801_v14  ;;  %v8010_v47 = vpop.f32.mrb[110].mxu0  ;;  %v8053_v13 = vpop.f32.mrb[110].mxu1  ;;  %v8153_v34 = vmul.f32 %v12916_v6, %v14332_v18  ;;  %v8231_v6 = vld [vmem:[#allocation9 + $0x78] sm:$0xff] }
 0x874   :  { %12917 = vtanh.f32 %v8062_v39  ;;  %v12083_v57 = vmul.f32 -1.442695, %v8064_v62  ;;  %v8070_v42 = vadd.f32 %v8010_v47, %v14802_v22  ;;  %v8072_v41 = vadd.f32 %v8053_v13, %v14803_v8  ;;  %v8012_v36 = vpop.f32.mrb[111].mxu0  ;;  %v8055_v24 = vpop.f32.mrb[111].mxu1 }
 0x875   :  { %12919 = vtanh.f32 %v8063_v40  ;;  %v12084_v3 = vmul.f32 -1.442695, %v8065_v29  ;;  %v8071_v5 = vadd.f32 %v8012_v36, %v14804_v31  ;;  %v8073_v4 = vadd.f32 %v8055_v24, %v14805_v51 }
 0x876   :  { %12921 = vpow2.f32 %v12083_v57  ;;  %v12085_v27 = vmul.f32 -1.442695, %v8072_v41  ;;  %v8152_v13 = vmul.f32 %v12912_v25, %v14329_v28  ;;  %v8230_v25 = vld [vmem:[#allocation9 + $0x70] sm:$0xff] }
 0x877   :  { %12923 = vpow2.f32 %v12084_v3  ;;  %v12086_v0 = vmul.f32 -1.442695, %v8073_v4 }
 0x878   :  { %12925 = vtanh.f32 %v8070_v42 }
 0x879   :  { %12927 = vpow2.f32 %v12085_v27 }
 0x87a   :  { %12929 = vtanh.f32 %v8071_v5 }
 0x87b   :  { %12931 = vpow2.f32 %v12086_v0 }
 0x87e   :  { %v12918_v45 = vpop.eup %12917 }
 0x87f   :  { %v12920_v48 = vpop.eup %12919  ;;  %v8154_v59 = vmul.f32 %v12918_v45, %v12902_v58 }
 0x880   :  { %v12922_v39 = vpop.eup %12921  ;;  %v8155_v62 = vmul.f32 %v12920_v48, %v12906_v43  ;;  %v8234_v48 = vld [vmem:[#allocation9 + $0x90] sm:$0xff] }
 0x881   :  { %v12924_v60 = vpop.eup %12923  ;;  %v14387_v46 = vadd.f32 %v8154_v59, %v8150_v33  ;;  %v8138_v50 = vadd.f32 1.0, %v12922_v39  ;;  %v8238_v39 = vld [vmem:[#allocation9 + $0xb0] sm:$0xff] }
 0x882   :  { %v12926_v40 = vpop.eup %12925  ;;  %v14389_v14 = vadd.f32 %v8155_v62, %v8151_v54  ;;  %v8139_v29 = vadd.f32 1.0, %v12924_v60  ;;  %v8235_v54 = vld [vmem:[#allocation9 + $0x98] sm:$0xff]  ;;  %v12107_v55 = vcombine.low %v8234_v48, %v8238_v39 }
 0x883   :  { %v12928_v47 = vpop.eup %12927  ;;  %12933 = vtanh.f32 %v14387_v46  ;;  %v8156_v57 = vmul.f32 %v12926_v40, %v12910_v10  ;;  %v8226_v10 = vld [vmem:[#allocation9 + $0x50] sm:$0xff]  ;;  %v8239_v62 = vld [vmem:[#allocation9 + $0xb8] sm:$0xff]  ;;  %v12108_v40 = vcombine.high %v8234_v48, %v8238_v39 }
 0x884   :  { %v12930_v44 = vpop.eup %12929  ;;  %12935 = vrcp.f32 %v8138_v50  ;;  %v8140_v22 = vadd.f32 1.0, %v12928_v47  ;;  %v12100_v33 = vcombine.high %v8226_v10, %v8230_v25  ;;  %v12099_v60 = vcombine.low %v8226_v10, %v8230_v25  ;;  %v8242_v47 = vld [vmem:[#allocation9 + $0xd0] sm:$0xff]  ;;  %v8271_v10 = vld [vmem:[#allocation9 + $0x1b8] sm:$0xff] }
 0x885   :  { %v12932_v42 = vpop.eup %12931  ;;  %12937 = vtanh.f32 %v14389_v14  ;;  %v14395_v8 = vadd.f32 %v8156_v57, %v8152_v13  ;;  %v8157_v41 = vmul.f32 %v12930_v44, %v12914_v56  ;;  %v8227_v56 = vld [vmem:[#allocation9 + $0x58] sm:$0xff]  ;;  %v8246_v13 = vld [vmem:[#allocation9 + $0xf0] sm:$0xff]  ;;  %v12109_v49 = vcombine.low %v8235_v54, %v8239_v62 }
 0x886   :  { %12939 = vrcp.f32 %v8139_v29  ;;  %v8141_v36 = vadd.f32 1.0, %v12932_v42  ;;  %v12102_v59 = vcombine.high %v8227_v56, %v8231_v6  ;;  %v12101_v50 = vcombine.low %v8227_v56, %v8231_v6  ;;  %v8243_v57 = vld [vmem:[#allocation9 + $0xd8] sm:$0xff] }
 0x887   :  { %12941 = vtanh.f32 %v14395_v8  ;;  %v14398_v24 = vadd.f32 %v8157_v41, %v8153_v34  ;;  %v12110_v29 = vcombine.high %v8235_v54, %v8239_v62  ;;  %v8247_v44 = vld [vmem:[#allocation9 + $0xf8] sm:$0xff]  ;;  %v12116_v30 = vcombine.high %v8242_v47, %v8246_v13 }
 0x888   :  { %12943 = vrcp.f32 %v8140_v22  ;;  %v12118_v9 = vcombine.high %v8243_v57, %v8247_v44  ;;  %v8251_v22 = vld [vmem:[#allocation9 + $0x118] sm:$0xff]  ;;  %v12115_v34 = vcombine.low %v8242_v47, %v8246_v13  ;;  %v12117_v41 = vcombine.low %v8243_v57, %v8247_v44  ;;  %v8286_v47 = vld [vmem:[#allocation9 + $0x230] sm:$0xff] }
 0x889   :  { %12945 = vtanh.f32 %v14398_v24  ;;  %v8255_v42 = vld [vmem:[#allocation9 + $0x138] sm:$0xff] }
 0x88a   :  { %12947 = vrcp.f32 %v8141_v36  ;;  %v8275_v39 = vld [vmem:[#allocation9 + $0x1d8] sm:$0xff] }
 0x88b   :  { %v8279_v54 = vld [vmem:[#allocation9 + $0x1f8] sm:$0xff] }
 0x88c   :  { %v8283_v13 = vld [vmem:[#allocation9 + $0x218] sm:$0xff] }
 0x88d   :  { %v12934_v28 = vpop.eup %12933  ;;  %v8287_v57 = vld [vmem:[#allocation9 + $0x238] sm:$0xff] }
 0x88e   :  { %v12936_v3 = vpop.eup %12935 }
 0x88f   :  { %v12938_v31 = vpop.eup %12937  ;;  %v8166_v58 = vmul.f32 %v12936_v3, %v12934_v28  ;;  %v12126_v28 = vcombine.high %v8251_v22, %v8255_v42  ;;  %v8258_v3 = vld [vmem:[#allocation9 + $0x150] sm:$0xff] }
 0x890   :  { %v12940_v5 = vpop.eup %12939 }
 0x891   :  { %v12942_v18 = vpop.eup %12941  ;;  %v8167_v0 = vmul.f32 %v12940_v5, %v12938_v31  ;;  %v8262_v31 = vld [vmem:[#allocation9 + $0x170] sm:$0xff]  ;;  %v8259_v5 = vld [vmem:[#allocation9 + $0x158] sm:$0xff] }
 0x892   :  { %v12944_v51 = vpop.eup %12943  ;;  %v12131_v25 = vcombine.low %v8258_v3, %v8262_v31 }
 0x893   :  { %v12946_v4 = vpop.eup %12945  ;;  %v8168_v27 = vmul.f32 %v12944_v51, %v12942_v18  ;;  %v8263_v18 = vld [vmem:[#allocation9 + $0x178] sm:$0xff] }
 0x894   :  { %v12948_v2 = vpop.eup %12947  ;;  %v12133_v56 = vcombine.low %v8259_v5, %v8263_v18 }
 0x895   :  { %v8169_v43 = vmul.f32 %v12948_v2, %v12946_v4  ;;  %v14401_v21 = vpack.c.bf16 %v8168_v27, %v8166_v58  ;;  %v12125_v4 = vcombine.low %v8251_v22, %v8255_v42  ;;  %v12132_v58 = vcombine.high %v8258_v3, %v8262_v31  ;;  %v8266_v2 = vld [vmem:[#allocation9 + $0x190] sm:$0xff]  ;;  %v8295_v22 = vld [vmem:[#allocation9 + $0x278] sm:$0xff] }
 0x896   :  { %v12134_v27 = vcombine.high %v8259_v5, %v8263_v18  ;;  %v8302_v3 = vld [vmem:[#allocation9 + $0x2b0] sm:$0xff]  ;;  %v8299_v31 = vld [vmem:[#allocation9 + $0x298] sm:$0xff] }
 0x897   :  { %v14403_v45 = vpack.c.bf16 %v8169_v43, %v8167_v0  ;;  %v8270_v0 = vld [vmem:[#allocation9 + $0x1b0] sm:$0xff]  ;;  %v8267_v43 = vld [vmem:[#allocation9 + $0x198] sm:$0xff] }
 0x898   :  { %v12140_v6 = vcombine.high %v8266_v2, %v8270_v0  ;;  %v12142_v48 = vcombine.high %v8267_v43, %v8271_v10  ;;  %v12139_v62 = vcombine.low %v8266_v2, %v8270_v0  ;;  %v8303_v5 = vld [vmem:[#allocation9 + $0x2b8] sm:$0xff]  ;;  %v8310_v2 = vld [vmem:[#allocation9 + $0x2f0] sm:$0xff] }
 0x899   :  { %9016 = vmatprep.mubr.bf16.mxu0 %v14403_v45  ;;  %9059 = vmatprep.mubr.bf16.mxu1 %v14403_v45  ;;  %v8307_v0 = vld [vmem:[#allocation9 + $0x2d8] sm:$0xff] }
 0x89a   :  { %9017 = vmatmul.mubr.bf16.vlgmr.msra.gmra.mrb[112].mxu0 %v14401_v21  ;;  %9060 = vmatmul.mubr.bf16.vlgmr.msra.gmra.mrb[112].mxu1 %v14401_v21 }
 0x89b   :  { %9071 = vmatpush1.bf16.msra.mxu0 %v12091_v61  ;;  %9114 = vmatpush1.bf16.msra.mxu1 %v12093_v53  ;;  %v8250_v61 = vld [vmem:[#allocation9 + $0x110] sm:$0xff] }
 0x89c   :  { %9102 = vmatprep.mubr.bf16.mxu0 %v14403_v45  ;;  %9145 = vmatprep.mubr.bf16.mxu1 %v14403_v45  ;;  %v8254_v53 = vld [vmem:[#allocation9 + $0x130] sm:$0xff] }
 0x89d   :  { %9072 = vmatprep.subr.bf16.mxu0 %v12100_v33  ;;  %9115 = vmatprep.subr.bf16.mxu1 %v12102_v59  ;;  %v12124_v36 = vcombine.high %v8250_v61, %v8254_v53  ;;  %v12123_v51 = vcombine.low %v8250_v61, %v8254_v53  ;;  %v8274_v33 = vld [vmem:[#allocation9 + $0x1d0] sm:$0xff]  ;;  %v8291_v53 = vld [vmem:[#allocation9 + $0x258] sm:$0xff] }
 0x89e   :  { %v8278_v59 = vld [vmem:[#allocation9 + $0x1f0] sm:$0xff] }
 0x89f   :  { %9073 = vmatpush1.bf16.msra.mxu0 %v12099_v60  ;;  %9116 = vmatpush1.bf16.msra.mxu1 %v12101_v50  ;;  %v12141_v60 = vcombine.low %v8267_v43, %v8271_v10  ;;  %v12148_v50 = vcombine.high %v8274_v33, %v8278_v59  ;;  %v12147_v44 = vcombine.low %v8274_v33, %v8278_v59  ;;  %v8294_v61 = vld [vmem:[#allocation9 + $0x270] sm:$0xff]  ;;  %v8311_v43 = vld [vmem:[#allocation9 + $0x2f8] sm:$0xff] }
 0x8a0   :  { %9074 = vmatprep.subr.bf16.mxu0 %v12108_v40  ;;  %9117 = vmatprep.subr.bf16.mxu1 %v12110_v29  ;;  %v12150_v40 = vcombine.high %v8275_v39, %v8279_v54  ;;  %v8282_v29 = vld [vmem:[#allocation9 + $0x210] sm:$0xff]  ;;  %v8315_v59 = vld [vmem:[#allocation9 + $0x318] sm:$0xff] }
 0x8a1   :  { %v12155_v42 = vcombine.low %v8282_v29, %v8286_v47  ;;  %v8318_v33 = vld [vmem:[#allocation9 + $0x330] sm:$0xff] }
 0x8a3   :  { %9075 = vmatpush1.bf16.msra.mxu0 %v12107_v55  ;;  %9118 = vmatpush1.bf16.msra.mxu1 %v12109_v49  ;;  %v12149_v55 = vcombine.low %v8275_v39, %v8279_v54  ;;  %v12156_v49 = vcombine.high %v8282_v29, %v8286_v47  ;;  %v8319_v39 = vld [vmem:[#allocation9 + $0x338] sm:$0xff]  ;;  %v8326_v29 = vld [vmem:[#allocation9 + $0x370] sm:$0xff] }
 0x8a4   :  { %9076 = vmatprep.subr.bf16.mxu0 %v12116_v30  ;;  %9119 = vmatprep.subr.bf16.mxu1 %v12118_v9  ;;  %v12158_v30 = vcombine.high %v8283_v13, %v8287_v57  ;;  %v8290_v9 = vld [vmem:[#allocation9 + $0x250] sm:$0xff]  ;;  %v8323_v47 = vld [vmem:[#allocation9 + $0x358] sm:$0xff] }
 0x8a5   :  { %v12163_v18 = vcombine.low %v8290_v9, %v8294_v61 }
 0x8a7   :  { %9077 = vmatpush1.bf16.msra.mxu0 %v12115_v34  ;;  %9120 = vmatpush1.bf16.msra.mxu1 %v12117_v41  ;;  %v12157_v34 = vcombine.low %v8283_v13, %v8287_v57  ;;  %v12164_v41 = vcombine.high %v8290_v9, %v8294_v61  ;;  %v8327_v13 = vld [vmem:[#allocation9 + $0x378] sm:$0xff]  ;;  %v8334_v9 = vld [vmem:[#allocation9 + $0x3b0] sm:$0xff] }
 0x8a8   :  { %9078 = vmatprep.subr.bf16.mxu0 %v12124_v36  ;;  %9121 = vmatprep.subr.bf16.mxu1 %v12126_v28  ;;  %v12166_v36 = vcombine.high %v8291_v53, %v8295_v22  ;;  %v8298_v28 = vld [vmem:[#allocation9 + $0x290] sm:$0xff]  ;;  %v8331_v61 = vld [vmem:[#allocation9 + $0x398] sm:$0xff] }
 0x8a9   :  { %v12171_v10 = vcombine.low %v8298_v28, %v8302_v3 }
 0x8ab   :  { %9079 = vmatpush1.bf16.msra.mxu0 %v12123_v51  ;;  %9122 = vmatpush1.bf16.msra.mxu1 %v12125_v4  ;;  %v12165_v51 = vcombine.low %v8291_v53, %v8295_v22  ;;  %v12172_v4 = vcombine.high %v8298_v28, %v8302_v3  ;;  %v8335_v53 = vld [vmem:[#allocation9 + $0x3b8] sm:$0xff]  ;;  %v8342_v28 = vld [vmem:[#allocation9 + $0x3f0] sm:$0xff] }
 0x8ac   :  { %9080 = vmatprep.subr.bf16.mxu0 %v12132_v58  ;;  %9123 = vmatprep.subr.bf16.mxu1 %v12134_v27  ;;  %v12174_v58 = vcombine.high %v8299_v31, %v8303_v5  ;;  %v8306_v27 = vld [vmem:[#allocation9 + $0x2d0] sm:$0xff]  ;;  %v8339_v3 = vld [vmem:[#allocation9 + $0x3d8] sm:$0xff] }
 0x8ad   :  { %v12179_v54 = vcombine.low %v8306_v27, %v8310_v2 }
 0x8af   :  { %9081 = vmatpush1.bf16.msra.mxu0 %v12131_v25  ;;  %9124 = vmatpush1.bf16.msra.mxu1 %v12133_v56  ;;  %v12173_v25 = vcombine.low %v8299_v31, %v8303_v5  ;;  %v12180_v56 = vcombine.high %v8306_v27, %v8310_v2  ;;  %v8343_v31 = vld [vmem:[#allocation9 + $0x3f8] sm:$0xff]  ;;  %v9314_v2 = vld [vmem:[#allocation9] sm:$0xff] }
 0x8b0   :  { %9082 = vmatprep.subr.bf16.mxu0 %v12140_v6  ;;  %9125 = vmatprep.subr.bf16.mxu1 %v12142_v48  ;;  %v12182_v6 = vcombine.high %v8307_v0, %v8311_v43  ;;  %v8314_v48 = vld [vmem:[#allocation9 + $0x310] sm:$0xff]  ;;  %v12213_v27 = vcombine.low %v8339_v3, %v8343_v31 }
 0x8b1   :  { %v12187_v57 = vcombine.low %v8314_v48, %v8318_v33 }
 0x8b3   :  { %9083 = vmatpush1.bf16.msra.mxu0 %v12139_v62  ;;  %9126 = vmatpush1.bf16.msra.mxu1 %v12141_v60  ;;  %v12181_v62 = vcombine.low %v8307_v0, %v8311_v43  ;;  %v12188_v60 = vcombine.high %v8314_v48, %v8318_v33  ;;  %v9318_v0 = vld [vmem:[#allocation9 + $0x20] sm:$0xff]  ;;  %v9315_v43 = vld [vmem:[#allocation9 + $0x8] sm:$0xff] }
 0x8b4   :  { %9084 = vmatprep.subr.bf16.mxu0 %v12148_v50  ;;  %9127 = vmatprep.subr.bf16.mxu1 %v12150_v40  ;;  %v12190_v50 = vcombine.high %v8315_v59, %v8319_v39  ;;  %v8322_v40 = vld [vmem:[#allocation9 + $0x350] sm:$0xff]  ;;  %v9326_v48 = vld [vmem:[#allocation9 + $0x60] sm:$0xff] }
 0x8b5   :  { %v12195_v22 = vcombine.low %v8322_v40, %v8326_v29 }
 0x8b7   :  { %9085 = vmatpush1.bf16.msra.mxu0 %v12147_v44  ;;  %9128 = vmatpush1.bf16.msra.mxu1 %v12149_v55  ;;  %v12189_v44 = vcombine.low %v8315_v59, %v8319_v39  ;;  %v12196_v55 = vcombine.high %v8322_v40, %v8326_v29  ;;  %v9334_v40 = vld [vmem:[#allocation9 + $0xa0] sm:$0xff]  ;;  %v9331_v29 = vld [vmem:[#allocation9 + $0x88] sm:$0xff] }
 0x8b8   :  { %9086 = vmatprep.subr.bf16.mxu0 %v12156_v49  ;;  %9129 = vmatprep.subr.bf16.mxu1 %v12158_v30  ;;  %v12198_v49 = vcombine.high %v8323_v47, %v8327_v13  ;;  %v8330_v30 = vld [vmem:[#allocation9 + $0x390] sm:$0xff] }
 0x8b9   :  { %v12203_v5 = vcombine.low %v8330_v30, %v8334_v9 }
 0x8bb   :  { %9087 = vmatpush1.bf16.msra.mxu0 %v12155_v42  ;;  %9130 = vmatpush1.bf16.msra.mxu1 %v12157_v34  ;;  %v12197_v42 = vcombine.low %v8323_v47, %v8327_v13  ;;  %v12204_v34 = vcombine.high %v8330_v30, %v8334_v9  ;;  %v9335_v47 = vld [vmem:[#allocation9 + $0xa8] sm:$0xff]  ;;  %v9342_v30 = vld [vmem:[#allocation9 + $0xe0] sm:$0xff] }
 0x8bc   :  { %9088 = vmatprep.subr.bf16.mxu0 %v12164_v41  ;;  %9131 = vmatprep.subr.bf16.mxu1 %v12166_v36  ;;  %v12206_v41 = vcombine.high %v8331_v61, %v8335_v53  ;;  %v8338_v36 = vld [vmem:[#allocation9 + $0x3d0] sm:$0xff]  ;;  %v9339_v9 = vld [vmem:[#allocation9 + $0xc8] sm:$0xff] }
 0x8bf   :  { %9089 = vmatpush1.bf16.msra.mxu0 %v12163_v18  ;;  %9132 = vmatpush1.bf16.msra.mxu1 %v12165_v51  ;;  %v12205_v18 = vcombine.low %v8331_v61, %v8335_v53  ;;  %v12212_v51 = vcombine.high %v8338_v36, %v8342_v28  ;;  %v9343_v61 = vld [vmem:[#allocation9 + $0xe8] sm:$0xff] }
 0x8c0   :  { %9090 = vmatprep.subr.bf16.mxu0 %v12172_v4  ;;  %9133 = vmatprep.subr.bf16.mxu1 %v12174_v58  ;;  %v12214_v4 = vcombine.high %v8339_v3, %v8343_v31  ;;  %v12211_v58 = vcombine.low %v8338_v36, %v8342_v28  ;;  %v9350_v36 = vld [vmem:[#allocation9 + $0x120] sm:$0xff]  ;;  %v9347_v28 = vld [vmem:[#allocation9 + $0x108] sm:$0xff] }
 0x8c1   :  { %v9351_v3 = vld [vmem:[#allocation9 + $0x128] sm:$0xff] }
 0x8c3   :  { %9091 = vmatpush1.bf16.msra.mxu0 %v12171_v10  ;;  %9134 = vmatpush1.bf16.msra.mxu1 %v12173_v25  ;;  %v12227_v10 = vcombine.low %v9314_v2, %v9318_v0  ;;  %v12228_v25 = vcombine.high %v9314_v2, %v9318_v0  ;;  %v9359_v2 = vld [vmem:[#allocation9 + $0x168] sm:$0xff] }
 0x8c4   :  { %9092 = vmatprep.subr.bf16.mxu0 %v12180_v56  ;;  %9135 = vmatprep.subr.bf16.mxu1 %v12182_v6  ;;  %v9319_v56 = vld [vmem:[#allocation9 + $0x28] sm:$0xff]  ;;  %v9322_v6 = vld [vmem:[#allocation9 + $0x40] sm:$0xff] }
 0x8c5   :  { %v12229_v33 = vcombine.low %v9315_v43, %v9319_v56  ;;  %v12230_v59 = vcombine.high %v9315_v43, %v9319_v56  ;;  %v12236_v39 = vcombine.high %v9322_v6, %v9326_v48  ;;  %v12235_v13 = vcombine.low %v9322_v6, %v9326_v48  ;;  %v9362_v56 = vld [vmem:[#allocation9 + $0x180] sm:$0xff]  ;;  %v9363_v48 = vld [vmem:[#allocation9 + $0x188] sm:$0xff] }
 0x8c6   :  { %v12261_v43 = vcombine.low %v9347_v28, %v9351_v3  ;;  %v9366_v6 = vld [vmem:[#allocation9 + $0x1a0] sm:$0xff] }
 0x8c7   :  { %9093 = vmatpush1.bf16.msra.mxu0 %v12179_v54  ;;  %9136 = vmatpush1.bf16.msra.mxu1 %v12181_v62  ;;  %v9323_v54 = vld [vmem:[#allocation9 + $0x48] sm:$0xff] }
 0x8c8   :  { %9094 = vmatprep.subr.bf16.mxu0 %v12188_v60  ;;  %9137 = vmatprep.subr.bf16.mxu1 %v12190_v50  ;;  %v9327_v62 = vld [vmem:[#allocation9 + $0x68] sm:$0xff]  ;;  %v9330_v60 = vld [vmem:[#allocation9 + $0x80] sm:$0xff] }
 0x8c9   :  { %v12238_v50 = vcombine.high %v9323_v54, %v9327_v62  ;;  %v12243_v53 = vcombine.low %v9330_v60, %v9334_v40 }
 0x8cb   :  { %9095 = vmatpush1.bf16.msra.mxu0 %v12187_v57  ;;  %9138 = vmatpush1.bf16.msra.mxu1 %v12189_v44  ;;  %v12237_v57 = vcombine.low %v9323_v54, %v9327_v62  ;;  %v12244_v44 = vcombine.high %v9330_v60, %v9334_v40  ;;  %v12276_v54 = vcombine.high %v9362_v56, %v9366_v6  ;;  %v9370_v40 = vld [vmem:[#allocation9 + $0x1c0] sm:$0xff] }
 0x8cc   :  { %9096 = vmatprep.subr.bf16.mxu0 %v12196_v55  ;;  %9139 = vmatprep.subr.bf16.mxu1 %v12198_v49  ;;  %v12246_v55 = vcombine.high %v9331_v29, %v9335_v47  ;;  %v9338_v49 = vld [vmem:[#allocation9 + $0xc0] sm:$0xff]  ;;  %v12275_v60 = vcombine.low %v9362_v56, %v9366_v6 }
 0x8cd   :  { %v12251_v31 = vcombine.low %v9338_v49, %v9342_v30  ;;  %v9402_v6 = vld [vmem:[#allocation9 + $0x2c0] sm:$0xff] }
 0x8cf   :  { %9097 = vmatpush1.bf16.msra.mxu0 %v12195_v22  ;;  %9140 = vmatpush1.bf16.msra.mxu1 %v12197_v42  ;;  %v12245_v22 = vcombine.low %v9331_v29, %v9335_v47  ;;  %v12252_v42 = vcombine.high %v9338_v49, %v9342_v30  ;;  %v9374_v29 = vld [vmem:[#allocation9 + $0x1e0] sm:$0xff]  ;;  %v9371_v47 = vld [vmem:[#allocation9 + $0x1c8] sm:$0xff] }
 0x8d0   :  { %9098 = vmatprep.subr.bf16.mxu0 %v12204_v34  ;;  %9141 = vmatprep.subr.bf16.mxu1 %v12206_v41  ;;  %v12254_v34 = vcombine.high %v9339_v9, %v9343_v61  ;;  %v9346_v41 = vld [vmem:[#allocation9 + $0x100] sm:$0xff] }
 0x8d1   :  { %v12259_v0 = vcombine.low %v9346_v41, %v9350_v36  ;;  %v9378_v30 = vld [vmem:[#allocation9 + $0x200] sm:$0xff] }
 0x8d3   :  { %9099 = vmatpush1.bf16.msra.mxu0 %v12203_v5  ;;  %9142 = vmatpush1.bf16.msra.mxu1 %v12205_v18  ;;  %v12253_v5 = vcombine.low %v9339_v9, %v9343_v61  ;;  %v12260_v18 = vcombine.high %v9346_v41, %v9350_v36  ;;  %v9382_v9 = vld [vmem:[#allocation9 + $0x220] sm:$0xff]  ;;  %v9379_v61 = vld [vmem:[#allocation9 + $0x208] sm:$0xff] }
 0x8d4   :  { %9100 = vmatprep.subr.bf16.mxu0 %v12212_v51  ;;  %9143 = vmatprep.subr.bf16.mxu1 %v12214_v4  ;;  %v12262_v51 = vcombine.high %v9347_v28, %v9351_v3  ;;  %v9354_v4 = vld [vmem:[#allocation9 + $0x140] sm:$0xff]  ;;  %v9387_v3 = vld [vmem:[#allocation9 + $0x248] sm:$0xff] }
 0x8d5   :  { %v9386_v36 = vld [vmem:[#allocation9 + $0x240] sm:$0xff] }
 0x8d6   :  { %v9390_v28 = vld [vmem:[#allocation9 + $0x260] sm:$0xff] }
 0x8d7   :  { %9101 = vmatpush1.bf16.msra.mxu0 %v12211_v58  ;;  %9144 = vmatpush1.bf16.msra.mxu1 %v12213_v27  ;;  %v9358_v58 = vld [vmem:[#allocation9 + $0x160] sm:$0xff]  ;;  %v9355_v27 = vld [vmem:[#allocation9 + $0x148] sm:$0xff] }
 0x8d8   :  { %10082 = vmatprep.subr.bf16.mxu0 %v12228_v25  ;;  %10125 = vmatprep.subr.bf16.mxu1 %v12230_v59  ;;  %v12270_v25 = vcombine.high %v9355_v27, %v9359_v2  ;;  %v12267_v59 = vcombine.low %v9354_v4, %v9358_v58 }
 0x8da   :  { %9103 = vmatmul.mubr.bf16.vlgmr.msra.gmra.mrb[116].mxu0 %v14401_v21  ;;  %9146 = vmatmul.mubr.bf16.vlgmr.msra.gmra.mrb[116].mxu1 %v14401_v21 }
 0x8db   :  { %10083 = vmatpush1.bf16.msra.mxu0 %v12227_v10  ;;  %10126 = vmatpush1.bf16.msra.mxu1 %v12229_v33  ;;  %v12268_v10 = vcombine.high %v9354_v4, %v9358_v58  ;;  %v9367_v33 = vld [vmem:[#allocation9 + $0x1a8] sm:$0xff]  ;;  %v9394_v58 = vld [vmem:[#allocation9 + $0x280] sm:$0xff] }
 0x8dc   :  { %10084 = vmatprep.subr.bf16.mxu0 %v12236_v39  ;;  %10127 = vmatprep.subr.bf16.mxu1 %v12238_v50  ;;  %v12269_v39 = vcombine.low %v9355_v27, %v9359_v2  ;;  %v12278_v62 = vcombine.high %v9363_v48, %v9367_v33  ;;  %v12277_v50 = vcombine.low %v9363_v48, %v9367_v33  ;;  %v9398_v27 = vld [vmem:[#allocation9 + $0x2a0] sm:$0xff]  ;;  %v9395_v2 = vld [vmem:[#allocation9 + $0x288] sm:$0xff] }
 0x8dd   :  { %v9406_v48 = vld [vmem:[#allocation9 + $0x2e0] sm:$0xff]  ;;  %v9403_v33 = vld [vmem:[#allocation9 + $0x2c8] sm:$0xff] }
 0x8df   :  { %10085 = vmatpush1.bf16.msra.mxu0 %v12235_v13  ;;  %10128 = vmatpush1.bf16.msra.mxu1 %v12237_v57  ;;  %v12284_v13 = vcombine.high %v9370_v40, %v9374_v29  ;;  %v9375_v57 = vld [vmem:[#allocation9 + $0x1e8] sm:$0xff] }
 0x8e0   :  { %10086 = vmatprep.subr.bf16.mxu0 %v12244_v44  ;;  %10129 = vmatprep.subr.bf16.mxu1 %v12246_v55  ;;  %v12283_v44 = vcombine.low %v9370_v40, %v9374_v29  ;;  %v12285_v55 = vcombine.low %v9371_v47, %v9375_v57  ;;  %v12286_v49 = vcombine.high %v9371_v47, %v9375_v57  ;;  %v9414_v40 = vld [vmem:[#allocation9 + $0x320] sm:$0xff]  ;;  %v9411_v29 = vld [vmem:[#allocation9 + $0x308] sm:$0xff] }
 0x8e3   :  { %10087 = vmatpush1.bf16.msra.mxu0 %v12243_v53  ;;  %10130 = vmatpush1.bf16.msra.mxu1 %v12245_v22  ;;  %v12292_v53 = vcombine.high %v9378_v30, %v9382_v9  ;;  %v9383_v22 = vld [vmem:[#allocation9 + $0x228] sm:$0xff] }
 0x8e4   :  { %10088 = vmatprep.subr.bf16.mxu0 %v12252_v42  ;;  %10131 = vmatprep.subr.bf16.mxu1 %v12254_v34  ;;  %v12291_v42 = vcombine.low %v9378_v30, %v9382_v9  ;;  %v12293_v34 = vcombine.low %v9379_v61, %v9383_v22  ;;  %v12294_v41 = vcombine.high %v9379_v61, %v9383_v22  ;;  %v9422_v30 = vld [vmem:[#allocation9 + $0x360] sm:$0xff]  ;;  %v9419_v9 = vld [vmem:[#allocation9 + $0x348] sm:$0xff] }
 0x8e7   :  { %10089 = vmatpush1.bf16.msra.mxu0 %v12251_v31  ;;  %10132 = vmatpush1.bf16.msra.mxu1 %v12253_v5  ;;  %v12300_v31 = vcombine.high %v9386_v36, %v9390_v28  ;;  %v9391_v5 = vld [vmem:[#allocation9 + $0x268] sm:$0xff] }
 0x8e8   :  { %10090 = vmatprep.subr.bf16.mxu0 %v12260_v18  ;;  %10133 = vmatprep.subr.bf16.mxu1 %v12262_v51  ;;  %v12299_v18 = vcombine.low %v9386_v36, %v9390_v28  ;;  %v12301_v51 = vcombine.low %v9387_v3, %v9391_v5  ;;  %v12302_v4 = vcombine.high %v9387_v3, %v9391_v5  ;;  %v9430_v36 = vld [vmem:[#allocation9 + $0x3a0] sm:$0xff]  ;;  %v9427_v28 = vld [vmem:[#allocation9 + $0x388] sm:$0xff] }
 0x8eb   :  { %10091 = vmatpush1.bf16.msra.mxu0 %v12259_v0  ;;  %10134 = vmatpush1.bf16.msra.mxu1 %v12261_v43  ;;  %v12308_v0 = vcombine.high %v9394_v58, %v9398_v27  ;;  %v9399_v43 = vld [vmem:[#allocation9 + $0x2a8] sm:$0xff] }
 0x8ec   :  { %10092 = vmatprep.subr.bf16.mxu0 %v12268_v10  ;;  %10135 = vmatprep.subr.bf16.mxu1 %v12270_v25  ;;  %v12307_v10 = vcombine.low %v9394_v58, %v9398_v27  ;;  %v12309_v25 = vcombine.low %v9395_v2, %v9399_v43  ;;  %v12310_v56 = vcombine.high %v9395_v2, %v9399_v43  ;;  %v9438_v58 = vld [vmem:[#allocation9 + $0x3e0] sm:$0xff]  ;;  %v9435_v27 = vld [vmem:[#allocation9 + $0x3c8] sm:$0xff] }
 0x8ef   :  { %10093 = vmatpush1.bf16.msra.mxu0 %v12267_v59  ;;  %10136 = vmatpush1.bf16.msra.mxu1 %v12269_v39  ;;  %v12316_v59 = vcombine.high %v9402_v6, %v9406_v48  ;;  %v9407_v39 = vld [vmem:[#allocation9 + $0x2e8] sm:$0xff] }
 0x8f0   :  { %10094 = vmatprep.subr.bf16.mxu0 %v12276_v54  ;;  %10137 = vmatprep.subr.bf16.mxu1 %v12278_v62  ;;  %v12315_v54 = vcombine.low %v9402_v6, %v9406_v48  ;;  %v12317_v62 = vcombine.low %v9403_v33, %v9407_v39  ;;  %v14421_v6 = vld [vmem:[#allocation9 + $0x30] sm:$0xff]  ;;  %v14423_v48 = vld [vmem:[#allocation9 + $0x18] sm:$0xff] }
 0x8f3   :  { %10095 = vmatpush1.bf16.msra.mxu0 %v12275_v60  ;;  %10138 = vmatpush1.bf16.msra.mxu1 %v12277_v50  ;;  %v12318_v60 = vcombine.high %v9403_v33, %v9407_v39  ;;  %v9410_v50 = vld [vmem:[#allocation9 + $0x300] sm:$0xff] }
 0x8f4   :  { %10096 = vmatprep.subr.bf16.mxu0 %v12284_v13  ;;  %10139 = vmatprep.subr.bf16.mxu1 %v12286_v49  ;;  %v12324_v47 = vcombine.high %v9410_v50, %v9414_v40  ;;  %v9415_v13 = vld [vmem:[#allocation9 + $0x328] sm:$0xff]  ;;  %v12323_v57 = vcombine.low %v9410_v50, %v9414_v40  ;;  %v9418_v49 = vld [vmem:[#allocation9 + $0x340] sm:$0xff] }
 0x8f5   :  { %v12332_v61 = vcombine.high %v9418_v49, %v9422_v30  ;;  %v12331_v22 = vcombine.low %v9418_v49, %v9422_v30  ;;  %v14806_v40 = vld [vmem:[#allocation52_spill] sm:$0xff]  ;;  %v14809_v30 = vld [vmem:[#allocation55_spill] sm:$0xff] }
 0x8f7   :  { %10097 = vmatpush1.bf16.msra.mxu0 %v12283_v44  ;;  %10140 = vmatpush1.bf16.msra.mxu1 %v12285_v55  ;;  %v12325_v44 = vcombine.low %v9411_v29, %v9415_v13  ;;  %v12326_v55 = vcombine.high %v9411_v29, %v9415_v13 }
 0x8f8   :  { %10098 = vmatprep.subr.bf16.mxu0 %v12292_v53  ;;  %10141 = vmatprep.subr.bf16.mxu1 %v12294_v41  ;;  %v9423_v53 = vld [vmem:[#allocation9 + $0x368] sm:$0xff]  ;;  %v9426_v41 = vld [vmem:[#allocation9 + $0x380] sm:$0xff] }
 0x8f9   :  { %v12340_v3 = vcombine.high %v9426_v41, %v9430_v36  ;;  %v12339_v5 = vcombine.low %v9426_v41, %v9430_v36 }
 0x8fb   :  { %10099 = vmatpush1.bf16.msra.mxu0 %v12291_v42  ;;  %10142 = vmatpush1.bf16.msra.mxu1 %v12293_v34  ;;  %v12333_v42 = vcombine.low %v9419_v9, %v9423_v53  ;;  %v12334_v34 = vcombine.high %v9419_v9, %v9423_v53 }
 0x8fc   :  { %10100 = vmatprep.subr.bf16.mxu0 %v12300_v31  ;;  %10143 = vmatprep.subr.bf16.mxu1 %v12302_v4  ;;  %v9431_v31 = vld [vmem:[#allocation9 + $0x3a8] sm:$0xff]  ;;  %v9434_v4 = vld [vmem:[#allocation9 + $0x3c0] sm:$0xff] }
 0x8fd   :  { %v12348_v2 = vcombine.high %v9434_v4, %v9438_v58  ;;  %v12347_v43 = vcombine.low %v9434_v4, %v9438_v58 }
 0x8ff   :  { %10101 = vmatpush1.bf16.msra.mxu0 %v12299_v18  ;;  %10144 = vmatpush1.bf16.msra.mxu1 %v12301_v51  ;;  %v12341_v18 = vcombine.low %v9427_v28, %v9431_v31  ;;  %v12342_v51 = vcombine.high %v9427_v28, %v9431_v31 }
 0x900   :  { %10102 = vmatprep.subr.bf16.mxu0 %v12308_v0  ;;  %10145 = vmatprep.subr.bf16.mxu1 %v12310_v56  ;;  %v9439_v0 = vld [vmem:[#allocation9 + $0x3e8] sm:$0xff]  ;;  %v14419_v56 = vld [vmem:[#allocation9 + $0x10] sm:$0xff] }
 0x901   :  { %v12232_v33 = vcombine.high %v14419_v56, %v14421_v6  ;;  %v12231_v39 = vcombine.low %v14419_v56, %v14421_v6 }
 0x903   :  { %10103 = vmatpush1.bf16.msra.mxu0 %v12307_v10  ;;  %10146 = vmatpush1.bf16.msra.mxu1 %v12309_v25  ;;  %v12349_v10 = vcombine.low %v9435_v27, %v9439_v0  ;;  %v12350_v25 = vcombine.high %v9435_v27, %v9439_v0 }
 0x904   :  { %10104 = vmatprep.subr.bf16.mxu0 %v12316_v59  ;;  %10147 = vmatprep.subr.bf16.mxu1 %v12318_v60  ;;  %v14427_v59 = vld [vmem:[#allocation9 + $0x38] sm:$0xff] }
 0x907   :  { %10105 = vmatpush1.bf16.msra.mxu0 %v12315_v54  ;;  %10148 = vmatpush1.bf16.msra.mxu1 %v12317_v62  ;;  %v12233_v54 = vcombine.low %v14423_v48, %v14427_v59  ;;  %v12234_v62 = vcombine.high %v14423_v48, %v14427_v59 }
 0x908   :  { %10106 = vmatprep.subr.bf16.mxu0 %v12324_v47  ;;  %10149 = vmatprep.subr.bf16.mxu1 %v12326_v55  ;;  %v14807_v47 = vld [vmem:[#allocation53_spill] sm:$0xff]  ;;  %v14808_v55 = vld [vmem:[#allocation54_spill] sm:$0xff] }
 0x90b   :  { %10107 = vmatpush1.bf16.msra.mxu0 %v12323_v57  ;;  %10150 = vmatpush1.bf16.msra.mxu1 %v12325_v44 }
 0x90c   :  { %10108 = vmatprep.subr.bf16.mxu0 %v12332_v61  ;;  %10151 = vmatprep.subr.bf16.mxu1 %v12334_v34  ;;  %v14811_v34 = vld [vmem:[#allocation57_spill] sm:$0xff] }
 0x90f   :  { %10109 = vmatpush1.bf16.msra.mxu0 %v12331_v22  ;;  %10152 = vmatpush1.bf16.msra.mxu1 %v12333_v42  ;;  %v14810_v22 = vld [vmem:[#allocation56_spill] sm:$0xff] }
 0x910   :  { %10110 = vmatprep.subr.bf16.mxu0 %v12340_v3  ;;  %10153 = vmatprep.subr.bf16.mxu1 %v12342_v51  ;;  %v14812_v3 = vld [vmem:[#allocation58_spill] sm:$0xff] }
 0x913   :  { %10111 = vmatpush1.bf16.msra.mxu0 %v12339_v5  ;;  %10154 = vmatpush1.bf16.msra.mxu1 %v12341_v18  ;;  %v14813_v5 = vld [vmem:[#allocation59_spill] sm:$0xff] }
 0x914   :  { %10112 = vmatprep.subr.bf16.mxu0 %v12348_v2  ;;  %10155 = vmatprep.subr.bf16.mxu1 %v12350_v25 }
 0x917   :  { %10113 = vmatpush1.bf16.msra.mxu0 %v12347_v43  ;;  %10156 = vmatpush1.bf16.msra.mxu1 %v12349_v10 }
 0x918   :  { %10168 = vmatprep.subr.bf16.mxu0 %v12232_v33  ;;  %10211 = vmatprep.subr.bf16.mxu1 %v12234_v62 }
 0x96d   :  { %v9018_v60 = vpop.f32.mrb[112].mxu0  ;;  %v9061_v50 = vpop.f32.mrb[112].mxu1 }
 0x96e   :  { %v9156_v29 = vadd.f32 %v9018_v60, %v14806_v40  ;;  %v9158_v13 = vadd.f32 %v9061_v50, %v14807_v47  ;;  %v9020_v57 = vpop.f32.mrb[113].mxu0  ;;  %v9063_v44 = vpop.f32.mrb[113].mxu1 }
 0x96f   :  { %v9157_v49 = vadd.f32 %v9020_v57, %v14808_v55  ;;  %v9159_v9 = vadd.f32 %v9063_v44, %v14809_v30  ;;  %v9022_v61 = vpop.f32.mrb[114].mxu0  ;;  %v9065_v53 = vpop.f32.mrb[114].mxu1 }
 0x970   :  { %v9164_v42 = vadd.f32 %v9022_v61, %v14810_v22  ;;  %v9166_v41 = vadd.f32 %v9065_v53, %v14811_v34  ;;  %v9024_v36 = vpop.f32.mrb[115].mxu0  ;;  %v9067_v28 = vpop.f32.mrb[115].mxu1  ;;  %v12215_v51 = vmul.f32 -1.442695, %v9156_v29  ;;  %v12219_v4 = vmul.f32 -1.442695, %v9158_v13 }
 0x971   :  { %v9165_v31 = vadd.f32 %v9024_v36, %v14812_v3  ;;  %v9167_v18 = vadd.f32 %v9067_v28, %v14813_v5  ;;  %v12216_v58 = vmul.f32 -1.442695, %v9157_v49  ;;  %v12220_v27 = vmul.f32 -1.442695, %v9159_v9 }
 0x972   :  { %12949 = vpow2.f32 %v12215_v51  ;;  %v12217_v2 = vmul.f32 -1.442695, %v9164_v42  ;;  %v12221_v0 = vmul.f32 -1.442695, %v9166_v41  ;;  %v14814_v42 = vld [vmem:[#allocation100_spill] sm:$0xff]  ;;  %v14815_v41 = vld [vmem:[#allocation101_spill] sm:$0xff] }
 0x973   :  { %12951 = vpow2.f32 %v12219_v4  ;;  %v12218_v43 = vmul.f32 -1.442695, %v9165_v31  ;;  %v12222_v10 = vmul.f32 -1.442695, %v9167_v18  ;;  %v14816_v31 = vld [vmem:[#allocation102_spill] sm:$0xff]  ;;  %v14817_v18 = vld [vmem:[#allocation103_spill] sm:$0xff] }
 0x974   :  { %12953 = vpow2.f32 %v12216_v58 }
 0x975   :  { %12955 = vpow2.f32 %v12220_v27 }
 0x976   :  { %12957 = vpow2.f32 %v12217_v2  ;;  %v14818_v2 = vld [vmem:[#allocation104_spill] sm:$0xff] }
 0x977   :  { %12959 = vpow2.f32 %v12221_v0 }
 0x978   :  { %12961 = vpow2.f32 %v12218_v43  ;;  %v14819_v43 = vld [vmem:[#allocation105_spill] sm:$0xff] }
 0x979   :  { %12963 = vpow2.f32 %v12222_v10 }
 0x97c   :  { %v12950_v25 = vpop.eup %12949 }
 0x97d   :  { %v12952_v33 = vpop.eup %12951  ;;  %v9184_v50 = vadd.f32 1.0, %v12950_v25 }
 0x97e   :  { %v12954_v62 = vpop.eup %12953  ;;  %v9208_v29 = vadd.f32 1.0, %v12952_v33 }
 0x97f   :  { %v12956_v60 = vpop.eup %12955  ;;  %v9185_v13 = vadd.f32 1.0, %v12954_v62  ;;  %12965 = vrcp.f32 %v9184_v50 }
 0x980   :  { %v12958_v40 = vpop.eup %12957  ;;  %v9209_v44 = vadd.f32 1.0, %v12956_v60  ;;  %12967 = vrcp.f32 %v9208_v29  ;;  %v14820_v60 = vld [vmem:[#allocation106_spill] sm:$0xff] }
 0x981   :  { %v12960_v47 = vpop.eup %12959  ;;  %v9186_v49 = vadd.f32 1.0, %v12958_v40  ;;  %12969 = vrcp.f32 %v9185_v13  ;;  %v14821_v40 = vld [vmem:[#allocation107_spill] sm:$0xff] }
 0x982   :  { %v12962_v57 = vpop.eup %12961  ;;  %v9210_v30 = vadd.f32 1.0, %v12960_v47  ;;  %12971 = vrcp.f32 %v9209_v44 }
 0x983   :  { %v12964_v55 = vpop.eup %12963  ;;  %v9187_v9 = vadd.f32 1.0, %v12962_v57  ;;  %12973 = vrcp.f32 %v9186_v49 }
 0x984   :  { %v9211_v61 = vadd.f32 1.0, %v12964_v55  ;;  %12975 = vrcp.f32 %v9210_v30 }
 0x985   :  { %12977 = vrcp.f32 %v9187_v9 }
 0x986   :  { %12979 = vrcp.f32 %v9211_v61 }
 0x989   :  { %v12966_v47 = vpop.eup %12965 }
 0x98a   :  { %v12968_v57 = vpop.eup %12967 }
 0x98b   :  { %v12970_v55 = vpop.eup %12969 }
 0x98c   :  { %v12972_v49 = vpop.eup %12971 }
 0x98d   :  { %v12974_v30 = vpop.eup %12973 }
 0x98e   :  { %v12976_v9 = vpop.eup %12975 }
 0x98f   :  { %v12978_v61 = vpop.eup %12977 }
 0x9ad   :  { %v9104_v53 = vpop.f32.mrb[116].mxu0  ;;  %v9147_v22 = vpop.f32.mrb[116].mxu1 }
 0x9ae   :  { %v9160_v34 = vadd.f32 %v9104_v53, %v14814_v42  ;;  %v9162_v36 = vadd.f32 %v9147_v22, %v14815_v41  ;;  %v9106_v28 = vpop.f32.mrb[117].mxu0  ;;  %v9149_v3 = vpop.f32.mrb[117].mxu1 }
 0x9af   :  { %v9161_v5 = vadd.f32 %v9106_v28, %v14816_v31  ;;  %v9163_v51 = vadd.f32 %v9149_v3, %v14817_v18  ;;  %v9108_v4 = vpop.f32.mrb[118].mxu0  ;;  %v9151_v58 = vpop.f32.mrb[118].mxu1  ;;  %v9249_v28 = vmul.f32 %v12972_v49, %v14389_v14 }
 0x9b0   :  { %12981 = vtanh.f32 %v9160_v34  ;;  %v12223_v27 = vmul.f32 -1.442695, %v9162_v36  ;;  %v9168_v0 = vadd.f32 %v9108_v4, %v14818_v2  ;;  %v9170_v10 = vadd.f32 %v9151_v58, %v14819_v43  ;;  %v9110_v25 = vpop.f32.mrb[119].mxu0  ;;  %v9153_v33 = vpop.f32.mrb[119].mxu1 }
 0x9b1   :  { %12983 = vtanh.f32 %v9161_v5  ;;  %v12224_v62 = vmul.f32 -1.442695, %v9163_v51  ;;  %v9169_v50 = vadd.f32 %v9110_v25, %v14820_v60  ;;  %v9171_v29 = vadd.f32 %v9153_v33, %v14821_v40  ;;  %v12980_v53 = vpop.eup %12979 }
 0x9b2   :  { %12985 = vpow2.f32 %v12223_v27  ;;  %v12225_v13 = vmul.f32 -1.442695, %v9170_v10  ;;  %v9248_v34 = vmul.f32 %v12968_v57, %v14387_v46  ;;  %v9250_v2 = vmul.f32 %v12976_v9, %v14395_v8 }
 0x9b3   :  { %12987 = vpow2.f32 %v12224_v62  ;;  %v12226_v44 = vmul.f32 -1.442695, %v9171_v29  ;;  %v9251_v14 = vmul.f32 %v12980_v53, %v14398_v24  ;;  %v9328_v53 = vld [vmem:[#allocation9 + $0x70] sm:$0xff] }
 0x9b4   :  { %12989 = vtanh.f32 %v9168_v0 }
 0x9b5   :  { %12991 = vpow2.f32 %v12225_v13 }
 0x9b6   :  { %12993 = vtanh.f32 %v9169_v50 }
 0x9b7   :  { %12995 = vpow2.f32 %v12226_v44 }
 0x9ba   :  { %v12982_v22 = vpop.eup %12981 }
 0x9bb   :  { %v12984_v42 = vpop.eup %12983  ;;  %v9252_v41 = vmul.f32 %v12982_v22, %v12966_v47  ;;  %v9325_v22 = vld [vmem:[#allocation9 + $0x58] sm:$0xff] }
 0x9bc   :  { %v12986_v36 = vpop.eup %12985  ;;  %v9253_v3 = vmul.f32 %v12984_v42, %v12970_v55  ;;  %v9329_v42 = vld [vmem:[#allocation9 + $0x78] sm:$0xff] }
 0x9bd   :  { %v12988_v31 = vpop.eup %12987  ;;  %v14453_v5 = vadd.f32 %v9252_v41, %v9248_v34  ;;  %v9236_v18 = vadd.f32 1.0, %v12986_v36  ;;  %v9332_v41 = vld [vmem:[#allocation9 + $0x90] sm:$0xff] }
 0x9be   :  { %v12990_v51 = vpop.eup %12989  ;;  %v14455_v4 = vadd.f32 %v9253_v3, %v9249_v28  ;;  %v9237_v58 = vadd.f32 1.0, %v12988_v31  ;;  %v12242_v28 = vcombine.high %v9325_v22, %v9329_v42  ;;  %v9336_v3 = vld [vmem:[#allocation9 + $0xb0] sm:$0xff]  ;;  %v9333_v31 = vld [vmem:[#allocation9 + $0x98] sm:$0xff] }
 0x9bf   :  { %v12992_v27 = vpop.eup %12991  ;;  %12997 = vtanh.f32 %v14453_v5  ;;  %v9254_v0 = vmul.f32 %v12990_v51, %v12974_v30  ;;  %v12247_v56 = vcombine.low %v9332_v41, %v9336_v3 }
 0x9c0   :  { %v12994_v46 = vpop.eup %12993  ;;  %12999 = vrcp.f32 %v9236_v18  ;;  %v9238_v43 = vadd.f32 1.0, %v12992_v27  ;;  %v9337_v18 = vld [vmem:[#allocation9 + $0xb8] sm:$0xff]  ;;  %v12248_v27 = vcombine.high %v9332_v41, %v9336_v3  ;;  %v9372_v3 = vld [vmem:[#allocation9 + $0x1d0] sm:$0xff] }
 0x9c1   :  { %v12996_v10 = vpop.eup %12995  ;;  %13001 = vtanh.f32 %v14455_v4  ;;  %v14461_v25 = vadd.f32 %v9254_v0, %v9250_v2  ;;  %v9255_v33 = vmul.f32 %v12994_v46, %v12978_v61  ;;  %v9324_v61 = vld [vmem:[#allocation9 + $0x50] sm:$0xff]  ;;  %v12250_v2 = vcombine.high %v9333_v31, %v9337_v18 }
 0x9c2   :  { %13003 = vrcp.f32 %v9237_v58  ;;  %v9239_v62 = vadd.f32 1.0, %v12996_v10  ;;  %v12240_v36 = vcombine.high %v9324_v61, %v9328_v53  ;;  %v12239_v51 = vcombine.low %v9324_v61, %v9328_v53  ;;  %v9340_v0 = vld [vmem:[#allocation9 + $0xd0] sm:$0xff]  ;;  %v9345_v10 = vld [vmem:[#allocation9 + $0xf8] sm:$0xff] }
 0x9c3   :  { %13005 = vtanh.f32 %v14461_v25  ;;  %v14464_v60 = vadd.f32 %v9255_v33, %v9251_v14  ;;  %v12241_v58 = vcombine.low %v9325_v22, %v9329_v42  ;;  %v9344_v46 = vld [vmem:[#allocation9 + $0xf0] sm:$0xff]  ;;  %v12249_v6 = vcombine.low %v9333_v31, %v9337_v18  ;;  %v9349_v14 = vld [vmem:[#allocation9 + $0x118] sm:$0xff] }
 0x9c4   :  { %13007 = vrcp.f32 %v9238_v43  ;;  %v9341_v43 = vld [vmem:[#allocation9 + $0xd8] sm:$0xff]  ;;  %v12256_v48 = vcombine.high %v9340_v0, %v9344_v46  ;;  %v9368_v61 = vld [vmem:[#allocation9 + $0x1b0] sm:$0xff] }
 0x9c5   :  { %13009 = vtanh.f32 %v14464_v60  ;;  %v12258_v59 = vcombine.high %v9341_v43, %v9345_v10  ;;  %v9353_v33 = vld [vmem:[#allocation9 + $0x138] sm:$0xff]  ;;  %v9376_v31 = vld [vmem:[#allocation9 + $0x1f0] sm:$0xff] }
 0x9c6   :  { %13011 = vrcp.f32 %v9239_v62  ;;  %v12255_v62 = vcombine.low %v9340_v0, %v9344_v46  ;;  %v9365_v53 = vld [vmem:[#allocation9 + $0x198] sm:$0xff]  ;;  %v9380_v46 = vld [vmem:[#allocation9 + $0x210] sm:$0xff] }
 0x9c7   :  { %v9369_v22 = vld [vmem:[#allocation9 + $0x1b8] sm:$0xff] }
 0x9c8   :  { %v9373_v18 = vld [vmem:[#allocation9 + $0x1d8] sm:$0xff] }
 0x9c9   :  { %v12998_v8 = vpop.eup %12997 }
 0x9ca   :  { %v13000_v50 = vpop.eup %12999 }
 0x9cb   :  { %v13002_v40 = vpop.eup %13001  ;;  %v9264_v57 = vmul.f32 %v13000_v50, %v12998_v8  ;;  %v12257_v8 = vcombine.low %v9341_v43, %v9345_v10  ;;  %v9384_v43 = vld [vmem:[#allocation9 + $0x230] sm:$0xff]  ;;  %v9381_v10 = vld [vmem:[#allocation9 + $0x218] sm:$0xff] }
 0x9cc   :  { %v13004_v29 = vpop.eup %13003 }
 0x9cd   :  { %v13006_v24 = vpop.eup %13005  ;;  %v9265_v49 = vmul.f32 %v13004_v29, %v13002_v40  ;;  %v12266_v40 = vcombine.high %v9349_v14, %v9353_v33  ;;  %v9356_v29 = vld [vmem:[#allocation9 + $0x150] sm:$0xff] }
 0x9ce   :  { %v13008_v47 = vpop.eup %13007 }
 0x9cf   :  { %v13010_v13 = vpop.eup %13009  ;;  %v9266_v44 = vmul.f32 %v13008_v47, %v13006_v24  ;;  %v9360_v24 = vld [vmem:[#allocation9 + $0x170] sm:$0xff]  ;;  %v9357_v47 = vld [vmem:[#allocation9 + $0x158] sm:$0xff] }
 0x9d0   :  { %v13012_v55 = vpop.eup %13011  ;;  %v12271_v42 = vcombine.low %v9356_v29, %v9360_v24 }
 0x9d1   :  { %v9267_v30 = vmul.f32 %v13012_v55, %v13010_v13  ;;  %v14467_v9 = vpack.c.bf16 %v9266_v44, %v9264_v57  ;;  %v9361_v13 = vld [vmem:[#allocation9 + $0x178] sm:$0xff]  ;;  %v12265_v44 = vcombine.low %v9349_v14, %v9353_v33  ;;  %v12272_v55 = vcombine.high %v9356_v29, %v9360_v24  ;;  %v9392_v14 = vld [vmem:[#allocation9 + $0x270] sm:$0xff] }
 0x9d2   :  { %v12273_v41 = vcombine.low %v9357_v47, %v9361_v13  ;;  %v9389_v33 = vld [vmem:[#allocation9 + $0x258] sm:$0xff]  ;;  %v9396_v24 = vld [vmem:[#allocation9 + $0x290] sm:$0xff] }
 0x9d3   :  { %v14469_v34 = vpack.c.bf16 %v9267_v30, %v9265_v49  ;;  %v12274_v49 = vcombine.high %v9357_v47, %v9361_v13  ;;  %v9364_v30 = vld [vmem:[#allocation9 + $0x190] sm:$0xff]  ;;  %v9397_v13 = vld [vmem:[#allocation9 + $0x298] sm:$0xff] }
 0x9d4   :  { %v9400_v47 = vld [vmem:[#allocation9 + $0x2b0] sm:$0xff] }
 0x9d5   :  { %10114 = vmatprep.mubr.bf16.mxu0 %v14469_v34  ;;  %10157 = vmatprep.mubr.bf16.mxu1 %v14469_v34 }
 0x9d6   :  { %10115 = vmatmul.mubr.bf16.vlgmr.msra.gmra.mrb[120].mxu0 %v14467_v9  ;;  %10158 = vmatmul.mubr.bf16.vlgmr.msra.gmra.mrb[120].mxu1 %v14467_v9 }
 0x9d7   :  { %10169 = vmatpush1.bf16.msra.mxu0 %v12231_v39  ;;  %10212 = vmatpush1.bf16.msra.mxu1 %v12233_v54  ;;  %v9348_v39 = vld [vmem:[#allocation9 + $0x110] sm:$0xff] }
 0x9d8   :  { %10200 = vmatprep.mubr.bf16.mxu0 %v14469_v34  ;;  %10243 = vmatprep.mubr.bf16.mxu1 %v14469_v34  ;;  %v9352_v54 = vld [vmem:[#allocation9 + $0x130] sm:$0xff] }
 0x9d9   :  { %10170 = vmatprep.subr.bf16.mxu0 %v12240_v36  ;;  %10213 = vmatprep.subr.bf16.mxu1 %v12242_v28  ;;  %v12264_v50 = vcombine.high %v9348_v39, %v9352_v54  ;;  %v12263_v57 = vcombine.low %v9348_v39, %v9352_v54  ;;  %v12280_v36 = vcombine.high %v9364_v30, %v9368_v61  ;;  %v9388_v54 = vld [vmem:[#allocation9 + $0x250] sm:$0xff] }
 0x9da   :  { %v12282_v28 = vcombine.high %v9365_v53, %v9369_v22 }
 0x9db   :  { %10171 = vmatpush1.bf16.msra.mxu0 %v12239_v51  ;;  %10214 = vmatpush1.bf16.msra.mxu1 %v12241_v58  ;;  %v9377_v51 = vld [vmem:[#allocation9 + $0x1f8] sm:$0xff]  ;;  %v12279_v58 = vcombine.low %v9364_v30, %v9368_v61  ;;  %v9404_v61 = vld [vmem:[#allocation9 + $0x2d0] sm:$0xff] }
 0x9dc   :  { %10172 = vmatprep.subr.bf16.mxu0 %v12248_v27  ;;  %10215 = vmatprep.subr.bf16.mxu1 %v12250_v2  ;;  %v12281_v27 = vcombine.low %v9365_v53, %v9369_v22  ;;  %v12288_v2 = vcombine.high %v9372_v3, %v9376_v31  ;;  %v12290_v0 = vcombine.high %v9373_v18, %v9377_v51  ;;  %v9408_v53 = vld [vmem:[#allocation9 + $0x2f0] sm:$0xff]  ;;  %v9405_v22 = vld [vmem:[#allocation9 + $0x2d8] sm:$0xff] }
 0x9df   :  { %10173 = vmatpush1.bf16.msra.mxu0 %v12247_v56  ;;  %10216 = vmatpush1.bf16.msra.mxu1 %v12249_v6  ;;  %v9385_v56 = vld [vmem:[#allocation9 + $0x238] sm:$0xff]  ;;  %v12287_v6 = vcombine.low %v9372_v3, %v9376_v31  ;;  %v9412_v31 = vld [vmem:[#allocation9 + $0x310] sm:$0xff] }
 0x9e0   :  { %10174 = vmatprep.subr.bf16.mxu0 %v12256_v48  ;;  %10217 = vmatprep.subr.bf16.mxu1 %v12258_v59  ;;  %v12289_v48 = vcombine.low %v9373_v18, %v9377_v51  ;;  %v12296_v59 = vcombine.high %v9380_v46, %v9384_v43  ;;  %v12298_v39 = vcombine.high %v9381_v10, %v9385_v56  ;;  %v9416_v18 = vld [vmem:[#allocation9 + $0x330] sm:$0xff]  ;;  %v9413_v51 = vld [vmem:[#allocation9 + $0x318] sm:$0xff] }
 0x9e3   :  { %10175 = vmatpush1.bf16.msra.mxu0 %v12255_v62  ;;  %10218 = vmatpush1.bf16.msra.mxu1 %v12257_v8  ;;  %v9393_v62 = vld [vmem:[#allocation9 + $0x278] sm:$0xff]  ;;  %v12295_v8 = vcombine.low %v9380_v46, %v9384_v43  ;;  %v9420_v43 = vld [vmem:[#allocation9 + $0x350] sm:$0xff] }
 0x9e4   :  { %10176 = vmatprep.subr.bf16.mxu0 %v12264_v50  ;;  %10219 = vmatprep.subr.bf16.mxu1 %v12266_v40  ;;  %v12297_v50 = vcombine.low %v9381_v10, %v9385_v56  ;;  %v12304_v40 = vcombine.high %v9388_v54, %v9392_v14  ;;  %v12306_v29 = vcombine.high %v9389_v33, %v9393_v62  ;;  %v9424_v10 = vld [vmem:[#allocation9 + $0x370] sm:$0xff]  ;;  %v9421_v56 = vld [vmem:[#allocation9 + $0x358] sm:$0xff] }
 0x9e7   :  { %10177 = vmatpush1.bf16.msra.mxu0 %v12263_v57  ;;  %10220 = vmatpush1.bf16.msra.mxu1 %v12265_v44  ;;  %v9401_v57 = vld [vmem:[#allocation9 + $0x2b8] sm:$0xff]  ;;  %v12303_v44 = vcombine.low %v9388_v54, %v9392_v14  ;;  %v9428_v14 = vld [vmem:[#allocation9 + $0x390] sm:$0xff] }
 0x9e8   :  { %10178 = vmatprep.subr.bf16.mxu0 %v12272_v55  ;;  %10221 = vmatprep.subr.bf16.mxu1 %v12274_v49  ;;  %v12305_v55 = vcombine.low %v9389_v33, %v9393_v62  ;;  %v12312_v49 = vcombine.high %v9396_v24, %v9400_v47  ;;  %v12314_v30 = vcombine.high %v9397_v13, %v9401_v57  ;;  %v9432_v33 = vld [vmem:[#allocation9 + $0x3b0] sm:$0xff]  ;;  %v9429_v62 = vld [vmem:[#allocation9 + $0x398] sm:$0xff] }
 0x9eb   :  { %10179 = vmatpush1.bf16.msra.mxu0 %v12271_v42  ;;  %10222 = vmatpush1.bf16.msra.mxu1 %v12273_v41  ;;  %v9409_v42 = vld [vmem:[#allocation9 + $0x2f8] sm:$0xff]  ;;  %v12311_v41 = vcombine.low %v9396_v24, %v9400_v47  ;;  %v9436_v47 = vld [vmem:[#allocation9 + $0x3d0] sm:$0xff] }
 0x9ec   :  { %10180 = vmatprep.subr.bf16.mxu0 %v12280_v36  ;;  %10223 = vmatprep.subr.bf16.mxu1 %v12282_v28  ;;  %v12313_v36 = vcombine.low %v9397_v13, %v9401_v57  ;;  %v12320_v28 = vcombine.high %v9404_v61, %v9408_v53  ;;  %v12322_v3 = vcombine.high %v9405_v22, %v9409_v42  ;;  %v9440_v13 = vld [vmem:[#allocation9 + $0x3f0] sm:$0xff]  ;;  %v9437_v57 = vld [vmem:[#allocation9 + $0x3d8] sm:$0xff] }
 0x9ef   :  { %10181 = vmatpush1.bf16.msra.mxu0 %v12279_v58  ;;  %10224 = vmatpush1.bf16.msra.mxu1 %v12281_v27  ;;  %v9417_v58 = vld [vmem:[#allocation9 + $0x338] sm:$0xff]  ;;  %v12319_v27 = vcombine.low %v9404_v61, %v9408_v53  ;;  %v12351_v53 = vcombine.low %v9436_v47, %v9440_v13 }
 0x9f0   :  { %10182 = vmatprep.subr.bf16.mxu0 %v12288_v2  ;;  %10225 = vmatprep.subr.bf16.mxu1 %v12290_v0  ;;  %v12321_v2 = vcombine.low %v9405_v22, %v9409_v42  ;;  %v12328_v0 = vcombine.high %v9412_v31, %v9416_v18  ;;  %v12330_v46 = vcombine.high %v9413_v51, %v9417_v58  ;;  %v12471_v42 = vld [vmem:[#allocation12 + $0x4] ss:$16 sps:$4 sm:$0xff]  }
 0x9f3   :  { %10183 = vmatpush1.bf16.msra.mxu0 %v12287_v6  ;;  %10226 = vmatpush1.bf16.msra.mxu1 %v12289_v48  ;;  %v9425_v6 = vld [vmem:[#allocation9 + $0x378] sm:$0xff]  ;;  %v12327_v48 = vcombine.low %v9412_v31, %v9416_v18  ;;  %v12480_v31 = vld [vmem:[#allocation12 + $0x2c] ss:$16 sps:$4 sm:$0xff]  }
 0x9f4   :  { %10184 = vmatprep.subr.bf16.mxu0 %v12296_v59  ;;  %10227 = vmatprep.subr.bf16.mxu1 %v12298_v39  ;;  %v12329_v59 = vcombine.low %v9413_v51, %v9417_v58  ;;  %v12336_v39 = vcombine.high %v9420_v43, %v9424_v10  ;;  %v12338_v54 = vcombine.high %v9421_v56, %v9425_v6  ;;  %v12475_v18 = vld [vmem:[#allocation12 + $0x20] ss:$16 sps:$4 sm:$0xff]   ;;  %v12478_v51 = vld [vmem:[#allocation12 + $0x28] ss:$16 sps:$4 sm:$0xff]   ;;  %v12483_v58 = vld [vmem:[#allocation12 + $0x44] ss:$16 sps:$4 sm:$0xff]  }
 0x9f7   :  { %10185 = vmatpush1.bf16.msra.mxu0 %v12295_v8  ;;  %10228 = vmatpush1.bf16.msra.mxu1 %v12297_v50  ;;  %v9433_v8 = vld [vmem:[#allocation9 + $0x3b8] sm:$0xff]  ;;  %v12335_v50 = vcombine.low %v9420_v43, %v9424_v10  ;;  %v12492_v43 = vld [vmem:[#allocation12 + $0x6c] ss:$16 sps:$4 sm:$0xff]  }
 0x9f8   :  { %10186 = vmatprep.subr.bf16.mxu0 %v12304_v40  ;;  %10229 = vmatprep.subr.bf16.mxu1 %v12306_v29  ;;  %v12337_v40 = vcombine.low %v9421_v56, %v9425_v6  ;;  %v12344_v29 = vcombine.high %v9428_v14, %v9432_v33  ;;  %v12346_v24 = vcombine.high %v9429_v62, %v9433_v8  ;;  %v12487_v10 = vld [vmem:[#allocation12 + $0x60] ss:$16 sps:$4 sm:$0xff]   ;;  %v12490_v56 = vld [vmem:[#allocation12 + $0x68] ss:$16 sps:$4 sm:$0xff]   ;;  %v12495_v6 = vld [vmem:[#allocation12 + $0x84] ss:$16 sps:$4 sm:$0xff]  }
 0x9fb   :  { %10187 = vmatpush1.bf16.msra.mxu0 %v12303_v44  ;;  %10230 = vmatpush1.bf16.msra.mxu1 %v12305_v55  ;;  %v9441_v44 = vld [vmem:[#allocation9 + $0x3f8] sm:$0xff]  ;;  %v12343_v55 = vcombine.low %v9428_v14, %v9432_v33  ;;  %v12502_v33 = vld [vmem:[#allocation12 + $0xa8] ss:$16 sps:$4 sm:$0xff]  }
 0x9fc   :  { %10188 = vmatprep.subr.bf16.mxu0 %v12312_v49  ;;  %10231 = vmatprep.subr.bf16.mxu1 %v12314_v30  ;;  %v12345_v49 = vcombine.low %v9429_v62, %v9433_v8  ;;  %v12352_v30 = vcombine.high %v9436_v47, %v9440_v13  ;;  %v12354_v61 = vcombine.high %v9437_v57, %v9441_v44  ;;  %v12499_v14 = vld [vmem:[#allocation12 + $0xa0] ss:$16 sps:$4 sm:$0xff]   ;;  %v12507_v62 = vld [vmem:[#allocation12 + $0xc4] ss:$16 sps:$4 sm:$0xff]   ;;  %v12510_v8 = vld [vmem:[#allocation12 + $0xcc] ss:$16 sps:$4 sm:$0xff]  }
 0x9fd   :  { %v12353_v22 = vcombine.low %v9437_v57, %v9441_v44  ;;  %v12511_v47 = vld [vmem:[#allocation12 + $0xe0] ss:$16 sps:$4 sm:$0xff]   ;;  %v12514_v13 = vld [vmem:[#allocation12 + $0xe8] ss:$16 sps:$4 sm:$0xff]   ;;  %v12519_v57 = vld [vmem:[#allocation12 + $0x104] ss:$16 sps:$4 sm:$0xff]  }
 0x9fe   :  { %v12522_v44 = vld [vmem:[#allocation12 + $0x10c] ss:$16 sps:$4 sm:$0xff]  }
 0x9ff   :  { %10189 = vmatpush1.bf16.msra.mxu0 %v12311_v41  ;;  %10232 = vmatpush1.bf16.msra.mxu1 %v12313_v36  ;;  %v12474_v41 = vld [vmem:[#allocation12 + $0xc] ss:$16 sps:$4 sm:$0xff]   ;;  %v12469_v36 = vld [vmem:[#allocation12] ss:$16 sps:$4 sm:$0xff]  }
 0xa00   :  { %10190 = vmatprep.subr.bf16.mxu0 %v12320_v28  ;;  %10233 = vmatprep.subr.bf16.mxu1 %v12322_v3  ;;  %v12472_v28 = vld [vmem:[#allocation12 + $0x8] ss:$16 sps:$4 sm:$0xff]   ;;  %v12477_v3 = vld [vmem:[#allocation12 + $0x24] ss:$16 sps:$4 sm:$0xff]  }
 0xa03   :  { %10191 = vmatpush1.bf16.msra.mxu0 %v12319_v27  ;;  %10234 = vmatpush1.bf16.msra.mxu1 %v12321_v2  ;;  %v12486_v27 = vld [vmem:[#allocation12 + $0x4c] ss:$16 sps:$4 sm:$0xff]   ;;  %v12481_v2 = vld [vmem:[#allocation12 + $0x40] ss:$16 sps:$4 sm:$0xff]  }
 0xa04   :  { %10192 = vmatprep.subr.bf16.mxu0 %v12328_v0  ;;  %10235 = vmatprep.subr.bf16.mxu1 %v12330_v46  ;;  %v12484_v0 = vld [vmem:[#allocation12 + $0x48] ss:$16 sps:$4 sm:$0xff]   ;;  %v12489_v46 = vld [vmem:[#allocation12 + $0x64] ss:$16 sps:$4 sm:$0xff]  }
 0xa07   :  { %10193 = vmatpush1.bf16.msra.mxu0 %v12327_v48  ;;  %10236 = vmatpush1.bf16.msra.mxu1 %v12329_v59  ;;  %v12493_v48 = vld [vmem:[#allocation12 + $0x80] ss:$16 sps:$4 sm:$0xff]   ;;  %v12496_v59 = vld [vmem:[#allocation12 + $0x88] ss:$16 sps:$4 sm:$0xff]  }
 0xa08   :  { %10194 = vmatprep.subr.bf16.mxu0 %v12336_v39  ;;  %10237 = vmatprep.subr.bf16.mxu1 %v12338_v54  ;;  %v12501_v39 = vld [vmem:[#allocation12 + $0xa4] ss:$16 sps:$4 sm:$0xff]   ;;  %v12504_v54 = vld [vmem:[#allocation12 + $0xac] ss:$16 sps:$4 sm:$0xff]  }
 0xa0b   :  { %10195 = vmatpush1.bf16.msra.mxu0 %v12335_v50  ;;  %10238 = vmatpush1.bf16.msra.mxu1 %v12337_v40  ;;  %v12505_v50 = vld [vmem:[#allocation12 + $0xc0] ss:$16 sps:$4 sm:$0xff]   ;;  %v12508_v40 = vld [vmem:[#allocation12 + $0xc8] ss:$16 sps:$4 sm:$0xff]  }
 0xa0c   :  { %10196 = vmatprep.subr.bf16.mxu0 %v12344_v29  ;;  %10239 = vmatprep.subr.bf16.mxu1 %v12346_v24  ;;  %v12513_v29 = vld [vmem:[#allocation12 + $0xe4] ss:$16 sps:$4 sm:$0xff]   ;;  %v12516_v24 = vld [vmem:[#allocation12 + $0xec] ss:$16 sps:$4 sm:$0xff]  }
 0xa0f   :  { %10197 = vmatpush1.bf16.msra.mxu0 %v12343_v55  ;;  %10240 = vmatpush1.bf16.msra.mxu1 %v12345_v49  ;;  %v12517_v55 = vld [vmem:[#allocation12 + $0x100] ss:$16 sps:$4 sm:$0xff]   ;;  %v12520_v49 = vld [vmem:[#allocation12 + $0x108] ss:$16 sps:$4 sm:$0xff]  }
 0xa10   :  { %10198 = vmatprep.subr.bf16.mxu0 %v12352_v30  ;;  %10241 = vmatprep.subr.bf16.mxu1 %v12354_v61  ;;  %v12525_v30 = vld [vmem:[#allocation12 + $0x124] ss:$16 sps:$4 sm:$0xff]   ;;  %v12528_v61 = vld [vmem:[#allocation12 + $0x12c] ss:$16 sps:$4 sm:$0xff]  }
 0xa13   :  { %10199 = vmatpush1.bf16.msra.mxu0 %v12351_v53  ;;  %10242 = vmatpush1.bf16.msra.mxu1 %v12353_v22  ;;  %v12523_v53 = vld [vmem:[#allocation12 + $0x120] ss:$16 sps:$4 sm:$0xff]   ;;  %v12526_v22 = vld [vmem:[#allocation12 + $0x128] ss:$16 sps:$4 sm:$0xff]  }
 0xa14   :  { %10793 = vmatprep.subr.bf16.mxu0 %v12471_v42  ;;  %10906 = vmatprep.subr.bf16.mxu1 %v12474_v41  ;;  %v12531_v42 = vld [vmem:[#allocation12 + $0x144] ss:$16 sps:$4 sm:$0xff]   ;;  %v12534_v41 = vld [vmem:[#allocation12 + $0x14c] ss:$16 sps:$4 sm:$0xff]  }
 0xa16   :  { %10201 = vmatmul.mubr.bf16.vlgmr.msra.gmra.mrb[124].mxu0 %v14467_v9  ;;  %10244 = vmatmul.mubr.bf16.vlgmr.msra.gmra.mrb[124].mxu1 %v14467_v9 }
 0xa17   :  { %10794 = vmatpush1.bf16.msra.mxu0 %v12469_v36  ;;  %10825 = vmatprep.mubr.bf16.mxu0 %v14073_v63  ;;  %v12529_v36 = vld [vmem:[#allocation12 + $0x140] ss:$16 sps:$4 sm:$0xff]  }
 0xa18   :  { %10907 = vmatpush1.bf16.msra.mxu1 %v12472_v28  ;;  %10938 = vmatprep.mubr.bf16.mxu1 %v14073_v63  ;;  %v12498_v63 = vld [vmem:[#allocation12 + $0x8c] ss:$16 sps:$4 sm:$0xff]   ;;  %v12532_v28 = vld [vmem:[#allocation12 + $0x148] ss:$16 sps:$4 sm:$0xff]  }
 0xa19   :  { %10795 = vmatprep.subr.bf16.mxu0 %v12477_v3  ;;  %10908 = vmatprep.subr.bf16.mxu1 %v12480_v31  ;;  %v12537_v3 = vld [vmem:[#allocation12 + $0x164] ss:$16 sps:$4 sm:$0xff]   ;;  %v12540_v31 = vld [vmem:[#allocation12 + $0x16c] ss:$16 sps:$4 sm:$0xff]  }
 0xa1b   :  { %10796 = vmatpush1.bf16.msra.mxu0 %v12475_v18  ;;  %v12535_v18 = vld [vmem:[#allocation12 + $0x160] ss:$16 sps:$4 sm:$0xff]  }
 0xa1c   :  { %10909 = vmatpush1.bf16.msra.mxu1 %v12478_v51  ;;  %10797 = vmatprep.subr.bf16.mxu0 %v12483_v58  ;;  %v12538_v51 = vld [vmem:[#allocation12 + $0x168] ss:$16 sps:$4 sm:$0xff]   ;;  %v12543_v58 = vld [vmem:[#allocation12 + $0x184] ss:$16 sps:$4 sm:$0xff]  }
 0xa1d   :  { %10910 = vmatprep.subr.bf16.mxu1 %v12486_v27  ;;  %v12546_v27 = vld [vmem:[#allocation12 + $0x18c] ss:$16 sps:$4 sm:$0xff]  }
 0xa1f   :  { %10798 = vmatpush1.bf16.msra.mxu0 %v12481_v2  ;;  %v12541_v2 = vld [vmem:[#allocation12 + $0x180] ss:$16 sps:$4 sm:$0xff]  }
 0xa20   :  { %10911 = vmatpush1.bf16.msra.mxu1 %v12484_v0  ;;  %10799 = vmatprep.subr.bf16.mxu0 %v12489_v46  ;;  %v12544_v0 = vld [vmem:[#allocation12 + $0x188] ss:$16 sps:$4 sm:$0xff]   ;;  %v12549_v46 = vld [vmem:[#allocation12 + $0x1a4] ss:$16 sps:$4 sm:$0xff]  }
 0xa21   :  { %10912 = vmatprep.subr.bf16.mxu1 %v12492_v43  ;;  %v12552_v43 = vld [vmem:[#allocation12 + $0x1ac] ss:$16 sps:$4 sm:$0xff]  }
 0xa23   :  { %10800 = vmatpush1.bf16.msra.mxu0 %v12487_v10  ;;  %v12547_v10 = vld [vmem:[#allocation12 + $0x1a0] ss:$16 sps:$4 sm:$0xff]  }
 0xa24   :  { %10913 = vmatpush1.bf16.msra.mxu1 %v12490_v56  ;;  %10801 = vmatprep.subr.bf16.mxu0 %v12495_v6  ;;  %v12550_v56 = vld [vmem:[#allocation12 + $0x1a8] ss:$16 sps:$4 sm:$0xff]   ;;  %v12555_v6 = vld [vmem:[#allocation12 + $0x1c4] ss:$16 sps:$4 sm:$0xff]  }
 0xa25   :  { %10914 = vmatprep.subr.bf16.mxu1 %v12498_v63  ;;  %v12558_v63 = vld [vmem:[#allocation12 + $0x1cc] ss:$16 sps:$4 sm:$0xff]  }
 0xa27   :  { %10802 = vmatpush1.bf16.msra.mxu0 %v12493_v48  ;;  %v12553_v48 = vld [vmem:[#allocation12 + $0x1c0] ss:$16 sps:$4 sm:$0xff]  }
 0xa28   :  { %10915 = vmatpush1.bf16.msra.mxu1 %v12496_v59  ;;  %10803 = vmatprep.subr.bf16.mxu0 %v12501_v39  ;;  %v12556_v59 = vld [vmem:[#allocation12 + $0x1c8] ss:$16 sps:$4 sm:$0xff]   ;;  %v12561_v39 = vld [vmem:[#allocation12 + $0x1e4] ss:$16 sps:$4 sm:$0xff]  }
 0xa29   :  { %10916 = vmatprep.subr.bf16.mxu1 %v12504_v54  ;;  %v12564_v54 = vld [vmem:[#allocation12 + $0x1ec] ss:$16 sps:$4 sm:$0xff]  }
 0xa2b   :  { %10804 = vmatpush1.bf16.msra.mxu0 %v12499_v14  ;;  %v12559_v14 = vld [vmem:[#allocation12 + $0x1e0] ss:$16 sps:$4 sm:$0xff]  }
 0xa2c   :  { %10917 = vmatpush1.bf16.msra.mxu1 %v12502_v33  ;;  %10805 = vmatprep.subr.bf16.mxu0 %v12507_v62  ;;  %v12562_v33 = vld [vmem:[#allocation12 + $0x1e8] ss:$16 sps:$4 sm:$0xff]   ;;  %v14825_v62 = vld [vmem:[#allocation66_spill] sm:$0xff] }
 0xa2d   :  { %10918 = vmatprep.subr.bf16.mxu1 %v12510_v8 }
 0xa2f   :  { %10806 = vmatpush1.bf16.msra.mxu0 %v12505_v50 }
 0xa30   :  { %10919 = vmatpush1.bf16.msra.mxu1 %v12508_v40  ;;  %10807 = vmatprep.subr.bf16.mxu0 %v12513_v29  ;;  %v14826_v40 = vld [vmem:[#allocation61_spill] sm:$0xff]  ;;  %v14827_v29 = vld [vmem:[#allocation64_spill] sm:$0xff] }
 0xa31   :  { %10920 = vmatprep.subr.bf16.mxu1 %v12516_v24 }
 0xa33   :  { %10808 = vmatpush1.bf16.msra.mxu0 %v12511_v47 }
 0xa34   :  { %10921 = vmatpush1.bf16.msra.mxu1 %v12514_v13  ;;  %10809 = vmatprep.subr.bf16.mxu0 %v12519_v57  ;;  %v14828_v13 = vld [vmem:[#allocation65_spill] sm:$0xff] }
 0xa35   :  { %10922 = vmatprep.subr.bf16.mxu1 %v12522_v44  ;;  %v14829_v44 = vld [vmem:[#allocation67_spill] sm:$0xff] }
 0xa37   :  { %10810 = vmatpush1.bf16.msra.mxu0 %v12517_v55 }
 0xa38   :  { %10923 = vmatpush1.bf16.msra.mxu1 %v12520_v49  ;;  %10811 = vmatprep.subr.bf16.mxu0 %v12525_v30 }
 0xa39   :  { %10924 = vmatprep.subr.bf16.mxu1 %v12528_v61 }
 0xa3b   :  { %10812 = vmatpush1.bf16.msra.mxu0 %v12523_v53 }
 0xa3c   :  { %10925 = vmatpush1.bf16.msra.mxu1 %v12526_v22  ;;  %10813 = vmatprep.subr.bf16.mxu0 %v12531_v42 }
 0xa3d   :  { %10926 = vmatprep.subr.bf16.mxu1 %v12534_v41 }
 0xa3f   :  { %10814 = vmatpush1.bf16.msra.mxu0 %v12529_v36 }
 0xa40   :  { %10927 = vmatpush1.bf16.msra.mxu1 %v12532_v28  ;;  %10815 = vmatprep.subr.bf16.mxu0 %v12537_v3 }
 0xa41   :  { %10928 = vmatprep.subr.bf16.mxu1 %v12540_v31 }
 0xa43   :  { %10816 = vmatpush1.bf16.msra.mxu0 %v12535_v18 }
 0xa44   :  { %10929 = vmatpush1.bf16.msra.mxu1 %v12538_v51  ;;  %10817 = vmatprep.subr.bf16.mxu0 %v12543_v58 }
 0xa45   :  { %10930 = vmatprep.subr.bf16.mxu1 %v12546_v27 }
 0xa47   :  { %10818 = vmatpush1.bf16.msra.mxu0 %v12541_v2 }
 0xa48   :  { %10931 = vmatpush1.bf16.msra.mxu1 %v12544_v0  ;;  %10819 = vmatprep.subr.bf16.mxu0 %v12549_v46 }
 0xa49   :  { %10932 = vmatprep.subr.bf16.mxu1 %v12552_v43 }
 0xa4b   :  { %10820 = vmatpush1.bf16.msra.mxu0 %v12547_v10 }
 0xa4c   :  { %10933 = vmatpush1.bf16.msra.mxu1 %v12550_v56  ;;  %10821 = vmatprep.subr.bf16.mxu0 %v12555_v6 }
 0xa4d   :  { %10934 = vmatprep.subr.bf16.mxu1 %v12558_v63 }
 0xa4f   :  { %10822 = vmatpush1.bf16.msra.mxu0 %v12553_v48 }
 0xa50   :  { %10935 = vmatpush1.bf16.msra.mxu1 %v12556_v59  ;;  %10823 = vmatprep.subr.bf16.mxu0 %v12561_v39 }
 0xa51   :  { %10936 = vmatprep.subr.bf16.mxu1 %v12564_v54 }
 0xa53   :  { %10824 = vmatpush1.bf16.msra.mxu0 %v12559_v14 }
 0xa54   :  { %10937 = vmatpush1.bf16.msra.mxu1 %v12562_v33 }
 0xa56   :  { %10826 = vmatmul.mubr.bf16.vlgmr.msra.gmra.mrb[128].mxu0 %v14071_v52 }
 0xa57   :  { %10939 = vmatmul.mubr.bf16.vlgmr.msra.gmra.mrb[128].mxu1 %v14071_v52  ;;  %10835 = vmatprep.mubr.bf16.mxu0 %v14139_v35 }
 0xa58   :  { %10948 = vmatprep.mubr.bf16.mxu1 %v14139_v35  ;;  %v14822_v35 = vld [vmem:[#allocation60_spill] sm:$0xff] }
 0xa5e   :  { %10836 = vmatmul.mubr.bf16.gmra.mrb[132].mxu0 %v14137_v32 }
 0xa5f   :  { %10949 = vmatmul.mubr.bf16.gmra.mrb[132].mxu1 %v14137_v32  ;;  %10845 = vmatprep.mubr.bf16.mxu0 %v14205_v7 }
 0xa60   :  { %10958 = vmatprep.mubr.bf16.mxu1 %v14205_v7  ;;  %v14823_v7 = vld [vmem:[#allocation62_spill] sm:$0xff] }
 0xa66   :  { %10846 = vmatmul.mubr.bf16.gmra.mrb[136].mxu0 %v14203_v38 }
 0xa67   :  { %10959 = vmatmul.mubr.bf16.gmra.mrb[136].mxu1 %v14203_v38  ;;  %10855 = vmatprep.mubr.bf16.mxu0 %v14271_v17 }
 0xa68   :  { %10968 = vmatprep.mubr.bf16.mxu1 %v14271_v17 }
 0xa6e   :  { %10856 = vmatmul.mubr.bf16.gmra.mrb[140].mxu0 %v14269_v20 }
 0xa6f   :  { %10969 = vmatmul.mubr.bf16.gmra.mrb[140].mxu1 %v14269_v20  ;;  %10865 = vmatprep.mubr.bf16.mxu0 %v14337_v23 }
 0xa70   :  { %10978 = vmatprep.mubr.bf16.mxu1 %v14337_v23  ;;  %v14824_v23 = vld [vmem:[#allocation63_spill] sm:$0xff] }
 0xa76   :  { %10866 = vmatmul.mubr.bf16.gmra.mrb[144].mxu0 %v14335_v12 }
 0xa77   :  { %10979 = vmatmul.mubr.bf16.gmra.mrb[144].mxu1 %v14335_v12  ;;  %10875 = vmatprep.mubr.bf16.mxu0 %v14403_v45 }
 0xa78   :  { %10988 = vmatprep.mubr.bf16.mxu1 %v14403_v45 }
 0xa7e   :  { %10876 = vmatmul.mubr.bf16.gmra.mrb[148].mxu0 %v14401_v21 }
 0xa7f   :  { %10989 = vmatmul.mubr.bf16.gmra.mrb[148].mxu1 %v14401_v21  ;;  %10885 = vmatprep.mubr.bf16.mxu0 %v14469_v34 }
 0xa80   :  { %10998 = vmatprep.mubr.bf16.mxu1 %v14469_v34 }
 0xa86   :  { %10886 = vmatmul.mubr.bf16.gmra.mrb[152].mxu0 %v14467_v9 }
 0xa87   :  { %10999 = vmatmul.mubr.bf16.gmra.mrb[152].mxu1 %v14467_v9 }
 0xaa9   :  { %v10116_v52 = vpop.f32.mrb[120].mxu0  ;;  %v10159_v32 = vpop.f32.mrb[120].mxu1 }
 0xaaa   :  { %v10254_v38 = vadd.f32 %v10116_v52, %v14822_v35  ;;  %v10256_v20 = vadd.f32 %v10159_v32, %v14823_v7  ;;  %v10118_v17 = vpop.f32.mrb[121].mxu0  ;;  %v10161_v12 = vpop.f32.mrb[121].mxu1 }
 0xaab   :  { %v10255_v45 = vadd.f32 %v10118_v17, %v14824_v23  ;;  %v10257_v21 = vadd.f32 %v10161_v12, %v14825_v62  ;;  %v10120_v8 = vpop.f32.mrb[122].mxu0  ;;  %v10163_v50 = vpop.f32.mrb[122].mxu1  ;;  %v14830_v12 = vld [vmem:[#allocation108_spill] sm:$0xff] }
 0xaac   :  { %v10262_v34 = vadd.f32 %v10120_v8, %v14826_v40  ;;  %v10264_v24 = vadd.f32 %v10163_v50, %v14827_v29  ;;  %v10122_v47 = vpop.f32.mrb[123].mxu0  ;;  %v10165_v9 = vpop.f32.mrb[123].mxu1  ;;  %v12355_v49 = vmul.f32 -1.442695, %v10254_v38  ;;  %v12359_v30 = vmul.f32 -1.442695, %v10256_v20 }
 0xaad   :  { %v10263_v57 = vadd.f32 %v10122_v47, %v14828_v13  ;;  %v10265_v55 = vadd.f32 %v10165_v9, %v14829_v44  ;;  %v12356_v61 = vmul.f32 -1.442695, %v10255_v45  ;;  %v12360_v53 = vmul.f32 -1.442695, %v10257_v21 }
 0xaae   :  { %13013 = vpow2.f32 %v12355_v49  ;;  %v12357_v22 = vmul.f32 -1.442695, %v10262_v34  ;;  %v12361_v42 = vmul.f32 -1.442695, %v10264_v24 }
 0xaaf   :  { %13015 = vpow2.f32 %v12359_v30  ;;  %v12358_v41 = vmul.f32 -1.442695, %v10263_v57  ;;  %v12362_v36 = vmul.f32 -1.442695, %v10265_v55 }
 0xab0   :  { %13017 = vpow2.f32 %v12356_v61 }
 0xab1   :  { %13019 = vpow2.f32 %v12360_v53 }
 0xab2   :  { %13021 = vpow2.f32 %v12357_v22 }
 0xab3   :  { %13023 = vpow2.f32 %v12361_v42 }
 0xab4   :  { %13025 = vpow2.f32 %v12358_v41 }
 0xab5   :  { %13027 = vpow2.f32 %v12362_v36 }
 0xab8   :  { %v13014_v28 = vpop.eup %13013 }
 0xab9   :  { %v13016_v3 = vpop.eup %13015  ;;  %v10282_v51 = vadd.f32 1.0, %v13014_v28 }
 0xaba   :  { %v13018_v31 = vpop.eup %13017  ;;  %v10306_v27 = vadd.f32 1.0, %v13016_v3 }
 0xabb   :  { %v13020_v18 = vpop.eup %13019  ;;  %v10283_v0 = vadd.f32 1.0, %v13018_v31  ;;  %13029 = vrcp.f32 %v10282_v51 }
 0xabc   :  { %v13022_v58 = vpop.eup %13021  ;;  %v10307_v43 = vadd.f32 1.0, %v13020_v18  ;;  %13031 = vrcp.f32 %v10306_v27 }
 0xabd   :  { %v13024_v2 = vpop.eup %13023  ;;  %v10284_v56 = vadd.f32 1.0, %v13022_v58  ;;  %13033 = vrcp.f32 %v10283_v0 }
 0xabe   :  { %v13026_v46 = vpop.eup %13025  ;;  %v10308_v6 = vadd.f32 1.0, %v13024_v2  ;;  %13035 = vrcp.f32 %v10307_v43 }
 0xabf   :  { %v13028_v10 = vpop.eup %13027  ;;  %v10285_v63 = vadd.f32 1.0, %v13026_v46  ;;  %13037 = vrcp.f32 %v10284_v56 }
 0xac0   :  { %v10309_v48 = vadd.f32 1.0, %v13028_v10  ;;  %13039 = vrcp.f32 %v10308_v6 }
 0xac1   :  { %13041 = vrcp.f32 %v10285_v63 }
 0xac2   :  { %13043 = vrcp.f32 %v10309_v48 }
 0xac5   :  { %v13030_v8 = vpop.eup %13029 }
 0xae9   :  { %v10202_v59 = vpop.f32.mrb[124].mxu0  ;;  %v10245_v39 = vpop.f32.mrb[124].mxu1 }
 0xaea   :  { %v10258_v54 = vadd.f32 %v10202_v59, %v14019_v19  ;;  %v10260_v14 = vadd.f32 %v10245_v39, %v14022_v11  ;;  %v10204_v33 = vpop.f32.mrb[125].mxu0  ;;  %v10247_v52 = vpop.f32.mrb[125].mxu1 }
 0xaeb   :  { %v10259_v32 = vadd.f32 %v10204_v33, %v14025_v37  ;;  %v10261_v35 = vadd.f32 %v10247_v52, %v14028_v16  ;;  %v10206_v38 = vpop.f32.mrb[126].mxu0  ;;  %v10249_v7 = vpop.f32.mrb[126].mxu1  ;;  %v14831_v33 = vld [vmem:[#allocation21_spill] sm:$0xff] }
 0xaec   :  { %13045 = vtanh.f32 %v10258_v54  ;;  %v12363_v20 = vmul.f32 -1.442695, %v10260_v14  ;;  %v10266_v17 = vadd.f32 %v10206_v38, %v14031_v15  ;;  %v10268_v23 = vadd.f32 %v10249_v7, %v14830_v12  ;;  %v10208_v45 = vpop.f32.mrb[127].mxu0  ;;  %v10251_v62 = vpop.f32.mrb[127].mxu1  ;;  %v10451_v14 = vld [vmem:[#allocation13] sm:$0xf] }
 0xaed   :  { %13047 = vtanh.f32 %v10259_v32  ;;  %v12364_v19 = vmul.f32 -1.442695, %v10261_v35  ;;  %v10267_v11 = vadd.f32 %v10208_v45, %v14037_v26  ;;  %v10269_v21 = vadd.f32 %v10251_v62, %v14041_v1  ;;  %v13032_v16 = vpop.eup %13031 }
 0xaee   :  { %13049 = vpow2.f32 %v12363_v20  ;;  %v12365_v37 = vmul.f32 -1.442695, %v10268_v23  ;;  %v13034_v40 = vpop.eup %13033  ;;  %v10346_v1 = vmul.f32 %v13032_v16, %v14453_v5  ;;  %v14832_v52 = vsub.s32 0, %v14831_v33 }
 0xaef   :  { %13051 = vpow2.f32 %v12364_v19  ;;  %v12366_v50 = vmul.f32 -1.442695, %v10269_v21  ;;  %v13036_v34 = vpop.eup %13035  ;;  %v14833_v35 = vsub.s32 2, %v14831_v33  ;;  %v14834_v7 = vsub.s32 1, %v14831_v33 }
 0xaf0   :  { %13053 = vtanh.f32 %v10266_v17  ;;  %v13038_v15 = vpop.eup %13037  ;;  %v10347_v44 = vmul.f32 %v13036_v34, %v14455_v4  ;;  %v14535_v32 = vrot.slane %v10451_v14, %v14832_v52  ;;  %v14835_v17 = vsub.s32 3, %v14831_v33 }
 0xaf1   :  { %13055 = vpow2.f32 %v12365_v37  ;;  %v13040_v29 = vpop.eup %13039  ;;  %v14539_v38 = vrot.slane %v10451_v14, %v14833_v35  ;;  %v14543_v20 = vrot.slane %v10451_v14, %v14834_v7 }
 0xaf2   :  { %13057 = vtanh.f32 %v10267_v11  ;;  %v13042_v24 = vpop.eup %13041  ;;  %v10348_v36 = vmul.f32 %v13040_v29, %v14461_v25  ;;  %v14547_v12 = vrot.slane %v10451_v14, %v14835_v17 }
 0xaf3   :  { %13059 = vpow2.f32 %v12366_v50  ;;  %v13044_v47 = vpop.eup %13043 }
 0xaf4   :  { %v10349_v18 = vmul.f32 %v13044_v47, %v14464_v60 }
 0xaf6   :  { %v13046_v9 = vpop.eup %13045 }
 0xaf7   :  { %v13048_v26 = vpop.eup %13047  ;;  %v10350_v13 = vmul.f32 %v13046_v9, %v13030_v8 }
 0xaf8   :  { %v13050_v57 = vpop.eup %13049  ;;  %v10351_v55 = vmul.f32 %v13048_v26, %v13034_v40 }
 0xaf9   :  { %v13052_v49 = vpop.eup %13051  ;;  %v10354_v30 = vadd.f32 %v10350_v13, %v10346_v1  ;;  %v10334_v61 = vadd.f32 1.0, %v13050_v57 }
 0xafa   :  { %v13054_v53 = vpop.eup %13053  ;;  %v10355_v22 = vadd.f32 %v10351_v55, %v10347_v44  ;;  %v10335_v42 = vadd.f32 1.0, %v13052_v49 }
 0xafb   :  { %v13056_v41 = vpop.eup %13055  ;;  %13061 = vtanh.f32 %v10354_v30  ;;  %v10352_v28 = vmul.f32 %v13054_v53, %v13038_v15 }
 0xafc   :  { %v13058_v3 = vpop.eup %13057  ;;  %13063 = vrcp.f32 %v10334_v61  ;;  %v10336_v31 = vadd.f32 1.0, %v13056_v41 }
 0xafd   :  { %v13060_v5 = vpop.eup %13059  ;;  %13065 = vtanh.f32 %v10355_v22  ;;  %v10356_v4 = vadd.f32 %v10352_v28, %v10348_v36  ;;  %v10353_v51 = vmul.f32 %v13058_v3, %v13042_v24 }
 0xafe   :  { %13067 = vrcp.f32 %v10335_v42  ;;  %v10337_v58 = vadd.f32 1.0, %v13060_v5 }
 0xaff   :  { %13069 = vtanh.f32 %v10356_v4  ;;  %v10357_v27 = vadd.f32 %v10353_v51, %v10349_v18 }
 0xb00   :  { %13071 = vrcp.f32 %v10336_v31 }
 0xb01   :  { %13073 = vtanh.f32 %v10357_v27 }
 0xb02   :  { %13075 = vrcp.f32 %v10337_v58 }
 0xb05   :  { %v13062_v2 = vpop.eup %13061 }
 0xb06   :  { %v13064_v25 = vpop.eup %13063 }
 0xb07   :  { %v13066_v0 = vpop.eup %13065  ;;  %v10362_v46 = vmul.f32 %v13064_v25, %v13062_v2 }
 0xb08   :  { %v13068_v43 = vpop.eup %13067 }
 0xb09   :  { %v13070_v10 = vpop.eup %13069  ;;  %v10363_v56 = vmul.f32 %v13068_v43, %v13066_v0 }
 0xb0a   :  { %v13072_v6 = vpop.eup %13071 }
 0xb0b   :  { %v13074_v63 = vpop.eup %13073  ;;  %v10364_v60 = vmul.f32 %v13072_v6, %v13070_v10 }
 0xb0c   :  { %v13076_v48 = vpop.eup %13075 }
 0xb0d   :  { %v10365_v59 = vmul.f32 %v13076_v48, %v13074_v63  ;;  %v10366_v39 = vpack.c.bf16 %v10364_v60, %v10362_v46 }
 0xb0f   :  { %v10367_v54 = vpack.c.bf16 %v10365_v59, %v10363_v56 }
 0xb11   :  { %10895 = vmatprep.mubr.bf16.mxu0 %v10367_v54  ;;  %11008 = vmatprep.mubr.bf16.mxu1 %v10367_v54 }
 0xb12   :  { %10896 = vmatmul.mubr.bf16.gmra.mrb[156].mxu0 %v10366_v39  ;;  %11009 = vmatmul.mubr.bf16.gmra.mrb[156].mxu1 %v10366_v39 }
 0xb29   :  { %v10827_v23 = vpop.f32.mrb[128].mxu0 }
 0xb2a   :  { %v10828_v45 = vadd.f32 %v10827_v23, %v14535_v32  ;;  %v10940_v62 = vpop.f32.mrb[128].mxu1  ;;  %v10829_v19 = vpop.f32.mrb[129].mxu0 }
 0xb2b   :  { %v10941_v11 = vadd.f32 %v10940_v62, %v14539_v38  ;;  %v10830_v21 = vadd.f32 %v10829_v19, %v14543_v20  ;;  %v10942_v8 = vpop.f32.mrb[129].mxu1  ;;  %v10831_v37 = vpop.f32.mrb[130].mxu0 }
 0xb2c   :  { %11019 = vst [vmem:[#allocation15] sm:$0xff] %v10828_v45  ;;  %v10943_v16 = vadd.f32 %v10942_v8, %v14547_v12  ;;  %v10832_v50 = vadd.f32 %v10831_v37, %v14535_v32  ;;  %v10944_v40 = vpop.f32.mrb[130].mxu1  ;;  %v10833_v34 = vpop.f32.mrb[131].mxu0 }
 0xb2d   :  { %11021 = vst [vmem:[#allocation15 + $0x10] sm:$0xff] %v10941_v11  ;;  %11020 = vst [vmem:[#allocation15 + $0x8] sm:$0xff] %v10830_v21  ;;  %v10945_v15 = vadd.f32 %v10944_v40, %v14539_v38  ;;  %v10834_v29 = vadd.f32 %v10833_v34, %v14543_v20  ;;  %v10946_v24 = vpop.f32.mrb[131].mxu1 }
 0xb2e   :  { %11022 = vst [vmem:[#allocation15 + $0x18] sm:$0xff] %v10943_v16  ;;  %11023 = vst [vmem:[#allocation15 + $0x20] sm:$0xff] %v10832_v50  ;;  %v10947_v47 = vadd.f32 %v10946_v24, %v14547_v12 }
 0xb2f   :  { %11025 = vst [vmem:[#allocation15 + $0x30] sm:$0xff] %v10945_v15  ;;  %11024 = vst [vmem:[#allocation15 + $0x28] sm:$0xff] %v10834_v29 }
 0xb30   :  { %11026 = vst [vmem:[#allocation15 + $0x38] sm:$0xff] %v10947_v47 }
 0xb31   :  { %v10837_v9 = vpop.f32.mrb[132].mxu0 }
 0xb32   :  { %v10838_v26 = vadd.f32 %v10837_v9, %v14535_v32  ;;  %v10950_v1 = vpop.f32.mrb[132].mxu1  ;;  %v10839_v13 = vpop.f32.mrb[133].mxu0 }
 0xb33   :  { %v10951_v57 = vadd.f32 %v10950_v1, %v14539_v38  ;;  %v10840_v44 = vadd.f32 %v10839_v13, %v14543_v20  ;;  %v10952_v55 = vpop.f32.mrb[133].mxu1  ;;  %v10841_v49 = vpop.f32.mrb[134].mxu0 }
 0xb34   :  { %11027 = vst [vmem:[#allocation15 + $0x40] sm:$0xff] %v10838_v26  ;;  %v10953_v30 = vadd.f32 %v10952_v55, %v14547_v12  ;;  %v10842_v61 = vadd.f32 %v10841_v49, %v14535_v32  ;;  %v10954_v53 = vpop.f32.mrb[134].mxu1  ;;  %v10843_v22 = vpop.f32.mrb[135].mxu0 }
 0xb35   :  { %11029 = vst [vmem:[#allocation15 + $0x50] sm:$0xff] %v10951_v57  ;;  %11028 = vst [vmem:[#allocation15 + $0x48] sm:$0xff] %v10840_v44  ;;  %v10955_v42 = vadd.f32 %v10954_v53, %v14539_v38  ;;  %v10844_v41 = vadd.f32 %v10843_v22, %v14543_v20  ;;  %v10956_v36 = vpop.f32.mrb[135].mxu1 }
 0xb36   :  { %11030 = vst [vmem:[#allocation15 + $0x58] sm:$0xff] %v10953_v30  ;;  %11031 = vst [vmem:[#allocation15 + $0x60] sm:$0xff] %v10842_v61  ;;  %v10957_v28 = vadd.f32 %v10956_v36, %v14547_v12 }
 0xb37   :  { %11033 = vst [vmem:[#allocation15 + $0x70] sm:$0xff] %v10955_v42  ;;  %11032 = vst [vmem:[#allocation15 + $0x68] sm:$0xff] %v10844_v41 }
 0xb38   :  { %11034 = vst [vmem:[#allocation15 + $0x78] sm:$0xff] %v10957_v28 }
 0xb39   :  { %v10847_v3 = vpop.f32.mrb[136].mxu0 }
 0xb3a   :  { %v10848_v31 = vadd.f32 %v10847_v3, %v14535_v32  ;;  %v10960_v5 = vpop.f32.mrb[136].mxu1  ;;  %v10849_v18 = vpop.f32.mrb[137].mxu0 }
 0xb3b   :  { %v10961_v4 = vadd.f32 %v10960_v5, %v14539_v38  ;;  %v10850_v51 = vadd.f32 %v10849_v18, %v14543_v20  ;;  %v10962_v58 = vpop.f32.mrb[137].mxu1  ;;  %v10851_v27 = vpop.f32.mrb[138].mxu0 }
 0xb3c   :  { %11035 = vst [vmem:[#allocation15 + $0x80] sm:$0xff] %v10848_v31  ;;  %v10963_v2 = vadd.f32 %v10962_v58, %v14547_v12  ;;  %v10852_v25 = vadd.f32 %v10851_v27, %v14535_v32  ;;  %v10964_v0 = vpop.f32.mrb[138].mxu1  ;;  %v10853_v46 = vpop.f32.mrb[139].mxu0 }
 0xb3d   :  { %11037 = vst [vmem:[#allocation15 + $0x90] sm:$0xff] %v10961_v4  ;;  %11036 = vst [vmem:[#allocation15 + $0x88] sm:$0xff] %v10850_v51  ;;  %v10965_v43 = vadd.f32 %v10964_v0, %v14539_v38  ;;  %v10854_v10 = vadd.f32 %v10853_v46, %v14543_v20  ;;  %v10966_v56 = vpop.f32.mrb[139].mxu1 }
 0xb3e   :  { %11038 = vst [vmem:[#allocation15 + $0x98] sm:$0xff] %v10963_v2  ;;  %11039 = vst [vmem:[#allocation15 + $0xa0] sm:$0xff] %v10852_v25  ;;  %v10967_v6 = vadd.f32 %v10966_v56, %v14547_v12 }
 0xb3f   :  { %11041 = vst [vmem:[#allocation15 + $0xb0] sm:$0xff] %v10965_v43  ;;  %11040 = vst [vmem:[#allocation15 + $0xa8] sm:$0xff] %v10854_v10 }
 0xb40   :  { %11042 = vst [vmem:[#allocation15 + $0xb8] sm:$0xff] %v10967_v6 }
 0xb41   :  { %v10857_v63 = vpop.f32.mrb[140].mxu0 }
 0xb42   :  { %v10858_v60 = vadd.f32 %v10857_v63, %v14535_v32  ;;  %v10970_v48 = vpop.f32.mrb[140].mxu1  ;;  %v10859_v59 = vpop.f32.mrb[141].mxu0 }
 0xb43   :  { %v10971_v39 = vadd.f32 %v10970_v48, %v14539_v38  ;;  %v10860_v54 = vadd.f32 %v10859_v59, %v14543_v20  ;;  %v10972_v14 = vpop.f32.mrb[141].mxu1  ;;  %v10861_v33 = vpop.f32.mrb[142].mxu0 }
 0xb44   :  { %11043 = vst [vmem:[#allocation15 + $0xc0] sm:$0xff] %v10858_v60  ;;  %v10973_v52 = vadd.f32 %v10972_v14, %v14547_v12  ;;  %v10862_v35 = vadd.f32 %v10861_v33, %v14535_v32  ;;  %v10974_v7 = vpop.f32.mrb[142].mxu1  ;;  %v10863_v17 = vpop.f32.mrb[143].mxu0 }
 0xb45   :  { %11045 = vst [vmem:[#allocation15 + $0xd0] sm:$0xff] %v10971_v39  ;;  %11044 = vst [vmem:[#allocation15 + $0xc8] sm:$0xff] %v10860_v54  ;;  %v10975_v23 = vadd.f32 %v10974_v7, %v14539_v38  ;;  %v10864_v45 = vadd.f32 %v10863_v17, %v14543_v20  ;;  %v10976_v62 = vpop.f32.mrb[143].mxu1 }
 0xb46   :  { %11046 = vst [vmem:[#allocation15 + $0xd8] sm:$0xff] %v10973_v52  ;;  %11047 = vst [vmem:[#allocation15 + $0xe0] sm:$0xff] %v10862_v35  ;;  %v10977_v19 = vadd.f32 %v10976_v62, %v14547_v12 }
 0xb47   :  { %11049 = vst [vmem:[#allocation15 + $0xf0] sm:$0xff] %v10975_v23  ;;  %11048 = vst [vmem:[#allocation15 + $0xe8] sm:$0xff] %v10864_v45 }
 0xb48   :  { %11050 = vst [vmem:[#allocation15 + $0xf8] sm:$0xff] %v10977_v19 }
 0xb49   :  { %v10867_v11 = vpop.f32.mrb[144].mxu0 }
 0xb4a   :  { %v10868_v21 = vadd.f32 %v10867_v11, %v14535_v32  ;;  %v10980_v8 = vpop.f32.mrb[144].mxu1  ;;  %v10869_v37 = vpop.f32.mrb[145].mxu0 }
 0xb4b   :  { %v10981_v16 = vadd.f32 %v10980_v8, %v14539_v38  ;;  %v10870_v50 = vadd.f32 %v10869_v37, %v14543_v20  ;;  %v10982_v40 = vpop.f32.mrb[145].mxu1  ;;  %v10871_v34 = vpop.f32.mrb[146].mxu0 }
 0xb4c   :  { %11051 = vst [vmem:[#allocation15 + $0x100] sm:$0xff] %v10868_v21  ;;  %v10983_v15 = vadd.f32 %v10982_v40, %v14547_v12  ;;  %v10872_v29 = vadd.f32 %v10871_v34, %v14535_v32  ;;  %v10984_v24 = vpop.f32.mrb[146].mxu1  ;;  %v10873_v47 = vpop.f32.mrb[147].mxu0 }
 0xb4d   :  { %11053 = vst [vmem:[#allocation15 + $0x110] sm:$0xff] %v10981_v16  ;;  %11052 = vst [vmem:[#allocation15 + $0x108] sm:$0xff] %v10870_v50  ;;  %v10985_v9 = vadd.f32 %v10984_v24, %v14539_v38  ;;  %v10874_v26 = vadd.f32 %v10873_v47, %v14543_v20  ;;  %v10986_v1 = vpop.f32.mrb[147].mxu1 }
 0xb4e   :  { %11054 = vst [vmem:[#allocation15 + $0x118] sm:$0xff] %v10983_v15  ;;  %11055 = vst [vmem:[#allocation15 + $0x120] sm:$0xff] %v10872_v29  ;;  %v10987_v13 = vadd.f32 %v10986_v1, %v14547_v12 }
 0xb4f   :  { %11057 = vst [vmem:[#allocation15 + $0x130] sm:$0xff] %v10985_v9  ;;  %11056 = vst [vmem:[#allocation15 + $0x128] sm:$0xff] %v10874_v26 }
 0xb50   :  { %11058 = vst [vmem:[#allocation15 + $0x138] sm:$0xff] %v10987_v13 }
 0xb51   :  { %v10877_v57 = vpop.f32.mrb[148].mxu0 }
 0xb52   :  { %v10878_v44 = vadd.f32 %v10877_v57, %v14535_v32  ;;  %v10990_v55 = vpop.f32.mrb[148].mxu1  ;;  %v10879_v49 = vpop.f32.mrb[149].mxu0 }
 0xb53   :  { %v10991_v30 = vadd.f32 %v10990_v55, %v14539_v38  ;;  %v10880_v61 = vadd.f32 %v10879_v49, %v14543_v20  ;;  %v10992_v53 = vpop.f32.mrb[149].mxu1  ;;  %v10881_v22 = vpop.f32.mrb[150].mxu0 }
 0xb54   :  { %11059 = vst [vmem:[#allocation15 + $0x140] sm:$0xff] %v10878_v44  ;;  %v10993_v42 = vadd.f32 %v10992_v53, %v14547_v12  ;;  %v10882_v41 = vadd.f32 %v10881_v22, %v14535_v32  ;;  %v10994_v36 = vpop.f32.mrb[150].mxu1  ;;  %v10883_v28 = vpop.f32.mrb[151].mxu0 }
 0xb55   :  { %11061 = vst [vmem:[#allocation15 + $0x150] sm:$0xff] %v10991_v30  ;;  %11060 = vst [vmem:[#allocation15 + $0x148] sm:$0xff] %v10880_v61  ;;  %v10995_v3 = vadd.f32 %v10994_v36, %v14539_v38  ;;  %v10884_v31 = vadd.f32 %v10883_v28, %v14543_v20  ;;  %v10996_v5 = vpop.f32.mrb[151].mxu1 }
 0xb56   :  { %11062 = vst [vmem:[#allocation15 + $0x158] sm:$0xff] %v10993_v42  ;;  %11063 = vst [vmem:[#allocation15 + $0x160] sm:$0xff] %v10882_v41  ;;  %v10997_v18 = vadd.f32 %v10996_v5, %v14547_v12 }
 0xb57   :  { %11065 = vst [vmem:[#allocation15 + $0x170] sm:$0xff] %v10995_v3  ;;  %11064 = vst [vmem:[#allocation15 + $0x168] sm:$0xff] %v10884_v31 }
 0xb58   :  { %11066 = vst [vmem:[#allocation15 + $0x178] sm:$0xff] %v10997_v18 }
 0xb59   :  { %v10887_v4 = vpop.f32.mrb[152].mxu0 }
 0xb5a   :  { %v10888_v51 = vadd.f32 %v10887_v4, %v14535_v32  ;;  %v11000_v58 = vpop.f32.mrb[152].mxu1  ;;  %v10889_v27 = vpop.f32.mrb[153].mxu0 }
 0xb5b   :  { %v11001_v2 = vadd.f32 %v11000_v58, %v14539_v38  ;;  %v10890_v25 = vadd.f32 %v10889_v27, %v14543_v20  ;;  %v11002_v0 = vpop.f32.mrb[153].mxu1  ;;  %v10891_v46 = vpop.f32.mrb[154].mxu0 }
 0xb5c   :  { %11067 = vst [vmem:[#allocation15 + $0x180] sm:$0xff] %v10888_v51  ;;  %v11003_v43 = vadd.f32 %v11002_v0, %v14547_v12  ;;  %v10892_v10 = vadd.f32 %v10891_v46, %v14535_v32  ;;  %v11004_v56 = vpop.f32.mrb[154].mxu1  ;;  %v10893_v6 = vpop.f32.mrb[155].mxu0 }
 0xb5d   :  { %11069 = vst [vmem:[#allocation15 + $0x190] sm:$0xff] %v11001_v2  ;;  %11068 = vst [vmem:[#allocation15 + $0x188] sm:$0xff] %v10890_v25  ;;  %v11005_v63 = vadd.f32 %v11004_v56, %v14539_v38  ;;  %v10894_v60 = vadd.f32 %v10893_v6, %v14543_v20  ;;  %v11006_v48 = vpop.f32.mrb[155].mxu1 }
 0xb5e   :  { %11070 = vst [vmem:[#allocation15 + $0x198] sm:$0xff] %v11003_v43  ;;  %11071 = vst [vmem:[#allocation15 + $0x1a0] sm:$0xff] %v10892_v10  ;;  %v11007_v59 = vadd.f32 %v11006_v48, %v14547_v12 }
 0xb5f   :  { %11073 = vst [vmem:[#allocation15 + $0x1b0] sm:$0xff] %v11005_v63  ;;  %11072 = vst [vmem:[#allocation15 + $0x1a8] sm:$0xff] %v10894_v60 }
 0xb60   :  { %11074 = vst [vmem:[#allocation15 + $0x1b8] sm:$0xff] %v11007_v59 }
 0xbe5   :  { %v10897_v39 = vpop.f32.mrb[156].mxu0  ;;  %v11010_v54 = vpop.f32.mrb[156].mxu1 }
 0xbe6   :  { %v10898_v14 = vadd.f32 %v10897_v39, %v14535_v32  ;;  %v11011_v33 = vadd.f32 %v11010_v54, %v14539_v38  ;;  %v10899_v52 = vpop.f32.mrb[157].mxu0  ;;  %v11012_v35 = vpop.f32.mrb[157].mxu1 }
 0xbe7   :  { %v10900_v7 = vadd.f32 %v10899_v52, %v14543_v20  ;;  %v11013_v17 = vadd.f32 %v11012_v35, %v14547_v12  ;;  %v10901_v23 = vpop.f32.mrb[158].mxu0  ;;  %v11014_v45 = vpop.f32.mrb[158].mxu1 }
 0xbe8   :  { %11075 = vst [vmem:[#allocation15 + $0x1c0] sm:$0xff] %v10898_v14  ;;  %11077 = vst [vmem:[#allocation15 + $0x1d0] sm:$0xff] %v11011_v33  ;;  %v10902_v62 = vadd.f32 %v10901_v23, %v14535_v32  ;;  %v11015_v19 = vadd.f32 %v11014_v45, %v14539_v38  ;;  %v10903_v11 = vpop.f32.mrb[159].mxu0  ;;  %v11016_v21 = vpop.f32.mrb[159].mxu1 }
 0xbe9   :  { %11076 = vst [vmem:[#allocation15 + $0x1c8] sm:$0xff] %v10900_v7  ;;  %11078 = vst [vmem:[#allocation15 + $0x1d8] sm:$0xff] %v11013_v17  ;;  %v10904_v8 = vadd.f32 %v10903_v11, %v14543_v20  ;;  %v11017_v37 = vadd.f32 %v11016_v21, %v14547_v12 }
 0xbea   :  { %11079 = vst [vmem:[#allocation15 + $0x1e0] sm:$0xff] %v10902_v62  ;;  %11081 = vst [vmem:[#allocation15 + $0x1f0] sm:$0xff] %v11015_v19 }
 0xbeb   :  { %11080 = vst [vmem:[#allocation15 + $0x1e8] sm:$0xff] %v10904_v8  ;;  %11082 = vst [vmem:[#allocation15 + $0x1f8] sm:$0xff] %v11017_v37 }
 0xbec   :  { %13220 = shalt.err (!%p13217_p10)
}
 0xbed   :  { %s13221_s26 = scalar_lea.hbm %s14634_s6, 8192 }
 0xbee   :  { %p13222_p11 = scmp.ne.s32.totalorder %s14634_s6, %s13221_s26  ;;  %p13225_p12 = scmp.lt.u32.totalorder %s13221_s26, %s14634_s6 }
 0xbf0   :  { %p13227_p13 = pnand %p13225_p12, %p13222_p11 }
 0xbf2   :  { %13230 = shalt.err (!%p13227_p13)
}
 0xbf3   :  { %11094 = dma.vmem_to_hbm [thread:$0]  %s11089_s0, 8192, %s14634_s6, [#allocation6], %s13242_s7, %s13242_s7, %s13243_s8  }
 0xbf4   :  { %13239 = dma.done.wait [#allocation6], 8192  }
 0xbf5   :  { %13240 = vsyncadd [#allocation6], 4294959104 }
 0xbf6   :  { %11098 = vsyncpa [#allocation5], 1 }
 0xbf7   :  { %11099 = vsyncpa [#allocation8], 1 }
 0xbf8   :  { %11100 = vsyncpa [#allocation11], 1 }
 0xbf9   :  { %11101 = vsyncpa [#allocation14], 1 }
 0xbfa   :  { %11102 = vsyncpa [#allocation6], 1 }

</bundles_post_ra>
